<compile_context>
chip_gen: v6e
topology: v6e:2x2x1
jax: 0.10.0
libtpu: 0.0.40
codegen_flags: <defaults>
</compile_context>

<pallas_src>
import numpy as np

import jax
import jax.numpy as jnp
from jax import lax
from jax.experimental import pallas as pl
from jax.experimental.pallas import tpu as pltpu


C_REAL = 500                 # Conv1d out_channels in the PyTorch module
C_PAD = 512                  # lane-aligned padding (extra channels are zero)
KERNEL_SIZES = (3, 4, 5)
K_MAX = max(KERNEL_SIZES)
N_TAPS = sum(KERNEL_SIZES)   # 12 packed tap rows
TAP_START = (0, 3, 7)        # first packed tap row of each branch
LAST_TAP = (2, 6, 11)        # last packed tap row of each branch


# ----------------------------------------------------------------------------
# Fused kernel: conv branches (streamed) + max-pool + MLP epilogue
# ----------------------------------------------------------------------------
def _make_fused_kernel(B, L, tc):
    BL = B * L

    def kernel(xs_ref, cw_ref, cb_ref,
               w1_ref, b1_ref, w2_ref, b2_ref,
               w3_ref, b3_ref, w4_ref, b4_ref,
               o_ref, z_ref, feat_ref):
        # Grid: (c, r) with c = output-channel block, r = packed conv tap row.
        c = pl.program_id(0)
        r = pl.program_id(1)

        # Reset the tap accumulator at the first tap of each branch.
        is_branch_start = (r == TAP_START[0]) | (r == TAP_START[1]) | (r == TAP_START[2])

        @pl.when(is_branch_start)
        def _():
            z_ref[...] = jnp.zeros_like(z_ref)

        # Tap index within the current branch: selects one of the pre-shifted
        # (aligned) copies of x -> no unaligned bf16 slicing in the kernel.
        start = jnp.where(r < TAP_START[1], TAP_START[0],
                          jnp.where(r < TAP_START[2], TAP_START[1], TAP_START[2]))
        shift = r - start
        x_tap = xs_ref[shift]                                   # (B*L, E) bf16

        # One batch-merged matmul per grid step; MXU accumulates into f32.
        z_ref[...] += jnp.dot(x_tap, cw_ref[0],
                              preferred_element_type=jnp.float32)

        # Finalize a (branch, C-block): masked max over valid conv positions,
        # + bias, ReLU, store pooled features (bf16) into scratch.
        # max_t relu(z_t + b) == relu(max_t z_t + b), so bias/ReLU after pool.
        for br, (r_last, ksz) in enumerate(zip(LAST_TAP, KERNEL_SIZES)):
            t_valid = L - ksz + 1
            for ci in range(C_PAD // tc):
                col = br * C_PAD + ci * tc

                @pl.when((r == r_last) & (c == ci))
                def _(t_valid=t_valid, br=br, ci=ci, col=col):
                    z3 = z_ref[...].reshape(B, L, tc)
                    t_io = lax.broadcasted_iota(jnp.int32, (B, L, tc), 1)
                    pooled = jnp.max(jnp.where(t_io < t_valid, z3, -jnp.inf),
                                     axis=1)                     # (B, tc) f32
                    bias = cb_ref[...][br, ci * tc:(ci + 1) * tc]
                    pooled = jnp.maximum(pooled + bias, 0.0)
                    feat_ref[:, col:col + tc] = pooled.astype(feat_ref.dtype)

        # MLP epilogue on the very last grid step (dropout = identity, eval).
        @pl.when((c == pl.num_programs(0) - 1) & (r == N_TAPS - 1))
        def _():
            h = jnp.dot(feat_ref[...], w1_ref[...],
                        preferred_element_type=jnp.float32)
            h = jnp.maximum(h + b1_ref[...], 0.0)
            h = jnp.dot(h.astype(jnp.bfloat16), w2_ref[...],
                        preferred_element_type=jnp.float32)
            h = jnp.maximum(h + b2_ref[...], 0.0)
            h = jnp.dot(h.astype(jnp.bfloat16), w3_ref[...],
                        preferred_element_type=jnp.float32)
            h = jnp.maximum(h + b3_ref[...], 0.0)
            out = jnp.dot(h.astype(jnp.bfloat16), w4_ref[...],
                          preferred_element_type=jnp.float32)
            o_ref[...] = out + b4_ref[...]

    return kernel


def mind_cnn_fused_call(x_shift, params, *, B, L, num_classes, tc=256):
    E = x_shift.shape[-1]
    assert C_PAD % tc == 0
    n_cblk = C_PAD // tc
    kernel = _make_fused_kernel(B, L, tc)

    return pl.pallas_call(
        kernel,
        out_shape=jax.ShapeDtypeStruct((B, num_classes), jnp.float32),
        grid=(n_cblk, N_TAPS),
        in_specs=[
            # Pre-shifted x copies: resident for the whole grid.
            pl.BlockSpec(x_shift.shape, lambda c, r: (0, 0, 0)),
            # Packed conv weights: streamed one (E, tc) slab per step.
            pl.BlockSpec((1, E, tc), lambda c, r: (r, 0, c)),
            # Conv bias: tiny, resident.
            pl.BlockSpec(params["conv_b"].shape, lambda c, r: (0, 0)),
            # MLP weights / biases: constant blocks, fetched once.
            pl.BlockSpec(params["fc1_w"].shape, lambda c, r: (0, 0)),
            pl.BlockSpec(params["fc1_b"].shape, lambda c, r: (0, 0)),
            pl.BlockSpec(params["fc2_w"].shape, lambda c, r: (0, 0)),
            pl.BlockSpec(params["fc2_b"].shape, lambda c, r: (0, 0)),
            pl.BlockSpec(params["fc3_w"].shape, lambda c, r: (0, 0)),
            pl.BlockSpec(params["fc3_b"].shape, lambda c, r: (0, 0)),
            pl.BlockSpec(params["fc4_w"].shape, lambda c, r: (0, 0)),
            pl.BlockSpec(params["fc4_b"].shape, lambda c, r: (0, 0)),
        ],
        out_specs=pl.BlockSpec((B, num_classes), lambda c, r: (0, 0)),
        scratch_shapes=[
            pltpu.VMEM((B * L, tc), jnp.float32),       # per-branch tap accumulator
            pltpu.VMEM((B, 3 * C_PAD), jnp.bfloat16),   # pooled conv features
        ],
        compiler_params=pltpu.CompilerParams(
            dimension_semantics=("arbitrary", "arbitrary"),
            vmem_limit_bytes=32 * 1024 * 1024,
        ),
    )(x_shift, params["conv_w"], params["conv_b"],
      params["fc1_w"], params["fc1_b"], params["fc2_w"], params["fc2_b"],
      params["fc3_w"], params["fc3_b"], params["fc4_w"], params["fc4_b"])


# ----------------------------------------------------------------------------
# Parameter construction (deterministic, synthetic — no checkpoint loading)
# ----------------------------------------------------------------------------
def init_params(key, vocab_size, embed_dim, num_classes):
    ks = jax.random.split(key, 16)
    scale = 0.02
    p = {}
    # Embedding table (stand-in for RoBERTa word embeddings), bf16.
    p["embed"] = (scale * jax.random.normal(
        ks[0], (vocab_size, embed_dim), jnp.float32)).astype(jnp.bfloat16)

    # Conv weights packed as (sum_k k, E, C_PAD) = (12, E, 512), taps stacked
    # branch-major; bias as (3, C_PAD).  Padded channels are exactly zero.
    w_taps, b_rows = [], []
    for i, k in enumerate(KERNEL_SIZES):
        w = scale * jax.random.normal(
            ks[1 + 2 * i], (k, embed_dim, C_REAL), jnp.float32)
        b = scale * jax.random.normal(ks[2 + 2 * i], (C_REAL,), jnp.float32)
        w_taps.append(jnp.pad(w, ((0, 0), (0, 0), (0, C_PAD - C_REAL))))
        b_rows.append(jnp.pad(b, (0, C_PAD - C_REAL)))
    p["conv_w"] = jnp.concatenate(w_taps, axis=0).astype(jnp.bfloat16)
    p["conv_b"] = jnp.stack(b_rows, axis=0)                     # (3, 512) f32

    # FC stack: 1500 -> 1024 -> 512 -> 256 -> num_classes, weights as (in,out).
    # fc1 gets zero rows so the padded 512-channel feature blocks map exactly
    # onto the original 500-channel rows (results unchanged).
    dims = [3 * C_REAL, 1024, 512, 256, num_classes]
    w1 = scale * jax.random.normal(ks[7], (dims[0], dims[1]), jnp.float32)
    w1_blocks = [
        jnp.pad(w1[i * C_REAL:(i + 1) * C_REAL],
                ((0, C_PAD - C_REAL), (0, 0)))
        for i in range(3)
    ]
    p["fc1_w"] = jnp.concatenate(w1_blocks, axis=0).astype(jnp.bfloat16)
    p["fc1_b"] = scale * jax.random.normal(ks[8], (1, dims[1]), jnp.float32)
    for i in range(1, 4):
        p[f"fc{i + 1}_w"] = (scale * jax.random.normal(
            ks[7 + 2 * i], (dims[i], dims[i + 1]), jnp.float32)
        ).astype(jnp.bfloat16)
        p[f"fc{i + 1}_b"] = scale * jax.random.normal(
            ks[8 + 2 * i], (1, dims[i + 1]), jnp.float32)
    return p


# ----------------------------------------------------------------------------
# Full forward pass
# ----------------------------------------------------------------------------
def mind_cnn_forward(token_ids, params):
    B, L = token_ids.shape
    assert L >= K_MAX, "sequence shorter than the largest conv kernel"
    # Embedding lookup (gather) stays in plain JAX — glue only.
    x = jnp.take(params["embed"], token_ids, axis=0)            # (B, L, E) bf16
    E = x.shape[-1]
    # Build the 5 tap-shifted, zero-padded copies of x once (aligned, ~240 KB):
    # x_shift[j, b*L + t, :] = x[b, t + j] for t + j < L, else 0.
    xp = jnp.pad(x, ((0, 0), (0, K_MAX - 1), (0, 0)))
    x_shift = jnp.stack(
        [xp[:, j:j + L, :].reshape(B * L, E) for j in range(K_MAX)], axis=0)
    num_classes = params["fc4_b"].shape[-1]
    return mind_cnn_fused_call(x_shift, params, B=B, L=L,
                               num_classes=num_classes)


# ----------------------------------------------------------------------------
# Pure-JAX reference (same bf16 weights) for a tolerance regression test
# ----------------------------------------------------------------------------
def mind_cnn_reference(token_ids, params):
    x = jnp.take(params["embed"], token_ids, axis=0)            # (B, L, E) bf16
    B, L, _ = x.shape
    feats = []
    row = 0
    for br, k in enumerate(KERNEL_SIZES):
        w = params["conv_w"][row:row + k]                       # (k, E, C_PAD)
        row += k
        b = params["conv_b"][br]                                # (C_PAD,)
        T = L - k + 1
        y = jnp.zeros((B, T, C_PAD), jnp.float32)
        for j in range(k):
            y = y + jnp.einsum("ble,ec->blc", x[:, j:j + T, :], w[j],
                               preferred_element_type=jnp.float32)
        y = jax.nn.relu(y + b[None, None, :])
        feats.append(jnp.max(y, axis=1))
    feat = jnp.concatenate(feats, axis=1).astype(jnp.bfloat16)  # (B, 1536)
    h = jnp.dot(feat, params["fc1_w"], preferred_element_type=jnp.float32)
    h = jax.nn.relu(h + params["fc1_b"]).astype(jnp.bfloat16)
    h = jnp.dot(h, params["fc2_w"], preferred_element_type=jnp.float32)
    h = jax.nn.relu(h + params["fc2_b"]).astype(jnp.bfloat16)
    h = jnp.dot(h, params["fc3_w"], preferred_element_type=jnp.float32)
    h = jax.nn.relu(h + params["fc3_b"]).astype(jnp.bfloat16)
    return jnp.dot(h, params["fc4_w"],
                   preferred_element_type=jnp.float32) + params["fc4_b"]


# ----------------------------------------------------------------------------
if __name__ == "__main__":
    B, L = 2, 16          # batch, sequence length (>= max kernel size 5)
    VOCAB = 100
    EMBED_DIM = 768
    NUM_CLASSES = 23

    key = jax.random.PRNGKey(0)
    k_params, k_ids = jax.random.split(key)
    params = init_params(k_params, VOCAB, EMBED_DIM, NUM_CLASSES)
    token_ids = jax.random.randint(k_ids, (B, L), 0, VOCAB, dtype=jnp.int32)

    logits = jax.jit(mind_cnn_forward)(token_ids, params)
    jax.block_until_ready(logits)

    assert logits.shape == (B, NUM_CLASSES), logits.shape
    assert bool(jnp.all(jnp.isfinite(logits)))

    # Tolerance-based regression test against the pure-JAX reference.
    ref = jax.jit(mind_cnn_reference)(token_ids, params)
    np.testing.assert_allclose(np.asarray(logits), np.asarray(ref),
                               rtol=5e-2, atol=5e-3)

    print("KERNEL_OK")
</pallas_src>

<mosaic_0001>
module attributes {stable_mosaic.version = 11 : i64} {
  func.func @kernel(%arg0: i32, %arg1: i32, %arg2: memref<5x32x768xbf16, #tpu.memory_space<vmem>>, %arg3: memref<1x768x256xbf16, #tpu.memory_space<vmem>>, %arg4: memref<3x512xf32, #tpu.memory_space<vmem>>, %arg5: memref<1536x1024xbf16, #tpu.memory_space<vmem>>, %arg6: memref<1x1024xf32, #tpu.memory_space<vmem>>, %arg7: memref<1024x512xbf16, #tpu.memory_space<vmem>>, %arg8: memref<1x512xf32, #tpu.memory_space<vmem>>, %arg9: memref<512x256xbf16, #tpu.memory_space<vmem>>, %arg10: memref<1x256xf32, #tpu.memory_space<vmem>>, %arg11: memref<256x23xbf16, #tpu.memory_space<vmem>>, %arg12: memref<1x23xf32, #tpu.memory_space<vmem>>, %arg13: memref<2x23xf32, #tpu.memory_space<vmem>>, %arg14: memref<32x256xf32, #tpu.memory_space<vmem>>, %arg15: memref<2x1536xbf16, #tpu.memory_space<vmem>>) attributes {dimension_semantics = [#tpu.dimension_semantics<arbitrary>, #tpu.dimension_semantics<arbitrary>], iteration_bounds = array<i64: 2, 12>, scalar_prefetch = 0 : i64, scratch_operands = 2 : i64, tpu.core_type = #tpu.core_type<tc>, window_params = [{pipeline_mode = #tpu.pipeline_mode<synchronous>, transform_indices = @transform_0, window_bounds = array<i64: 5, 32, 768>}, {transform_indices = @transform_1, window_bounds = array<i64: 1, 768, 256>}, {pipeline_mode = #tpu.pipeline_mode<synchronous>, transform_indices = @transform_2, window_bounds = array<i64: 3, 512>}, {pipeline_mode = #tpu.pipeline_mode<synchronous>, transform_indices = @transform_3, window_bounds = array<i64: 1536, 1024>}, {pipeline_mode = #tpu.pipeline_mode<synchronous>, transform_indices = @transform_4, window_bounds = array<i64: 1, 1024>}, {pipeline_mode = #tpu.pipeline_mode<synchronous>, transform_indices = @transform_5, window_bounds = array<i64: 1024, 512>}, {pipeline_mode = #tpu.pipeline_mode<synchronous>, transform_indices = @transform_6, window_bounds = array<i64: 1, 512>}, {pipeline_mode = #tpu.pipeline_mode<synchronous>, transform_indices = @transform_7, window_bounds = array<i64: 512, 256>}, {pipeline_mode = #tpu.pipeline_mode<synchronous>, transform_indices = @transform_8, window_bounds = array<i64: 1, 256>}, {pipeline_mode = #tpu.pipeline_mode<synchronous>, transform_indices = @transform_9, window_bounds = array<i64: 256, 23>}, {pipeline_mode = #tpu.pipeline_mode<synchronous>, transform_indices = @transform_10, window_bounds = array<i64: 1, 23>}, {pipeline_mode = #tpu.pipeline_mode<synchronous>, transform_indices = @transform_11, window_bounds = array<i64: 2, 23>}]} {
    %c0_i32 = arith.constant 0 : i32
    %0 = arith.cmpi eq, %arg1, %c0_i32 : i32
    %c3_i32 = arith.constant 3 : i32
    %1 = arith.cmpi eq, %arg1, %c3_i32 : i32
    %2 = arith.ori %0, %1 : i1
    %c7_i32 = arith.constant 7 : i32
    %3 = arith.cmpi eq, %arg1, %c7_i32 : i32
    %4 = arith.ori %2, %3 : i1
    %5 = arith.extui %4 : i1 to i32
    %c0_i32_0 = arith.constant 0 : i32
    %6 = arith.cmpi ne, %5, %c0_i32_0 : i32
    scf.if %6 {
      %cst_31 = arith.constant 0.000000e+00 : f32
      %56 = vector.broadcast %cst_31 : f32 to vector<32x256xf32>
      %c0_32 = arith.constant 0 : index
      %c0_33 = arith.constant 0 : index
      %57 = vector.load %arg14[%c0_32, %c0_33] : memref<32x256xf32, #tpu.memory_space<vmem>>, vector<32x256xf32>
      tpu.vector_store %arg14[%c0_32, %c0_33], %56 {strides = array<i32>} : memref<32x256xf32, #tpu.memory_space<vmem>>, vector<32x256xf32>,
    } else {
    }
    %c3_i32_1 = arith.constant 3 : i32
    %7 = arith.cmpi slt, %arg1, %c3_i32_1 : i32
    %c7_i32_2 = arith.constant 7 : i32
    %8 = arith.cmpi slt, %arg1, %c7_i32_2 : i32
    %c3_i32_3 = arith.constant 3 : i32
    %c7_i32_4 = arith.constant 7 : i32
    %9 = arith.select %8, %c3_i32_3, %c7_i32_4 : i32
    %c0_i32_5 = arith.constant 0 : i32
    %10 = arith.select %7, %c0_i32_5, %9 : i32
    %11 = arith.subi %arg1, %10 : i32
    %12 = arith.index_cast %11 : i32 to index
    %c0 = arith.constant 0 : index
    %c0_6 = arith.constant 0 : index
    %13 = vector.load %arg2[%12, %c0, %c0_6] : memref<5x32x768xbf16, #tpu.memory_space<vmem>>, vector<1x32x768xbf16>
    %14 = vector.shape_cast %13 : vector<1x32x768xbf16> to vector<32x768xbf16>
    %c0_7 = arith.constant 0 : index
    %c0_8 = arith.constant 0 : index
    %15 = vector.load %arg14[%c0_7, %c0_8] : memref<32x256xf32, #tpu.memory_space<vmem>>, vector<32x256xf32>
    %c0_9 = arith.constant 0 : index
    %c0_10 = arith.constant 0 : index
    %c0_11 = arith.constant 0 : index
    %16 = vector.load %arg3[%c0_9, %c0_10, %c0_11] : memref<1x768x256xbf16, #tpu.memory_space<vmem>>, vector<1x768x256xbf16>
    %17 = vector.shape_cast %16 : vector<1x768x256xbf16> to vector<768x256xbf16>
    %cst = arith.constant dense<0.000000e+00> : vector<32x256xf32>
    %18 = tpu.matmul %14, %17, %cst {dimension_numbers = #tpu.dot_dimension_numbers<[1], [0], [0], [1], [0, 0, 1, 1], [], []>} : vector<32x768xbf16>, vector<768x256xbf16>, vector<32x256xf32> -> vector<32x256xf32>
    %19 = arith.addf %15, %18 : vector<32x256xf32>
    %c0_12 = arith.constant 0 : index
    %c0_13 = arith.constant 0 : index
    %20 = vector.load %arg14[%c0_12, %c0_13] : memref<32x256xf32, #tpu.memory_space<vmem>>, vector<32x256xf32>
    tpu.vector_store %arg14[%c0_12, %c0_13], %19 {strides = array<i32>} : memref<32x256xf32, #tpu.memory_space<vmem>>, vector<32x256xf32>,
    %c2_i32 = arith.constant 2 : i32
    %21 = arith.cmpi eq, %arg1, %c2_i32 : i32
    %c0_i32_14 = arith.constant 0 : i32
    %22 = arith.cmpi eq, %arg0, %c0_i32_14 : i32
    %23 = arith.andi %21, %22 : i1
    %24 = arith.extui %23 : i1 to i32
    %c0_i32_15 = arith.constant 0 : i32
    %25 = arith.cmpi ne, %24, %c0_i32_15 : i32
    scf.if %25 {
      %c0_31 = arith.constant 0 : index
      %c0_32 = arith.constant 0 : index
      %56 = vector.load %arg14[%c0_31, %c0_32] : memref<32x256xf32, #tpu.memory_space<vmem>>, vector<32x256xf32>
      %57 = vector.shape_cast %56 : vector<32x256xf32> to vector<2x16x256xf32>
      %58 = tpu.iota {dimensions = array<i32: 1>} : vector<2x16x256xi32>
      %c14_i32 = arith.constant 14 : i32
      %59 = vector.broadcast %c14_i32 : i32 to vector<2x16x256xi32>
      %60 = arith.cmpi slt, %58, %59 : vector<2x16x256xi32>
      %cst_33 = arith.constant 0xFF800000 : f32
      %61 = vector.broadcast %cst_33 : f32 to vector<2x16x256xf32>
      %62 = arith.select %60, %57, %61 : vector<2x16x256xi1>, vector<2x16x256xf32>
      %cst_34 = arith.constant dense<0xFF800000> : vector<2x256xf32>
      %63 = vector.multi_reduction <maximumf>, %62, %cst_34 [1] : vector<2x16x256xf32> to vector<2x256xf32>
      %c0_35 = arith.constant 0 : index
      %c0_36 = arith.constant 0 : index
      %64 = vector.load %arg4[%c0_35, %c0_36] : memref<3x512xf32, #tpu.memory_space<vmem>>, vector<3x512xf32>
      %65 = vector.extract_strided_slice %64 {offsets = [0, 0], sizes = [1, 256], strides = [1, 1]} : vector<3x512xf32> to vector<1x256xf32>
      %66 = vector.shape_cast %65 : vector<1x256xf32> to vector<256xf32>
      %67 = vector.shape_cast %66 : vector<256xf32> to vector<1x256xf32>
      %68 = vector.broadcast %67 : vector<1x256xf32> to vector<2x256xf32>
      %69 = arith.addf %63, %68 : vector<2x256xf32>
      %cst_37 = arith.constant 0.000000e+00 : f32
      %70 = vector.broadcast %cst_37 : f32 to vector<2x256xf32>
      %71 = arith.maximumf %69, %70 : vector<2x256xf32>
      %72 = arith.truncf %71 : vector<2x256xf32> to vector<2x256xbf16>
      %c0_38 = arith.constant 0 : index
      %c0_39 = arith.constant 0 : index
      %73 = vector.load %arg15[%c0_38, %c0_39] : memref<2x1536xbf16, #tpu.memory_space<vmem>>, vector<2x256xbf16>
      tpu.vector_store %arg15[%c0_38, %c0_39], %72 {strides = array<i32>} : memref<2x1536xbf16, #tpu.memory_space<vmem>>, vector<2x256xbf16>,
    } else {
    }
    %c2_i32_16 = arith.constant 2 : i32
    %26 = arith.cmpi eq, %arg1, %c2_i32_16 : i32
    %c1_i32 = arith.constant 1 : i32
    %27 = arith.cmpi eq, %arg0, %c1_i32 : i32
    %28 = arith.andi %26, %27 : i1
    %29 = arith.extui %28 : i1 to i32
    %c0_i32_17 = arith.constant 0 : i32
    %30 = arith.cmpi ne, %29, %c0_i32_17 : i32
    scf.if %30 {
      %c0_31 = arith.constant 0 : index
      %c0_32 = arith.constant 0 : index
      %56 = vector.load %arg14[%c0_31, %c0_32] : memref<32x256xf32, #tpu.memory_space<vmem>>, vector<32x256xf32>
      %57 = vector.shape_cast %56 : vector<32x256xf32> to vector<2x16x256xf32>
      %58 = tpu.iota {dimensions = array<i32: 1>} : vector<2x16x256xi32>
      %c14_i32 = arith.constant 14 : i32
      %59 = vector.broadcast %c14_i32 : i32 to vector<2x16x256xi32>
      %60 = arith.cmpi slt, %58, %59 : vector<2x16x256xi32>
      %cst_33 = arith.constant 0xFF800000 : f32
      %61 = vector.broadcast %cst_33 : f32 to vector<2x16x256xf32>
      %62 = arith.select %60, %57, %61 : vector<2x16x256xi1>, vector<2x16x256xf32>
      %cst_34 = arith.constant dense<0xFF800000> : vector<2x256xf32>
      %63 = vector.multi_reduction <maximumf>, %62, %cst_34 [1] : vector<2x16x256xf32> to vector<2x256xf32>
      %c0_35 = arith.constant 0 : index
      %c0_36 = arith.constant 0 : index
      %64 = vector.load %arg4[%c0_35, %c0_36] : memref<3x512xf32, #tpu.memory_space<vmem>>, vector<3x512xf32>
      %65 = vector.extract_strided_slice %64 {offsets = [0, 256], sizes = [1, 256], strides = [1, 1]} : vector<3x512xf32> to vector<1x256xf32>
      %66 = vector.shape_cast %65 : vector<1x256xf32> to vector<256xf32>
      %67 = vector.shape_cast %66 : vector<256xf32> to vector<1x256xf32>
      %68 = vector.broadcast %67 : vector<1x256xf32> to vector<2x256xf32>
      %69 = arith.addf %63, %68 : vector<2x256xf32>
      %cst_37 = arith.constant 0.000000e+00 : f32
      %70 = vector.broadcast %cst_37 : f32 to vector<2x256xf32>
      %71 = arith.maximumf %69, %70 : vector<2x256xf32>
      %72 = arith.truncf %71 : vector<2x256xf32> to vector<2x256xbf16>
      %c0_38 = arith.constant 0 : index
      %c256 = arith.constant 256 : index
      %73 = vector.load %arg15[%c0_38, %c256] : memref<2x1536xbf16, #tpu.memory_space<vmem>>, vector<2x256xbf16>
      tpu.vector_store %arg15[%c0_38, %c256], %72 {strides = array<i32>} : memref<2x1536xbf16, #tpu.memory_space<vmem>>, vector<2x256xbf16>,
    } else {
    }
    %c6_i32 = arith.constant 6 : i32
    %31 = arith.cmpi eq, %arg1, %c6_i32 : i32
    %c0_i32_18 = arith.constant 0 : i32
    %32 = arith.cmpi eq, %arg0, %c0_i32_18 : i32
    %33 = arith.andi %31, %32 : i1
    %34 = arith.extui %33 : i1 to i32
    %c0_i32_19 = arith.constant 0 : i32
    %35 = arith.cmpi ne, %34, %c0_i32_19 : i32
    scf.if %35 {
      %c0_31 = arith.constant 0 : index
      %c0_32 = arith.constant 0 : index
      %56 = vector.load %arg14[%c0_31, %c0_32] : memref<32x256xf32, #tpu.memory_space<vmem>>, vector<32x256xf32>
      %57 = vector.shape_cast %56 : vector<32x256xf32> to vector<2x16x256xf32>
      %58 = tpu.iota {dimensions = array<i32: 1>} : vector<2x16x256xi32>
      %c13_i32 = arith.constant 13 : i32
      %59 = vector.broadcast %c13_i32 : i32 to vector<2x16x256xi32>
      %60 = arith.cmpi slt, %58, %59 : vector<2x16x256xi32>
      %cst_33 = arith.constant 0xFF800000 : f32
      %61 = vector.broadcast %cst_33 : f32 to vector<2x16x256xf32>
      %62 = arith.select %60, %57, %61 : vector<2x16x256xi1>, vector<2x16x256xf32>
      %cst_34 = arith.constant dense<0xFF800000> : vector<2x256xf32>
      %63 = vector.multi_reduction <maximumf>, %62, %cst_34 [1] : vector<2x16x256xf32> to vector<2x256xf32>
      %c0_35 = arith.constant 0 : index
      %c0_36 = arith.constant 0 : index
      %64 = vector.load %arg4[%c0_35, %c0_36] : memref<3x512xf32, #tpu.memory_space<vmem>>, vector<3x512xf32>
      %65 = vector.extract_strided_slice %64 {offsets = [1, 0], sizes = [1, 256], strides = [1, 1]} : vector<3x512xf32> to vector<1x256xf32>
      %66 = vector.shape_cast %65 : vector<1x256xf32> to vector<256xf32>
      %67 = vector.shape_cast %66 : vector<256xf32> to vector<1x256xf32>
      %68 = vector.broadcast %67 : vector<1x256xf32> to vector<2x256xf32>
      %69 = arith.addf %63, %68 : vector<2x256xf32>
      %cst_37 = arith.constant 0.000000e+00 : f32
      %70 = vector.broadcast %cst_37 : f32 to vector<2x256xf32>
      %71 = arith.maximumf %69, %70 : vector<2x256xf32>
      %72 = arith.truncf %71 : vector<2x256xf32> to vector<2x256xbf16>
      %c0_38 = arith.constant 0 : index
      %c512 = arith.constant 512 : index
      %73 = vector.load %arg15[%c0_38, %c512] : memref<2x1536xbf16, #tpu.memory_space<vmem>>, vector<2x256xbf16>
      tpu.vector_store %arg15[%c0_38, %c512], %72 {strides = array<i32>} : memref<2x1536xbf16, #tpu.memory_space<vmem>>, vector<2x256xbf16>,
    } else {
    }
    %c6_i32_20 = arith.constant 6 : i32
    %36 = arith.cmpi eq, %arg1, %c6_i32_20 : i32
    %c1_i32_21 = arith.constant 1 : i32
    %37 = arith.cmpi eq, %arg0, %c1_i32_21 : i32
    %38 = arith.andi %36, %37 : i1
    %39 = arith.extui %38 : i1 to i32
    %c0_i32_22 = arith.constant 0 : i32
    %40 = arith.cmpi ne, %39, %c0_i32_22 : i32
    scf.if %40 {
      %c0_31 = arith.constant 0 : index
      %c0_32 = arith.constant 0 : index
      %56 = vector.load %arg14[%c0_31, %c0_32] : memref<32x256xf32, #tpu.memory_space<vmem>>, vector<32x256xf32>
      %57 = vector.shape_cast %56 : vector<32x256xf32> to vector<2x16x256xf32>
      %58 = tpu.iota {dimensions = array<i32: 1>} : vector<2x16x256xi32>
      %c13_i32 = arith.constant 13 : i32
      %59 = vector.broadcast %c13_i32 : i32 to vector<2x16x256xi32>
      %60 = arith.cmpi slt, %58, %59 : vector<2x16x256xi32>
      %cst_33 = arith.constant 0xFF800000 : f32
      %61 = vector.broadcast %cst_33 : f32 to vector<2x16x256xf32>
      %62 = arith.select %60, %57, %61 : vector<2x16x256xi1>, vector<2x16x256xf32>
      %cst_34 = arith.constant dense<0xFF800000> : vector<2x256xf32>
      %63 = vector.multi_reduction <maximumf>, %62, %cst_34 [1] : vector<2x16x256xf32> to vector<2x256xf32>
      %c0_35 = arith.constant 0 : index
      %c0_36 = arith.constant 0 : index
      %64 = vector.load %arg4[%c0_35, %c0_36] : memref<3x512xf32, #tpu.memory_space<vmem>>, vector<3x512xf32>
      %65 = vector.extract_strided_slice %64 {offsets = [1, 256], sizes = [1, 256], strides = [1, 1]} : vector<3x512xf32> to vector<1x256xf32>
      %66 = vector.shape_cast %65 : vector<1x256xf32> to vector<256xf32>
      %67 = vector.shape_cast %66 : vector<256xf32> to vector<1x256xf32>
      %68 = vector.broadcast %67 : vector<1x256xf32> to vector<2x256xf32>
      %69 = arith.addf %63, %68 : vector<2x256xf32>
      %cst_37 = arith.constant 0.000000e+00 : f32
      %70 = vector.broadcast %cst_37 : f32 to vector<2x256xf32>
      %71 = arith.maximumf %69, %70 : vector<2x256xf32>
      %72 = arith.truncf %71 : vector<2x256xf32> to vector<2x256xbf16>
      %c0_38 = arith.constant 0 : index
      %c768 = arith.constant 768 : index
      %73 = vector.load %arg15[%c0_38, %c768] : memref<2x1536xbf16, #tpu.memory_space<vmem>>, vector<2x256xbf16>
      tpu.vector_store %arg15[%c0_38, %c768], %72 {strides = array<i32>} : memref<2x1536xbf16, #tpu.memory_space<vmem>>, vector<2x256xbf16>,
    } else {
    }
    %c11_i32 = arith.constant 11 : i32
    %41 = arith.cmpi eq, %arg1, %c11_i32 : i32
    %c0_i32_23 = arith.constant 0 : i32
    %42 = arith.cmpi eq, %arg0, %c0_i32_23 : i32
    %43 = arith.andi %41, %42 : i1
    %44 = arith.extui %43 : i1 to i32
    %c0_i32_24 = arith.constant 0 : i32
    %45 = arith.cmpi ne, %44, %c0_i32_24 : i32
    scf.if %45 {
      %c0_31 = arith.constant 0 : index
      %c0_32 = arith.constant 0 : index
      %56 = vector.load %arg14[%c0_31, %c0_32] : memref<32x256xf32, #tpu.memory_space<vmem>>, vector<32x256xf32>
      %57 = vector.shape_cast %56 : vector<32x256xf32> to vector<2x16x256xf32>
      %58 = tpu.iota {dimensions = array<i32: 1>} : vector<2x16x256xi32>
      %c12_i32 = arith.constant 12 : i32
      %59 = vector.broadcast %c12_i32 : i32 to vector<2x16x256xi32>
      %60 = arith.cmpi slt, %58, %59 : vector<2x16x256xi32>
      %cst_33 = arith.constant 0xFF800000 : f32
      %61 = vector.broadcast %cst_33 : f32 to vector<2x16x256xf32>
      %62 = arith.select %60, %57, %61 : vector<2x16x256xi1>, vector<2x16x256xf32>
      %cst_34 = arith.constant dense<0xFF800000> : vector<2x256xf32>
      %63 = vector.multi_reduction <maximumf>, %62, %cst_34 [1] : vector<2x16x256xf32> to vector<2x256xf32>
      %c0_35 = arith.constant 0 : index
      %c0_36 = arith.constant 0 : index
      %64 = vector.load %arg4[%c0_35, %c0_36] : memref<3x512xf32, #tpu.memory_space<vmem>>, vector<3x512xf32>
      %65 = vector.extract_strided_slice %64 {offsets = [2, 0], sizes = [1, 256], strides = [1, 1]} : vector<3x512xf32> to vector<1x256xf32>
      %66 = vector.shape_cast %65 : vector<1x256xf32> to vector<256xf32>
      %67 = vector.shape_cast %66 : vector<256xf32> to vector<1x256xf32>
      %68 = vector.broadcast %67 : vector<1x256xf32> to vector<2x256xf32>
      %69 = arith.addf %63, %68 : vector<2x256xf32>
      %cst_37 = arith.constant 0.000000e+00 : f32
      %70 = vector.broadcast %cst_37 : f32 to vector<2x256xf32>
      %71 = arith.maximumf %69, %70 : vector<2x256xf32>
      %72 = arith.truncf %71 : vector<2x256xf32> to vector<2x256xbf16>
      %c0_38 = arith.constant 0 : index
      %c1024 = arith.constant 1024 : index
      %73 = vector.load %arg15[%c0_38, %c1024] : memref<2x1536xbf16, #tpu.memory_space<vmem>>, vector<2x256xbf16>
      tpu.vector_store %arg15[%c0_38, %c1024], %72 {strides = array<i32>} : memref<2x1536xbf16, #tpu.memory_space<vmem>>, vector<2x256xbf16>,
    } else {
    }
    %c11_i32_25 = arith.constant 11 : i32
    %46 = arith.cmpi eq, %arg1, %c11_i32_25 : i32
    %c1_i32_26 = arith.constant 1 : i32
    %47 = arith.cmpi eq, %arg0, %c1_i32_26 : i32
    %48 = arith.andi %46, %47 : i1
    %49 = arith.extui %48 : i1 to i32
    %c0_i32_27 = arith.constant 0 : i32
    %50 = arith.cmpi ne, %49, %c0_i32_27 : i32
    scf.if %50 {
      %c0_31 = arith.constant 0 : index
      %c0_32 = arith.constant 0 : index
      %56 = vector.load %arg14[%c0_31, %c0_32] : memref<32x256xf32, #tpu.memory_space<vmem>>, vector<32x256xf32>
      %57 = vector.shape_cast %56 : vector<32x256xf32> to vector<2x16x256xf32>
      %58 = tpu.iota {dimensions = array<i32: 1>} : vector<2x16x256xi32>
      %c12_i32 = arith.constant 12 : i32
      %59 = vector.broadcast %c12_i32 : i32 to vector<2x16x256xi32>
      %60 = arith.cmpi slt, %58, %59 : vector<2x16x256xi32>
      %cst_33 = arith.constant 0xFF800000 : f32
      %61 = vector.broadcast %cst_33 : f32 to vector<2x16x256xf32>
      %62 = arith.select %60, %57, %61 : vector<2x16x256xi1>, vector<2x16x256xf32>
      %cst_34 = arith.constant dense<0xFF800000> : vector<2x256xf32>
      %63 = vector.multi_reduction <maximumf>, %62, %cst_34 [1] : vector<2x16x256xf32> to vector<2x256xf32>
      %c0_35 = arith.constant 0 : index
      %c0_36 = arith.constant 0 : index
      %64 = vector.load %arg4[%c0_35, %c0_36] : memref<3x512xf32, #tpu.memory_space<vmem>>, vector<3x512xf32>
      %65 = vector.extract_strided_slice %64 {offsets = [2, 256], sizes = [1, 256], strides = [1, 1]} : vector<3x512xf32> to vector<1x256xf32>
      %66 = vector.shape_cast %65 : vector<1x256xf32> to vector<256xf32>
      %67 = vector.shape_cast %66 : vector<256xf32> to vector<1x256xf32>
      %68 = vector.broadcast %67 : vector<1x256xf32> to vector<2x256xf32>
      %69 = arith.addf %63, %68 : vector<2x256xf32>
      %cst_37 = arith.constant 0.000000e+00 : f32
      %70 = vector.broadcast %cst_37 : f32 to vector<2x256xf32>
      %71 = arith.maximumf %69, %70 : vector<2x256xf32>
      %72 = arith.truncf %71 : vector<2x256xf32> to vector<2x256xbf16>
      %c0_38 = arith.constant 0 : index
      %c1280 = arith.constant 1280 : index
      %73 = vector.load %arg15[%c0_38, %c1280] : memref<2x1536xbf16, #tpu.memory_space<vmem>>, vector<2x256xbf16>
      tpu.vector_store %arg15[%c0_38, %c1280], %72 {strides = array<i32>} : memref<2x1536xbf16, #tpu.memory_space<vmem>>, vector<2x256xbf16>,
    } else {
    }
    %c1_i32_28 = arith.constant 1 : i32
    %51 = arith.cmpi eq, %arg0, %c1_i32_28 : i32
    %c11_i32_29 = arith.constant 11 : i32
    %52 = arith.cmpi eq, %arg1, %c11_i32_29 : i32
    %53 = arith.andi %51, %52 : i1
    %54 = arith.extui %53 : i1 to i32
    %c0_i32_30 = arith.constant 0 : i32
    %55 = arith.cmpi ne, %54, %c0_i32_30 : i32
    scf.if %55 {
      %c0_31 = arith.constant 0 : index
      %c0_32 = arith.constant 0 : index
      %56 = vector.load %arg15[%c0_31, %c0_32] : memref<2x1536xbf16, #tpu.memory_space<vmem>>, vector<2x1536xbf16>
      %c0_33 = arith.constant 0 : index
      %c0_34 = arith.constant 0 : index
      %57 = vector.load %arg5[%c0_33, %c0_34] : memref<1536x1024xbf16, #tpu.memory_space<vmem>>, vector<1536x1024xbf16>
      %cst_35 = arith.constant dense<0.000000e+00> : vector<2x1024xf32>
      %58 = tpu.matmul %56, %57, %cst_35 {dimension_numbers = #tpu.dot_dimension_numbers<[1], [0], [0], [1], [0, 0, 1, 1], [], []>} : vector<2x1536xbf16>, vector<1536x1024xbf16>, vector<2x1024xf32> -> vector<2x1024xf32>
      %c0_36 = arith.constant 0 : index
      %c0_37 = arith.constant 0 : index
      %59 = vector.load %arg6[%c0_36, %c0_37] : memref<1x1024xf32, #tpu.memory_space<vmem>>, vector<1x1024xf32>
      %60 = vector.broadcast %59 : vector<1x1024xf32> to vector<2x1024xf32>
      %61 = arith.addf %58, %60 : vector<2x1024xf32>
      %cst_38 = arith.constant 0.000000e+00 : f32
      %62 = vector.broadcast %cst_38 : f32 to vector<2x1024xf32>
      %63 = arith.maximumf %61, %62 : vector<2x1024xf32>
      %64 = arith.truncf %63 : vector<2x1024xf32> to vector<2x1024xbf16>
      %c0_39 = arith.constant 0 : index
      %c0_40 = arith.constant 0 : index
      %65 = vector.load %arg7[%c0_39, %c0_40] : memref<1024x512xbf16, #tpu.memory_space<vmem>>, vector<1024x512xbf16>
      %cst_41 = arith.constant dense<0.000000e+00> : vector<2x512xf32>
      %66 = tpu.matmul %64, %65, %cst_41 {dimension_numbers = #tpu.dot_dimension_numbers<[1], [0], [0], [1], [0, 0, 1, 1], [], []>} : vector<2x1024xbf16>, vector<1024x512xbf16>, vector<2x512xf32> -> vector<2x512xf32>
      %c0_42 = arith.constant 0 : index
      %c0_43 = arith.constant 0 : index
      %67 = vector.load %arg8[%c0_42, %c0_43] : memref<1x512xf32, #tpu.memory_space<vmem>>, vector<1x512xf32>
      %68 = vector.broadcast %67 : vector<1x512xf32> to vector<2x512xf32>
      %69 = arith.addf %66, %68 : vector<2x512xf32>
      %cst_44 = arith.constant 0.000000e+00 : f32
      %70 = vector.broadcast %cst_44 : f32 to vector<2x512xf32>
      %71 = arith.maximumf %69, %70 : vector<2x512xf32>
      %72 = arith.truncf %71 : vector<2x512xf32> to vector<2x512xbf16>
      %c0_45 = arith.constant 0 : index
      %c0_46 = arith.constant 0 : index
      %73 = vector.load %arg9[%c0_45, %c0_46] : memref<512x256xbf16, #tpu.memory_space<vmem>>, vector<512x256xbf16>
      %cst_47 = arith.constant dense<0.000000e+00> : vector<2x256xf32>
      %74 = tpu.matmul %72, %73, %cst_47 {dimension_numbers = #tpu.dot_dimension_numbers<[1], [0], [0], [1], [0, 0, 1, 1], [], []>} : vector<2x512xbf16>, vector<512x256xbf16>, vector<2x256xf32> -> vector<2x256xf32>
      %c0_48 = arith.constant 0 : index
      %c0_49 = arith.constant 0 : index
      %75 = vector.load %arg10[%c0_48, %c0_49] : memref<1x256xf32, #tpu.memory_space<vmem>>, vector<1x256xf32>
      %76 = vector.broadcast %75 : vector<1x256xf32> to vector<2x256xf32>
      %77 = arith.addf %74, %76 : vector<2x256xf32>
      %cst_50 = arith.constant 0.000000e+00 : f32
      %78 = vector.broadcast %cst_50 : f32 to vector<2x256xf32>
      %79 = arith.maximumf %77, %78 : vector<2x256xf32>
      %80 = arith.truncf %79 : vector<2x256xf32> to vector<2x256xbf16>
      %c0_51 = arith.constant 0 : index
      %c0_52 = arith.constant 0 : index
      %81 = vector.load %arg11[%c0_51, %c0_52] : memref<256x23xbf16, #tpu.memory_space<vmem>>, vector<256x23xbf16>
      %cst_53 = arith.constant dense<0.000000e+00> : vector<2x23xf32>
      %82 = tpu.matmul %80, %81, %cst_53 {dimension_numbers = #tpu.dot_dimension_numbers<[1], [0], [0], [1], [0, 0, 1, 1], [], []>} : vector<2x256xbf16>, vector<256x23xbf16>, vector<2x23xf32> -> vector<2x23xf32>
      %c0_54 = arith.constant 0 : index
      %c0_55 = arith.constant 0 : index
      %83 = vector.load %arg12[%c0_54, %c0_55] : memref<1x23xf32, #tpu.memory_space<vmem>>, vector<1x23xf32>
      %84 = vector.broadcast %83 : vector<1x23xf32> to vector<2x23xf32>
      %85 = arith.addf %82, %84 : vector<2x23xf32>
      %c0_56 = arith.constant 0 : index
      %c0_57 = arith.constant 0 : index
      %86 = vector.load %arg13[%c0_56, %c0_57] : memref<2x23xf32, #tpu.memory_space<vmem>>, vector<2x23xf32>
      tpu.vector_store %arg13[%c0_56, %c0_57], %85 {strides = array<i32>} : memref<2x23xf32, #tpu.memory_space<vmem>>, vector<2x23xf32>,
    } else {
    }
    return
  }
  func.func @transform_0(%arg0: i32, %arg1: i32) -> (i32, i32, i32) {
    %c0_i32 = arith.constant 0 : i32
    %c0_i32_0 = arith.constant 0 : i32
    %c0_i32_1 = arith.constant 0 : i32
    %c0_i32_2 = arith.constant 0 : i32
    return %c0_i32, %c0_i32_0, %c0_i32_1 : i32, i32, i32
  }
  func.func @transform_1(%arg0: i32, %arg1: i32) -> (i32, i32, i32) {
    %c0_i32 = arith.constant 0 : i32
    %c0_i32_0 = arith.constant 0 : i32
    return %arg1, %c0_i32, %arg0 : i32, i32, i32
  }
  func.func @transform_2(%arg0: i32, %arg1: i32) -> (i32, i32) {
    %c0_i32 = arith.constant 0 : i32
    %c0_i32_0 = arith.constant 0 : i32
    %c0_i32_1 = arith.constant 0 : i32
    return %c0_i32, %c0_i32_0 : i32, i32
  }
  func.func @transform_3(%arg0: i32, %arg1: i32) -> (i32, i32) {
    %c0_i32 = arith.constant 0 : i32
    %c0_i32_0 = arith.constant 0 : i32
    %c0_i32_1 = arith.constant 0 : i32
    return %c0_i32, %c0_i32_0 : i32, i32
  }
  func.func @transform_4(%arg0: i32, %arg1: i32) -> (i32, i32) {
    %c0_i32 = arith.constant 0 : i32
    %c0_i32_0 = arith.constant 0 : i32
    %c0_i32_1 = arith.constant 0 : i32
    return %c0_i32, %c0_i32_0 : i32, i32
  }
  func.func @transform_5(%arg0: i32, %arg1: i32) -> (i32, i32) {
    %c0_i32 = arith.constant 0 : i32
    %c0_i32_0 = arith.constant 0 : i32
    %c0_i32_1 = arith.constant 0 : i32
    return %c0_i32, %c0_i32_0 : i32, i32
  }
  func.func @transform_6(%arg0: i32, %arg1: i32) -> (i32, i32) {
    %c0_i32 = arith.constant 0 : i32
    %c0_i32_0 = arith.constant 0 : i32
    %c0_i32_1 = arith.constant 0 : i32
    return %c0_i32, %c0_i32_0 : i32, i32
  }
  func.func @transform_7(%arg0: i32, %arg1: i32) -> (i32, i32) {
    %c0_i32 = arith.constant 0 : i32
    %c0_i32_0 = arith.constant 0 : i32
    %c0_i32_1 = arith.constant 0 : i32
    return %c0_i32, %c0_i32_0 : i32, i32
  }
  func.func @transform_8(%arg0: i32, %arg1: i32) -> (i32, i32) {
    %c0_i32 = arith.constant 0 : i32
    %c0_i32_0 = arith.constant 0 : i32
    %c0_i32_1 = arith.constant 0 : i32
    return %c0_i32, %c0_i32_0 : i32, i32
  }
  func.func @transform_9(%arg0: i32, %arg1: i32) -> (i32, i32) {
    %c0_i32 = arith.constant 0 : i32
    %c0_i32_0 = arith.constant 0 : i32
    %c0_i32_1 = arith.constant 0 : i32
    return %c0_i32, %c0_i32_0 : i32, i32
  }
  func.func @transform_10(%arg0: i32, %arg1: i32) -> (i32, i32) {
    %c0_i32 = arith.constant 0 : i32
    %c0_i32_0 = arith.constant 0 : i32
    %c0_i32_1 = arith.constant 0 : i32
    return %c0_i32, %c0_i32_0 : i32, i32
  }
  func.func @transform_11(%arg0: i32, %arg1: i32) -> (i32, i32) {
    %c0_i32 = arith.constant 0 : i32
    %c0_i32_0 = arith.constant 0 : i32
    %c0_i32_1 = arith.constant 0 : i32
    return %c0_i32, %c0_i32_0 : i32, i32
  }
}

</mosaic_0001>

<bundles_post_ra>
// kernel: mind_cnn_forward.1
= control target key start
LH: loop header
LB: loop body
LE: loop exit
PB: predicated region body
PF: predicated region fallthrough
CT: control target
= control target key end

     0   :  { %s14248_s0 = inlined_call_operand.vmem [shape: bf16[5,32,768], index: 0, kind: input, shape index: {}]   ;;  %s14249_s1 = inlined_call_operand.hbm [shape: bf16[12,768,512], index: 1, kind: input, shape index: {}]   ;;  %s14250_s2 = inlined_call_operand.hbm [shape: f32[3,512], index: 2, kind: input, shape index: {}]   ;;  %s14251_s3 = inlined_call_operand.hbm [shape: bf16[1536,1024], index: 3, kind: input, shape index: {}]   ;;  %s14252_s4 = inlined_call_operand.hbm [shape: f32[1,1024], index: 4, kind: input, shape index: {}]   ;;  %s14253_s5 = inlined_call_operand.hbm [shape: bf16[1024,512], index: 5, kind: input, shape index: {}]   ;;  %s14254_s6 = inlined_call_operand.hbm [shape: f32[1,512], index: 6, kind: input, shape index: {}]   ;;  %s14255_s7 = inlined_call_operand.hbm [shape: bf16[512,256], index: 7, kind: input, shape index: {}]   ;;  %s14256_s8 = inlined_call_operand.hbm [shape: f32[1,256], index: 8, kind: input, shape index: {}]   ;;  %s14257_s9 = inlined_call_operand.vmem [shape: bf16[256,23], index: 9, kind: input, shape index: {}]   ;;  %s14258_s10 = inlined_call_operand.hbm [shape: f32[1,23], index: 10, kind: input, shape index: {}]   ;;  %s14259_s11 = inlined_call_operand.hbm [shape: f32[2,23], index: 11, kind: output, shape index: {}]  }
   0x1   :  { %14268 = sst [smem:[#allocation27_spill]] %s14250_s2 }
   0x2   :  { %14269 = sst [smem:[#allocation28_spill]] %s14251_s3 }
   0x3   :  { %14270 = sst [smem:[#allocation29_spill]] %s14252_s4 }
   0x4   :  { %14271 = sst [smem:[#allocation30_spill]] %s14253_s5 }
   0x5   :  { %14272 = sst [smem:[#allocation31_spill]] %s14254_s6 }
   0x6   :  { %14273 = sst [smem:[#allocation32_spill]] %s14255_s7 }
   0x7   :  { %14274 = sst [smem:[#allocation33_spill]] %s14256_s8 }
   0x8   :  { %14275 = sst [smem:[#allocation34_spill]] %s14258_s10 }
   0x9   :  { %14276 = sst [smem:[#allocation35_spill]] %s14259_s11 }
   0xa   :  { %16 = vsyncpa [#allocation5], 0 }
   0xb   :  { %18 = vsyncpa [#allocation5 + $0x1], 0 }
   0xc   :  { %19 = vsyncpa [#allocation8], 0 }
   0xd   :  { %20 = vsyncpa [#allocation11], 0 }
   0xe   :  { %21 = vsyncpa [#allocation14], 0 }
   0xf   :  { %22 = vsyncpa [#allocation17], 0 }
  0x10   :  { %23 = vsyncpa [#allocation6], 0  ;;  %s13451_s17 = smov 0   ;;  %s13453_s18 = smov 0  }
  0x11   :  { %s13455_s19 = smov 0   ;;  %s13457_s20 = smov 0  }
  0x12   :  { %s13459_s21 = smov 0   ;;  %s13461_s22 = smov 0  }
  0x13   :  { %s13463_s23 = smov 0   ;;  %s13465_s24 = smov 0  }
  0x14 LB: > { %s14260_s25 = sadd.s32 4294967295, %s13360_s24   ;;  %p10858_p0 = scmp.ge.s32.totalorder %s13360_s24, 1  ;;  %s13360_s24 = sphi %s13465_s24, %s29_s24   ;;  %s13356_s23 = sphi %s13463_s23, %s14310_s23   ;;  %s13352_s22 = sphi %s13461_s22, %s14309_s22   ;;  %s13348_s21 = sphi %s13459_s21, %s14308_s21   ;;  %s13344_s20 = sphi %s13457_s20, %s14307_s20   ;;  %s13340_s19 = sphi %s13455_s19, %s14306_s19   ;;  %s13336_s18 = sphi %s13453_s18, %s14305_s18   ;;  %s13332_s17 = sphi %s13451_s17, %s14304_s17  }
  0x15   : > { %p13495_p1 = scmp.eq.s32.totalorder %s14260_s25, 0  ;;  %p305_p2 = scmp.lt.s32.totalorder %s13360_s24, 25 }
  0x16   : > { %s13362_s28 = smov [#allocation7]   ;;  %s13363_s30 = smov [#allocation10]  }
  0x17   : > { %s14277_s26 = scalar_select %p13495_p1, 1, 0 }
  0x18   : > { %p13500_p3 = pnand %p10858_p0, %p305_p2  ;;  %s321_s29 = sshll.u32 %s13362_s28, 4  ;;  %s322_s29 = int_to_ptr.vmem [resolvable:$true] %s321_s29 }
  0x19   : > { %s345_s12 = sshll.u32 %s13363_s30, 4  ;;  %s13364_s14 = smov [#allocation13]   ;;  %s346_s12 = int_to_ptr.vmem [resolvable:$true] %s345_s12 }
  0x1a   : > { %s14278_s27 = scalar_select %p13500_p3, 1, 0 }
  0x1b   : > { %p12212_p4 = pneg %p13500_p3  ;;  %s369_s15 = sshll.u32 %s13364_s14, 4  ;;  %s13512_s15 = int_to_ptr.vmem [resolvable:$true] %s369_s15 }
  0x1c   : > { %s13025_s28 = scalar_lea.vmem %s322_s29, 256  ;;  %p13033_p10 = scmp.lt.s32.totalorder %s322_s29, %s322_s29 }
  0x1d   : > { %p13508_p5 = pnand %p12212_p4, %p13495_p1  ;;  %p13026_p7 = scmp.ne.s32.totalorder %s322_s29, %s13025_s28 }
  0x1e   : > { %p13034_p11 = scmp.lt.s32.totalorder %s13025_s28, %s13025_s28 }
  0x1f   : > { %p13516_p6 = pneg %p13508_p5 }
  0x20   : > { %p13035_p12 = por %p13034_p11, %p13033_p10 }
  0x21   : > { %p13028_p8 = pnand %p13026_p7, %p13516_p6 }
  0x23   : > { %p13029_p9 = pneg %p13028_p8 }
  0x25   : > { %p13036_p13 = pnand %p13035_p12, %p13029_p9 }
  0x27   : > { %13039 = shalt.err (!%p13036_p13)
}
  0x28   : > { %s14281_s2 = sld [smem:[#allocation27_spill]]  ;;  %s13051_s25 = scalar_lea.vmem %s346_s12, 128 }
  0x29   : > { %p13052_p0 = scmp.ne.s32.totalorder %s346_s12, %s13051_s25  ;;  %p13059_p3 = scmp.lt.s32.totalorder %s346_s12, %s346_s12 }
  0x2a   : > { %p13060_p7 = scmp.lt.s32.totalorder %s13051_s25, %s13051_s25 }
  0x2b   : > { %p13054_p2 = pnand %p13052_p0, %p13516_p6 }
  0x2c   : > { %p13061_p8 = por %p13060_p7, %p13059_p3 }
  0x2d   : > { %p13055_p4 = pneg %p13054_p2 }
  0x2e   : > { %12215 = dma.hbm_to_vmem [thread:$0]  (!%p13508_p5), %s14281_s2, 256, %s322_s29, [#allocation8]  }
  0x2f   : > { %p13062_p1 = pnand %p13061_p8, %p13055_p4 }
  0x31   : > { %13065 = shalt.err (!%p13062_p1)
}
  0x32   : > { %s14282_s4 = sld [smem:[#allocation29_spill]]  ;;  %s13077_s29 = scalar_lea.vmem %s13512_s15, 64 }
  0x33   : > { %p13078_p9 = scmp.ne.s32.totalorder %s13512_s15, %s13077_s29  ;;  %p13085_p12 = scmp.lt.s32.totalorder %s13512_s15, %s13512_s15 }
  0x34   : > { %p13086_p3 = scmp.lt.s32.totalorder %s13077_s29, %s13077_s29 }
  0x35   : > { %p13080_p10 = pnand %p13078_p9, %p13516_p6 }
  0x36   : > { %p13087_p13 = por %p13086_p3, %p13085_p12 }
  0x37   : > { %p13081_p11 = pneg %p13080_p10 }
  0x38   : > { %12221 = dma.hbm_to_vmem [thread:$0]  (!%p13508_p5), %s14282_s4, 128, %s346_s12, [#allocation11]  }
  0x39   : > { %p13088_p1 = pnand %p13087_p13, %p13081_p11 }
  0x3b   : > { %13091 = shalt.err (!%p13088_p1)
}
  0x3c   : > { %s14283_s6 = sld [smem:[#allocation31_spill]]  ;;  %s13365_s12 = smov [#allocation16]  }
  0x3d   : > { %s393_s30 = sshll.u32 %s13365_s12, 4  ;;  %s13366_s14 = smov [#allocation9]   ;;  %s394_s30 = int_to_ptr.vmem [resolvable:$true] %s393_s30 }
  0x3e   : > { %s331_s28 = sshll.u32 %s13366_s14, 4  ;;  %s13103_s2 = scalar_lea.vmem %s394_s30, 32  ;;  %s332_s28 = int_to_ptr.vmem [resolvable:$true] %s331_s28 }
  0x3f   : > { %p13104_p0 = scmp.ne.s32.totalorder %s394_s30, %s13103_s2  ;;  %p13111_p7 = scmp.lt.s32.totalorder %s394_s30, %s394_s30 }
  0x40   : > { %p13112_p8 = scmp.lt.s32.totalorder %s13103_s2, %s13103_s2 }
  0x41   : > { %p13106_p2 = pnand %p13104_p0, %p13516_p6 }
  0x42   : > { %12227 = dma.hbm_to_vmem [thread:$0]  (!%p13508_p5), %s14283_s6, 64, %s13512_s15, [#allocation14]  }
  0x43   : > { %p13107_p4 = pneg %p13106_p2  ;;  %p13113_p9 = por %p13112_p8, %p13111_p7 }
  0x45   : > { %p13114_p10 = pnand %p13113_p9, %p13107_p4 }
  0x47   : > { %13117 = shalt.err (!%p13114_p10)
}
  0x48   : > { %s14284_s8 = sld [smem:[#allocation33_spill]]  ;;  %s13129_s15 = scalar_lea.vmem %s332_s28, 98304 }
  0x49   : > { %p13130_p11 = scmp.ne.s32.totalorder %s332_s28, %s13129_s15  ;;  %p13137_p13 = scmp.lt.s32.totalorder %s332_s28, %s332_s28 }
  0x4a   : > { %p13138_p1 = scmp.lt.s32.totalorder %s13129_s15, %s13129_s15 }
  0x4b   : > { %p13132_p12 = pnand %p13130_p11, %p13516_p6 }
  0x4c   : > { %p13139_p0 = por %p13138_p1, %p13137_p13 }
  0x4d   : > { %p13133_p3 = pneg %p13132_p12 }
  0x4e   : > { %12233 = dma.hbm_to_vmem [thread:$0]  (!%p13508_p5), %s14284_s8, 32, %s394_s30, [#allocation17]  }
  0x4f   : > { %p13140_p2 = pnand %p13139_p0, %p13133_p3 }
  0x51   : > { %13143 = shalt.err (!%p13140_p2)
}
  0x52   : > { %s13367_s2 = smov 512   ;;  %s13368_s25 = smov 32  }
  0x53   : > { %s14285_s3 = sld [smem:[#allocation28_spill]]  ;;  %s13369_s30 = smov [#allocation12]  }
  0x54   : > { %s355_s29 = sshll.u32 %s13369_s30, 4  ;;  %s356_s29 = int_to_ptr.vmem [resolvable:$true] %s355_s29 }
  0x55   : > { %s13155_s11 = scalar_lea.vmem %s356_s29, 32768  ;;  %p13163_p9 = scmp.lt.s32.totalorder %s356_s29, %s356_s29 }
  0x56   : > { %p13156_p4 = scmp.ne.s32.totalorder %s356_s29, %s13155_s11  ;;  %p13164_p10 = scmp.lt.s32.totalorder %s13155_s11, %s13155_s11 }
  0x58   : > { %p13158_p7 = pnand %p13156_p4, %p13516_p6  ;;  %p13165_p11 = por %p13164_p10, %p13163_p9 }
  0x59   : > { %12218 = dma.hbm_to_vmem [thread:$0]  (!%p13508_p5), %s14285_s3, 98304, %s332_s28, [#allocation8], %s13367_s2, %s13367_s2, %s13368_s25  }
  0x5a   : > { %p13159_p8 = pneg %p13158_p7 }
  0x5c   : > { %p13166_p12 = pnand %p13165_p11, %p13159_p8 }
  0x5e   : > { %13169 = shalt.err (!%p13166_p12)
}
  0x5f   : > { %s14264_s15 = smov 256   ;;  %s13371_s4 = smov 16  }
  0x60   : > { %s14286_s5 = sld [smem:[#allocation30_spill]]  ;;  %s13372_s25 = smov [#allocation15]  }
  0x61   : > { %s379_s12 = sshll.u32 %s13372_s25, 4  ;;  %s380_s12 = int_to_ptr.vmem [resolvable:$true] %s379_s12 }
  0x62   : > { %s13181_s14 = scalar_lea.vmem %s380_s12, 8192  ;;  %p13189_p0 = scmp.lt.s32.totalorder %s380_s12, %s380_s12 }
  0x63   : > { %p13182_p3 = scmp.ne.s32.totalorder %s380_s12, %s13181_s14  ;;  %p13190_p2 = scmp.lt.s32.totalorder %s13181_s14, %s13181_s14 }
  0x65   : > { %p13184_p13 = pnand %p13182_p3, %p13516_p6  ;;  %p13191_p4 = por %p13190_p2, %p13189_p0 }
  0x66   : > { %12224 = dma.hbm_to_vmem [thread:$0]  (!%p13508_p5), %s14286_s5, 32768, %s356_s29, [#allocation11], %s14264_s15, %s14264_s15, %s13371_s4  }
  0x67   : > { %p13185_p1 = pneg %p13184_p13 }
  0x69   : > { %p13192_p7 = pnand %p13191_p4, %p13185_p1 }
  0x6b   : > { %13195 = shalt.err (!%p13192_p7)
}
  0x6c   : > { %s14265_s30 = smov 128   ;;  %s14266_s11 = smov 8  }
  0x6d   : > { %s14287_s7 = sld [smem:[#allocation32_spill]]  ;;  %s13375_s28 = smov [#allocation18]  }
  0x6e   : > { %s407_s2 = sshll.u32 %s13375_s28, 4  ;;  %s408_s2 = int_to_ptr.vmem [resolvable:$true] %s407_s2 }
  0x6f   : > { %s13207_s25 = scalar_lea.vmem %s408_s2, 16  ;;  %s13214_s14 = scalar_lea.vmem %s408_s2, 32 }
  0x70   : > { %p13208_p8 = scmp.ne.s32.totalorder %s408_s2, %s13207_s25  ;;  %p13215_p11 = scmp.lt.s32.totalorder %s408_s2, %s408_s2 }
  0x71   : > { %p13216_p12 = scmp.lt.s32.totalorder %s13214_s14, %s13207_s25 }
  0x72   : > { %p13210_p9 = pnand %p13208_p8, %p13516_p6 }
  0x73   : > { %12230 = dma.hbm_to_vmem [thread:$0]  (!%p13508_p5), %s14287_s7, 8192, %s380_s12, [#allocation14], %s14265_s30, %s14265_s30, %s14266_s11  }
  0x74   : > { %p13211_p10 = pneg %p13210_p9  ;;  %p13217_p3 = por %p13216_p12, %p13215_p11 }
  0x76   : > { %p13218_p13 = pnand %p13217_p3, %p13211_p10 }
  0x78   : > { %13221 = shalt.err (!%p13218_p13)
}
  0x79   : > { %s14288_s10 = sld [smem:[#allocation34_spill]]  ;;  %s38_s16 = sadd.s32 1, %s13352_s22 }
  0x7a   : > { %s41_s13 = sadd.s32 1, %s13356_s23  ;;  %p39_p6 = scmp.ge.s32.totalorder %s38_s16, 12 }
  0x7b   : > { %s71_s12 = sadd.s32 1, %s13340_s19  ;;  %p78_p1 = scmp.ne.s32.totalorder %s13340_s19, %s13336_s18 }
  0x7c   : > { %p79_p0 = scmp.eq.s32.totalorder %s13360_s24, 0  ;;  %s14312_s16 = smov (%p39_p6, %s38_s16), 0 }
  0x7d   : > { %s14314_s13 = smov (!%p39_p6, %s41_s13), %s13356_s23  ;;  %s66_s3 = ssub.s32 %s13352_s22, %s14312_s16 }
  0x7e   : > { %p13597_p2 = por %p79_p0, %p78_p1  ;;  %p84_p4 = scmp.ne.s32.totalorder %s13336_s18, %s13332_s17 }
  0x7f   : > { %12236 = dma.hbm_to_vmem [thread:$0]  (!%p13508_p5), %s14288_s10, 16, %s408_s2, [#allocation17]  }
  0x80   : > { %p43_p5 = scmp.ge.s32.totalorder %s14314_s13, 2  ;;  %p12249_p7 = scmp.lt.s32.totalorder %s13360_s24, 24 }
  0x81   : > { %s418_s4 = sand.u32 1, %s13340_s19   ;;  %p14291_p8 = scmp.ne.s32.totalorder %s14277_s26, 0 }
  0x82   : > { %s14316_s13 = smov (%p43_p5, %s14314_s13), 0  ;;  %s12171_s2 = smul.u32 768, %s418_s4 }
  0x83   : > { %14290 = sst [smem:[#allocation26_spill]] %s14316_s13  ;;  %p13609_p9 = por %p14291_p8, %p84_p4 }
  0x84   : > { %s67_s28 = ssub.s32 %s13356_s23, %s14316_s13  ;;  %s10868_s14 = sshll.u32 %s13356_s23, 1 }
  0x85   : > { %s68_s25 = sor.u32 %s67_s28, %s66_s3  ;;  %s12172_s30 = smul.u32 384, %s13352_s22 }
  0x86   : > { %p69_p10 = scmp.eq.s32.totalorder %s68_s25, 0  ;;  %s422_s11 = scalar_lea.vmem [#allocation4], %s12171_s2 }
  0x87   : > { %s431_s17 = sshll.u32 %s422_s11, 4  ;;  %s428_s6 = sadd.s32 %s12172_s30, %s10868_s14  ;;  %s432_s17 = int_to_ptr.vmem [resolvable:$true] %s431_s17 }
  0x88   : > { %s13618_s5 = scalar_select %p69_p10, %s13340_s19, %s71_s12  }
  0x89   : > { %s10869_s7 = sshll.u32 %s428_s6, 6  ;;  %p13624_p11 = pnand %p12249_p7, %p13597_p2 }
  0x8a   : > { %s430_s3 = scalar_lea.hbm %s14249_s1, %s10869_s7  ;;  %s419_s28 = scalar_lea.sflag [#allocation5], %s418_s4 }
  0x8b   : > { %p13224_p12 = pneg %p13624_p11  ;;  %s13235_s11 = scalar_lea.vmem %s432_s17, 12288 }
  0x8c   : > { %p13236_p3 = scmp.ne.s32.totalorder %s432_s17, %s13235_s11  ;;  %s13376_s30 = smov [#allocation4]  }
  0x8d   : > { %s13240_s6 = sshll.u32 %s13376_s30, 4  ;;  %s13241_s6 = int_to_ptr.vmem [resolvable:$false] %s13240_s6 }
  0x8e   : > { %p13238_p13 = pnand %p13236_p3, %p13224_p12  ;;  %s13242_s12 = scalar_lea.vmem %s13241_s6, 24576 }
  0x8f   : > { %p13243_p1 = scmp.lt.s32.totalorder %s432_s17, %s13241_s6  ;;  %p13244_p0 = scmp.lt.s32.totalorder %s13242_s12, %s13235_s11 }
  0x90   : > { %p13239_p6 = pneg %p13238_p13 }
  0x91   : > { %p13245_p2 = por %p13244_p0, %p13243_p1 }
  0x93   : > { %p13246_p5 = pnand %p13245_p2, %p13239_p6 }
  0x95   : > { %13249 = shalt.err (!%p13246_p5)
}
  0x96   : > { %s14294_s10 = smov 8   ;;  %s14295_s7 = smov 128  }
  0x97   : > { %s14296_s13 = smov 256   ;;  %p14297_p4 = scmp.ne.s32.totalorder %s14278_s27, 0 }
  0x98   : > { %12240 = dma.hbm_to_vmem [thread:$0]  (!%p13624_p11), %s430_s3, 12288, %s432_s17, %s419_s28, %s14296_s13, %s14295_s7, %s14294_s10  }
  0x99   : > { %443 = sbr.rel (%p14297_p4) target bundleno = 2516 (0x9d4), region = 64  ;;  %s445_s15 = sand.u32 (!%p14297_p4), 1, %s13336_s18  }
  0x9a   : > { %s12173_s4 = smul.u32 (!%p14297_p4), 768, %s445_s15  ;;  %s446_s2 = scalar_lea.sflag (!%p14297_p4), [#allocation5], %s445_s15 }
  0x9c   : > { %s13641_s25 = scalar_lea.vmem (!%p14297_p4), [#allocation4], %s12173_s4 }
  0x9e   : > { %13307 = dma.done.wait (%p13609_p9), %s446_s2, 12288  }
  0x9f   : > { %13309 = vsyncadd (%p13609_p9), %s446_s2, 4294955008  ;;  %p14298_p7 = scmp.ne.s32.totalorder %s14277_s26, 0 }
  0xa1   : > { %13311 = dma.done.wait (%p14298_p7), [#allocation8], 98560  }
  0xa2   : > { %13313 = vsyncadd (%p14298_p7), [#allocation8], 4294868736 }
  0xa3   : > { %13315 = dma.done.wait (%p14298_p7), [#allocation11], 32896  }
  0xa4   : > { %13317 = vsyncadd (%p14298_p7), [#allocation11], 4294934400 }
  0xa5   : > { %13319 = dma.done.wait (%p14298_p7), [#allocation14], 8256  }
  0xa6   : > { %13321 = vsyncadd (%p14298_p7), [#allocation14], 4294959040 }
  0xa7   : > { %13323 = dma.done.wait (%p14298_p7), [#allocation17], 48  }
  0xa8   : > { %13325 = vsyncadd (%p14298_p7), [#allocation17], 4294967248  ;;  %p517_p8 = scmp.eq.s32.totalorder %s13344_s20, 0  ;;  %p518_p9 = scmp.eq.s32.totalorder %s13344_s20, 3 }
  0xa9   : > { %p520_p10 = scmp.eq.s32.totalorder %s13344_s20, 7 }
  0xaa   : > { %p519_p11 = por %p518_p9, %p517_p8 }
  0xac   : > { %p521_p12 = por %p520_p10, %p519_p11 }
  0xad   : > { %v13377_v0 = vmov (%p521_p12), 0.0  }
  0xae   : > { %524 = sbr.rel (!%p521_p12) target bundleno = 179 (0xb3), region = 104  ;;  %525 = vst [vmem:[#allocation2 + $0x30] sm:$0xff] (%p521_p12), %v13377_v0  ;;  %526 = vst [vmem:[#allocation2] sm:$0xff] (%p521_p12), %v13377_v0 }
  0xaf   : > { %527 = vst [vmem:[#allocation2 + $0x18] sm:$0xff] (%p521_p12), %v13377_v0  ;;  %528 = vst [vmem:[#allocation2 + $0x10] sm:$0xff] (%p521_p12), %v13377_v0 }
  0xb0   : > { %529 = vst [vmem:[#allocation2 + $0x8] sm:$0xff] (%p521_p12), %v13377_v0  ;;  %530 = vst [vmem:[#allocation2 + $0x20] sm:$0xff] (%p521_p12), %v13377_v0 }
  0xb1   : > { %531 = vst [vmem:[#allocation2 + $0x28] sm:$0xff] (%p521_p12), %v13377_v0  ;;  %532 = vst [vmem:[#allocation2 + $0x38] sm:$0xff] (%p521_p12), %v13377_v0 }
  0xb3 PF: > { %v12352_v1 = vld [vmem:[%s13641_s25 + $0x74] ss:$8 sps:$4 sm:$0xff]   ;;  %v12356_v3 = vld [vmem:[%s13641_s25 + $0x70] ss:$8 sps:$4 sm:$0xff]   ;;  %v12358_v5 = vld [vmem:[%s13641_s25 + $0x64] ss:$8 sps:$4 sm:$0xff]  }
  0xb4   : > { %v12354_v2 = vld [vmem:[%s13641_s25 + $0x174] ss:$8 sps:$4 sm:$0xff]   ;;  %1197 = vmatprep.subr.bf16.mxu0 %v12352_v1  ;;  %v12357_v4 = vld [vmem:[%s13641_s25 + $0x170] ss:$8 sps:$4 sm:$0xff]   ;;  %v12360_v6 = vld [vmem:[%s13641_s25 + $0x164] ss:$8 sps:$4 sm:$0xff]  }
  0xb5   : > { %1250 = vmatprep.subr.bf16.mxu1 %v12354_v2  ;;  %1198 = vmatpush1.bf16.msra.mxu0 %v12356_v3  ;;  %v12362_v7 = vld [vmem:[%s13641_s25 + $0x60] ss:$8 sps:$4 sm:$0xff]   ;;  %v12364_v9 = vld [vmem:[%s13641_s25 + $0x54] ss:$8 sps:$4 sm:$0xff]   ;;  %v12368_v11 = vld [vmem:[%s13641_s25 + $0x50] ss:$8 sps:$4 sm:$0xff]  }
  0xb6   : > { %1251 = vmatpush1.bf16.msra.mxu1 %v12357_v4  ;;  %1199 = vmatprep.subr.bf16.mxu0 %v12358_v5  ;;  %v12363_v8 = vld [vmem:[%s13641_s25 + $0x160] ss:$8 sps:$4 sm:$0xff]   ;;  %v12366_v10 = vld [vmem:[%s13641_s25 + $0x154] ss:$8 sps:$4 sm:$0xff]   ;;  %v12369_v12 = vld [vmem:[%s13641_s25 + $0x150] ss:$8 sps:$4 sm:$0xff]  }
  0xb7   : > { %1252 = vmatprep.subr.bf16.mxu1 %v12360_v6  ;;  %v12370_v13 = vld [vmem:[%s13641_s25 + $0x44] ss:$8 sps:$4 sm:$0xff]   ;;  %v12374_v15 = vld [vmem:[%s13641_s25 + $0x40] ss:$8 sps:$4 sm:$0xff]   ;;  %v12376_v17 = vld [vmem:[%s13641_s25 + $0x34] ss:$8 sps:$4 sm:$0xff]  }
  0xb8   : > { %v12372_v14 = vld [vmem:[%s13641_s25 + $0x144] ss:$8 sps:$4 sm:$0xff]   ;;  %v12375_v16 = vld [vmem:[%s13641_s25 + $0x140] ss:$8 sps:$4 sm:$0xff]   ;;  %v12378_v18 = vld [vmem:[%s13641_s25 + $0x134] ss:$8 sps:$4 sm:$0xff]  }
  0xb9   : > { %1200 = vmatpush1.bf16.msra.mxu0 %v12362_v7  ;;  %v12380_v19 = vld [vmem:[%s13641_s25 + $0x30] ss:$8 sps:$4 sm:$0xff]   ;;  %v12382_v21 = vld [vmem:[%s13641_s25 + $0x24] ss:$8 sps:$4 sm:$0xff]   ;;  %v12386_v23 = vld [vmem:[%s13641_s25 + $0x20] ss:$8 sps:$4 sm:$0xff]  }
  0xba   : > { %1253 = vmatpush1.bf16.msra.mxu1 %v12363_v8  ;;  %1201 = vmatprep.subr.bf16.mxu0 %v12364_v9  ;;  %v12381_v20 = vld [vmem:[%s13641_s25 + $0x130] ss:$8 sps:$4 sm:$0xff]   ;;  %v12384_v22 = vld [vmem:[%s13641_s25 + $0x124] ss:$8 sps:$4 sm:$0xff]   ;;  %v12387_v24 = vld [vmem:[%s13641_s25 + $0x120] ss:$8 sps:$4 sm:$0xff]  }
  0xbb   : > { %1254 = vmatprep.subr.bf16.mxu1 %v12366_v10  ;;  %v12388_v25 = vld [vmem:[%s13641_s25 + $0x14] ss:$8 sps:$4 sm:$0xff]   ;;  %p534_p3 = scmp.lt.s32.totalorder %s13344_s20, 7  ;;  %v12392_v27 = vld [vmem:[%s13641_s25 + $0x10] ss:$8 sps:$4 sm:$0xff]   ;;  %p533_p13 = scmp.lt.s32.totalorder %s13344_s20, 3 }
  0xbc   : > { %v12390_v26 = vld [vmem:[%s13641_s25 + $0x114] ss:$8 sps:$4 sm:$0xff]   ;;  %v12393_v28 = vld [vmem:[%s13641_s25 + $0x110] ss:$8 sps:$4 sm:$0xff]   ;;  %v12394_v29 = vld [vmem:[%s13641_s25 + $0x4] ss:$8 sps:$4 sm:$0xff]  }
  0xbd   : > { %1202 = vmatpush1.bf16.msra.mxu0 %v12368_v11  ;;  %v12396_v30 = vld [vmem:[%s13641_s25 + $0x104] ss:$8 sps:$4 sm:$0xff]   ;;  %s535_s8 = scalar_select %p534_p3, 3, 7  ;;  %v12398_v31 = vld [vmem:[%s13641_s25] ss:$8 sps:$4 sm:$0xff]  }
  0xbe   : > { %1255 = vmatpush1.bf16.msra.mxu1 %v12369_v12  ;;  %1203 = vmatprep.subr.bf16.mxu0 %v12370_v13  ;;  %v12399_v32 = vld [vmem:[%s13641_s25 + $0x100] ss:$8 sps:$4 sm:$0xff]   ;;  %v12400_v33 = vld [vmem:[%s13641_s25 + $0xf4] ss:$8 sps:$4 sm:$0xff]   ;;  %v12404_v35 = vld [vmem:[%s13641_s25 + $0xf0] ss:$8 sps:$4 sm:$0xff]  }
  0xbf   : > { %1256 = vmatprep.subr.bf16.mxu1 %v12372_v14  ;;  %v12402_v34 = vld [vmem:[%s13641_s25 + $0x1f4] ss:$8 sps:$4 sm:$0xff]   ;;  %s14318_s8 = smov (%p533_p13, %s535_s8), 0  ;;  %v12405_v36 = vld [vmem:[%s13641_s25 + $0x1f0] ss:$8 sps:$4 sm:$0xff]   ;;  %p1372_p6 = scmp.eq.s32.totalorder %s13344_s20, 2 }
  0xc0   : > { %v12406_v37 = vld [vmem:[%s13641_s25 + $0xe4] ss:$8 sps:$4 sm:$0xff]   ;;  %s537_s26 = ssub.s32 %s13344_s20, %s14318_s8  ;;  %v12410_v39 = vld [vmem:[%s13641_s25 + $0xe0] ss:$8 sps:$4 sm:$0xff]   ;;  %v12412_v41 = vld [vmem:[%s13641_s25 + $0xd4] ss:$8 sps:$4 sm:$0xff]  }
  0xc1   : > { %1204 = vmatpush1.bf16.msra.mxu0 %v12374_v15  ;;  %v12408_v38 = vld [vmem:[%s13641_s25 + $0x1e4] ss:$8 sps:$4 sm:$0xff]   ;;  %v12411_v40 = vld [vmem:[%s13641_s25 + $0x1e0] ss:$8 sps:$4 sm:$0xff]   ;;  %s12116_s27 = smul.u32 96, %s537_s26  ;;  %p1373_p1 = scmp.eq.s32.totalorder %s13348_s21, 0 }
  0xc2   : > { %1257 = vmatpush1.bf16.msra.mxu1 %v12375_v16  ;;  %1205 = vmatprep.subr.bf16.mxu0 %v12376_v17  ;;  %v12414_v42 = vld [vmem:[%s13641_s25 + $0x1d4] ss:$8 sps:$4 sm:$0xff]   ;;  %v12416_v43 = vld [vmem:[%s13641_s25 + $0xd0] ss:$8 sps:$4 sm:$0xff]   ;;  %v12418_v45 = vld [vmem:[%s13641_s25 + $0xc4] ss:$8 sps:$4 sm:$0xff]  }
  0xc3   : > { %1258 = vmatprep.subr.bf16.mxu1 %v12378_v18  ;;  %v12417_v44 = vld [vmem:[%s13641_s25 + $0x1d0] ss:$8 sps:$4 sm:$0xff]   ;;  %s13717_s17 = scalar_lea.vmem %s14248_s0, %s12116_s27  ;;  %v12420_v46 = vld [vmem:[%s13641_s25 + $0x1c4] ss:$8 sps:$4 sm:$0xff]   ;;  %v12422_v47 = vld [vmem:[%s13641_s25 + $0xc0] ss:$8 sps:$4 sm:$0xff]   ;;  %p13788_p0 = pnand %p1373_p1, %p1372_p6 }
  0xc4   : > { %v12423_v48 = vld [vmem:[%s13641_s25 + $0x1c0] ss:$8 sps:$4 sm:$0xff]   ;;  %v12424_v49 = vld [vmem:[%s13641_s25 + $0xb4] ss:$8 sps:$4 sm:$0xff]   ;;  %v12450_v50 = vld [vmem:[%s13717_s17 + $0x4] ss:$24 sps:$4 sm:$0xff]  }
  0xc5   : > { %1206 = vmatpush1.bf16.msra.mxu0 %v12380_v19  ;;  %v12426_v51 = vld [vmem:[%s13641_s25 + $0x1b4] ss:$8 sps:$4 sm:$0xff]   ;;  %v12453_v52 = vld [vmem:[%s13717_s17 + $0xc] ss:$24 sps:$4 sm:$0xff]   ;;  %1229 = vmatprep.mubr.bf16.mxu0 %v12450_v50  ;;  %v12430_v55 = vld [vmem:[%s13641_s25 + $0xa4] ss:$8 sps:$4 sm:$0xff]  }
  0xc6   : > { %1259 = vmatpush1.bf16.msra.mxu1 %v12381_v20  ;;  %1207 = vmatprep.subr.bf16.mxu0 %v12382_v21  ;;  %v12428_v53 = vld [vmem:[%s13641_s25 + $0xb0] ss:$8 sps:$4 sm:$0xff]   ;;  %v12432_v56 = vld [vmem:[%s13641_s25 + $0x1a4] ss:$8 sps:$4 sm:$0xff]   ;;  %v12434_v57 = vld [vmem:[%s13641_s25 + $0xa0] ss:$8 sps:$4 sm:$0xff]  }
  0xc7   : > { %1260 = vmatprep.subr.bf16.mxu1 %v12384_v22  ;;  %v12429_v54 = vld [vmem:[%s13641_s25 + $0x1b0] ss:$8 sps:$4 sm:$0xff]   ;;  %1282 = vmatprep.mubr.bf16.mxu1 %v12453_v52  ;;  %v12435_v58 = vld [vmem:[%s13641_s25 + $0x1a0] ss:$8 sps:$4 sm:$0xff]   ;;  %v12436_v59 = vld [vmem:[%s13641_s25 + $0x94] ss:$8 sps:$4 sm:$0xff]  }
  0xc8   : > { %v12438_v60 = vld [vmem:[%s13641_s25 + $0x194] ss:$8 sps:$4 sm:$0xff]   ;;  %v12440_v61 = vld [vmem:[%s13641_s25 + $0x90] ss:$8 sps:$4 sm:$0xff]   ;;  %v12442_v63 = vld [vmem:[%s13641_s25 + $0x84] ss:$8 sps:$4 sm:$0xff]  }
  0xc9   : > { %1208 = vmatpush1.bf16.msra.mxu0 %v12386_v23  ;;  %v12441_v62 = vld [vmem:[%s13641_s25 + $0x190] ss:$8 sps:$4 sm:$0xff]   ;;  %v12444_v0 = vld [vmem:[%s13641_s25 + $0x184] ss:$8 sps:$4 sm:$0xff]   ;;  %v12446_v1 = vld [vmem:[%s13641_s25 + $0x80] ss:$8 sps:$4 sm:$0xff]  }
  0xca   : > { %1261 = vmatpush1.bf16.msra.mxu1 %v12387_v24  ;;  %1209 = vmatprep.subr.bf16.mxu0 %v12388_v25  ;;  %v12447_v2 = vld [vmem:[%s13641_s25 + $0x180] ss:$8 sps:$4 sm:$0xff]   ;;  %v12456_v3 = vld [vmem:[%s13641_s25 + $0x274] ss:$8 sps:$4 sm:$0xff]   ;;  %v12454_v6 = vld [vmem:[%s13641_s25 + $0x270] ss:$8 sps:$4 sm:$0xff]  }
  0xcb   : > { %1262 = vmatprep.subr.bf16.mxu1 %v12390_v26  ;;  %v12448_v4 = vld [vmem:[%s13717_s17] ss:$24 sps:$4 sm:$0xff]   ;;  %v12493_v8 = vld [vmem:[%s13717_s17 + $0x34] ss:$24 sps:$4 sm:$0xff]   ;;  %v12497_v12 = vld [vmem:[%s13717_s17 + $0x30] ss:$24 sps:$4 sm:$0xff]  }
  0xcc   : > { %v12451_v5 = vld [vmem:[%s13717_s17 + $0x8] ss:$24 sps:$4 sm:$0xff]   ;;  %v12459_v7 = vld [vmem:[%s13641_s25 + $0x264] ss:$8 sps:$4 sm:$0xff]   ;;  %v12495_v9 = vld [vmem:[%s13717_s17 + $0x3c] ss:$24 sps:$4 sm:$0xff]  }
  0xcd   : > { %1210 = vmatpush1.bf16.msra.mxu0 %v12392_v27  ;;  %v12457_v10 = vld [vmem:[%s13641_s25 + $0x260] ss:$8 sps:$4 sm:$0xff]   ;;  %v12462_v11 = vld [vmem:[%s13641_s25 + $0x254] ss:$8 sps:$4 sm:$0xff]   ;;  %v12498_v13 = vld [vmem:[%s13717_s17 + $0x38] ss:$24 sps:$4 sm:$0xff]  }
  0xce   : > { %1263 = vmatpush1.bf16.msra.mxu1 %v12393_v28  ;;  %1211 = vmatprep.subr.bf16.mxu0 %v12394_v29  ;;  %v12460_v14 = vld [vmem:[%s13641_s25 + $0x250] ss:$8 sps:$4 sm:$0xff]   ;;  %v12465_v15 = vld [vmem:[%s13641_s25 + $0x244] ss:$8 sps:$4 sm:$0xff]   ;;  %v12510_v16 = vld [vmem:[%s13717_s17 + $0x14] ss:$24 sps:$4 sm:$0xff]  }
  0xcf   : > { %1264 = vmatprep.subr.bf16.mxu1 %v12396_v30  ;;  %v12513_v17 = vld [vmem:[%s13717_s17 + $0x44] ss:$24 sps:$4 sm:$0xff]   ;;  %v12463_v18 = vld [vmem:[%s13641_s25 + $0x240] ss:$8 sps:$4 sm:$0xff]   ;;  %v12468_v19 = vld [vmem:[%s13641_s25 + $0x234] ss:$8 sps:$4 sm:$0xff]  }
  0xd0   : > { %v12466_v20 = vld [vmem:[%s13641_s25 + $0x230] ss:$8 sps:$4 sm:$0xff]   ;;  %v12471_v21 = vld [vmem:[%s13641_s25 + $0x224] ss:$8 sps:$4 sm:$0xff]   ;;  %v12469_v22 = vld [vmem:[%s13641_s25 + $0x220] ss:$8 sps:$4 sm:$0xff]  }
  0xd1   : > { %1212 = vmatpush1.bf16.msra.mxu0 %v12398_v31  ;;  %v12474_v23 = vld [vmem:[%s13641_s25 + $0x214] ss:$8 sps:$4 sm:$0xff]   ;;  %v12472_v24 = vld [vmem:[%s13641_s25 + $0x210] ss:$8 sps:$4 sm:$0xff]   ;;  %v12477_v25 = vld [vmem:[%s13641_s25 + $0x204] ss:$8 sps:$4 sm:$0xff]  }
  0xd2   : > { %1265 = vmatpush1.bf16.msra.mxu1 %v12399_v32  ;;  %1213 = vmatprep.subr.bf16.mxu0 %v12400_v33  ;;  %v12475_v26 = vld [vmem:[%s13641_s25 + $0x200] ss:$8 sps:$4 sm:$0xff]   ;;  %v12480_v27 = vld [vmem:[%s13641_s25 + $0x2f4] ss:$8 sps:$4 sm:$0xff]   ;;  %v12478_v28 = vld [vmem:[%s13641_s25 + $0x2f0] ss:$8 sps:$4 sm:$0xff]  }
  0xd3   : > { %1266 = vmatprep.subr.bf16.mxu1 %v12402_v34  ;;  %v12483_v29 = vld [vmem:[%s13641_s25 + $0x2e4] ss:$8 sps:$4 sm:$0xff]   ;;  %v12481_v30 = vld [vmem:[%s13641_s25 + $0x2e0] ss:$8 sps:$4 sm:$0xff]   ;;  %v12486_v31 = vld [vmem:[%s13641_s25 + $0x2d4] ss:$8 sps:$4 sm:$0xff]  }
  0xd4   : > { %v12484_v32 = vld [vmem:[%s13641_s25 + $0x2d0] ss:$8 sps:$4 sm:$0xff]   ;;  %v12489_v33 = vld [vmem:[%s13641_s25 + $0x2c4] ss:$8 sps:$4 sm:$0xff]   ;;  %v12487_v34 = vld [vmem:[%s13641_s25 + $0x2c0] ss:$8 sps:$4 sm:$0xff]  }
  0xd5   : > { %1214 = vmatpush2.bf16.msra.mxu0 %v12404_v35  ;;  %v12492_v35 = vld [vmem:[%s13641_s25 + $0x2b4] ss:$8 sps:$4 sm:$0xff]  }
  0xd6   : > { %1267 = vmatpush2.bf16.msra.mxu1 %v12405_v36  ;;  %1215 = vmatprep.subr.bf16.mxu0 %v12406_v37  ;;  %v12490_v36 = vld [vmem:[%s13641_s25 + $0x2b0] ss:$8 sps:$4 sm:$0xff]   ;;  %v12501_v37 = vld [vmem:[%s13641_s25 + $0x2a4] ss:$8 sps:$4 sm:$0xff]  }
  0xd7   : > { %1268 = vmatprep.subr.bf16.mxu1 %v12408_v38  ;;  %v12499_v38 = vld [vmem:[%s13641_s25 + $0x2a0] ss:$8 sps:$4 sm:$0xff]  }
  0xd9   : > { %1216 = vmatpush2.bf16.msra.mxu0 %v12410_v39  ;;  %v12504_v39 = vld [vmem:[%s13641_s25 + $0x294] ss:$8 sps:$4 sm:$0xff]  }
  0xda   : > { %1269 = vmatpush2.bf16.msra.mxu1 %v12411_v40  ;;  %1217 = vmatprep.subr.bf16.mxu0 %v12412_v41  ;;  %v12502_v40 = vld [vmem:[%s13641_s25 + $0x290] ss:$8 sps:$4 sm:$0xff]   ;;  %v12507_v41 = vld [vmem:[%s13641_s25 + $0x284] ss:$8 sps:$4 sm:$0xff]  }
  0xdb   : > { %1270 = vmatprep.subr.bf16.mxu1 %v12414_v42  ;;  %v12505_v42 = vld [vmem:[%s13641_s25 + $0x280] ss:$8 sps:$4 sm:$0xff]  }
  0xdd   : > { %1218 = vmatpush2.bf16.msra.mxu0 %v12416_v43  ;;  %v12508_v43 = vld [vmem:[%s13717_s17 + $0x10] ss:$24 sps:$4 sm:$0xff]  }
  0xde   : > { %1271 = vmatpush2.bf16.msra.mxu1 %v12417_v44  ;;  %1219 = vmatprep.subr.bf16.mxu0 %v12418_v45  ;;  %v12511_v44 = vld [vmem:[%s13717_s17 + $0x40] ss:$24 sps:$4 sm:$0xff]  }
  0xdf   : > { %1272 = vmatprep.subr.bf16.mxu1 %v12420_v46 }
  0xe1   : > { %1220 = vmatpush2.bf16.msra.mxu0 %v12422_v47 }
  0xe2   : > { %1273 = vmatpush2.bf16.msra.mxu1 %v12423_v48  ;;  %1221 = vmatprep.subr.bf16.mxu0 %v12424_v49 }
  0xe3   : > { %1274 = vmatprep.subr.bf16.mxu1 %v12426_v51 }
  0xe5   : > { %1222 = vmatpush2.bf16.msra.mxu0 %v12428_v53 }
  0xe6   : > { %1275 = vmatpush2.bf16.msra.mxu1 %v12429_v54  ;;  %1223 = vmatprep.subr.bf16.mxu0 %v12430_v55 }
  0xe7   : > { %1276 = vmatprep.subr.bf16.mxu1 %v12432_v56 }
  0xe9   : > { %1224 = vmatpush2.bf16.msra.mxu0 %v12434_v57 }
  0xea   : > { %1277 = vmatpush2.bf16.msra.mxu1 %v12435_v58  ;;  %1225 = vmatprep.subr.bf16.mxu0 %v12436_v59 }
  0xeb   : > { %1278 = vmatprep.subr.bf16.mxu1 %v12438_v60 }
  0xed   : > { %1226 = vmatpush2.bf16.msra.mxu0 %v12440_v61 }
  0xee   : > { %1279 = vmatpush2.bf16.msra.mxu1 %v12441_v62  ;;  %1227 = vmatprep.subr.bf16.mxu0 %v12442_v63  ;;  %v553_v63 = vld [vmem:[#allocation2 + $0x30] sm:$0xff] }
  0xef   : > { %1280 = vmatprep.subr.bf16.mxu1 %v12444_v0 }
  0xf1   : > { %1228 = vmatpush2.bf16.msra.mxu0 %v12446_v1  ;;  %v557_v1 = vld [vmem:[#allocation2 + $0x8] sm:$0xff] }
  0xf2   : > { %1281 = vmatpush2.bf16.msra.mxu1 %v12447_v2  ;;  %1303 = vmatprep.subr.bf16.mxu0 %v12456_v3 }
  0xf3   : > { %12139 = vmatprep.subr.bf16.mxu1 %v12456_v3 }
  0xf4   : > { %1230 = vmatmul.mubr.bf16.vlgmr.msra.gmra.mxu0 %v12448_v4 }
  0xf5   : > { %1283 = vmatmul.mubr.bf16.vlgmr.msra.gmra.mxu1 %v12451_v5  ;;  %1304 = vmatpush1.bf16.msra.mxu0 %v12454_v6 }
  0xf6   : > { %12155 = vmatpush1.bf16.msra.mxu1 %v12454_v6  ;;  %1305 = vmatprep.subr.bf16.mxu0 %v12459_v7 }
  0xf7   : > { %12140 = vmatprep.subr.bf16.mxu1 %v12459_v7  ;;  %1239 = vmatprep.mubr.bf16.mxu0 %v12493_v8 }
  0xf8   : > { %1292 = vmatprep.mubr.bf16.mxu1 %v12495_v9  ;;  %v554_v9 = vld [vmem:[#allocation2] sm:$0xff] }
  0xf9   : > { %1306 = vmatpush1.bf16.msra.mxu0 %v12457_v10 }
  0xfa   : > { %12156 = vmatpush1.bf16.msra.mxu1 %v12457_v10  ;;  %1307 = vmatprep.subr.bf16.mxu0 %v12462_v11 }
  0xfb   : > { %12141 = vmatprep.subr.bf16.mxu1 %v12462_v11  ;;  %v558_v11 = vld [vmem:[#allocation2 + $0x20] sm:$0xff] }
  0xfc   : > { %1240 = vmatmul.mubr.bf16.gmra.mxu0 %v12497_v12 }
  0xfd   : > { %1293 = vmatmul.mubr.bf16.gmra.mxu1 %v12498_v13  ;;  %1308 = vmatpush1.bf16.msra.mxu0 %v12460_v14 }
  0xfe   : > { %12157 = vmatpush1.bf16.msra.mxu1 %v12460_v14  ;;  %1309 = vmatprep.subr.bf16.mxu0 %v12465_v15 }
  0xff   : > { %12142 = vmatprep.subr.bf16.mxu1 %v12465_v15  ;;  %1335 = vmatprep.mubr.bf16.mxu0 %v12510_v16 }
 0x100   : > { %1345 = vmatprep.mubr.bf16.mxu1 %v12513_v17 }
 0x101   : > { %1310 = vmatpush1.bf16.msra.mxu0 %v12463_v18 }
 0x102   : > { %12158 = vmatpush1.bf16.msra.mxu1 %v12463_v18  ;;  %1311 = vmatprep.subr.bf16.mxu0 %v12468_v19 }
 0x103   : > { %12143 = vmatprep.subr.bf16.mxu1 %v12468_v19  ;;  %v555_v19 = vld [vmem:[#allocation2 + $0x18] sm:$0xff] }
 0x105   : > { %1312 = vmatpush1.bf16.msra.mxu0 %v12466_v20 }
 0x106   : > { %12159 = vmatpush1.bf16.msra.mxu1 %v12466_v20  ;;  %1313 = vmatprep.subr.bf16.mxu0 %v12471_v21 }
 0x107   : > { %12144 = vmatprep.subr.bf16.mxu1 %v12471_v21  ;;  %v559_v21 = vld [vmem:[#allocation2 + $0x28] sm:$0xff] }
 0x109   : > { %1314 = vmatpush1.bf16.msra.mxu0 %v12469_v22 }
 0x10a   : > { %12160 = vmatpush1.bf16.msra.mxu1 %v12469_v22  ;;  %1315 = vmatprep.subr.bf16.mxu0 %v12474_v23 }
 0x10b   : > { %12145 = vmatprep.subr.bf16.mxu1 %v12474_v23 }
 0x10d   : > { %1316 = vmatpush1.bf16.msra.mxu0 %v12472_v24 }
 0x10e   : > { %12161 = vmatpush1.bf16.msra.mxu1 %v12472_v24  ;;  %1317 = vmatprep.subr.bf16.mxu0 %v12477_v25 }
 0x10f   : > { %12146 = vmatprep.subr.bf16.mxu1 %v12477_v25 }
 0x111   : > { %1318 = vmatpush1.bf16.msra.mxu0 %v12475_v26 }
 0x112   : > { %12162 = vmatpush1.bf16.msra.mxu1 %v12475_v26  ;;  %1319 = vmatprep.subr.bf16.mxu0 %v12480_v27 }
 0x113   : > { %12147 = vmatprep.subr.bf16.mxu1 %v12480_v27  ;;  %v556_v27 = vld [vmem:[#allocation2 + $0x10] sm:$0xff] }
 0x115   : > { %1320 = vmatpush2.bf16.msra.mxu0 %v12478_v28 }
 0x116   : > { %12163 = vmatpush2.bf16.msra.mxu1 %v12478_v28  ;;  %1321 = vmatprep.subr.bf16.mxu0 %v12483_v29 }
 0x117   : > { %12148 = vmatprep.subr.bf16.mxu1 %v12483_v29  ;;  %v560_v29 = vld [vmem:[#allocation2 + $0x38] sm:$0xff] }
 0x119   : > { %1322 = vmatpush2.bf16.msra.mxu0 %v12481_v30 }
 0x11a   : > { %12164 = vmatpush2.bf16.msra.mxu1 %v12481_v30  ;;  %1323 = vmatprep.subr.bf16.mxu0 %v12486_v31 }
 0x11b   : > { %12149 = vmatprep.subr.bf16.mxu1 %v12486_v31 }
 0x11d   : > { %1324 = vmatpush2.bf16.msra.mxu0 %v12484_v32 }
 0x11e   : > { %12165 = vmatpush2.bf16.msra.mxu1 %v12484_v32  ;;  %1325 = vmatprep.subr.bf16.mxu0 %v12489_v33 }
 0x11f   : > { %12150 = vmatprep.subr.bf16.mxu1 %v12489_v33 }
 0x121   : > { %1326 = vmatpush2.bf16.msra.mxu0 %v12487_v34 }
 0x122   : > { %12166 = vmatpush2.bf16.msra.mxu1 %v12487_v34  ;;  %1327 = vmatprep.subr.bf16.mxu0 %v12492_v35 }
 0x123   : > { %12151 = vmatprep.subr.bf16.mxu1 %v12492_v35 }
 0x125   : > { %1328 = vmatpush2.bf16.msra.mxu0 %v12490_v36 }
 0x126   : > { %12167 = vmatpush2.bf16.msra.mxu1 %v12490_v36  ;;  %1329 = vmatprep.subr.bf16.mxu0 %v12501_v37 }
 0x127   : > { %12152 = vmatprep.subr.bf16.mxu1 %v12501_v37 }
 0x129   : > { %1330 = vmatpush2.bf16.msra.mxu0 %v12499_v38 }
 0x12a   : > { %12168 = vmatpush2.bf16.msra.mxu1 %v12499_v38  ;;  %1331 = vmatprep.subr.bf16.mxu0 %v12504_v39 }
 0x12b   : > { %12153 = vmatprep.subr.bf16.mxu1 %v12504_v39 }
 0x12d   : > { %1332 = vmatpush2.bf16.msra.mxu0 %v12502_v40 }
 0x12e   : > { %12169 = vmatpush2.bf16.msra.mxu1 %v12502_v40  ;;  %1333 = vmatprep.subr.bf16.mxu0 %v12507_v41 }
 0x12f   : > { %12154 = vmatprep.subr.bf16.mxu1 %v12507_v41 }
 0x131   : > { %1334 = vmatpush2.bf16.msra.mxu0 %v12505_v42 }
 0x132   : > { %12170 = vmatpush2.bf16.msra.mxu1 %v12505_v42 }
 0x134   : > { %1336 = vmatmul.mubr.bf16.vlgmr.msra.gmra.mxu0 %v12508_v43 }
 0x135   : > { %1346 = vmatmul.mubr.bf16.vlgmr.msra.gmra.mxu1 %v12511_v44 }
 0x1b4   : > { %v1231_v45 = vpop.f32.mrf.mxu0 }
 0x1b5   : > { %v1284_v46 = vpop.f32.mrf.mxu1 }
 0x1b6   : > { %v1233_v47 = vpop.f32.mrf.mxu0  ;;  %v1285_v61 = vadd.f32 %v1284_v46, %v1231_v45 }
 0x1b7   : > { %v1286_v48 = vpop.f32.mrf.mxu1 }
 0x1b8   : > { %v1235_v49 = vpop.f32.mrf.mxu0  ;;  %v1287_v3 = vadd.f32 %v1286_v48, %v1233_v47 }
 0x1b9   : > { %v1288_v50 = vpop.f32.mrf.mxu1 }
 0x1ba   : > { %v1237_v51 = vpop.f32.mrf.mxu0  ;;  %v1289_v7 = vadd.f32 %v1288_v50, %v1235_v49 }
 0x1bb   : > { %v1290_v52 = vpop.f32.mrf.mxu1 }
 0x1bc   : > { %v1241_v53 = vpop.f32.mrf.mxu0  ;;  %v1291_v17 = vadd.f32 %v1290_v52, %v1237_v51 }
 0x1bd   : > { %v1294_v54 = vpop.f32.mrf.mxu1 }
 0x1be   : > { %v1243_v55 = vpop.f32.mrf.mxu0  ;;  %v1295_v62 = vadd.f32 %v1294_v54, %v1241_v53 }
 0x1bf   : > { %v1296_v56 = vpop.f32.mrf.mxu1 }
 0x1c0   : > { %v1245_v57 = vpop.f32.mrf.mxu0  ;;  %v1297_v4 = vadd.f32 %v1296_v56, %v1243_v55 }
 0x1c1   : > { %v1298_v58 = vpop.f32.mrf.mxu1 }
 0x1c2   : > { %v1247_v59 = vpop.f32.mrf.mxu0  ;;  %v1299_v8 = vadd.f32 %v1298_v58, %v1245_v57 }
 0x1c3   : > { %v1300_v60 = vpop.f32.mrf.mxu1 }
 0x1c4   : > { %v1301_v18 = vadd.f32 %v1300_v60, %v1247_v59 }
 0x1f4   : > { %v1337_v0 = vpop.f32.mrf.mxu0 }
 0x1f5   : > { %v1347_v2 = vpop.f32.mrf.mxu1  ;;  %v1338_v5 = vadd.f32 %v1337_v0, %v1285_v61 }
 0x1f6   : > { %v1348_v6 = vadd.f32 %v1347_v2, %v1295_v62  ;;  %v1339_v10 = vpop.f32.mrf.mxu0 }
 0x1f7   : > { %v1349_v12 = vpop.f32.mrf.mxu1  ;;  %v1356_v13 = vadd.f32 %v1338_v5, %v553_v63  ;;  %v1340_v15 = vadd.f32 %v1339_v10, %v1287_v3 }
 0x1f8   : > { %v1360_v14 = vadd.f32 %v1348_v6, %v557_v1  ;;  %v1350_v16 = vadd.f32 %v1349_v12, %v1297_v4  ;;  %v1341_v20 = vpop.f32.mrf.mxu0 }
 0x1f9   : > { %v1351_v22 = vpop.f32.mrf.mxu1  ;;  %1364 = vst [vmem:[#allocation2 + $0x30] sm:$0xff] %v1356_v13  ;;  %v1357_v23 = vadd.f32 %v1340_v15, %v554_v9  ;;  %v1342_v25 = vadd.f32 %v1341_v20, %v1289_v7 }
 0x1fa   : > { %1368 = vst [vmem:[#allocation2 + $0x8] sm:$0xff] %v1360_v14  ;;  %v1361_v24 = vadd.f32 %v1350_v16, %v558_v11  ;;  %v1352_v26 = vadd.f32 %v1351_v22, %v1299_v8  ;;  %v1343_v28 = vpop.f32.mrf.mxu0 }
 0x1fb   : > { %v1353_v30 = vpop.f32.mrf.mxu1  ;;  %1365 = vst [vmem:[#allocation2] sm:$0xff] %v1357_v23  ;;  %v1358_v31 = vadd.f32 %v1342_v25, %v555_v19  ;;  %v1344_v33 = vadd.f32 %v1343_v28, %v1291_v17 }
 0x1fc   : > { %1369 = vst [vmem:[#allocation2 + $0x20] sm:$0xff] %v1361_v24  ;;  %v1362_v32 = vadd.f32 %v1352_v26, %v559_v21  ;;  %v1354_v34 = vadd.f32 %v1353_v30, %v1301_v18  ;;  %1377 = sbr.rel (%p13788_p0) target bundleno = 559 (0x22f), region = 108 }
 0x1fd   : > { %1366 = vst [vmem:[#allocation2 + $0x18] sm:$0xff] %v1358_v31  ;;  %v1359_v35 = vadd.f32 %v1344_v33, %v556_v27 }
 0x1fe   : > { %1370 = vst [vmem:[#allocation2 + $0x28] sm:$0xff] %v1362_v32  ;;  %v1363_v36 = vadd.f32 %v1354_v34, %v560_v29 }
 0x1ff   : > { %1367 = vst [vmem:[#allocation2 + $0x10] sm:$0xff] %v1359_v35 }
 0x200   : > { %1371 = vst [vmem:[#allocation2 + $0x38] sm:$0xff] %v1363_v36 }
 0x201   : > { %v1386_v37 = vlaneseq  ;;  %v1378_v39 = vld [vmem:[#allocation2 + $0x30] sm:$0xff]  ;;  %v1382_v46 = vld [vmem:[#allocation2 + $0x8] sm:$0xff]  ;;  %v13378_v9 = vmov 1966171168   ;;  %v13379_v22 = vmov 1935823168  }
 0x202   : > { %v1379_v45 = vld [vmem:[#allocation2] sm:$0xff]  ;;  %v1427_v62 = vld [vmem:[#allocation7] sm:$0x77]  ;;  %v1465_v10 = vunpack.c.l.s4 %v13378_v9  ;;  %v1494_v23 = vunpack.c.l.s4 %v13379_v22  ;;  %vm1526_vm1 = vcmask 1041409  }
 0x203   : > { %v13794_v38 = vshrl.u32 %v1386_v37, 7  ;;  %v1383_v47 = vld [vmem:[#allocation2 + $0x20] sm:$0xff] }
 0x204   : > { %v1380_v40 = vld [vmem:[#allocation2 + $0x18] sm:$0xff]  ;;  %v1466_v21 = vunpack.c.0.s8 %v1465_v10  ;;  %v1495_v33 = vunpack.c.0.s8 %v1494_v23 }
 0x205   : > { %v1384_v42 = vld [vmem:[#allocation2 + $0x28] sm:$0xff]  ;;  %v1388_v44 = vadd.s32 8, %v13794_v38  ;;  %v1431_v56 = vsub.s32 0, %v13794_v38  ;;  %v1435_v57 = vsub.s32 4, %v13794_v38 }
 0x206   : > { %v1381_v41 = vld [vmem:[#allocation2 + $0x10] sm:$0xff]  ;;  %v1469_v32 = vsub.s32 %v1466_v21, %v13794_v38 }
 0x207   : > { %v1385_v43 = vld [vmem:[#allocation2 + $0x38] sm:$0xff]  ;;  %vm1390_vm0 = vcmp.lt.s32.totalorder %v1388_v44, 14  ;;  %v1432_v3 = vrot.slane %v1427_v62, %v1431_v56  ;;  %v1436_v4 = vrot.slane %v1427_v62, %v1435_v57 }
 0x208   : > { %v1393_v48 = vsel %vm1390_vm0, %v1380_v40, -inf  ;;  %v1394_v49 = vsel %vm1390_vm0, %v1381_v41, -inf  ;;  %v1397_v50 = vsel %vm1390_vm0, %v1384_v42, -inf  ;;  %v1398_v51 = vsel %vm1390_vm0, %v1385_v43, -inf }
 0x209   : > { %v1399_v52 = vmax.f32 %v1378_v39, %v1393_v48  ;;  %v1406_v53 = vmax.f32 %v1379_v45, %v1394_v49  ;;  %v1413_v54 = vmax.f32 %v1382_v46, %v1397_v50  ;;  %v1420_v55 = vmax.f32 %v1383_v47, %v1398_v51 }
 0x20a   : > { %v1442_v15 = vrot.slane %v1432_v3, %v1431_v56  ;;  %v1446_v16 = vrot.slane %v1436_v4, %v1431_v56  ;;  %v1498_v43 = vsub.s32 %v1495_v33, %v13794_v38 }
 0x20b   : > { %v1400_v58 = vrot.slane %v1399_v52, 4  ;;  %v1407_v59 = vrot.slane %v1406_v53, 4  ;;  %v1414_v60 = vrot.slane %v1413_v54, 4  ;;  %v1421_v61 = vrot.slane %v1420_v55, 4 }
 0x20d   : > { %v1401_v63 = vmax.f32 %v1399_v52, %v1400_v58  ;;  %v1408_v0 = vmax.f32 %v1406_v53, %v1407_v59  ;;  %v1415_v1 = vmax.f32 %v1413_v54, %v1414_v60  ;;  %v1422_v2 = vmax.f32 %v1420_v55, %v1421_v61 }
 0x20f   : > { %v1402_v5 = vrot.slane %v1401_v63, 2  ;;  %v1409_v6 = vrot.slane %v1408_v0, 2  ;;  %v1416_v7 = vrot.slane %v1415_v1, 2  ;;  %v1423_v8 = vrot.slane %v1422_v2, 2 }
 0x211   : > { %v1403_v11 = vmax.f32 %v1401_v63, %v1402_v5  ;;  %v1410_v12 = vmax.f32 %v1408_v0, %v1409_v6  ;;  %v1417_v13 = vmax.f32 %v1415_v1, %v1416_v7  ;;  %v1424_v14 = vmax.f32 %v1422_v2, %v1423_v8 }
 0x213   : > { %v1404_v17 = vrot.slane %v1403_v11, 1  ;;  %v1411_v18 = vrot.slane %v1410_v12, 1  ;;  %v1418_v19 = vrot.slane %v1417_v13, 1  ;;  %v1425_v20 = vrot.slane %v1424_v14, 1 }
 0x215   : > { %v1405_v24 = vmax.f32 %v1403_v11, %v1404_v17  ;;  %v1412_v25 = vmax.f32 %v1410_v12, %v1411_v18  ;;  %v1419_v26 = vmax.f32 %v1417_v13, %v1418_v19  ;;  %v1426_v27 = vmax.f32 %v1424_v14, %v1425_v20 }
 0x217   : > { %v1447_v28 = vadd.f32 %v1442_v15, %v1405_v24  ;;  %v1448_v29 = vadd.f32 %v1446_v16, %v1412_v25  ;;  %v1449_v30 = vadd.f32 %v1442_v15, %v1419_v26  ;;  %v1450_v31 = vadd.f32 %v1446_v16, %v1426_v27 }
 0x219   : > { %v1451_v34 = vmax.f32 %v1447_v28, 0.0  ;;  %v1452_v35 = vmax.f32 %v1448_v29, 0.0  ;;  %v1453_v36 = vmax.f32 %v1449_v30, 0.0  ;;  %v1454_v37 = vmax.f32 %v1450_v31, 0.0 }
 0x21b   : > { %v10988_v39 = vpack.c.bf16 %v1452_v35, %v1451_v34  ;;  %v10989_v40 = vpack.c.bf16 %v1454_v37, %v1453_v36 }
 0x21d   : > { %v1470_v41 = vrot.slane %v10988_v39, %v1469_v32  ;;  %v1485_v42 = vrot.slane %v10989_v40, %v1469_v32 }
 0x21f   : > { %v1477_v44 = vrot.slane %v1470_v41, %v1469_v32  ;;  %v1492_v45 = vrot.slane %v1485_v42, %v1469_v32 }
 0x221   : > { %v1499_v46 = vrot.slane %v1477_v44, %v1498_v43  ;;  %v1513_v47 = vrot.slane %v1492_v45, %v1498_v43 }
 0x223   : > { %v1506_v48 = vrot.slane %v1499_v46, %v1498_v43  ;;  %v1520_v49 = vrot.slane %v1513_v47, %v1498_v43 }
 0x225   : > { %v1521_v50 = vunpack.c.l.b16 %v1506_v48  ;;  %v1522_v51 = vunpack.c.h.b16 %v1506_v48  ;;  %v1523_v52 = vunpack.c.l.b16 %v1520_v49  ;;  %v1524_v53 = vunpack.c.h.b16 %v1520_v49 }
 0x227   : > { %v1525_v54 = vrot.slane %v1523_v52, 7  ;;  %v1528_v55 = vrot.slane %v1524_v53, 7 }
 0x229   : > { %v1527_v56 = vsel %vm1526_vm1, %v1525_v54, %v1521_v50  ;;  %v1529_v57 = vsel %vm1526_vm1, %v1528_v55, %v1522_v51 }
 0x22a   : > { %v1530_v58 = vpack.c.b16 %v1529_v57, %v1527_v56 }
 0x22c   : > { %v1537_v59 = vrot.slane %v1530_v58, %v1469_v32 }
 0x22e   : > { %10990 = vst.sshfl [vmem:[#allocation3] sm:$0x5 pattern:$0x73625140] %v1537_v59 }
 0x22f PF: > { %p1547_p2 = scmp.eq.s32.totalorder %s13348_s21, 1 }
 0x231   : > { %p1548_p5 = pnand %p1547_p2, %p1372_p6 }
 0x233   : > { %1551 = sbr.rel (%p1548_p5) target bundleno = 614 (0x266), region = 112 }
 0x238   : > { %v1560_v38 = vlaneseq  ;;  %v1552_v61 = vld [vmem:[#allocation2 + $0x30] sm:$0xff]  ;;  %v1554_v62 = vld [vmem:[#allocation2 + $0x18] sm:$0xff]  ;;  %v1558_v0 = vld [vmem:[#allocation2 + $0x28] sm:$0xff]  ;;  %v13380_v31 = vmov 1966171168   ;;  %vm1700_vm3 = vcmask 1041409  }
 0x239   : > { %v1555_v63 = vld [vmem:[#allocation2 + $0x10] sm:$0xff]  ;;  %v1559_v1 = vld [vmem:[#allocation2 + $0x38] sm:$0xff]  ;;  %v1553_v3 = vld [vmem:[#allocation2] sm:$0xff]  ;;  %v1639_v32 = vunpack.c.l.s4 %v13380_v31  ;;  %v13381_v45 = vmov 1935823168  }
 0x23a   : > { %v13806_v60 = vshrl.u32 %v1560_v38, 7  ;;  %v1556_v4 = vld [vmem:[#allocation2 + $0x8] sm:$0xff]  ;;  %v1557_v5 = vld [vmem:[#allocation2 + $0x20] sm:$0xff]  ;;  %v1601_v20 = vld [vmem:[#allocation7 + $0x8] sm:$0x77]  ;;  %v1668_v46 = vunpack.c.l.s4 %v13381_v45 }
 0x23b   : > { %v1640_v44 = vunpack.c.0.s8 %v1639_v32 }
 0x23c   : > { %v1562_v2 = vadd.s32 8, %v13806_v60  ;;  %v1605_v14 = vsub.s32 0, %v13806_v60  ;;  %v1609_v15 = vsub.s32 4, %v13806_v60  ;;  %v1669_v56 = vunpack.c.0.s8 %v1668_v46 }
 0x23d   : > { %v1643_v55 = vsub.s32 %v1640_v44, %v13806_v60 }
 0x23e   : > { %vm1564_vm2 = vcmp.lt.s32.totalorder %v1562_v2, 14  ;;  %v1606_v25 = vrot.slane %v1601_v20, %v1605_v14  ;;  %v1610_v26 = vrot.slane %v1601_v20, %v1609_v15 }
 0x23f   : > { %v1567_v6 = vsel %vm1564_vm2, %v1554_v62, -inf  ;;  %v1568_v7 = vsel %vm1564_vm2, %v1555_v63, -inf  ;;  %v1571_v8 = vsel %vm1564_vm2, %v1558_v0, -inf  ;;  %v1572_v9 = vsel %vm1564_vm2, %v1559_v1, -inf }
 0x240   : > { %v1573_v10 = vmax.f32 %v1552_v61, %v1567_v6  ;;  %v1580_v11 = vmax.f32 %v1553_v3, %v1568_v7  ;;  %v1587_v12 = vmax.f32 %v1556_v4, %v1571_v8  ;;  %v1594_v13 = vmax.f32 %v1557_v5, %v1572_v9 }
 0x241   : > { %v1616_v37 = vrot.slane %v1606_v25, %v1605_v14  ;;  %v1620_v39 = vrot.slane %v1610_v26, %v1605_v14  ;;  %v1672_v1 = vsub.s32 %v1669_v56, %v13806_v60 }
 0x242   : > { %v1574_v16 = vrot.slane %v1573_v10, 4  ;;  %v1581_v17 = vrot.slane %v1580_v11, 4  ;;  %v1588_v18 = vrot.slane %v1587_v12, 4  ;;  %v1595_v19 = vrot.slane %v1594_v13, 4 }
 0x244   : > { %v1575_v21 = vmax.f32 %v1573_v10, %v1574_v16  ;;  %v1582_v22 = vmax.f32 %v1580_v11, %v1581_v17  ;;  %v1589_v23 = vmax.f32 %v1587_v12, %v1588_v18  ;;  %v1596_v24 = vmax.f32 %v1594_v13, %v1595_v19 }
 0x246   : > { %v1576_v27 = vrot.slane %v1575_v21, 2  ;;  %v1583_v28 = vrot.slane %v1582_v22, 2  ;;  %v1590_v29 = vrot.slane %v1589_v23, 2  ;;  %v1597_v30 = vrot.slane %v1596_v24, 2 }
 0x248   : > { %v1577_v33 = vmax.f32 %v1575_v21, %v1576_v27  ;;  %v1584_v34 = vmax.f32 %v1582_v22, %v1583_v28  ;;  %v1591_v35 = vmax.f32 %v1589_v23, %v1590_v29  ;;  %v1598_v36 = vmax.f32 %v1596_v24, %v1597_v30 }
 0x24a   : > { %v1578_v40 = vrot.slane %v1577_v33, 1  ;;  %v1585_v41 = vrot.slane %v1584_v34, 1  ;;  %v1592_v42 = vrot.slane %v1591_v35, 1  ;;  %v1599_v43 = vrot.slane %v1598_v36, 1 }
 0x24c   : > { %v1579_v47 = vmax.f32 %v1577_v33, %v1578_v40  ;;  %v1586_v48 = vmax.f32 %v1584_v34, %v1585_v41  ;;  %v1593_v49 = vmax.f32 %v1591_v35, %v1592_v42  ;;  %v1600_v50 = vmax.f32 %v1598_v36, %v1599_v43 }
 0x24e   : > { %v1621_v51 = vadd.f32 %v1616_v37, %v1579_v47  ;;  %v1622_v52 = vadd.f32 %v1620_v39, %v1586_v48  ;;  %v1623_v53 = vadd.f32 %v1616_v37, %v1593_v49  ;;  %v1624_v54 = vadd.f32 %v1620_v39, %v1600_v50 }
 0x250   : > { %v1625_v57 = vmax.f32 %v1621_v51, 0.0  ;;  %v1626_v58 = vmax.f32 %v1622_v52, 0.0  ;;  %v1627_v59 = vmax.f32 %v1623_v53, 0.0  ;;  %v1628_v38 = vmax.f32 %v1624_v54, 0.0 }
 0x252   : > { %v10991_v61 = vpack.c.bf16 %v1626_v58, %v1625_v57  ;;  %v10992_v62 = vpack.c.bf16 %v1628_v38, %v1627_v59 }
 0x254   : > { %v1644_v63 = vrot.slane %v10991_v61, %v1643_v55  ;;  %v1659_v0 = vrot.slane %v10992_v62, %v1643_v55 }
 0x256   : > { %v1651_v2 = vrot.slane %v1644_v63, %v1643_v55  ;;  %v1666_v3 = vrot.slane %v1659_v0, %v1643_v55 }
 0x258   : > { %v1673_v4 = vrot.slane %v1651_v2, %v1672_v1  ;;  %v1687_v5 = vrot.slane %v1666_v3, %v1672_v1 }
 0x25a   : > { %v1680_v6 = vrot.slane %v1673_v4, %v1672_v1  ;;  %v1694_v7 = vrot.slane %v1687_v5, %v1672_v1 }
 0x25c   : > { %v1695_v8 = vunpack.c.l.b16 %v1680_v6  ;;  %v1696_v9 = vunpack.c.h.b16 %v1680_v6  ;;  %v1697_v10 = vunpack.c.l.b16 %v1694_v7  ;;  %v1698_v11 = vunpack.c.h.b16 %v1694_v7 }
 0x25e   : > { %v1699_v12 = vrot.slane %v1697_v10, 7  ;;  %v1702_v13 = vrot.slane %v1698_v11, 7 }
 0x260   : > { %v1701_v14 = vsel %vm1700_vm3, %v1699_v12, %v1695_v8  ;;  %v1703_v15 = vsel %vm1700_vm3, %v1702_v13, %v1696_v9 }
 0x261   : > { %v1704_v16 = vpack.c.b16 %v1703_v15, %v1701_v14 }
 0x263   : > { %v1711_v17 = vrot.slane %v1704_v16, %v1643_v55 }
 0x265   : > { %10993 = vst.sshfl [vmem:[#allocation3 + $0x2] sm:$0x5 pattern:$0x73625140] %v1711_v17 }
 0x266 PF: > { %p1721_p4 = scmp.eq.s32.totalorder %s13344_s20, 6 }
 0x268   : > { %p1722_p7 = pnand %p1721_p4, %p1373_p1 }
 0x26a   : > { %1725 = sbr.rel (%p1722_p7) target bundleno = 669 (0x29d), region = 116 }
 0x26f   : > { %v1734_v60 = vlaneseq  ;;  %v1726_v19 = vld [vmem:[#allocation2 + $0x30] sm:$0xff]  ;;  %v1728_v20 = vld [vmem:[#allocation2 + $0x18] sm:$0xff]  ;;  %v1732_v22 = vld [vmem:[#allocation2 + $0x28] sm:$0xff]  ;;  %v13382_v54 = vmov 1966171168   ;;  %vm1874_vm5 = vcmask 1041409  }
 0x270   : > { %v1729_v21 = vld [vmem:[#allocation2 + $0x10] sm:$0xff]  ;;  %v1733_v23 = vld [vmem:[#allocation2 + $0x38] sm:$0xff]  ;;  %v1727_v25 = vld [vmem:[#allocation2] sm:$0xff]  ;;  %v1813_v55 = vunpack.c.l.s4 %v13382_v54  ;;  %v13383_v3 = vmov 1935823168  }
 0x271   : > { %v13818_v18 = vshrl.u32 %v1734_v60, 7  ;;  %v1730_v26 = vld [vmem:[#allocation2 + $0x8] sm:$0xff]  ;;  %v1731_v27 = vld [vmem:[#allocation2 + $0x20] sm:$0xff]  ;;  %v1842_v4 = vunpack.c.l.s4 %v13383_v3 }
 0x272   : > { %v1775_v43 = vld [vmem:[#allocation7] sm:$0x77]  ;;  %v1814_v2 = vunpack.c.0.s8 %v1813_v55 }
 0x273   : > { %v1736_v24 = vadd.s32 8, %v13818_v18  ;;  %v1779_v36 = vsub.s32 1, %v13818_v18  ;;  %v1783_v37 = vsub.s32 5, %v13818_v18  ;;  %v1843_v14 = vunpack.c.0.s8 %v1842_v4 }
 0x274   : > { %v1817_v13 = vsub.s32 %v1814_v2, %v13818_v18 }
 0x275   : > { %vm1738_vm4 = vcmp.lt.s32.totalorder %v1736_v24, 13  ;;  %v1780_v48 = vrot.slane %v1775_v43, %v1779_v36  ;;  %v1784_v49 = vrot.slane %v1775_v43, %v1783_v37 }
 0x276   : > { %v1741_v28 = vsel %vm1738_vm4, %v1728_v20, -inf  ;;  %v1742_v29 = vsel %vm1738_vm4, %v1729_v21, -inf  ;;  %v1745_v30 = vsel %vm1738_vm4, %v1732_v22, -inf  ;;  %v1746_v31 = vsel %vm1738_vm4, %v1733_v23, -inf }
 0x277   : > { %v1747_v32 = vmax.f32 %v1726_v19, %v1741_v28  ;;  %v1754_v33 = vmax.f32 %v1727_v25, %v1742_v29  ;;  %v1761_v34 = vmax.f32 %v1730_v26, %v1745_v30  ;;  %v1768_v35 = vmax.f32 %v1731_v27, %v1746_v31 }
 0x278   : > { %v1790_v38 = vrot.slane %v1780_v48, %v1779_v36  ;;  %v1794_v61 = vrot.slane %v1784_v49, %v1779_v36  ;;  %v1846_v23 = vsub.s32 %v1843_v14, %v13818_v18 }
 0x279   : > { %v1748_v39 = vrot.slane %v1747_v32, 4  ;;  %v1755_v40 = vrot.slane %v1754_v33, 4  ;;  %v1762_v41 = vrot.slane %v1761_v34, 4  ;;  %v1769_v42 = vrot.slane %v1768_v35, 4 }
 0x27b   : > { %v1749_v44 = vmax.f32 %v1747_v32, %v1748_v39  ;;  %v1756_v45 = vmax.f32 %v1754_v33, %v1755_v40  ;;  %v1763_v46 = vmax.f32 %v1761_v34, %v1762_v41  ;;  %v1770_v47 = vmax.f32 %v1768_v35, %v1769_v42 }
 0x27d   : > { %v1750_v50 = vrot.slane %v1749_v44, 2  ;;  %v1757_v51 = vrot.slane %v1756_v45, 2  ;;  %v1764_v52 = vrot.slane %v1763_v46, 2  ;;  %v1771_v53 = vrot.slane %v1770_v47, 2 }
 0x27f   : > { %v1751_v56 = vmax.f32 %v1749_v44, %v1750_v50  ;;  %v1758_v57 = vmax.f32 %v1756_v45, %v1757_v51  ;;  %v1765_v58 = vmax.f32 %v1763_v46, %v1764_v52  ;;  %v1772_v59 = vmax.f32 %v1770_v47, %v1771_v53 }
 0x281   : > { %v1752_v62 = vrot.slane %v1751_v56, 1  ;;  %v1759_v63 = vrot.slane %v1758_v57, 1  ;;  %v1766_v0 = vrot.slane %v1765_v58, 1  ;;  %v1773_v1 = vrot.slane %v1772_v59, 1 }
 0x283   : > { %v1753_v5 = vmax.f32 %v1751_v56, %v1752_v62  ;;  %v1760_v6 = vmax.f32 %v1758_v57, %v1759_v63  ;;  %v1767_v7 = vmax.f32 %v1765_v58, %v1766_v0  ;;  %v1774_v8 = vmax.f32 %v1772_v59, %v1773_v1 }
 0x285   : > { %v1795_v9 = vadd.f32 %v1790_v38, %v1753_v5  ;;  %v1796_v10 = vadd.f32 %v1794_v61, %v1760_v6  ;;  %v1797_v11 = vadd.f32 %v1790_v38, %v1767_v7  ;;  %v1798_v12 = vadd.f32 %v1794_v61, %v1774_v8 }
 0x287   : > { %v1799_v15 = vmax.f32 %v1795_v9, 0.0  ;;  %v1800_v16 = vmax.f32 %v1796_v10, 0.0  ;;  %v1801_v17 = vmax.f32 %v1797_v11, 0.0  ;;  %v1802_v60 = vmax.f32 %v1798_v12, 0.0 }
 0x289   : > { %v10994_v19 = vpack.c.bf16 %v1800_v16, %v1799_v15  ;;  %v10995_v20 = vpack.c.bf16 %v1802_v60, %v1801_v17 }
 0x28b   : > { %v1818_v21 = vrot.slane %v10994_v19, %v1817_v13  ;;  %v1833_v22 = vrot.slane %v10995_v20, %v1817_v13 }
 0x28d   : > { %v1825_v24 = vrot.slane %v1818_v21, %v1817_v13  ;;  %v1840_v25 = vrot.slane %v1833_v22, %v1817_v13 }
 0x28f   : > { %v1847_v26 = vrot.slane %v1825_v24, %v1846_v23  ;;  %v1861_v27 = vrot.slane %v1840_v25, %v1846_v23 }
 0x291   : > { %v1854_v28 = vrot.slane %v1847_v26, %v1846_v23  ;;  %v1868_v29 = vrot.slane %v1861_v27, %v1846_v23 }
 0x293   : > { %v1869_v30 = vunpack.c.l.b16 %v1854_v28  ;;  %v1870_v31 = vunpack.c.h.b16 %v1854_v28  ;;  %v1871_v32 = vunpack.c.l.b16 %v1868_v29  ;;  %v1872_v33 = vunpack.c.h.b16 %v1868_v29 }
 0x295   : > { %v1873_v34 = vrot.slane %v1871_v32, 7  ;;  %v1876_v35 = vrot.slane %v1872_v33, 7 }
 0x297   : > { %v1875_v36 = vsel %vm1874_vm5, %v1873_v34, %v1869_v30  ;;  %v1877_v37 = vsel %vm1874_vm5, %v1876_v35, %v1870_v31 }
 0x298   : > { %v1878_v39 = vpack.c.b16 %v1877_v37, %v1875_v36 }
 0x29a   : > { %v1885_v40 = vrot.slane %v1878_v39, %v1817_v13 }
 0x29c   : > { %10996 = vst.sshfl [vmem:[#allocation3 + $0x4] sm:$0x5 pattern:$0x73625140] %v1885_v40 }
 0x29d PF: > { %p1895_p8 = pnand %p1721_p4, %p1547_p2 }
 0x29f   : > { %1898 = sbr.rel (%p1895_p8) target bundleno = 722 (0x2d2), region = 120 }
 0x2a4   : > { %v1907_v18 = vlaneseq  ;;  %v1899_v42 = vld [vmem:[#allocation2 + $0x30] sm:$0xff]  ;;  %v1901_v43 = vld [vmem:[#allocation2 + $0x18] sm:$0xff]  ;;  %v1905_v45 = vld [vmem:[#allocation2 + $0x28] sm:$0xff]  ;;  %v13384_v12 = vmov 1966171168   ;;  %vm2047_vm7 = vcmask 1041409  }
 0x2a5   : > { %v1902_v44 = vld [vmem:[#allocation2 + $0x10] sm:$0xff]  ;;  %v1906_v46 = vld [vmem:[#allocation2 + $0x38] sm:$0xff]  ;;  %v1900_v48 = vld [vmem:[#allocation2] sm:$0xff]  ;;  %v1986_v13 = vunpack.c.l.s4 %v13384_v12  ;;  %v13385_v25 = vmov 1935823168  }
 0x2a6   : > { %v13829_v41 = vshrl.u32 %v1907_v18, 7  ;;  %v1903_v49 = vld [vmem:[#allocation2 + $0x8] sm:$0xff]  ;;  %v1904_v50 = vld [vmem:[#allocation2 + $0x20] sm:$0xff]  ;;  %v1948_v1 = vld [vmem:[#allocation7 + $0x8] sm:$0x77]  ;;  %v2015_v26 = vunpack.c.l.s4 %v13385_v25 }
 0x2a7   : > { %v1987_v24 = vunpack.c.0.s8 %v1986_v13 }
 0x2a8   : > { %v1909_v47 = vadd.s32 8, %v13829_v41  ;;  %v1952_v59 = vsub.s32 1, %v13829_v41  ;;  %v1956_v38 = vsub.s32 5, %v13829_v41  ;;  %v2016_v36 = vunpack.c.0.s8 %v2015_v26 }
 0x2a9   : > { %v1990_v35 = vsub.s32 %v1987_v24, %v13829_v41 }
 0x2aa   : > { %vm1911_vm6 = vcmp.lt.s32.totalorder %v1909_v47, 13  ;;  %v1953_v6 = vrot.slane %v1948_v1, %v1952_v59  ;;  %v1957_v7 = vrot.slane %v1948_v1, %v1956_v38 }
 0x2ab   : > { %v1914_v51 = vsel %vm1911_vm6, %v1901_v43, -inf  ;;  %v1915_v52 = vsel %vm1911_vm6, %v1902_v44, -inf  ;;  %v1918_v53 = vsel %vm1911_vm6, %v1905_v45, -inf  ;;  %v1919_v54 = vsel %vm1911_vm6, %v1906_v46, -inf }
 0x2ac   : > { %v1920_v55 = vmax.f32 %v1899_v42, %v1914_v51  ;;  %v1927_v56 = vmax.f32 %v1900_v48, %v1915_v52  ;;  %v1934_v57 = vmax.f32 %v1903_v49, %v1918_v53  ;;  %v1941_v58 = vmax.f32 %v1904_v50, %v1919_v54 }
 0x2ad   : > { %v1963_v60 = vrot.slane %v1953_v6, %v1952_v59  ;;  %v1967_v19 = vrot.slane %v1957_v7, %v1952_v59  ;;  %v2019_v46 = vsub.s32 %v2016_v36, %v13829_v41 }
 0x2ae   : > { %v1921_v61 = vrot.slane %v1920_v55, 4  ;;  %v1928_v62 = vrot.slane %v1927_v56, 4  ;;  %v1935_v63 = vrot.slane %v1934_v57, 4  ;;  %v1942_v0 = vrot.slane %v1941_v58, 4 }
 0x2b0   : > { %v1922_v2 = vmax.f32 %v1920_v55, %v1921_v61  ;;  %v1929_v3 = vmax.f32 %v1927_v56, %v1928_v62  ;;  %v1936_v4 = vmax.f32 %v1934_v57, %v1935_v63  ;;  %v1943_v5 = vmax.f32 %v1941_v58, %v1942_v0 }
 0x2b2   : > { %v1923_v8 = vrot.slane %v1922_v2, 2  ;;  %v1930_v9 = vrot.slane %v1929_v3, 2  ;;  %v1937_v10 = vrot.slane %v1936_v4, 2  ;;  %v1944_v11 = vrot.slane %v1943_v5, 2 }
 0x2b4   : > { %v1924_v14 = vmax.f32 %v1922_v2, %v1923_v8  ;;  %v1931_v15 = vmax.f32 %v1929_v3, %v1930_v9  ;;  %v1938_v16 = vmax.f32 %v1936_v4, %v1937_v10  ;;  %v1945_v17 = vmax.f32 %v1943_v5, %v1944_v11 }
 0x2b6   : > { %v1925_v20 = vrot.slane %v1924_v14, 1  ;;  %v1932_v21 = vrot.slane %v1931_v15, 1  ;;  %v1939_v22 = vrot.slane %v1938_v16, 1  ;;  %v1946_v23 = vrot.slane %v1945_v17, 1 }
 0x2b8   : > { %v1926_v27 = vmax.f32 %v1924_v14, %v1925_v20  ;;  %v1933_v28 = vmax.f32 %v1931_v15, %v1932_v21  ;;  %v1940_v29 = vmax.f32 %v1938_v16, %v1939_v22  ;;  %v1947_v30 = vmax.f32 %v1945_v17, %v1946_v23 }
 0x2ba   : > { %v1968_v31 = vadd.f32 %v1963_v60, %v1926_v27  ;;  %v1969_v32 = vadd.f32 %v1967_v19, %v1933_v28  ;;  %v1970_v33 = vadd.f32 %v1963_v60, %v1940_v29  ;;  %v1971_v34 = vadd.f32 %v1967_v19, %v1947_v30 }
 0x2bc   : > { %v1972_v37 = vmax.f32 %v1968_v31, 0.0  ;;  %v1973_v39 = vmax.f32 %v1969_v32, 0.0  ;;  %v1974_v40 = vmax.f32 %v1970_v33, 0.0  ;;  %v1975_v18 = vmax.f32 %v1971_v34, 0.0 }
 0x2be   : > { %v10997_v42 = vpack.c.bf16 %v1973_v39, %v1972_v37  ;;  %v10998_v43 = vpack.c.bf16 %v1975_v18, %v1974_v40 }
 0x2c0   : > { %v1991_v44 = vrot.slane %v10997_v42, %v1990_v35  ;;  %v2006_v45 = vrot.slane %v10998_v43, %v1990_v35 }
 0x2c2   : > { %v1998_v47 = vrot.slane %v1991_v44, %v1990_v35  ;;  %v2013_v48 = vrot.slane %v2006_v45, %v1990_v35 }
 0x2c4   : > { %v2020_v49 = vrot.slane %v1998_v47, %v2019_v46  ;;  %v2034_v50 = vrot.slane %v2013_v48, %v2019_v46 }
 0x2c6   : > { %v2027_v51 = vrot.slane %v2020_v49, %v2019_v46  ;;  %v2041_v52 = vrot.slane %v2034_v50, %v2019_v46 }
 0x2c8   : > { %v2042_v53 = vunpack.c.l.b16 %v2027_v51  ;;  %v2043_v54 = vunpack.c.h.b16 %v2027_v51  ;;  %v2044_v55 = vunpack.c.l.b16 %v2041_v52  ;;  %v2045_v56 = vunpack.c.h.b16 %v2041_v52 }
 0x2ca   : > { %v2046_v57 = vrot.slane %v2044_v55, 7  ;;  %v2049_v58 = vrot.slane %v2045_v56, 7 }
 0x2cc   : > { %v2048_v59 = vsel %vm2047_vm7, %v2046_v57, %v2042_v53  ;;  %v2050_v38 = vsel %vm2047_vm7, %v2049_v58, %v2043_v54 }
 0x2cd   : > { %v2051_v61 = vpack.c.b16 %v2050_v38, %v2048_v59 }
 0x2cf   : > { %v2058_v62 = vrot.slane %v2051_v61, %v1990_v35 }
 0x2d1   : > { %10999 = vst.sshfl [vmem:[#allocation3 + $0x6] sm:$0x5 pattern:$0x73625140] %v2058_v62 }
 0x2d2 PF: > { %p2068_p9 = scmp.eq.s32.totalorder %s13344_s20, 11 }
 0x2d4   : > { %p2069_p10 = pnand %p2068_p9, %p1373_p1 }
 0x2d6   : > { %2072 = sbr.rel (%p2069_p10) target bundleno = 777 (0x309), region = 124 }
 0x2db   : > { %v2081_v41 = vlaneseq  ;;  %v2073_v0 = vld [vmem:[#allocation2 + $0x30] sm:$0xff]  ;;  %v2075_v1 = vld [vmem:[#allocation2 + $0x18] sm:$0xff]  ;;  %v2079_v3 = vld [vmem:[#allocation2 + $0x28] sm:$0xff]  ;;  %v13386_v34 = vmov 1966171168   ;;  %vm2221_vm9 = vcmask 1041409  }
 0x2dc   : > { %v2076_v2 = vld [vmem:[#allocation2 + $0x10] sm:$0xff]  ;;  %v2080_v4 = vld [vmem:[#allocation2 + $0x38] sm:$0xff]  ;;  %v2074_v6 = vld [vmem:[#allocation2] sm:$0xff]  ;;  %v2160_v35 = vunpack.c.l.s4 %v13386_v34  ;;  %v13387_v48 = vmov 1935823168  }
 0x2dd   : > { %v13841_v63 = vshrl.u32 %v2081_v41, 7  ;;  %v2077_v7 = vld [vmem:[#allocation2 + $0x8] sm:$0xff]  ;;  %v2078_v8 = vld [vmem:[#allocation2 + $0x20] sm:$0xff]  ;;  %v2189_v49 = vunpack.c.l.s4 %v13387_v48 }
 0x2de   : > { %v2122_v23 = vld [vmem:[#allocation7] sm:$0x77]  ;;  %v2161_v47 = vunpack.c.0.s8 %v2160_v35 }
 0x2df   : > { %v2083_v5 = vadd.s32 8, %v13841_v63  ;;  %v2126_v17 = vsub.s32 2, %v13841_v63  ;;  %v2130_v60 = vsub.s32 6, %v13841_v63  ;;  %v2190_v59 = vunpack.c.0.s8 %v2189_v49 }
 0x2e0   : > { %v2164_v58 = vsub.s32 %v2161_v47, %v13841_v63 }
 0x2e1   : > { %vm2085_vm8 = vcmp.lt.s32.totalorder %v2083_v5, 12  ;;  %v2127_v28 = vrot.slane %v2122_v23, %v2126_v17  ;;  %v2131_v29 = vrot.slane %v2122_v23, %v2130_v60 }
 0x2e2   : > { %v2088_v9 = vsel %vm2085_vm8, %v2075_v1, -inf  ;;  %v2089_v10 = vsel %vm2085_vm8, %v2076_v2, -inf  ;;  %v2092_v11 = vsel %vm2085_vm8, %v2079_v3, -inf  ;;  %v2093_v12 = vsel %vm2085_vm8, %v2080_v4, -inf }
 0x2e3   : > { %v2094_v13 = vmax.f32 %v2073_v0, %v2088_v9  ;;  %v2101_v14 = vmax.f32 %v2074_v6, %v2089_v10  ;;  %v2108_v15 = vmax.f32 %v2077_v7, %v2092_v11  ;;  %v2115_v16 = vmax.f32 %v2078_v8, %v2093_v12 }
 0x2e4   : > { %v2137_v18 = vrot.slane %v2127_v28, %v2126_v17  ;;  %v2141_v42 = vrot.slane %v2131_v29, %v2126_v17  ;;  %v2193_v4 = vsub.s32 %v2190_v59, %v13841_v63 }
 0x2e5   : > { %v2095_v19 = vrot.slane %v2094_v13, 4  ;;  %v2102_v20 = vrot.slane %v2101_v14, 4  ;;  %v2109_v21 = vrot.slane %v2108_v15, 4  ;;  %v2116_v22 = vrot.slane %v2115_v16, 4 }
 0x2e7   : > { %v2096_v24 = vmax.f32 %v2094_v13, %v2095_v19  ;;  %v2103_v25 = vmax.f32 %v2101_v14, %v2102_v20  ;;  %v2110_v26 = vmax.f32 %v2108_v15, %v2109_v21  ;;  %v2117_v27 = vmax.f32 %v2115_v16, %v2116_v22 }
 0x2e9   : > { %v2097_v30 = vrot.slane %v2096_v24, 2  ;;  %v2104_v31 = vrot.slane %v2103_v25, 2  ;;  %v2111_v32 = vrot.slane %v2110_v26, 2  ;;  %v2118_v33 = vrot.slane %v2117_v27, 2 }
 0x2eb   : > { %v2098_v36 = vmax.f32 %v2096_v24, %v2097_v30  ;;  %v2105_v37 = vmax.f32 %v2103_v25, %v2104_v31  ;;  %v2112_v39 = vmax.f32 %v2110_v26, %v2111_v32  ;;  %v2119_v40 = vmax.f32 %v2117_v27, %v2118_v33 }
 0x2ed   : > { %v2099_v43 = vrot.slane %v2098_v36, 1  ;;  %v2106_v44 = vrot.slane %v2105_v37, 1  ;;  %v2113_v45 = vrot.slane %v2112_v39, 1  ;;  %v2120_v46 = vrot.slane %v2119_v40, 1 }
 0x2ef   : > { %v2100_v50 = vmax.f32 %v2098_v36, %v2099_v43  ;;  %v2107_v51 = vmax.f32 %v2105_v37, %v2106_v44  ;;  %v2114_v52 = vmax.f32 %v2112_v39, %v2113_v45  ;;  %v2121_v53 = vmax.f32 %v2119_v40, %v2120_v46 }
 0x2f1   : > { %v2142_v54 = vadd.f32 %v2137_v18, %v2100_v50  ;;  %v2143_v55 = vadd.f32 %v2141_v42, %v2107_v51  ;;  %v2144_v56 = vadd.f32 %v2137_v18, %v2114_v52  ;;  %v2145_v57 = vadd.f32 %v2141_v42, %v2121_v53 }
 0x2f3   : > { %v2146_v38 = vmax.f32 %v2142_v54, 0.0  ;;  %v2147_v61 = vmax.f32 %v2143_v55, 0.0  ;;  %v2148_v62 = vmax.f32 %v2144_v56, 0.0  ;;  %v2149_v41 = vmax.f32 %v2145_v57, 0.0 }
 0x2f5   : > { %v11000_v0 = vpack.c.bf16 %v2147_v61, %v2146_v38  ;;  %v11001_v1 = vpack.c.bf16 %v2149_v41, %v2148_v62 }
 0x2f7   : > { %v2165_v2 = vrot.slane %v11000_v0, %v2164_v58  ;;  %v2180_v3 = vrot.slane %v11001_v1, %v2164_v58 }
 0x2f9   : > { %v2172_v5 = vrot.slane %v2165_v2, %v2164_v58  ;;  %v2187_v6 = vrot.slane %v2180_v3, %v2164_v58 }
 0x2fb   : > { %v2194_v7 = vrot.slane %v2172_v5, %v2193_v4  ;;  %v2208_v8 = vrot.slane %v2187_v6, %v2193_v4 }
 0x2fd   : > { %v2201_v9 = vrot.slane %v2194_v7, %v2193_v4  ;;  %v2215_v10 = vrot.slane %v2208_v8, %v2193_v4 }
 0x2ff   : > { %v2216_v11 = vunpack.c.l.b16 %v2201_v9  ;;  %v2217_v12 = vunpack.c.h.b16 %v2201_v9  ;;  %v2218_v13 = vunpack.c.l.b16 %v2215_v10  ;;  %v2219_v14 = vunpack.c.h.b16 %v2215_v10 }
 0x301   : > { %v2220_v15 = vrot.slane %v2218_v13, 7  ;;  %v2223_v16 = vrot.slane %v2219_v14, 7 }
 0x303   : > { %v2222_v17 = vsel %vm2221_vm9, %v2220_v15, %v2216_v11  ;;  %v2224_v60 = vsel %vm2221_vm9, %v2223_v16, %v2217_v12 }
 0x304   : > { %v2225_v19 = vpack.c.b16 %v2224_v60, %v2222_v17 }
 0x306   : > { %v2232_v20 = vrot.slane %v2225_v19, %v2164_v58 }
 0x308   : > { %11002 = vst.sshfl [vmem:[#allocation3 + $0x8] sm:$0x5 pattern:$0x73625140] %v2232_v20 }
 0x309 PF: > { %p2242_p11 = pnand %p2068_p9, %p1547_p2 }
 0x30b   : > { %2245 = sbr.rel (%p2242_p11) target bundleno = 2495 (0x9bf), region = 128 }
 0x310   : > { %v2473_v63 = vld [vmem:[#allocation9 + $0x1c0] sm:$0xff]  ;;  %v2254_v53 = vlaneseq  ;;  %v13388_v54 = vmov 1966171168   ;;  %vm2394_vm11 = vcmask 1041409   ;;  %vm10705_vm12 = vcmask 181248  }
 0x311   : > { %v2477_v21 = vld [vmem:[#allocation9 + $0x1e0] sm:$0xff]  ;;  %v2333_v55 = vunpack.c.l.s4 %v13388_v54 }
 0x312   : > { %v2601_v22 = vld [vmem:[#allocation9 + $0x5c0] sm:$0xff]  ;;  %v11064_v23 = vcombine.high %v2473_v63, %v2477_v21  ;;  %v11063_v25 = vcombine.low %v2473_v63, %v2477_v21  ;;  %v13852_v0 = vshrl.u32 %v2254_v53, 7 }
 0x313   : > { %v2605_v24 = vld [vmem:[#allocation9 + $0x5e0] sm:$0xff]  ;;  %v2334_v1 = vunpack.c.0.s8 %v2333_v55 }
 0x314   : > { %v2465_v26 = vld [vmem:[#allocation9 + $0x180] sm:$0xff]  ;;  %v11192_v28 = vcombine.high %v2601_v22, %v2605_v24  ;;  %v11191_v29 = vcombine.low %v2601_v22, %v2605_v24  ;;  %7154 = vmatprep.subr.bf16.mxu0 %v11064_v23 }
 0x315   : > { %v2469_v27 = vld [vmem:[#allocation9 + $0x1a0] sm:$0xff]  ;;  %7155 = vmatpush1.bf16.msra.mxu0 %v11063_v25  ;;  %v13855_v10 = vsub.s32 %v2334_v1, %v13852_v0 }
 0x316   : > { %v11056_v30 = vcombine.high %v2465_v26, %v2469_v27  ;;  %v2593_v31 = vld [vmem:[#allocation9 + $0x580] sm:$0xff]  ;;  %7195 = vmatprep.subr.bf16.mxu1 %v11192_v28  ;;  %v11055_v39 = vcombine.low %v2465_v26, %v2469_v27 }
 0x317   : > { %v2597_v32 = vld [vmem:[#allocation9 + $0x5a0] sm:$0xff]  ;;  %7196 = vmatpush1.bf16.msra.mxu1 %v11191_v29 }
 0x318   : > { %v2457_v33 = vld [vmem:[#allocation9 + $0x140] sm:$0xff]  ;;  %v11184_v34 = vcombine.high %v2593_v31, %v2597_v32  ;;  %7156 = vmatprep.subr.bf16.mxu0 %v11056_v30  ;;  %v11183_v40 = vcombine.low %v2593_v31, %v2597_v32 }
 0x319   : > { %v2461_v35 = vld [vmem:[#allocation9 + $0x160] sm:$0xff]  ;;  %7157 = vmatpush1.bf16.msra.mxu0 %v11055_v39 }
 0x31a   : > { %v2585_v36 = vld [vmem:[#allocation9 + $0x540] sm:$0xff]  ;;  %v11048_v18 = vcombine.high %v2457_v33, %v2461_v35  ;;  %7197 = vmatprep.subr.bf16.mxu1 %v11184_v34  ;;  %v11047_v47 = vcombine.low %v2457_v33, %v2461_v35 }
 0x31b   : > { %v2589_v37 = vld [vmem:[#allocation9 + $0x560] sm:$0xff]  ;;  %7198 = vmatpush1.bf16.msra.mxu1 %v11183_v40 }
 0x31c   : > { %v11176_v42 = vcombine.high %v2585_v36, %v2589_v37  ;;  %v2449_v43 = vld [vmem:[#allocation9 + $0x100] sm:$0xff]  ;;  %7158 = vmatprep.subr.bf16.mxu0 %v11048_v18  ;;  %v11175_v48 = vcombine.low %v2585_v36, %v2589_v37 }
 0x31d   : > { %v2453_v44 = vld [vmem:[#allocation9 + $0x120] sm:$0xff]  ;;  %7159 = vmatpush1.bf16.msra.mxu0 %v11047_v47 }
 0x31e   : > { %v2577_v45 = vld [vmem:[#allocation9 + $0x500] sm:$0xff]  ;;  %v11040_v49 = vcombine.high %v2449_v43, %v2453_v44  ;;  %7199 = vmatprep.subr.bf16.mxu1 %v11176_v42  ;;  %v11039_v58 = vcombine.low %v2449_v43, %v2453_v44 }
 0x31f   : > { %v2581_v46 = vld [vmem:[#allocation9 + $0x520] sm:$0xff]  ;;  %7200 = vmatpush1.bf16.msra.mxu1 %v11175_v48 }
 0x320   : > { %v11168_v50 = vcombine.high %v2577_v45, %v2581_v46  ;;  %v2441_v51 = vld [vmem:[#allocation9 + $0xc0] sm:$0xff]  ;;  %7160 = vmatprep.subr.bf16.mxu0 %v11040_v49  ;;  %v11167_v59 = vcombine.low %v2577_v45, %v2581_v46 }
 0x321   : > { %v2445_v52 = vld [vmem:[#allocation9 + $0xe0] sm:$0xff]  ;;  %7161 = vmatpush1.bf16.msra.mxu0 %v11039_v58 }
 0x322   : > { %v2569_v56 = vld [vmem:[#allocation9 + $0x4c0] sm:$0xff]  ;;  %v11032_v38 = vcombine.high %v2441_v51, %v2445_v52  ;;  %7201 = vmatprep.subr.bf16.mxu1 %v11168_v50  ;;  %v11031_v4 = vcombine.low %v2441_v51, %v2445_v52 }
 0x323   : > { %v2573_v57 = vld [vmem:[#allocation9 + $0x4e0] sm:$0xff]  ;;  %7202 = vmatpush1.bf16.msra.mxu1 %v11167_v59 }
 0x324   : > { %v11160_v61 = vcombine.high %v2569_v56, %v2573_v57  ;;  %v2433_v62 = vld [vmem:[#allocation9 + $0x80] sm:$0xff]  ;;  %7162 = vmatprep.subr.bf16.mxu0 %v11032_v38  ;;  %v11159_v5 = vcombine.low %v2569_v56, %v2573_v57 }
 0x325   : > { %v2437_v41 = vld [vmem:[#allocation9 + $0xa0] sm:$0xff]  ;;  %7163 = vmatpush1.bf16.msra.mxu0 %v11031_v4 }
 0x326   : > { %v2561_v2 = vld [vmem:[#allocation9 + $0x480] sm:$0xff]  ;;  %v11024_v6 = vcombine.high %v2433_v62, %v2437_v41  ;;  %7203 = vmatprep.subr.bf16.mxu1 %v11160_v61  ;;  %v11023_v13 = vcombine.low %v2433_v62, %v2437_v41 }
 0x327   : > { %v2565_v3 = vld [vmem:[#allocation9 + $0x4a0] sm:$0xff]  ;;  %7204 = vmatpush1.bf16.msra.mxu1 %v11159_v5 }
 0x328   : > { %v11152_v7 = vcombine.high %v2561_v2, %v2565_v3  ;;  %v2425_v8 = vld [vmem:[#allocation9 + $0x40] sm:$0xff]  ;;  %7164 = vmatprep.subr.bf16.mxu0 %v11024_v6  ;;  %v11151_v14 = vcombine.low %v2561_v2, %v2565_v3 }
 0x329   : > { %v2429_v9 = vld [vmem:[#allocation9 + $0x60] sm:$0xff]  ;;  %7165 = vmatpush1.bf16.msra.mxu0 %v11023_v13 }
 0x32a   : > { %v2553_v11 = vld [vmem:[#allocation9 + $0x440] sm:$0xff]  ;;  %v11016_v15 = vcombine.high %v2425_v8, %v2429_v9  ;;  %7205 = vmatprep.subr.bf16.mxu1 %v11152_v7  ;;  %v11015_v22 = vcombine.low %v2425_v8, %v2429_v9 }
 0x32b   : > { %v2557_v12 = vld [vmem:[#allocation9 + $0x460] sm:$0xff]  ;;  %7206 = vmatpush1.bf16.msra.mxu1 %v11151_v14 }
 0x32c   : > { %v13857_v16 = vld [vmem:[#allocation3] sm:$0xff]  ;;  %v11144_v17 = vcombine.high %v2553_v11, %v2557_v12  ;;  %7166 = vmatprep.subr.bf16.mxu0 %v11016_v15  ;;  %v11143_v24 = vcombine.low %v2553_v11, %v2557_v12 }
 0x32d   : > { %v2417_v60 = vld [vmem:[#allocation9] sm:$0xff]  ;;  %v13861_v20 = vrot.slane %v13857_v16, %v13855_v10  ;;  %7167 = vmatpush1.bf16.msra.mxu0 %v11015_v22 }
 0x32e   : > { %v2421_v19 = vld [vmem:[#allocation9 + $0x20] sm:$0xff]  ;;  %7207 = vmatprep.subr.bf16.mxu1 %v11144_v17 }
 0x32f   : > { %v2545_v63 = vld [vmem:[#allocation9 + $0x400] sm:$0xff]  ;;  %v3244_v23 = vcombine.high %v13861_v20, %v13861_v20  ;;  %v11008_v25 = vcombine.high %v2417_v60, %v2421_v19  ;;  %v11007_v32 = vcombine.low %v2417_v60, %v2421_v19  ;;  %7208 = vmatpush1.bf16.msra.mxu1 %v11143_v24  ;;  %v3229_v19 = vcombine.high %v13857_v16, %v13857_v16 }
 0x330   : > { %v2549_v21 = vld [vmem:[#allocation9 + $0x420] sm:$0xff] }
 0x331   : > { %v11136_v26 = vcombine.high %v2545_v63, %v2549_v21  ;;  %v2537_v27 = vld [vmem:[#allocation9 + $0x3c0] sm:$0xff]  ;;  %v13866_v29 = vrot.slane %v3244_v23, %v13855_v10  ;;  %7168 = vmatprep.subr.bf16.mxu0 %v11008_v25  ;;  %v11135_v34 = vcombine.low %v2545_v63, %v2549_v21 }
 0x332   : > { %v2541_v28 = vld [vmem:[#allocation9 + $0x3e0] sm:$0xff]  ;;  %7169 = vmatpush1.bf16.msra.mxu0 %v11007_v32 }
 0x333   : > { %v2665_v30 = vld [vmem:[#allocation9 + $0x7c0] sm:$0xff]  ;;  %7186 = vmatprep.mubr.bf16.mxu0 %v13866_v29  ;;  %v13871_v33 = vcombine.high %v13866_v29, %v13866_v29  ;;  %v11128_v35 = vcombine.high %v2537_v27, %v2541_v28  ;;  %7209 = vmatprep.subr.bf16.mxu1 %v11136_v26  ;;  %v11127_v42 = vcombine.low %v2537_v27, %v2541_v28 }
 0x334   : > { %v2669_v31 = vld [vmem:[#allocation9 + $0x7e0] sm:$0xff]  ;;  %7210 = vmatpush1.bf16.msra.mxu1 %v11135_v34  ;;  %v13877_v28 = vrot.slane %v3229_v19, %v13855_v10 }
 0x335   : > { %v11256_v36 = vcombine.high %v2665_v30, %v2669_v31  ;;  %v2529_v37 = vld [vmem:[#allocation9 + $0x380] sm:$0xff]  ;;  %7227 = vmatprep.mubr.bf16.mxu1 %v13871_v33  ;;  %7170 = vmatprep.subr.bf16.mxu0 %v11128_v35  ;;  %v11255_v43 = vcombine.low %v2665_v30, %v2669_v31 }
 0x336   : > { %v2533_v39 = vld [vmem:[#allocation9 + $0x3a0] sm:$0xff]  ;;  %7171 = vmatpush2.bf16.msra.mxu0 %v11127_v42 }
 0x337   : > { %v2657_v40 = vld [vmem:[#allocation9 + $0x780] sm:$0xff]  ;;  %v11120_v44 = vcombine.high %v2529_v37, %v2533_v39  ;;  %7211 = vmatprep.subr.bf16.mxu1 %v11256_v36  ;;  %v11119_v50 = vcombine.low %v2529_v37, %v2533_v39  ;;  %v3245_v39 = vcombine.high %v13877_v28, %v13877_v28 }
 0x338   : > { %v2661_v18 = vld [vmem:[#allocation9 + $0x7a0] sm:$0xff]  ;;  %7212 = vmatpush2.bf16.msra.mxu1 %v11255_v43  ;;  %v13883_v43 = vrot.slane %v13861_v20, %v13855_v10 }
 0x339   : > { %v11248_v45 = vcombine.high %v2657_v40, %v2661_v18  ;;  %v2521_v46 = vld [vmem:[#allocation9 + $0x340] sm:$0xff]  ;;  %7172 = vmatprep.subr.bf16.mxu0 %v11120_v44  ;;  %v11247_v51 = vcombine.low %v2657_v40, %v2661_v18  ;;  %v2256_v44 = vadd.s32 8, %v13852_v0 }
 0x33a   : > { %v2525_v47 = vld [vmem:[#allocation9 + $0x360] sm:$0xff]  ;;  %7173 = vmatpush2.bf16.msra.mxu0 %v11119_v50  ;;  %v13887_v50 = vrot.slane %v3245_v39, %v13855_v10  ;;  %v13893_v20 = vcombine.high %v13883_v43, %v13883_v43 }
 0x33b   : > { %v2649_v48 = vld [vmem:[#allocation9 + $0x740] sm:$0xff]  ;;  %v11112_v52 = vcombine.high %v2521_v46, %v2525_v47  ;;  %7213 = vmatprep.subr.bf16.mxu1 %v11248_v45  ;;  %v11111_v58 = vcombine.low %v2521_v46, %v2525_v47  ;;  %vm2258_vm10 = vcmp.lt.s32.totalorder %v2256_v44, 12 }
 0x33c   : > { %v2653_v49 = vld [vmem:[#allocation9 + $0x760] sm:$0xff]  ;;  %7214 = vmatpush2.bf16.msra.mxu1 %v11247_v51 }
 0x33d   : > { %v11240_v53 = vcombine.high %v2649_v48, %v2653_v49  ;;  %v2513_v54 = vld [vmem:[#allocation9 + $0x300] sm:$0xff]  ;;  %7174 = vmatprep.subr.bf16.mxu0 %v11112_v52  ;;  %v11239_v59 = vcombine.low %v2649_v48, %v2653_v49 }
 0x33e   : > { %v2517_v55 = vld [vmem:[#allocation9 + $0x320] sm:$0xff]  ;;  %7175 = vmatpush2.bf16.msra.mxu0 %v11111_v58 }
 0x33f   : > { %v2641_v56 = vld [vmem:[#allocation9 + $0x700] sm:$0xff]  ;;  %v11104_v38 = vcombine.high %v2513_v54, %v2517_v55  ;;  %7215 = vmatprep.subr.bf16.mxu1 %v11240_v53  ;;  %v11103_v3 = vcombine.low %v2513_v54, %v2517_v55 }
 0x340   : > { %v2645_v57 = vld [vmem:[#allocation9 + $0x720] sm:$0xff]  ;;  %7216 = vmatpush2.bf16.msra.mxu1 %v11239_v59 }
 0x341   : > { %v11232_v61 = vcombine.high %v2641_v56, %v2645_v57  ;;  %v2505_v62 = vld [vmem:[#allocation9 + $0x2c0] sm:$0xff]  ;;  %7176 = vmatprep.subr.bf16.mxu0 %v11104_v38  ;;  %v11231_v4 = vcombine.low %v2641_v56, %v2645_v57  ;;  %v2246_v56 = vld [vmem:[#allocation2 + $0x30] sm:$0xff] }
 0x342   : > { %v2509_v41 = vld [vmem:[#allocation9 + $0x2e0] sm:$0xff]  ;;  %7177 = vmatpush2.bf16.msra.mxu0 %v11103_v3 }
 0x343   : > { %v2633_v1 = vld [vmem:[#allocation9 + $0x6c0] sm:$0xff]  ;;  %v11096_v5 = vcombine.high %v2505_v62, %v2509_v41  ;;  %7217 = vmatprep.subr.bf16.mxu1 %v11232_v61  ;;  %v11095_v12 = vcombine.low %v2505_v62, %v2509_v41  ;;  %v2249_v62 = vld [vmem:[#allocation2 + $0x10] sm:$0xff]  ;;  %v2250_v41 = vld [vmem:[#allocation2 + $0x8] sm:$0xff] }
 0x344   : > { %v2637_v2 = vld [vmem:[#allocation9 + $0x6e0] sm:$0xff]  ;;  %7218 = vmatpush2.bf16.msra.mxu1 %v11231_v4  ;;  %v2252_v4 = vld [vmem:[#allocation2 + $0x28] sm:$0xff] }
 0x345   : > { %v11224_v6 = vcombine.high %v2633_v1, %v2637_v2  ;;  %v2497_v7 = vld [vmem:[#allocation9 + $0x280] sm:$0xff]  ;;  %7178 = vmatprep.subr.bf16.mxu0 %v11096_v5  ;;  %v11223_v13 = vcombine.low %v2633_v1, %v2637_v2  ;;  %v13902_v2 = vcombine.high %v13887_v50, %v13887_v50 }
 0x346   : > { %v2501_v8 = vld [vmem:[#allocation9 + $0x2a0] sm:$0xff]  ;;  %7179 = vmatpush2.bf16.msra.mxu0 %v11095_v12 }
 0x347   : > { %v2625_v9 = vld [vmem:[#allocation9 + $0x680] sm:$0xff]  ;;  %v11088_v14 = vcombine.high %v2497_v7, %v2501_v8  ;;  %7219 = vmatprep.subr.bf16.mxu1 %v11224_v6  ;;  %v11087_v22 = vcombine.low %v2497_v7, %v2501_v8  ;;  %v2262_v7 = vsel %vm2258_vm10, %v2249_v62, -inf }
 0x348   : > { %v2629_v11 = vld [vmem:[#allocation9 + $0x6a0] sm:$0xff]  ;;  %7220 = vmatpush2.bf16.msra.mxu1 %v11223_v13 }
 0x349   : > { %v11216_v15 = vcombine.high %v2625_v9, %v2629_v11  ;;  %v2489_v17 = vld [vmem:[#allocation9 + $0x240] sm:$0xff]  ;;  %7180 = vmatprep.subr.bf16.mxu0 %v11088_v14  ;;  %v11215_v23 = vcombine.low %v2625_v9, %v2629_v11  ;;  %v2265_v11 = vsel %vm2258_vm10, %v2252_v4, -inf }
 0x34a   : > { %v2493_v60 = vld [vmem:[#allocation9 + $0x260] sm:$0xff]  ;;  %7181 = vmatpush2.bf16.msra.mxu0 %v11087_v22 }
 0x34b   : > { %v2617_v63 = vld [vmem:[#allocation9 + $0x640] sm:$0xff]  ;;  %v11080_v24 = vcombine.high %v2489_v17, %v2493_v60  ;;  %7221 = vmatprep.subr.bf16.mxu1 %v11216_v15  ;;  %v11079_v32 = vcombine.low %v2489_v17, %v2493_v60  ;;  %v2281_v60 = vmax.f32 %v2250_v41, %v2265_v11 }
 0x34c   : > { %v2621_v21 = vld [vmem:[#allocation9 + $0x660] sm:$0xff]  ;;  %7222 = vmatpush2.bf16.msra.mxu1 %v11215_v23 }
 0x34d   : > { %v11208_v25 = vcombine.high %v2617_v63, %v2621_v21  ;;  %v2481_v26 = vld [vmem:[#allocation9 + $0x200] sm:$0xff]  ;;  %7182 = vmatprep.subr.bf16.mxu0 %v11080_v24  ;;  %v11207_v16 = vcombine.low %v2617_v63, %v2621_v21  ;;  %v13914_v63 = vsub.s32 2, %v13852_v0 }
 0x34e   : > { %v2485_v27 = vld [vmem:[#allocation9 + $0x220] sm:$0xff]  ;;  %7183 = vmatpush2.bf16.msra.mxu0 %v11079_v32 }
 0x34f   : > { %v2609_v30 = vld [vmem:[#allocation9 + $0x600] sm:$0xff]  ;;  %v11072_v34 = vcombine.high %v2481_v26, %v2485_v27  ;;  %7223 = vmatprep.subr.bf16.mxu1 %v11208_v25  ;;  %v11071_v42 = vcombine.low %v2481_v26, %v2485_v27  ;;  %v2303_v27 = vsub.s32 6, %v13852_v0 }
 0x350   : > { %v2613_v31 = vld [vmem:[#allocation9 + $0x620] sm:$0xff]  ;;  %7224 = vmatpush2.bf16.msra.mxu1 %v11207_v16  ;;  %v2295_v16 = vld [vmem:[#allocation7 + $0x8] sm:$0x77] }
 0x351   : > { %v11200_v35 = vcombine.high %v2609_v30, %v2613_v31  ;;  %v2729_v36 = vld [vmem:[#allocation9 + $0x9c0] sm:$0xff]  ;;  %7184 = vmatprep.subr.bf16.mxu0 %v11072_v34  ;;  %v11199_v45 = vcombine.low %v2609_v30, %v2613_v31  ;;  %v2282_v31 = vrot.slane %v2281_v60, 4 }
 0x352   : > { %v2733_v37 = vld [vmem:[#allocation9 + $0x9e0] sm:$0xff]  ;;  %7185 = vmatpush2.bf16.msra.mxu0 %v11071_v42 }
 0x353   : > { %v2857_v40 = vld [vmem:[#allocation9 + $0xdc0] sm:$0xff]  ;;  %v11320_v46 = vcombine.high %v2729_v36, %v2733_v37  ;;  %7225 = vmatprep.subr.bf16.mxu1 %v11200_v35  ;;  %v11319_v53 = vcombine.low %v2729_v36, %v2733_v37  ;;  %v2283_v39 = vmax.f32 %v2281_v60, %v2282_v31 }
 0x354   : > { %v2861_v18 = vld [vmem:[#allocation9 + $0xde0] sm:$0xff]  ;;  %7226 = vmatpush2.bf16.msra.mxu1 %v11199_v45 }
 0x355   : > { %v11448_v47 = vcombine.high %v2857_v40, %v2861_v18  ;;  %v2721_v48 = vld [vmem:[#allocation9 + $0x980] sm:$0xff]  ;;  %7236 = vmatprep.subr.bf16.mxu0 %v11320_v46  ;;  %v11447_v58 = vcombine.low %v2857_v40, %v2861_v18  ;;  %7187 = vmatmul.mubr.bf16.vlgmr.msra.gmra.mxu0 %v13883_v43 }
 0x356   : > { %v2725_v49 = vld [vmem:[#allocation9 + $0x9a0] sm:$0xff]  ;;  %7237 = vmatpush1.bf16.msra.mxu0 %v11319_v53  ;;  %7268 = vmatprep.mubr.bf16.mxu0 %v13887_v50  ;;  %v2300_v53 = vrot.slane %v2295_v16, %v13914_v63 }
 0x357   : > { %v13889_v51 = vld [vmem:[#allocation9 + $0xd80] sm:$0xff]  ;;  %v11311_v59 = vcombine.low %v2721_v48, %v2725_v49  ;;  %v11312_v38 = vcombine.high %v2721_v48, %v2725_v49  ;;  %7277 = vmatprep.subr.bf16.mxu1 %v11448_v47  ;;  %7228 = vmatmul.mubr.bf16.vlgmr.msra.gmra.mxu1 %v13893_v20 }
 0x358   : > { %v2853_v52 = vld [vmem:[#allocation9 + $0xda0] sm:$0xff]  ;;  %7278 = vmatpush1.bf16.msra.mxu1 %v11447_v58  ;;  %7309 = vmatprep.mubr.bf16.mxu1 %v13902_v2 }
 0x359   : > { %v13895_v54 = vld [vmem:[#allocation9 + $0x940] sm:$0xff]  ;;  %v11440_v1 = vcombine.high %v13889_v51, %v2853_v52  ;;  %v11439_v15 = vcombine.low %v13889_v51, %v2853_v52  ;;  %7238 = vmatprep.subr.bf16.mxu0 %v11312_v38  ;;  %v2284_v51 = vrot.slane %v2283_v39, 2 }
 0x35a   : > { %v13897_v55 = vld [vmem:[#allocation9 + $0x960] sm:$0xff]  ;;  %7239 = vmatpush1.bf16.msra.mxu0 %v11311_v59 }
 0x35b   : > { %v2247_v57 = vld [vmem:[#allocation2] sm:$0xff]  ;;  %v2248_v61 = vld [vmem:[#allocation2 + $0x18] sm:$0xff]  ;;  %v11304_v21 = vcombine.high %v13895_v54, %v13897_v55  ;;  %7279 = vmatprep.subr.bf16.mxu1 %v11440_v1  ;;  %v11303_v36 = vcombine.low %v13895_v54, %v13897_v55  ;;  %v2304_v54 = vrot.slane %v2295_v16, %v2303_v27 }
 0x35c   : > { %v2251_v3 = vld [vmem:[#allocation2 + $0x20] sm:$0xff]  ;;  %v2253_v5 = vld [vmem:[#allocation2 + $0x38] sm:$0xff]  ;;  %v2261_v6 = vsel %vm2258_vm10, %v2248_v61, -inf  ;;  %v2274_v14 = vmax.f32 %v2247_v57, %v2262_v7  ;;  %7280 = vmatpush1.bf16.msra.mxu1 %v11439_v15  ;;  %v2285_v61 = vmax.f32 %v2283_v39, %v2284_v51 }
 0x35d   : > { %v2841_v8 = vld [vmem:[#allocation9 + $0xd40] sm:$0xff]  ;;  %v2266_v12 = vsel %vm2258_vm10, %v2253_v5, -inf  ;;  %v2267_v13 = vmax.f32 %v2246_v56, %v2261_v6  ;;  %7240 = vmatprep.subr.bf16.mxu0 %v11304_v21  ;;  %v2314_v11 = vrot.slane %v2304_v54, %v13914_v63 }
 0x35e   : > { %v2845_v9 = vld [vmem:[#allocation9 + $0xd60] sm:$0xff]  ;;  %v2288_v19 = vmax.f32 %v2251_v3, %v2266_v12  ;;  %v2275_v26 = vrot.slane %v2274_v14, 4  ;;  %7241 = vmatpush1.bf16.msra.mxu0 %v11303_v36  ;;  %v2286_v7 = vrot.slane %v2285_v61, 1 }
 0x35f   : > { %v13911_v17 = vld [vmem:[#allocation9 + $0x900] sm:$0xff]  ;;  %v2268_v25 = vrot.slane %v2267_v13, 4  ;;  %v11432_v30 = vcombine.high %v2841_v8, %v2845_v9  ;;  %v11431_v37 = vcombine.low %v2841_v8, %v2845_v9  ;;  %v2310_v9 = vrot.slane %v2300_v53, %v13914_v63 }
 0x360   : > { %v2709_v22 = vld [vmem:[#allocation9 + $0x920] sm:$0xff]  ;;  %v2289_v32 = vrot.slane %v2288_v19, 4  ;;  %v2276_v35 = vmax.f32 %v2274_v14, %v2275_v26 }
 0x361   : > { %v13918_v23 = vld [vmem:[#allocation9 + $0xd00] sm:$0xff]  ;;  %v2269_v34 = vmax.f32 %v2267_v13, %v2268_v25  ;;  %v11296_v18 = vcombine.high %v13911_v17, %v2709_v22  ;;  %7281 = vmatprep.subr.bf16.mxu1 %v11432_v30  ;;  %v11295_v55 = vcombine.low %v13911_v17, %v2709_v22  ;;  %v2287_v17 = vmax.f32 %v2285_v61, %v2286_v7 }
 0x362   : > { %v13920_v24 = vld [vmem:[#allocation9 + $0xd20] sm:$0xff]  ;;  %v2290_v40 = vmax.f32 %v2288_v19, %v2289_v32  ;;  %v2277_v48 = vrot.slane %v2276_v35, 2  ;;  %7282 = vmatpush1.bf16.msra.mxu1 %v11431_v37  ;;  %v13389_v19 = vmov 1935823168  }
 0x363   : > { %v11424_v42 = vcombine.high %v13918_v23, %v13920_v24  ;;  %v2697_v44 = vld [vmem:[#allocation9 + $0x8c0] sm:$0xff]  ;;  %v2270_v47 = vrot.slane %v2269_v34, 2  ;;  %v11423_v58 = vcombine.low %v13918_v23, %v13920_v24  ;;  %7242 = vmatprep.subr.bf16.mxu0 %v11296_v18  ;;  %v2362_v21 = vunpack.c.l.s4 %v13389_v19 }
 0x364   : > { %v2701_v45 = vld [vmem:[#allocation9 + $0x8e0] sm:$0xff]  ;;  %v2291_v52 = vrot.slane %v2290_v40, 2  ;;  %v2278_v57 = vmax.f32 %v2276_v35, %v2277_v48  ;;  %7243 = vmatpush1.bf16.msra.mxu0 %v11295_v55  ;;  %v2317_v16 = vadd.f32 %v2310_v9, %v2287_v17 }
 0x365   : > { %v2825_v46 = vld [vmem:[#allocation9 + $0xcc0] sm:$0xff]  ;;  %v2271_v56 = vmax.f32 %v2269_v34, %v2270_v47  ;;  %v11288_v59 = vcombine.high %v2697_v44, %v2701_v45  ;;  %7283 = vmatprep.subr.bf16.mxu1 %v11424_v42  ;;  %v11287_v12 = vcombine.low %v2697_v44, %v2701_v45  ;;  %v2363_v18 = vunpack.c.0.s8 %v2362_v21 }
 0x366   : > { %v2829_v49 = vld [vmem:[#allocation9 + $0xce0] sm:$0xff]  ;;  %v2292_v62 = vmax.f32 %v2290_v40, %v2291_v52  ;;  %v2279_v5 = vrot.slane %v2278_v57, 1  ;;  %7284 = vmatpush1.bf16.msra.mxu1 %v11423_v58  ;;  %v2321_v39 = vmax.f32 %v2317_v16, 0.0 }
 0x367   : > { %v2689_v38 = vld [vmem:[#allocation9 + $0x880] sm:$0xff]  ;;  %v11416_v41 = vcombine.high %v2825_v46, %v2829_v49  ;;  %v2272_v4 = vrot.slane %v2271_v56, 1  ;;  %v11415_v15 = vcombine.low %v2825_v46, %v2829_v49  ;;  %7244 = vmatprep.subr.bf16.mxu0 %v11288_v59 }
 0x368   : > { %v2693_v1 = vld [vmem:[#allocation9 + $0x8a0] sm:$0xff]  ;;  %v2293_v8 = vrot.slane %v2292_v62, 1  ;;  %v2280_v14 = vmax.f32 %v2278_v57, %v2279_v5  ;;  %7245 = vmatpush1.bf16.msra.mxu0 %v11287_v12 }
 0x369   : > { %v2817_v3 = vld [vmem:[#allocation9 + $0xc80] sm:$0xff]  ;;  %v2273_v13 = vmax.f32 %v2271_v56, %v2272_v4  ;;  %v11280_v22 = vcombine.high %v2689_v38, %v2693_v1  ;;  %7285 = vmatprep.subr.bf16.mxu1 %v11416_v41  ;;  %v11279_v37 = vcombine.low %v2689_v38, %v2693_v1  ;;  %v2366_v56 = vsub.s32 %v2363_v18, %v13852_v0 }
 0x36a   : > { %v2821_v6 = vld [vmem:[#allocation9 + $0xca0] sm:$0xff]  ;;  %v2294_v60 = vmax.f32 %v2292_v62, %v2293_v8  ;;  %v2316_v30 = vadd.f32 %v2314_v11, %v2280_v14  ;;  %7286 = vmatpush1.bf16.msra.mxu1 %v11415_v15 }
 0x36b   : > { %v2681_v23 = vld [vmem:[#allocation9 + $0x840] sm:$0xff]  ;;  %v2315_v26 = vadd.f32 %v2310_v9, %v2273_v13  ;;  %v11408_v31 = vcombine.high %v2817_v3, %v2821_v6  ;;  %7246 = vmatprep.subr.bf16.mxu0 %v11280_v22  ;;  %v11407_v42 = vcombine.low %v2817_v3, %v2821_v6 }
 0x36c   : > { %v2685_v24 = vld [vmem:[#allocation9 + $0x860] sm:$0xff]  ;;  %v2318_v34 = vadd.f32 %v2314_v11, %v2294_v60  ;;  %v2320_v36 = vmax.f32 %v2316_v30, 0.0  ;;  %7247 = vmatpush1.bf16.msra.mxu0 %v11279_v37 }
 0x36d   : > { %v2809_v25 = vld [vmem:[#allocation9 + $0xc40] sm:$0xff]  ;;  %v2319_v35 = vmax.f32 %v2315_v26, 0.0  ;;  %v11272_v44 = vcombine.high %v2681_v23, %v2685_v24  ;;  %7287 = vmatprep.subr.bf16.mxu1 %v11408_v31  ;;  %v11271_v54 = vcombine.low %v2681_v23, %v2685_v24 }
 0x36e   : > { %v2813_v32 = vld [vmem:[#allocation9 + $0xc60] sm:$0xff]  ;;  %v2322_v40 = vmax.f32 %v2318_v34, 0.0  ;;  %7288 = vmatpush1.bf16.msra.mxu1 %v11407_v42 }
 0x36f   : > { %v2673_v45 = vld [vmem:[#allocation9 + $0x800] sm:$0xff]  ;;  %v11003_v48 = vpack.c.bf16 %v2320_v36, %v2319_v35  ;;  %v11400_v49 = vcombine.high %v2809_v25, %v2813_v32  ;;  %7248 = vmatprep.subr.bf16.mxu0 %v11272_v44  ;;  %v11399_v57 = vcombine.low %v2809_v25, %v2813_v32 }
 0x370   : > { %v2677_v46 = vld [vmem:[#allocation9 + $0x820] sm:$0xff]  ;;  %v11004_v52 = vpack.c.bf16 %v2322_v40, %v2321_v39  ;;  %7249 = vmatpush1.bf16.msra.mxu0 %v11271_v54 }
 0x371   : > { %v2801_v47 = vld [vmem:[#allocation9 + $0xc00] sm:$0xff]  ;;  %v2338_v53 = vrot.slane %v11003_v48, %v13855_v10  ;;  %v11264_v58 = vcombine.high %v2673_v45, %v2677_v46  ;;  %7289 = vmatprep.subr.bf16.mxu1 %v11400_v49  ;;  %v11263_v5 = vcombine.low %v2673_v45, %v2677_v46 }
 0x372   : > { %v2805_v51 = vld [vmem:[#allocation9 + $0xc20] sm:$0xff]  ;;  %v2353_v55 = vrot.slane %v11004_v52, %v13855_v10  ;;  %7290 = vmatpush1.bf16.msra.mxu1 %v11399_v57 }
 0x373   : > { %v2793_v59 = vld [vmem:[#allocation9 + $0xbc0] sm:$0xff]  ;;  %v2345_v62 = vrot.slane %v2338_v53, %v13855_v10  ;;  %v11392_v41 = vcombine.high %v2801_v47, %v2805_v51  ;;  %7250 = vmatprep.subr.bf16.mxu0 %v11264_v58  ;;  %v11391_v7 = vcombine.low %v2801_v47, %v2805_v51 }
 0x374   : > { %v2797_v38 = vld [vmem:[#allocation9 + $0xbe0] sm:$0xff]  ;;  %v2360_v3 = vrot.slane %v2353_v55, %v13855_v10  ;;  %7251 = vmatpush1.bf16.msra.mxu0 %v11263_v5 }
 0x375   : > { %v2921_v61 = vld [vmem:[#allocation9 + $0xfc0] sm:$0xff]  ;;  %v2367_v4 = vrot.slane %v2345_v62, %v2366_v56  ;;  %v11384_v8 = vcombine.high %v2793_v59, %v2797_v38  ;;  %7291 = vmatprep.subr.bf16.mxu1 %v11392_v41  ;;  %v11383_v60 = vcombine.low %v2793_v59, %v2797_v38 }
 0x376   : > { %v2925_v1 = vld [vmem:[#allocation9 + $0xfe0] sm:$0xff]  ;;  %v2381_v6 = vrot.slane %v2360_v3, %v2366_v56  ;;  %7292 = vmatpush1.bf16.msra.mxu1 %v11391_v7 }
 0x377   : > { %v2785_v9 = vld [vmem:[#allocation9 + $0xb80] sm:$0xff]  ;;  %v2374_v13 = vrot.slane %v2367_v4, %v2366_v56  ;;  %v11512_v14 = vcombine.high %v2921_v61, %v2925_v1  ;;  %7252 = vmatprep.subr.bf16.mxu0 %v11384_v8  ;;  %v11511_v24 = vcombine.low %v2921_v61, %v2925_v1 }
 0x378   : > { %v2789_v11 = vld [vmem:[#allocation9 + $0xba0] sm:$0xff]  ;;  %v2388_v17 = vrot.slane %v2381_v6, %v2366_v56  ;;  %7253 = vmatpush2.bf16.msra.mxu0 %v11383_v60 }
 0x379   : > { %v2913_v12 = vld [vmem:[#allocation9 + $0xf80] sm:$0xff]  ;;  %v2389_v19 = vunpack.c.l.b16 %v2374_v13  ;;  %v2390_v21 = vunpack.c.h.b16 %v2374_v13  ;;  %v11376_v25 = vcombine.high %v2785_v9, %v2789_v11  ;;  %7293 = vmatprep.subr.bf16.mxu1 %v11512_v14  ;;  %v11375_v36 = vcombine.low %v2785_v9, %v2789_v11 }
 0x37a   : > { %v2917_v15 = vld [vmem:[#allocation9 + $0xfa0] sm:$0xff]  ;;  %v2391_v22 = vunpack.c.l.b16 %v2388_v17  ;;  %v2392_v23 = vunpack.c.h.b16 %v2388_v17  ;;  %7294 = vmatpush2.bf16.msra.mxu1 %v11511_v24 }
 0x37b   : > { %v2777_v26 = vld [vmem:[#allocation9 + $0xb40] sm:$0xff]  ;;  %v11504_v32 = vcombine.high %v2913_v12, %v2917_v15  ;;  %7254 = vmatprep.subr.bf16.mxu0 %v11376_v25  ;;  %v11503_v40 = vcombine.low %v2913_v12, %v2917_v15 }
 0x37c   : > { %v2781_v30 = vld [vmem:[#allocation9 + $0xb60] sm:$0xff]  ;;  %v2393_v34 = vrot.slane %v2391_v22, 7  ;;  %v2396_v35 = vrot.slane %v2392_v23, 7  ;;  %7255 = vmatpush2.bf16.msra.mxu0 %v11375_v36 }
 0x37d   : > { %v2905_v31 = vld [vmem:[#allocation9 + $0xf40] sm:$0xff]  ;;  %v11368_v18 = vcombine.high %v2777_v26, %v2781_v30  ;;  %7295 = vmatprep.subr.bf16.mxu1 %v11504_v32  ;;  %v11367_v51 = vcombine.low %v2777_v26, %v2781_v30 }
 0x37e   : > { %v2909_v16 = vld [vmem:[#allocation9 + $0xf60] sm:$0xff]  ;;  %v2395_v37 = vsel %vm2394_vm11, %v2393_v34, %v2389_v19  ;;  %v2397_v39 = vsel %vm2394_vm11, %v2396_v35, %v2390_v21  ;;  %7296 = vmatpush2.bf16.msra.mxu1 %v11503_v40 }
 0x37f   : > { %v2769_v42 = vld [vmem:[#allocation9 + $0xb00] sm:$0xff]  ;;  %v2398_v46 = vpack.c.b16 %v2397_v39, %v2395_v37  ;;  %v11496_v47 = vcombine.high %v2905_v31, %v2909_v16  ;;  %7256 = vmatprep.subr.bf16.mxu0 %v11368_v18  ;;  %v11495_v52 = vcombine.low %v2905_v31, %v2909_v16  ;;  %v13950_v39 = vrot.slane %v13877_v28, %v13855_v10 }
 0x380   : > { %v2773_v44 = vld [vmem:[#allocation9 + $0xb20] sm:$0xff]  ;;  %7257 = vmatpush2.bf16.msra.mxu0 %v11367_v51 }
 0x381   : > { %v2897_v45 = vld [vmem:[#allocation9 + $0xf00] sm:$0xff]  ;;  %v2405_v49 = vrot.slane %v2398_v46, %v13855_v10  ;;  %v11360_v53 = vcombine.high %v2769_v42, %v2773_v44  ;;  %7297 = vmatprep.subr.bf16.mxu1 %v11496_v47  ;;  %v11359_v59 = vcombine.low %v2769_v42, %v2773_v44 }
 0x382   : > { %v2901_v48 = vld [vmem:[#allocation9 + $0xf20] sm:$0xff]  ;;  %7298 = vmatpush2.bf16.msra.mxu1 %v11495_v52 }
 0x383   : > { %v2761_v54 = vld [vmem:[#allocation9 + $0xac0] sm:$0xff]  ;;  %11005 = vst.sshfl [vmem:[#allocation3 + $0xa] sm:$0x5 pattern:$0x73625140] %v2405_v49  ;;  %v11488_v57 = vcombine.high %v2897_v45, %v2901_v48  ;;  %7258 = vmatprep.subr.bf16.mxu0 %v11360_v53  ;;  %v11487_v38 = vcombine.low %v2897_v45, %v2901_v48  ;;  %v13957_v49 = vcombine.high %v13950_v39, %v13950_v39 }
 0x384   : > { %v2765_v55 = vld [vmem:[#allocation9 + $0xae0] sm:$0xff]  ;;  %7259 = vmatpush2.bf16.msra.mxu0 %v11359_v59 }
 0x385   : > { %v2889_v56 = vld [vmem:[#allocation9 + $0xec0] sm:$0xff]  ;;  %v11352_v61 = vcombine.high %v2761_v54, %v2765_v55  ;;  %7299 = vmatprep.subr.bf16.mxu1 %v11488_v57  ;;  %v11351_v5 = vcombine.low %v2761_v54, %v2765_v55 }
 0x386   : > { %v2893_v58 = vld [vmem:[#allocation9 + $0xee0] sm:$0xff]  ;;  %7300 = vmatpush2.bf16.msra.mxu1 %v11487_v38 }
 0x387   : > { %v2753_v62 = vld [vmem:[#allocation9 + $0xa80] sm:$0xff]  ;;  %v11480_v3 = vcombine.high %v2889_v56, %v2893_v58  ;;  %7260 = vmatprep.subr.bf16.mxu0 %v11352_v61  ;;  %v11479_v6 = vcombine.low %v2889_v56, %v2893_v58 }
 0x388   : > { %v2757_v41 = vld [vmem:[#allocation9 + $0xaa0] sm:$0xff]  ;;  %7261 = vmatpush2.bf16.msra.mxu0 %v11351_v5 }
 0x389   : > { %v2881_v1 = vld [vmem:[#allocation9 + $0xe80] sm:$0xff]  ;;  %v11344_v7 = vcombine.high %v2753_v62, %v2757_v41  ;;  %7301 = vmatprep.subr.bf16.mxu1 %v11480_v3  ;;  %v11343_v14 = vcombine.low %v2753_v62, %v2757_v41 }
 0x38a   : > { %v2885_v4 = vld [vmem:[#allocation9 + $0xea0] sm:$0xff]  ;;  %7302 = vmatpush2.bf16.msra.mxu1 %v11479_v6  ;;  %v13944_v24 = vld.sshfl [vmem:[#allocation3 + $0x8] sm:$0x33 pattern:$0x75316420] }
 0x38b   : > { %v2745_v8 = vld [vmem:[#allocation9 + $0xa40] sm:$0xff]  ;;  %v11472_v12 = vcombine.high %v2881_v1, %v2885_v4  ;;  %7262 = vmatprep.subr.bf16.mxu0 %v11344_v7  ;;  %v11471_v17 = vcombine.low %v2881_v1, %v2885_v4  ;;  %v3285_v36 = vcombine.high %v13944_v24, %v13944_v24 }
 0x38c   : > { %v2749_v9 = vld [vmem:[#allocation9 + $0xa60] sm:$0xff]  ;;  %7263 = vmatpush2.bf16.msra.mxu0 %v11343_v14 }
 0x38d   : > { %v2873_v11 = vld [vmem:[#allocation9 + $0xe40] sm:$0xff]  ;;  %v11336_v60 = vcombine.high %v2745_v8, %v2749_v9  ;;  %7303 = vmatprep.subr.bf16.mxu1 %v11472_v12  ;;  %v11335_v25 = vcombine.low %v2745_v8, %v2749_v9  ;;  %v13953_v48 = vrot.slane %v3285_v36, %v13855_v10 }
 0x38e   : > { %v2877_v13 = vld [vmem:[#allocation9 + $0xe60] sm:$0xff]  ;;  %7304 = vmatpush2.bf16.msra.mxu1 %v11471_v17 }
 0x38f   : > { %v2737_v15 = vld [vmem:[#allocation9 + $0xa00] sm:$0xff]  ;;  %v11464_v23 = vcombine.high %v2873_v11, %v2877_v13  ;;  %7264 = vmatprep.subr.bf16.mxu0 %v11336_v60  ;;  %v11463_v26 = vcombine.low %v2873_v11, %v2877_v13  ;;  %v13962_v58 = vcombine.high %v13953_v48, %v13953_v48 }
 0x390   : > { %v2741_v19 = vld [vmem:[#allocation9 + $0xa20] sm:$0xff]  ;;  %7265 = vmatpush2.bf16.msra.mxu0 %v11335_v25 }
 0x391   : > { %v2865_v21 = vld [vmem:[#allocation9 + $0xe00] sm:$0xff]  ;;  %v11328_v30 = vcombine.high %v2737_v15, %v2741_v19  ;;  %7305 = vmatprep.subr.bf16.mxu1 %v11464_v23  ;;  %v11327_v37 = vcombine.low %v2737_v15, %v2741_v19 }
 0x392   : > { %v2869_v22 = vld [vmem:[#allocation9 + $0xe20] sm:$0xff]  ;;  %7306 = vmatpush2.bf16.msra.mxu1 %v11463_v26 }
 0x393   : > { %v2985_v31 = vld [vmem:[#allocation9 + $0x11c0] sm:$0xff]  ;;  %v11456_v34 = vcombine.high %v2865_v21, %v2869_v22  ;;  %7266 = vmatprep.subr.bf16.mxu0 %v11328_v30  ;;  %v11455_v40 = vcombine.low %v2865_v21, %v2869_v22 }
 0x394   : > { %v2989_v32 = vld [vmem:[#allocation9 + $0x11e0] sm:$0xff]  ;;  %7267 = vmatpush2.bf16.msra.mxu0 %v11327_v37 }
 0x395   : > { %v3113_v16 = vld [vmem:[#allocation9 + $0x15c0] sm:$0xff]  ;;  %v11576_v18 = vcombine.high %v2985_v31, %v2989_v32  ;;  %7307 = vmatprep.subr.bf16.mxu1 %v11456_v34  ;;  %v11575_v28 = vcombine.low %v2985_v31, %v2989_v32 }
 0x396   : > { %v3117_v35 = vld [vmem:[#allocation9 + $0x15e0] sm:$0xff]  ;;  %7308 = vmatpush2.bf16.msra.mxu1 %v11455_v40 }
 0x397   : > { %v2977_v42 = vld [vmem:[#allocation9 + $0x1180] sm:$0xff]  ;;  %v11704_v46 = vcombine.high %v3113_v16, %v3117_v35  ;;  %7318 = vmatprep.subr.bf16.mxu0 %v11576_v18  ;;  %v11703_v51 = vcombine.low %v3113_v16, %v3117_v35  ;;  %7269 = vmatmul.mubr.bf16.vlgmr.msra.gmra.mxu0 %v13950_v39 }
 0x398   : > { %v2981_v44 = vld [vmem:[#allocation9 + $0x11a0] sm:$0xff]  ;;  %7319 = vmatpush1.bf16.msra.mxu0 %v11575_v28  ;;  %7350 = vmatprep.mubr.bf16.mxu0 %v13953_v48 }
 0x399   : > { %v3105_v45 = vld [vmem:[#allocation9 + $0x1580] sm:$0xff]  ;;  %v11568_v52 = vcombine.high %v2977_v42, %v2981_v44  ;;  %7359 = vmatprep.subr.bf16.mxu1 %v11704_v46  ;;  %7310 = vmatmul.mubr.bf16.vlgmr.msra.gmra.mxu1 %v13957_v49  ;;  %v11567_v59 = vcombine.low %v2977_v42, %v2981_v44 }
 0x39a   : > { %v3109_v47 = vld [vmem:[#allocation9 + $0x15a0] sm:$0xff]  ;;  %7360 = vmatpush1.bf16.msra.mxu1 %v11703_v51  ;;  %7391 = vmatprep.mubr.bf16.mxu1 %v13962_v58 }
 0x39b   : > { %v2969_v53 = vld [vmem:[#allocation9 + $0x1140] sm:$0xff]  ;;  %v11696_v55 = vcombine.high %v3105_v45, %v3109_v47  ;;  %7320 = vmatprep.subr.bf16.mxu0 %v11568_v52  ;;  %v11695_v38 = vcombine.low %v3105_v45, %v3109_v47 }
 0x39c   : > { %v2973_v54 = vld [vmem:[#allocation9 + $0x1160] sm:$0xff]  ;;  %7321 = vmatpush1.bf16.msra.mxu0 %v11567_v59 }
 0x39d   : > { %v3097_v56 = vld [vmem:[#allocation9 + $0x1540] sm:$0xff]  ;;  %v11560_v61 = vcombine.high %v2969_v53, %v2973_v54  ;;  %7361 = vmatprep.subr.bf16.mxu1 %v11696_v55  ;;  %v11559_v5 = vcombine.low %v2969_v53, %v2973_v54 }
 0x39e   : > { %v3101_v57 = vld [vmem:[#allocation9 + $0x1560] sm:$0xff]  ;;  %7362 = vmatpush1.bf16.msra.mxu1 %v11695_v38 }
 0x39f   : > { %v2961_v62 = vld [vmem:[#allocation9 + $0x1100] sm:$0xff]  ;;  %v11688_v3 = vcombine.high %v3097_v56, %v3101_v57  ;;  %7322 = vmatprep.subr.bf16.mxu0 %v11560_v61  ;;  %v11687_v6 = vcombine.low %v3097_v56, %v3101_v57 }
 0x3a0   : > { %v2965_v41 = vld [vmem:[#allocation9 + $0x1120] sm:$0xff]  ;;  %7323 = vmatpush1.bf16.msra.mxu0 %v11559_v5 }
 0x3a1   : > { %v3089_v1 = vld [vmem:[#allocation9 + $0x1500] sm:$0xff]  ;;  %v11552_v7 = vcombine.high %v2961_v62, %v2965_v41  ;;  %7363 = vmatprep.subr.bf16.mxu1 %v11688_v3  ;;  %v11551_v14 = vcombine.low %v2961_v62, %v2965_v41 }
 0x3a2   : > { %v3093_v4 = vld [vmem:[#allocation9 + $0x1520] sm:$0xff]  ;;  %7364 = vmatpush1.bf16.msra.mxu1 %v11687_v6 }
 0x3a3   : > { %v2953_v8 = vld [vmem:[#allocation9 + $0x10c0] sm:$0xff]  ;;  %v11680_v12 = vcombine.high %v3089_v1, %v3093_v4  ;;  %7324 = vmatprep.subr.bf16.mxu0 %v11552_v7  ;;  %v11679_v15 = vcombine.low %v3089_v1, %v3093_v4 }
 0x3a4   : > { %v2957_v9 = vld [vmem:[#allocation9 + $0x10e0] sm:$0xff]  ;;  %7325 = vmatpush1.bf16.msra.mxu0 %v11551_v14 }
 0x3a5   : > { %v3081_v11 = vld [vmem:[#allocation9 + $0x14c0] sm:$0xff]  ;;  %v11544_v17 = vcombine.high %v2953_v8, %v2957_v9  ;;  %7365 = vmatprep.subr.bf16.mxu1 %v11680_v12  ;;  %v11543_v25 = vcombine.low %v2953_v8, %v2957_v9 }
 0x3a6   : > { %v3085_v13 = vld [vmem:[#allocation9 + $0x14e0] sm:$0xff]  ;;  %7366 = vmatpush1.bf16.msra.mxu1 %v11679_v15 }
 0x3a7   : > { %v2945_v60 = vld [vmem:[#allocation9 + $0x1080] sm:$0xff]  ;;  %v11672_v22 = vcombine.high %v3081_v11, %v3085_v13  ;;  %7326 = vmatprep.subr.bf16.mxu0 %v11544_v17  ;;  %v11671_v26 = vcombine.low %v3081_v11, %v3085_v13 }
 0x3a8   : > { %v2949_v19 = vld [vmem:[#allocation9 + $0x10a0] sm:$0xff]  ;;  %7327 = vmatpush1.bf16.msra.mxu0 %v11543_v25 }
 0x3a9   : > { %v3073_v21 = vld [vmem:[#allocation9 + $0x1480] sm:$0xff]  ;;  %v11536_v30 = vcombine.high %v2945_v60, %v2949_v19  ;;  %7367 = vmatprep.subr.bf16.mxu1 %v11672_v22  ;;  %v11535_v36 = vcombine.low %v2945_v60, %v2949_v19 }
 0x3aa   : > { %v3077_v23 = vld [vmem:[#allocation9 + $0x14a0] sm:$0xff]  ;;  %7368 = vmatpush1.bf16.msra.mxu1 %v11671_v26 }
 0x3ab   : > { %v2937_v31 = vld [vmem:[#allocation9 + $0x1040] sm:$0xff]  ;;  %v11664_v34 = vcombine.high %v3073_v21, %v3077_v23  ;;  %7328 = vmatprep.subr.bf16.mxu0 %v11536_v30  ;;  %v11663_v37 = vcombine.low %v3073_v21, %v3077_v23 }
 0x3ac   : > { %v2941_v32 = vld [vmem:[#allocation9 + $0x1060] sm:$0xff]  ;;  %7329 = vmatpush1.bf16.msra.mxu0 %v11535_v36 }
 0x3ad   : > { %v3065_v16 = vld [vmem:[#allocation9 + $0x1440] sm:$0xff]  ;;  %v11528_v40 = vcombine.high %v2937_v31, %v2941_v32  ;;  %7369 = vmatprep.subr.bf16.mxu1 %v11664_v34  ;;  %v11527_v47 = vcombine.low %v2937_v31, %v2941_v32 }
 0x3ae   : > { %v3069_v35 = vld [vmem:[#allocation9 + $0x1460] sm:$0xff]  ;;  %7370 = vmatpush1.bf16.msra.mxu1 %v11663_v37 }
 0x3af   : > { %v2929_v18 = vld [vmem:[#allocation9 + $0x1000] sm:$0xff]  ;;  %v11656_v45 = vcombine.high %v3065_v16, %v3069_v35  ;;  %7330 = vmatprep.subr.bf16.mxu0 %v11528_v40  ;;  %v11655_v28 = vcombine.low %v3065_v16, %v3069_v35 }
 0x3b0   : > { %v2933_v42 = vld [vmem:[#allocation9 + $0x1020] sm:$0xff]  ;;  %7331 = vmatpush1.bf16.msra.mxu0 %v11527_v47 }
 0x3b1   : > { %v3057_v44 = vld [vmem:[#allocation9 + $0x1400] sm:$0xff]  ;;  %v11520_v51 = vcombine.high %v2929_v18, %v2933_v42  ;;  %7371 = vmatprep.subr.bf16.mxu1 %v11656_v45  ;;  %v11519_v57 = vcombine.low %v2929_v18, %v2933_v42 }
 0x3b2   : > { %v3061_v46 = vld [vmem:[#allocation9 + $0x1420] sm:$0xff]  ;;  %7372 = vmatpush1.bf16.msra.mxu1 %v11655_v28 }
 0x3b3   : > { %v3049_v52 = vld [vmem:[#allocation9 + $0x13c0] sm:$0xff]  ;;  %v11648_v55 = vcombine.high %v3057_v44, %v3061_v46  ;;  %7332 = vmatprep.subr.bf16.mxu0 %v11520_v51  ;;  %v11647_v59 = vcombine.low %v3057_v44, %v3061_v46 }
 0x3b4   : > { %v3053_v53 = vld [vmem:[#allocation9 + $0x13e0] sm:$0xff]  ;;  %7333 = vmatpush1.bf16.msra.mxu0 %v11519_v57 }
 0x3b5   : > { %v3177_v54 = vld [vmem:[#allocation9 + $0x17c0] sm:$0xff]  ;;  %v11640_v38 = vcombine.high %v3049_v52, %v3053_v53  ;;  %7373 = vmatprep.subr.bf16.mxu1 %v11648_v55  ;;  %v11639_v4 = vcombine.low %v3049_v52, %v3053_v53 }
 0x3b6   : > { %v3181_v56 = vld [vmem:[#allocation9 + $0x17e0] sm:$0xff]  ;;  %7374 = vmatpush1.bf16.msra.mxu1 %v11647_v59 }
 0x3b7   : > { %v3041_v61 = vld [vmem:[#allocation9 + $0x1380] sm:$0xff]  ;;  %v11768_v1 = vcombine.high %v3177_v54, %v3181_v56  ;;  %7334 = vmatprep.subr.bf16.mxu0 %v11640_v38  ;;  %v11767_v5 = vcombine.low %v3177_v54, %v3181_v56 }
 0x3b8   : > { %v3045_v62 = vld [vmem:[#allocation9 + $0x13a0] sm:$0xff]  ;;  %7335 = vmatpush2.bf16.msra.mxu0 %v11639_v4 }
 0x3b9   : > { %v3169_v41 = vld [vmem:[#allocation9 + $0x1780] sm:$0xff]  ;;  %v11632_v6 = vcombine.high %v3041_v61, %v3045_v62  ;;  %7375 = vmatprep.subr.bf16.mxu1 %v11768_v1  ;;  %v11631_v13 = vcombine.low %v3041_v61, %v3045_v62 }
 0x3ba   : > { %v3173_v3 = vld [vmem:[#allocation9 + $0x17a0] sm:$0xff]  ;;  %7376 = vmatpush2.bf16.msra.mxu1 %v11767_v5 }
 0x3bb   : > { %v3033_v7 = vld [vmem:[#allocation9 + $0x1340] sm:$0xff]  ;;  %v11760_v11 = vcombine.high %v3169_v41, %v3173_v3  ;;  %7336 = vmatprep.subr.bf16.mxu0 %v11632_v6  ;;  %v11759_v14 = vcombine.low %v3169_v41, %v3173_v3  ;;  %v2474_v6 = vld [vmem:[#allocation9 + $0x1c8] sm:$0xff] }
 0x3bc   : > { %v3037_v8 = vld [vmem:[#allocation9 + $0x1360] sm:$0xff]  ;;  %7337 = vmatpush2.bf16.msra.mxu0 %v11631_v13  ;;  %v13969_v13 = vrot.slane %v13944_v24, %v13855_v10 }
 0x3bd   : > { %v3161_v9 = vld [vmem:[#allocation9 + $0x1740] sm:$0xff]  ;;  %v11624_v15 = vcombine.high %v3033_v7, %v3037_v8  ;;  %7377 = vmatprep.subr.bf16.mxu1 %v11760_v11  ;;  %v11623_v23 = vcombine.low %v3033_v7, %v3037_v8  ;;  %v2478_v7 = vld [vmem:[#allocation9 + $0x1e8] sm:$0xff] }
 0x3be   : > { %v3165_v12 = vld [vmem:[#allocation9 + $0x1760] sm:$0xff]  ;;  %7378 = vmatpush2.bf16.msra.mxu1 %v11759_v14  ;;  %v2602_v8 = vld [vmem:[#allocation9 + $0x5c8] sm:$0xff] }
 0x3bf   : > { %v3025_v17 = vld [vmem:[#allocation9 + $0x1300] sm:$0xff]  ;;  %v11752_v21 = vcombine.high %v3161_v9, %v3165_v12  ;;  %7338 = vmatprep.subr.bf16.mxu0 %v11624_v15  ;;  %v11751_v25 = vcombine.low %v3161_v9, %v3165_v12  ;;  %v2606_v11 = vld [vmem:[#allocation9 + $0x5e8] sm:$0xff]  ;;  %v11066_v15 = vcombine.high %v2474_v6, %v2478_v7 }
 0x3c0   : > { %v3029_v60 = vld [vmem:[#allocation9 + $0x1320] sm:$0xff]  ;;  %7339 = vmatpush2.bf16.msra.mxu0 %v11623_v23  ;;  %v13973_v23 = vcombine.high %v13969_v13, %v13969_v13  ;;  %v11193_v10 = vcombine.low %v2602_v8, %v2606_v11 }
 0x3c1   : > { %v3153_v19 = vld [vmem:[#allocation9 + $0x1700] sm:$0xff]  ;;  %v11616_v26 = vcombine.high %v3025_v17, %v3029_v60  ;;  %7379 = vmatprep.subr.bf16.mxu1 %v11752_v21  ;;  %v11615_v35 = vcombine.low %v3025_v17, %v3029_v60  ;;  %v2466_v17 = vld [vmem:[#allocation9 + $0x188] sm:$0xff]  ;;  %v11194_v21 = vcombine.high %v2602_v8, %v2606_v11 }
 0x3c2   : > { %v3157_v22 = vld [vmem:[#allocation9 + $0x1720] sm:$0xff]  ;;  %7380 = vmatpush2.bf16.msra.mxu1 %v11751_v25  ;;  %v2470_v60 = vld [vmem:[#allocation9 + $0x1a8] sm:$0xff]  ;;  %v11065_v25 = vcombine.low %v2474_v6, %v2478_v7 }
 0x3c3   : > { %v3017_v30 = vld [vmem:[#allocation9 + $0x12c0] sm:$0xff]  ;;  %v11744_v16 = vcombine.high %v3153_v19, %v3157_v22  ;;  %7340 = vmatprep.subr.bf16.mxu0 %v11616_v26  ;;  %v11743_v36 = vcombine.low %v3153_v19, %v3157_v22  ;;  %v2594_v19 = vld [vmem:[#allocation9 + $0x588] sm:$0xff]  ;;  %v11058_v24 = vcombine.high %v2466_v17, %v2470_v60 }
 0x3c4   : > { %v3021_v31 = vld [vmem:[#allocation9 + $0x12e0] sm:$0xff]  ;;  %7341 = vmatpush2.bf16.msra.mxu0 %v11615_v35  ;;  %v2598_v22 = vld [vmem:[#allocation9 + $0x5a8] sm:$0xff] }
 0x3c5   : > { %v3145_v32 = vld [vmem:[#allocation9 + $0x16c0] sm:$0xff]  ;;  %v11608_v37 = vcombine.high %v3017_v30, %v3021_v31  ;;  %7381 = vmatprep.subr.bf16.mxu1 %v11744_v16  ;;  %v11607_v46 = vcombine.low %v3017_v30, %v3021_v31  ;;  %v2458_v26 = vld [vmem:[#allocation9 + $0x148] sm:$0xff]  ;;  %v11185_v35 = vcombine.low %v2594_v19, %v2598_v22 }
 0x3c6   : > { %v3149_v34 = vld [vmem:[#allocation9 + $0x16e0] sm:$0xff]  ;;  %7382 = vmatpush2.bf16.msra.mxu1 %v11743_v36  ;;  %v2462_v30 = vld [vmem:[#allocation9 + $0x168] sm:$0xff] }
 0x3c7   : > { %v3009_v40 = vld [vmem:[#allocation9 + $0x1280] sm:$0xff]  ;;  %v11736_v44 = vcombine.high %v3145_v32, %v3149_v34  ;;  %7342 = vmatprep.subr.bf16.mxu0 %v11608_v37  ;;  %v11735_v47 = vcombine.low %v3145_v32, %v3149_v34  ;;  %v2586_v31 = vld [vmem:[#allocation9 + $0x548] sm:$0xff]  ;;  %v11186_v32 = vcombine.high %v2594_v19, %v2598_v22  ;;  %v11057_v34 = vcombine.low %v2466_v17, %v2470_v60 }
 0x3c8   : > { %v3013_v18 = vld [vmem:[#allocation9 + $0x12a0] sm:$0xff]  ;;  %7343 = vmatpush2.bf16.msra.mxu0 %v11607_v46  ;;  %v2590_v16 = vld [vmem:[#allocation9 + $0x568] sm:$0xff]  ;;  %v11050_v36 = vcombine.high %v2458_v26, %v2462_v30 }
 0x3c9   : > { %v3137_v42 = vld [vmem:[#allocation9 + $0x1680] sm:$0xff]  ;;  %v11600_v28 = vcombine.high %v3009_v40, %v3013_v18  ;;  %7383 = vmatprep.subr.bf16.mxu1 %v11736_v44  ;;  %v11599_v56 = vcombine.low %v3009_v40, %v3013_v18  ;;  %v2450_v37 = vld [vmem:[#allocation9 + $0x108] sm:$0xff]  ;;  %v11177_v46 = vcombine.low %v2586_v31, %v2590_v16 }
 0x3ca   : > { %v3141_v45 = vld [vmem:[#allocation9 + $0x16a0] sm:$0xff]  ;;  %7384 = vmatpush2.bf16.msra.mxu1 %v11735_v47  ;;  %v2454_v40 = vld [vmem:[#allocation9 + $0x128] sm:$0xff] }
 0x3cb   : > { %v3001_v51 = vld [vmem:[#allocation9 + $0x1240] sm:$0xff]  ;;  %v11728_v54 = vcombine.high %v3137_v42, %v3141_v45  ;;  %7344 = vmatprep.subr.bf16.mxu0 %v11600_v28  ;;  %v11727_v57 = vcombine.low %v3137_v42, %v3141_v45  ;;  %v2578_v18 = vld [vmem:[#allocation9 + $0x508] sm:$0xff]  ;;  %v11178_v42 = vcombine.high %v2586_v31, %v2590_v16  ;;  %v11049_v45 = vcombine.low %v2458_v26, %v2462_v30 }
 0x3cc   : > { %v3005_v52 = vld [vmem:[#allocation9 + $0x1260] sm:$0xff]  ;;  %7345 = vmatpush2.bf16.msra.mxu0 %v11599_v56  ;;  %v2582_v44 = vld [vmem:[#allocation9 + $0x528] sm:$0xff]  ;;  %v11042_v47 = vcombine.high %v2450_v37, %v2454_v40 }
 0x3cd   : > { %v3129_v53 = vld [vmem:[#allocation9 + $0x1640] sm:$0xff]  ;;  %v11592_v59 = vcombine.high %v3001_v51, %v3005_v52  ;;  %7385 = vmatprep.subr.bf16.mxu1 %v11728_v54  ;;  %v11591_v3 = vcombine.low %v3001_v51, %v3005_v52  ;;  %v2442_v28 = vld [vmem:[#allocation9 + $0xc8] sm:$0xff]  ;;  %v11169_v56 = vcombine.low %v2578_v18, %v2582_v44 }
 0x3ce   : > { %v3133_v55 = vld [vmem:[#allocation9 + $0x1660] sm:$0xff]  ;;  %7386 = vmatpush2.bf16.msra.mxu1 %v11727_v57  ;;  %v2446_v51 = vld [vmem:[#allocation9 + $0xe8] sm:$0xff] }
 0x3cf   : > { %v2993_v38 = vld [vmem:[#allocation9 + $0x1200] sm:$0xff]  ;;  %v11720_v41 = vcombine.high %v3129_v53, %v3133_v55  ;;  %7346 = vmatprep.subr.bf16.mxu0 %v11592_v59  ;;  %v11719_v4 = vcombine.low %v3129_v53, %v3133_v55  ;;  %v2570_v52 = vld [vmem:[#allocation9 + $0x4c8] sm:$0xff]  ;;  %v11170_v53 = vcombine.high %v2578_v18, %v2582_v44  ;;  %v11041_v55 = vcombine.low %v2450_v37, %v2454_v40 }
 0x3d0   : > { %v2997_v61 = vld [vmem:[#allocation9 + $0x1220] sm:$0xff]  ;;  %7347 = vmatpush2.bf16.msra.mxu0 %v11591_v3  ;;  %v2574_v54 = vld [vmem:[#allocation9 + $0x4e8] sm:$0xff]  ;;  %v11034_v57 = vcombine.high %v2442_v28, %v2446_v51 }
 0x3d1   : > { %v3121_v62 = vld [vmem:[#allocation9 + $0x1600] sm:$0xff]  ;;  %v11584_v5 = vcombine.high %v2993_v38, %v2997_v61  ;;  %7387 = vmatprep.subr.bf16.mxu1 %v11720_v41  ;;  %v11583_v12 = vcombine.low %v2993_v38, %v2997_v61  ;;  %v2434_v59 = vld [vmem:[#allocation9 + $0x88] sm:$0xff]  ;;  %v11161_v3 = vcombine.low %v2570_v52, %v2574_v54 }
 0x3d2   : > { %v3125_v1 = vld [vmem:[#allocation9 + $0x1620] sm:$0xff]  ;;  %7388 = vmatpush2.bf16.msra.mxu1 %v11719_v4  ;;  %v2438_v38 = vld [vmem:[#allocation9 + $0xa8] sm:$0xff] }
 0x3d3   : > { %v11712_v9 = vcombine.high %v3121_v62, %v3125_v1  ;;  %7348 = vmatprep.subr.bf16.mxu0 %v11584_v5  ;;  %v11711_v14 = vcombine.low %v3121_v62, %v3125_v1  ;;  %v2562_v61 = vld [vmem:[#allocation9 + $0x488] sm:$0xff]  ;;  %v11162_v62 = vcombine.high %v2570_v52, %v2574_v54  ;;  %v11033_v1 = vcombine.low %v2442_v28, %v2446_v51 }
 0x3d4   : > { %7349 = vmatpush2.bf16.msra.mxu0 %v11583_v12  ;;  %v2566_v41 = vld [vmem:[#allocation9 + $0x4a8] sm:$0xff]  ;;  %v11026_v4 = vcombine.high %v2434_v59, %v2438_v38  ;;  %v11025_v11 = vcombine.low %v2434_v59, %v2438_v38 }
 0x3d5   : > { %7389 = vmatprep.subr.bf16.mxu1 %v11712_v9  ;;  %7400 = vmatprep.subr.bf16.mxu0 %v11066_v15  ;;  %v2426_v5 = vld [vmem:[#allocation9 + $0x48] sm:$0xff]  ;;  %v11154_v8 = vcombine.high %v2562_v61, %v2566_v41  ;;  %v11153_v12 = vcombine.low %v2562_v61, %v2566_v41 }
 0x3d6   : > { %7390 = vmatpush2.bf16.msra.mxu1 %v11711_v14  ;;  %v2430_v6 = vld [vmem:[#allocation9 + $0x68] sm:$0xff] }
 0x3d7   : > { %7441 = vmatprep.subr.bf16.mxu1 %v11194_v21  ;;  %7351 = vmatmul.mubr.bf16.vlgmr.msra.gmra.mxu0 %v13969_v13  ;;  %v2554_v7 = vld [vmem:[#allocation9 + $0x448] sm:$0xff]  ;;  %v11018_v14 = vcombine.high %v2426_v5, %v2430_v6  ;;  %v11017_v22 = vcombine.low %v2426_v5, %v2430_v6 }
 0x3d8   : > { %7401 = vmatpush1.bf16.msra.mxu0 %v11065_v25  ;;  %7432 = vmatprep.mubr.bf16.mxu0 %v13866_v29  ;;  %v2558_v9 = vld [vmem:[#allocation9 + $0x468] sm:$0xff] }
 0x3d9   : > { %7392 = vmatmul.mubr.bf16.vlgmr.msra.gmra.mxu1 %v13973_v23  ;;  %7402 = vmatprep.subr.bf16.mxu0 %v11058_v24  ;;  %v2418_v15 = vld [vmem:[#allocation9 + $0x8] sm:$0xff]  ;;  %v11146_v19 = vcombine.high %v2554_v7, %v2558_v9  ;;  %v11145_v25 = vcombine.low %v2554_v7, %v2558_v9 }
 0x3da   : > { %7442 = vmatpush1.bf16.msra.mxu1 %v11193_v10  ;;  %7473 = vmatprep.mubr.bf16.mxu1 %v13871_v33  ;;  %v2422_v17 = vld [vmem:[#allocation9 + $0x28] sm:$0xff] }
 0x3db   : > { %7443 = vmatprep.subr.bf16.mxu1 %v11186_v32  ;;  %v2546_v60 = vld [vmem:[#allocation9 + $0x408] sm:$0xff]  ;;  %v11010_v10 = vcombine.high %v2418_v15, %v2422_v17  ;;  %v11009_v16 = vcombine.low %v2418_v15, %v2422_v17 }
 0x3dc   : > { %7403 = vmatpush1.bf16.msra.mxu0 %v11057_v34  ;;  %v2550_v21 = vld [vmem:[#allocation9 + $0x428] sm:$0xff] }
 0x3dd   : > { %7404 = vmatprep.subr.bf16.mxu0 %v11050_v36  ;;  %v2538_v24 = vld [vmem:[#allocation9 + $0x3c8] sm:$0xff]  ;;  %v11138_v31 = vcombine.high %v2546_v60, %v2550_v21  ;;  %v11137_v34 = vcombine.low %v2546_v60, %v2550_v21 }
 0x3de   : > { %7444 = vmatpush1.bf16.msra.mxu1 %v11185_v35  ;;  %v2542_v26 = vld [vmem:[#allocation9 + $0x3e8] sm:$0xff] }
 0x3df   : > { %7445 = vmatprep.subr.bf16.mxu1 %v11178_v42  ;;  %v2666_v30 = vld [vmem:[#allocation9 + $0x7c8] sm:$0xff]  ;;  %v11130_v35 = vcombine.high %v2538_v24, %v2542_v26  ;;  %v11129_v44 = vcombine.low %v2538_v24, %v2542_v26 }
 0x3e0   : > { %7405 = vmatpush1.bf16.msra.mxu0 %v11049_v45  ;;  %v2670_v32 = vld [vmem:[#allocation9 + $0x7e8] sm:$0xff] }
 0x3e1   : > { %7406 = vmatprep.subr.bf16.mxu0 %v11042_v47  ;;  %v2530_v36 = vld [vmem:[#allocation9 + $0x388] sm:$0xff]  ;;  %v11258_v18 = vcombine.high %v2666_v30, %v2670_v32  ;;  %v11257_v45 = vcombine.low %v2666_v30, %v2670_v32 }
 0x3e2   : > { %7446 = vmatpush1.bf16.msra.mxu1 %v11177_v46  ;;  %v2534_v37 = vld [vmem:[#allocation9 + $0x3a8] sm:$0xff] }
 0x3e3   : > { %7447 = vmatprep.subr.bf16.mxu1 %v11170_v53  ;;  %v2658_v40 = vld [vmem:[#allocation9 + $0x788] sm:$0xff]  ;;  %v11122_v46 = vcombine.high %v2530_v36, %v2534_v37  ;;  %v11121_v54 = vcombine.low %v2530_v36, %v2534_v37 }
 0x3e4   : > { %7407 = vmatpush1.bf16.msra.mxu0 %v11041_v55  ;;  %v2662_v42 = vld [vmem:[#allocation9 + $0x7a8] sm:$0xff] }
 0x3e5   : > { %7408 = vmatprep.subr.bf16.mxu0 %v11034_v57  ;;  %v2522_v47 = vld [vmem:[#allocation9 + $0x348] sm:$0xff]  ;;  %v11250_v52 = vcombine.high %v2658_v40, %v2662_v42  ;;  %v11249_v55 = vcombine.low %v2658_v40, %v2662_v42 }
 0x3e6   : > { %7448 = vmatpush1.bf16.msra.mxu1 %v11169_v56  ;;  %v2526_v28 = vld [vmem:[#allocation9 + $0x368] sm:$0xff] }
 0x3e7   : > { %7449 = vmatprep.subr.bf16.mxu1 %v11162_v62  ;;  %v2650_v51 = vld [vmem:[#allocation9 + $0x748] sm:$0xff]  ;;  %v11114_v56 = vcombine.high %v2522_v47, %v2526_v28  ;;  %v11113_v41 = vcombine.low %v2522_v47, %v2526_v28 }
 0x3e8   : > { %7409 = vmatpush1.bf16.msra.mxu0 %v11033_v1  ;;  %v2654_v53 = vld [vmem:[#allocation9 + $0x768] sm:$0xff] }
 0x3e9   : > { %7410 = vmatprep.subr.bf16.mxu0 %v11026_v4  ;;  %v2514_v57 = vld [vmem:[#allocation9 + $0x308] sm:$0xff]  ;;  %v11242_v61 = vcombine.high %v2650_v51, %v2654_v53  ;;  %v11241_v1 = vcombine.low %v2650_v51, %v2654_v53 }
 0x3ea   : > { %7450 = vmatpush1.bf16.msra.mxu1 %v11161_v3  ;;  %v2518_v59 = vld [vmem:[#allocation9 + $0x328] sm:$0xff] }
 0x3eb   : > { %7451 = vmatprep.subr.bf16.mxu1 %v11154_v8  ;;  %v2642_v38 = vld [vmem:[#allocation9 + $0x708] sm:$0xff]  ;;  %v11106_v3 = vcombine.high %v2514_v57, %v2518_v59  ;;  %v11105_v9 = vcombine.low %v2514_v57, %v2518_v59 }
 0x3ec   : > { %7411 = vmatpush1.bf16.msra.mxu0 %v11025_v11  ;;  %v2646_v62 = vld [vmem:[#allocation9 + $0x728] sm:$0xff] }
 0x3ed   : > { %7412 = vmatprep.subr.bf16.mxu0 %v11018_v14  ;;  %v2506_v4 = vld [vmem:[#allocation9 + $0x2c8] sm:$0xff]  ;;  %v11234_v7 = vcombine.high %v2642_v38, %v2646_v62  ;;  %v11233_v11 = vcombine.low %v2642_v38, %v2646_v62  ;;  %v13983_v38 = vsub.s32 1, %v13852_v0 }
 0x3ee   : > { %7452 = vmatpush1.bf16.msra.mxu1 %v11153_v12  ;;  %v2510_v5 = vld [vmem:[#allocation9 + $0x2e8] sm:$0xff] }
 0x3ef   : > { %7453 = vmatprep.subr.bf16.mxu1 %v11146_v19  ;;  %v2634_v6 = vld [vmem:[#allocation9 + $0x6c8] sm:$0xff]  ;;  %v11098_v12 = vcombine.high %v2506_v4, %v2510_v5  ;;  %v11097_v21 = vcombine.low %v2506_v4, %v2510_v5 }
 0x3f0   : > { %7413 = vmatpush1.bf16.msra.mxu0 %v11017_v22  ;;  %v2638_v8 = vld [vmem:[#allocation9 + $0x6e8] sm:$0xff] }
 0x3f1   : > { %7414 = vmatprep.subr.bf16.mxu0 %v11010_v10  ;;  %v2498_v14 = vld [vmem:[#allocation9 + $0x288] sm:$0xff]  ;;  %v11226_v60 = vcombine.high %v2634_v6, %v2638_v8  ;;  %v11225_v22 = vcombine.low %v2634_v6, %v2638_v8 }
 0x3f2   : > { %7454 = vmatpush1.bf16.msra.mxu1 %v11145_v25  ;;  %v2502_v15 = vld [vmem:[#allocation9 + $0x2a8] sm:$0xff] }
 0x3f3   : > { %7455 = vmatprep.subr.bf16.mxu1 %v11138_v31  ;;  %v2626_v17 = vld [vmem:[#allocation9 + $0x688] sm:$0xff]  ;;  %v11090_v25 = vcombine.high %v2498_v14, %v2502_v15  ;;  %v11089_v32 = vcombine.low %v2498_v14, %v2502_v15 }
 0x3f4   : > { %7415 = vmatpush1.bf16.msra.mxu0 %v11009_v16  ;;  %v2630_v19 = vld [vmem:[#allocation9 + $0x6a8] sm:$0xff] }
 0x3f5   : > { %7416 = vmatprep.subr.bf16.mxu0 %v11130_v35  ;;  %v2490_v10 = vld [vmem:[#allocation9 + $0x248] sm:$0xff]  ;;  %v11218_v30 = vcombine.high %v2626_v17, %v2630_v19  ;;  %v11217_v16 = vcombine.low %v2626_v17, %v2630_v19 }
 0x3f6   : > { %7456 = vmatpush1.bf16.msra.mxu1 %v11137_v34  ;;  %v2494_v24 = vld [vmem:[#allocation9 + $0x268] sm:$0xff] }
 0x3f7   : > { %7457 = vmatprep.subr.bf16.mxu1 %v11258_v18  ;;  %v2618_v26 = vld [vmem:[#allocation9 + $0x648] sm:$0xff]  ;;  %v11082_v34 = vcombine.high %v2490_v10, %v2494_v24  ;;  %v11081_v42 = vcombine.low %v2490_v10, %v2494_v24 }
 0x3f8   : > { %7417 = vmatpush2.bf16.msra.mxu0 %v11129_v44  ;;  %v2622_v31 = vld [vmem:[#allocation9 + $0x668] sm:$0xff] }
 0x3f9   : > { %7418 = vmatprep.subr.bf16.mxu0 %v11122_v46  ;;  %v11210_v35 = vcombine.high %v2618_v26, %v2622_v31  ;;  %v2482_v36 = vld [vmem:[#allocation9 + $0x208] sm:$0xff]  ;;  %v11209_v44 = vcombine.low %v2618_v26, %v2622_v31 }
 0x3fa   : > { %7458 = vmatpush2.bf16.msra.mxu1 %v11257_v45  ;;  %v2486_v37 = vld [vmem:[#allocation9 + $0x228] sm:$0xff] }
 0x3fb   : > { %7459 = vmatprep.subr.bf16.mxu1 %v11250_v52  ;;  %v2610_v40 = vld [vmem:[#allocation9 + $0x608] sm:$0xff]  ;;  %v11074_v45 = vcombine.high %v2482_v36, %v2486_v37  ;;  %v11073_v53 = vcombine.low %v2482_v36, %v2486_v37 }
 0x3fc   : > { %7419 = vmatpush2.bf16.msra.mxu0 %v11121_v54  ;;  %v2614_v18 = vld [vmem:[#allocation9 + $0x628] sm:$0xff]  ;;  %v13980_v54 = vsub.s32 0, %v13852_v0 }
 0x3fd   : > { %7420 = vmatprep.subr.bf16.mxu0 %v11114_v56  ;;  %v11202_v46 = vcombine.high %v2610_v40, %v2614_v18  ;;  %v2730_v47 = vld [vmem:[#allocation9 + $0x9c8] sm:$0xff]  ;;  %v3185_v56 = vld [vmem:[#allocation10] sm:$0xff] }
 0x3fe   : > { %7460 = vmatpush2.bf16.msra.mxu1 %v11249_v55  ;;  %v2734_v28 = vld [vmem:[#allocation9 + $0x9e8] sm:$0xff]  ;;  %v11201_v55 = vcombine.low %v2610_v40, %v2614_v18 }
 0x3ff   : > { %7461 = vmatprep.subr.bf16.mxu1 %v11242_v61  ;;  %v2858_v51 = vld [vmem:[#allocation9 + $0xdc8] sm:$0xff]  ;;  %v11322_v57 = vcombine.high %v2730_v47, %v2734_v28  ;;  %v11321_v4 = vcombine.low %v2730_v47, %v2734_v28 }
 0x400   : > { %7421 = vmatpush2.bf16.msra.mxu0 %v11113_v41  ;;  %v2862_v52 = vld [vmem:[#allocation9 + $0xde8] sm:$0xff] }
 0x401   : > { %7422 = vmatprep.subr.bf16.mxu0 %v11106_v3  ;;  %v11450_v59 = vcombine.high %v2858_v51, %v2862_v52  ;;  %v2722_v61 = vld [vmem:[#allocation9 + $0x988] sm:$0xff]  ;;  %v3190_v3 = vrot.slane %v3185_v56, %v13980_v54  ;;  %v11449_v5 = vcombine.low %v2858_v51, %v2862_v52 }
 0x402   : > { %7462 = vmatpush2.bf16.msra.mxu1 %v11241_v1  ;;  %v2726_v62 = vld [vmem:[#allocation9 + $0x9a8] sm:$0xff] }
 0x403   : > { %7463 = vmatprep.subr.bf16.mxu1 %v11234_v7  ;;  %v2850_v41 = vld [vmem:[#allocation9 + $0xd88] sm:$0xff]  ;;  %v11314_v6 = vcombine.high %v2722_v61, %v2726_v62  ;;  %v3194_v7 = vrot.slane %v3185_v56, %v13983_v38  ;;  %v11313_v19 = vcombine.low %v2722_v61, %v2726_v62 }
 0x404   : > { %7423 = vmatpush2.bf16.msra.mxu0 %v11105_v9  ;;  %v2854_v1 = vld [vmem:[#allocation9 + $0xda8] sm:$0xff] }
 0x405   : > { %7424 = vmatprep.subr.bf16.mxu0 %v11098_v12  ;;  %v11442_v8 = vcombine.high %v2850_v41, %v2854_v1  ;;  %v2714_v9 = vld [vmem:[#allocation9 + $0x948] sm:$0xff] }
 0x406   : > { %7464 = vmatpush2.bf16.msra.mxu1 %v11233_v11  ;;  %v2718_v11 = vld [vmem:[#allocation9 + $0x968] sm:$0xff] }
 0x407   : > { %7465 = vmatprep.subr.bf16.mxu1 %v11226_v60  ;;  %v2842_v14 = vld [vmem:[#allocation9 + $0xd48] sm:$0xff]  ;;  %v11305_v40 = vcombine.low %v2714_v9, %v2718_v11 }
 0x408   : > { %7425 = vmatpush2.bf16.msra.mxu0 %v11097_v21  ;;  %v2846_v15 = vld [vmem:[#allocation9 + $0xd68] sm:$0xff] }
 0x409   : > { %7426 = vmatprep.subr.bf16.mxu0 %v11090_v25  ;;  %v11306_v25 = vcombine.high %v2714_v9, %v2718_v11  ;;  %v2706_v31 = vld [vmem:[#allocation9 + $0x908] sm:$0xff] }
 0x40a   : > { %7466 = vmatpush2.bf16.msra.mxu1 %v11225_v22  ;;  %v11441_v22 = vcombine.low %v2850_v41, %v2854_v1  ;;  %v2698_v47 = vld [vmem:[#allocation9 + $0x8c8] sm:$0xff] }
 0x40b   : > { %7467 = vmatprep.subr.bf16.mxu1 %v11218_v30  ;;  %v11434_v30 = vcombine.high %v2842_v14, %v2846_v15  ;;  %v2702_v28 = vld [vmem:[#allocation9 + $0x8e8] sm:$0xff] }
 0x40c   : > { %7427 = vmatpush2.bf16.msra.mxu0 %v11089_v32  ;;  %v2710_v32 = vld [vmem:[#allocation9 + $0x928] sm:$0xff]  ;;  %v11290_v56 = vcombine.high %v2698_v47, %v2702_v28  ;;  %v11289_v1 = vcombine.low %v2698_v47, %v2702_v28 }
 0x40d   : > { %7428 = vmatprep.subr.bf16.mxu0 %v11082_v34  ;;  %v2834_v34 = vld [vmem:[#allocation9 + $0xd08] sm:$0xff] }
 0x40e   : > { %7468 = vmatpush2.bf16.msra.mxu1 %v11217_v16  ;;  %v2826_v51 = vld [vmem:[#allocation9 + $0xcc8] sm:$0xff] }
 0x40f   : > { %7469 = vmatprep.subr.bf16.mxu1 %v11210_v35  ;;  %v2838_v35 = vld [vmem:[#allocation9 + $0xd28] sm:$0xff] }
 0x410   : > { %7429 = vmatpush2.bf16.msra.mxu0 %v11081_v42  ;;  %v11433_v42 = vcombine.low %v2842_v14, %v2846_v15  ;;  %v2830_v52 = vld [vmem:[#allocation9 + $0xce8] sm:$0xff] }
 0x411   : > { %7430 = vmatprep.subr.bf16.mxu0 %v11074_v45  ;;  %v2694_v61 = vld [vmem:[#allocation9 + $0x8a8] sm:$0xff] }
 0x412   : > { %7470 = vmatpush2.bf16.msra.mxu1 %v11209_v44  ;;  %v11298_v44 = vcombine.high %v2706_v31, %v2710_v32  ;;  %v2818_v62 = vld [vmem:[#allocation9 + $0xc88] sm:$0xff] }
 0x413   : > { %7471 = vmatprep.subr.bf16.mxu1 %v11202_v46  ;;  %v11426_v46 = vcombine.high %v2834_v34, %v2838_v35  ;;  %v2822_v41 = vld [vmem:[#allocation9 + $0xca8] sm:$0xff] }
 0x414   : > { %7431 = vmatpush2.bf16.msra.mxu0 %v11073_v53  ;;  %v11297_v53 = vcombine.low %v2706_v31, %v2710_v32  ;;  %v2814_v9 = vld [vmem:[#allocation9 + $0xc68] sm:$0xff] }
 0x415   : > { %7482 = vmatprep.subr.bf16.mxu0 %v11322_v57  ;;  %v7188_v12 = vpop.f32.mrf.mxu0  ;;  %v11418_v57 = vcombine.high %v2826_v51, %v2830_v52  ;;  %v2798_v31 = vld [vmem:[#allocation9 + $0xbe8] sm:$0xff] }
 0x416   : > { %7472 = vmatpush2.bf16.msra.mxu1 %v11201_v55  ;;  %v7189_v17 = vadd.f32 %v7188_v12, %v3190_v3  ;;  %v11425_v55 = vcombine.low %v2834_v34, %v2838_v35  ;;  %v11417_v3 = vcombine.low %v2826_v51, %v2830_v52  ;;  %v11409_v12 = vcombine.low %v2818_v62, %v2822_v41  ;;  %v2922_v32 = vld [vmem:[#allocation9 + $0xfc8] sm:$0xff] }
 0x417   : > { %7523 = vmatprep.subr.bf16.mxu1 %v11450_v59  ;;  %7433 = vmatmul.mubr.bf16.vlgmr.msra.gmra.mxu0 %v13883_v43  ;;  %v7229_v60 = vpop.f32.mrf.mxu1  ;;  %v7190_v21 = vpop.f32.mrf.mxu0  ;;  %v2690_v59 = vld [vmem:[#allocation9 + $0x888] sm:$0xff] }
 0x418   : > { %7483 = vmatpush1.bf16.msra.mxu0 %v11321_v4  ;;  %v13989_v10 = vadd.f32 %v7229_v60, %v7189_v17  ;;  %v7191_v24 = vadd.f32 %v7190_v21, %v3194_v7  ;;  %7514 = vmatprep.mubr.bf16.mxu0 %v13887_v50  ;;  %v11282_v4 = vcombine.high %v2690_v59, %v2694_v61  ;;  %v2686_v7 = vld [vmem:[#allocation9 + $0x868] sm:$0xff] }
 0x419   : > { %7474 = vmatmul.mubr.bf16.vlgmr.msra.gmra.mxu1 %v13893_v20  ;;  %7484 = vmatprep.subr.bf16.mxu0 %v11314_v6  ;;  %v7231_v26 = vpop.f32.mrf.mxu1  ;;  %v7192_v16 = vpop.f32.mrf.mxu0  ;;  %v2682_v6 = vld [vmem:[#allocation9 + $0x848] sm:$0xff]  ;;  %v11281_v11 = vcombine.low %v2690_v59, %v2694_v61 }
 0x41a   : > { %7524 = vmatpush1.bf16.msra.mxu1 %v11449_v5  ;;  %7555 = vmatprep.mubr.bf16.mxu1 %v13902_v2  ;;  %v13993_v36 = vadd.f32 %v7231_v26, %v7191_v24  ;;  %v11410_v5 = vcombine.high %v2818_v62, %v2822_v41  ;;  %v11274_v14 = vcombine.high %v2682_v6, %v2686_v7  ;;  %v2674_v17 = vld [vmem:[#allocation9 + $0x808] sm:$0xff] }
 0x41b   : > { %7525 = vmatprep.subr.bf16.mxu1 %v11442_v8  ;;  %v7233_v37 = vpop.f32.mrf.mxu1  ;;  %v7193_v18 = vpop.f32.mrf.mxu0  ;;  %v2810_v8 = vld [vmem:[#allocation9 + $0xc48] sm:$0xff] }
 0x41c   : > { %7485 = vmatpush1.bf16.msra.mxu0 %v11313_v19  ;;  %v11402_v15 = vcombine.high %v2810_v8, %v2814_v9  ;;  %v2678_v60 = vld [vmem:[#allocation9 + $0x828] sm:$0xff] }
 0x41d   : > { %7486 = vmatprep.subr.bf16.mxu0 %v11306_v25  ;;  %v7234_v45 = vpop.f32.mrf.mxu1  ;;  %v2802_v19 = vld [vmem:[#allocation9 + $0xc08] sm:$0xff]  ;;  %v11401_v25 = vcombine.low %v2810_v8, %v2814_v9  ;;  %v11266_v24 = vcombine.high %v2674_v17, %v2678_v60  ;;  %v11265_v34 = vcombine.low %v2674_v17, %v2678_v60 }
 0x41e   : > { %7526 = vmatpush1.bf16.msra.mxu1 %v11441_v22  ;;  %v2806_v21 = vld [vmem:[#allocation9 + $0xc28] sm:$0xff]  ;;  %v11273_v22 = vcombine.low %v2682_v6, %v2686_v7 }
 0x41f   : > { %7527 = vmatprep.subr.bf16.mxu1 %v11434_v30  ;;  %v11394_v26 = vcombine.high %v2802_v19, %v2806_v21  ;;  %v2794_v30 = vld [vmem:[#allocation9 + $0xbc8] sm:$0xff]  ;;  %v11393_v35 = vcombine.low %v2802_v19, %v2806_v21 }
 0x420   : > { %7487 = vmatpush1.bf16.msra.mxu0 %v11305_v40  ;;  %v2926_v16 = vld [vmem:[#allocation9 + $0xfe8] sm:$0xff]  ;;  %v11386_v37 = vcombine.high %v2794_v30, %v2798_v31 }
 0x421   : > { %7488 = vmatprep.subr.bf16.mxu0 %v11298_v44  ;;  %v11514_v40 = vcombine.high %v2922_v32, %v2926_v16  ;;  %v2786_v18 = vld [vmem:[#allocation9 + $0xb88] sm:$0xff]  ;;  %v11513_v47 = vcombine.low %v2922_v32, %v2926_v16 }
 0x422   : > { %7528 = vmatpush1.bf16.msra.mxu1 %v11433_v42  ;;  %v2790_v42 = vld [vmem:[#allocation9 + $0xba8] sm:$0xff] }
 0x423   : > { %7529 = vmatprep.subr.bf16.mxu1 %v11426_v46  ;;  %v2914_v44 = vld [vmem:[#allocation9 + $0xf88] sm:$0xff]  ;;  %v11385_v46 = vcombine.low %v2794_v30, %v2798_v31  ;;  %v11378_v28 = vcombine.high %v2786_v18, %v2790_v42 }
 0x424   : > { %7489 = vmatpush1.bf16.msra.mxu0 %v11297_v53  ;;  %v2918_v45 = vld [vmem:[#allocation9 + $0xfa8] sm:$0xff] }
 0x425   : > { %7490 = vmatprep.subr.bf16.mxu0 %v11290_v56  ;;  %v11506_v51 = vcombine.high %v2914_v44, %v2918_v45  ;;  %v2778_v52 = vld [vmem:[#allocation9 + $0xb48] sm:$0xff]  ;;  %v11505_v59 = vcombine.low %v2914_v44, %v2918_v45 }
 0x426   : > { %7530 = vmatpush1.bf16.msra.mxu1 %v11425_v55  ;;  %v2782_v53 = vld [vmem:[#allocation9 + $0xb68] sm:$0xff] }
 0x427   : > { %7531 = vmatprep.subr.bf16.mxu1 %v11418_v57  ;;  %v2906_v55 = vld [vmem:[#allocation9 + $0xf48] sm:$0xff]  ;;  %v11377_v57 = vcombine.low %v2786_v18, %v2790_v42  ;;  %v11370_v61 = vcombine.high %v2778_v52, %v2782_v53 }
 0x428   : > { %7491 = vmatpush1.bf16.msra.mxu0 %v11289_v1  ;;  %v2910_v56 = vld [vmem:[#allocation9 + $0xf68] sm:$0xff] }
 0x429   : > { %7492 = vmatprep.subr.bf16.mxu0 %v11282_v4  ;;  %v11498_v62 = vcombine.high %v2906_v55, %v2910_v56  ;;  %v2770_v41 = vld [vmem:[#allocation9 + $0xb08] sm:$0xff]  ;;  %v11497_v6 = vcombine.low %v2906_v55, %v2910_v56 }
 0x42a   : > { %7532 = vmatpush1.bf16.msra.mxu1 %v11417_v3  ;;  %v2774_v1 = vld [vmem:[#allocation9 + $0xb28] sm:$0xff] }
 0x42b   : > { %7533 = vmatprep.subr.bf16.mxu1 %v11410_v5  ;;  %v2898_v3 = vld [vmem:[#allocation9 + $0xf08] sm:$0xff]  ;;  %v11369_v5 = vcombine.low %v2778_v52, %v2782_v53  ;;  %v11362_v7 = vcombine.high %v2770_v41, %v2774_v1 }
 0x42c   : > { %7493 = vmatpush1.bf16.msra.mxu0 %v11281_v11  ;;  %v2902_v4 = vld [vmem:[#allocation9 + $0xf28] sm:$0xff] }
 0x42d   : > { %7494 = vmatprep.subr.bf16.mxu0 %v11274_v14  ;;  %v11490_v8 = vcombine.high %v2898_v3, %v2902_v4  ;;  %v2762_v9 = vld [vmem:[#allocation9 + $0xac8] sm:$0xff]  ;;  %v11489_v17 = vcombine.low %v2898_v3, %v2902_v4 }
 0x42e   : > { %7534 = vmatpush1.bf16.msra.mxu1 %v11409_v12  ;;  %v2766_v11 = vld [vmem:[#allocation9 + $0xae8] sm:$0xff] }
 0x42f   : > { %7535 = vmatprep.subr.bf16.mxu1 %v11402_v15  ;;  %v2890_v12 = vld [vmem:[#allocation9 + $0xec8] sm:$0xff]  ;;  %v11361_v15 = vcombine.low %v2770_v41, %v2774_v1  ;;  %v11354_v60 = vcombine.high %v2762_v9, %v2766_v11 }
 0x430   : > { %7495 = vmatpush1.bf16.msra.mxu0 %v11273_v22  ;;  %v2894_v14 = vld [vmem:[#allocation9 + $0xee8] sm:$0xff] }
 0x431   : > { %7496 = vmatprep.subr.bf16.mxu0 %v11266_v24  ;;  %v11482_v19 = vcombine.high %v2890_v12, %v2894_v14  ;;  %v2754_v21 = vld [vmem:[#allocation9 + $0xa88] sm:$0xff]  ;;  %v11481_v30 = vcombine.low %v2890_v12, %v2894_v14 }
 0x432   : > { %7536 = vmatpush1.bf16.msra.mxu1 %v11401_v25  ;;  %v2758_v22 = vld [vmem:[#allocation9 + $0xaa8] sm:$0xff] }
 0x433   : > { %7537 = vmatprep.subr.bf16.mxu1 %v11394_v26  ;;  %v2882_v25 = vld [vmem:[#allocation9 + $0xe88] sm:$0xff]  ;;  %v11353_v26 = vcombine.low %v2762_v9, %v2766_v11  ;;  %v11346_v31 = vcombine.high %v2754_v21, %v2758_v22 }
 0x434   : > { %7497 = vmatpush1.bf16.msra.mxu0 %v11265_v34  ;;  %v2886_v24 = vld [vmem:[#allocation9 + $0xea8] sm:$0xff] }
 0x435   : > { %7498 = vmatprep.subr.bf16.mxu0 %v11386_v37  ;;  %v11474_v32 = vcombine.high %v2882_v25, %v2886_v24  ;;  %v2746_v16 = vld [vmem:[#allocation9 + $0xa48] sm:$0xff]  ;;  %v11473_v18 = vcombine.low %v2882_v25, %v2886_v24 }
 0x436   : > { %7538 = vmatpush1.bf16.msra.mxu1 %v11393_v35  ;;  %v2750_v34 = vld [vmem:[#allocation9 + $0xa68] sm:$0xff] }
 0x437   : > { %7539 = vmatprep.subr.bf16.mxu1 %v11514_v40  ;;  %v2874_v35 = vld [vmem:[#allocation9 + $0xe48] sm:$0xff]  ;;  %v11345_v40 = vcombine.low %v2754_v21, %v2758_v22  ;;  %v11338_v42 = vcombine.high %v2746_v16, %v2750_v34 }
 0x438   : > { %7499 = vmatpush2.bf16.msra.mxu0 %v11385_v46  ;;  %v2878_v37 = vld [vmem:[#allocation9 + $0xe68] sm:$0xff] }
 0x439   : > { %7500 = vmatprep.subr.bf16.mxu0 %v11378_v28  ;;  %v11466_v44 = vcombine.high %v2874_v35, %v2878_v37  ;;  %v2738_v45 = vld [vmem:[#allocation9 + $0xa08] sm:$0xff]  ;;  %v11465_v52 = vcombine.low %v2874_v35, %v2878_v37 }
 0x43a   : > { %7540 = vmatpush2.bf16.msra.mxu1 %v11513_v47  ;;  %v2742_v46 = vld [vmem:[#allocation9 + $0xa28] sm:$0xff] }
 0x43b   : > { %7541 = vmatprep.subr.bf16.mxu1 %v11506_v51  ;;  %v2866_v47 = vld [vmem:[#allocation9 + $0xe08] sm:$0xff]  ;;  %v11337_v51 = vcombine.low %v2746_v16, %v2750_v34  ;;  %v11330_v53 = vcombine.high %v2738_v45, %v2742_v46 }
 0x43c   : > { %7501 = vmatpush2.bf16.msra.mxu0 %v11377_v57  ;;  %v2870_v28 = vld [vmem:[#allocation9 + $0xe28] sm:$0xff] }
 0x43d   : > { %7502 = vmatprep.subr.bf16.mxu0 %v11370_v61  ;;  %v11458_v55 = vcombine.high %v2866_v47, %v2870_v28  ;;  %v2986_v56 = vld [vmem:[#allocation9 + $0x11c8] sm:$0xff]  ;;  %v11457_v41 = vcombine.low %v2866_v47, %v2870_v28 }
 0x43e   : > { %7542 = vmatpush2.bf16.msra.mxu1 %v11505_v59  ;;  %v2990_v57 = vld [vmem:[#allocation9 + $0x11e8] sm:$0xff] }
 0x43f   : > { %7543 = vmatprep.subr.bf16.mxu1 %v11498_v62  ;;  %v3114_v59 = vld [vmem:[#allocation9 + $0x15c8] sm:$0xff]  ;;  %v11329_v62 = vcombine.low %v2738_v45, %v2742_v46  ;;  %v11578_v1 = vcombine.high %v2986_v56, %v2990_v57 }
 0x440   : > { %7503 = vmatpush2.bf16.msra.mxu0 %v11369_v5  ;;  %v3118_v61 = vld [vmem:[#allocation9 + $0x15e8] sm:$0xff] }
 0x441   : > { %7504 = vmatprep.subr.bf16.mxu0 %v11362_v7  ;;  %v11706_v3 = vcombine.high %v3114_v59, %v3118_v61  ;;  %v2978_v4 = vld [vmem:[#allocation9 + $0x1188] sm:$0xff]  ;;  %v11705_v9 = vcombine.low %v3114_v59, %v3118_v61 }
 0x442   : > { %7544 = vmatpush2.bf16.msra.mxu1 %v11497_v6  ;;  %v2982_v5 = vld [vmem:[#allocation9 + $0x11a8] sm:$0xff] }
 0x443   : > { %7545 = vmatprep.subr.bf16.mxu1 %v11490_v8  ;;  %v3106_v6 = vld [vmem:[#allocation9 + $0x1588] sm:$0xff]  ;;  %v11577_v8 = vcombine.low %v2986_v56, %v2990_v57  ;;  %v11570_v11 = vcombine.high %v2978_v4, %v2982_v5  ;;  %v11569_v25 = vcombine.low %v2978_v4, %v2982_v5 }
 0x444   : > { %7505 = vmatpush2.bf16.msra.mxu0 %v11361_v15  ;;  %v3110_v7 = vld [vmem:[#allocation9 + $0x15a8] sm:$0xff] }
 0x445   : > { %7506 = vmatprep.subr.bf16.mxu0 %v11354_v60  ;;  %v11698_v12 = vcombine.high %v3106_v6, %v3110_v7  ;;  %v2970_v14 = vld [vmem:[#allocation9 + $0x1148] sm:$0xff] }
 0x446   : > { %7546 = vmatpush2.bf16.msra.mxu1 %v11489_v17  ;;  %v2974_v15 = vld [vmem:[#allocation9 + $0x1168] sm:$0xff] }
 0x447   : > { %7547 = vmatprep.subr.bf16.mxu1 %v11482_v19  ;;  %v3098_v60 = vld [vmem:[#allocation9 + $0x1548] sm:$0xff]  ;;  %v11561_v45 = vcombine.low %v2970_v14, %v2974_v15 }
 0x448   : > { %7507 = vmatpush2.bf16.msra.mxu0 %v11353_v26  ;;  %v3102_v19 = vld [vmem:[#allocation9 + $0x1568] sm:$0xff]  ;;  %v11697_v26 = vcombine.low %v3106_v6, %v3110_v7 }
 0x449   : > { %7508 = vmatprep.subr.bf16.mxu0 %v11346_v31  ;;  %v11690_v34 = vcombine.high %v3098_v60, %v3102_v19  ;;  %v2962_v35 = vld [vmem:[#allocation9 + $0x1108] sm:$0xff] }
 0x44a   : > { %7548 = vmatpush2.bf16.msra.mxu1 %v11481_v30  ;;  %v11562_v30 = vcombine.high %v2970_v14, %v2974_v15  ;;  %v2966_v37 = vld [vmem:[#allocation9 + $0x1128] sm:$0xff] }
 0x44b   : > { %7549 = vmatprep.subr.bf16.mxu1 %v11474_v32  ;;  %v11554_v47 = vcombine.high %v2962_v35, %v2966_v37  ;;  %v3086_v56 = vld [vmem:[#allocation9 + $0x14e8] sm:$0xff]  ;;  %v11553_v57 = vcombine.low %v2962_v35, %v2966_v37 }
 0x44c   : > { %7509 = vmatpush2.bf16.msra.mxu0 %v11345_v40  ;;  %v3090_v40 = vld [vmem:[#allocation9 + $0x1508] sm:$0xff] }
 0x44d   : > { %7510 = vmatprep.subr.bf16.mxu0 %v11338_v42  ;;  %v3078_v4 = vld [vmem:[#allocation9 + $0x14a8] sm:$0xff] }
 0x44e   : > { %7550 = vmatpush2.bf16.msra.mxu1 %v11473_v18  ;;  %v3094_v18 = vld [vmem:[#allocation9 + $0x1528] sm:$0xff] }
 0x44f   : > { %7551 = vmatprep.subr.bf16.mxu1 %v11466_v44  ;;  %v11681_v59 = vcombine.low %v3090_v40, %v3094_v18  ;;  %v3070_v14 = vld [vmem:[#allocation9 + $0x1468] sm:$0xff] }
 0x450   : > { %7511 = vmatpush2.bf16.msra.mxu0 %v11337_v51  ;;  %v11682_v51 = vcombine.high %v3090_v40, %v3094_v18  ;;  %v3054_v35 = vld [vmem:[#allocation9 + $0x13e8] sm:$0xff] }
 0x451   : > { %7512 = vmatprep.subr.bf16.mxu0 %v11330_v53  ;;  %v2958_v53 = vld [vmem:[#allocation9 + $0x10e8] sm:$0xff] }
 0x452   : > { %7552 = vmatpush2.bf16.msra.mxu1 %v11465_v52  ;;  %v2954_v52 = vld [vmem:[#allocation9 + $0x10c8] sm:$0xff] }
 0x453   : > { %7553 = vmatprep.subr.bf16.mxu1 %v11458_v55  ;;  %v3082_v55 = vld [vmem:[#allocation9 + $0x14c8] sm:$0xff]  ;;  %v11546_v61 = vcombine.high %v2954_v52, %v2958_v53  ;;  %v11545_v5 = vcombine.low %v2954_v52, %v2958_v53 }
 0x454   : > { %7513 = vmatpush2.bf16.msra.mxu0 %v11329_v62  ;;  %v11674_v62 = vcombine.high %v3082_v55, %v3086_v56  ;;  %v11673_v6 = vcombine.low %v3082_v55, %v3086_v56  ;;  %v3178_v37 = vld [vmem:[#allocation9 + $0x17c8] sm:$0xff] }
 0x455   : > { %7564 = vmatprep.subr.bf16.mxu0 %v11578_v1  ;;  %v2950_v1 = vld [vmem:[#allocation9 + $0x10a8] sm:$0xff] }
 0x456   : > { %7554 = vmatpush2.bf16.msra.mxu1 %v11457_v41  ;;  %v2946_v41 = vld [vmem:[#allocation9 + $0x1088] sm:$0xff] }
 0x457   : > { %7605 = vmatprep.subr.bf16.mxu1 %v11706_v3  ;;  %v7270_v17 = vpop.f32.mrf.mxu0  ;;  %7515 = vmatmul.mubr.bf16.vlgmr.msra.gmra.mxu0 %v13950_v39  ;;  %v3074_v3 = vld [vmem:[#allocation9 + $0x1488] sm:$0xff]  ;;  %v11538_v7 = vcombine.high %v2946_v41, %v2950_v1  ;;  %v11537_v15 = vcombine.low %v2946_v41, %v2950_v1 }
 0x458   : > { %v7271_v21 = vadd.f32 %v7270_v17, %v13989_v10  ;;  %7565 = vmatpush1.bf16.msra.mxu0 %v11577_v8  ;;  %7596 = vmatprep.mubr.bf16.mxu0 %v13953_v48  ;;  %v11666_v8 = vcombine.high %v3074_v3, %v3078_v4  ;;  %v11665_v17 = vcombine.low %v3074_v3, %v3078_v4  ;;  %v3034_v56 = vld [vmem:[#allocation9 + $0x1348] sm:$0xff] }
 0x459   : > { %v7311_v22 = vpop.f32.mrf.mxu1  ;;  %7556 = vmatmul.mubr.bf16.vlgmr.msra.gmra.mxu1 %v13957_v49  ;;  %v7272_v24 = vpop.f32.mrf.mxu0  ;;  %7566 = vmatprep.subr.bf16.mxu0 %v11570_v11  ;;  %v2942_v11 = vld [vmem:[#allocation9 + $0x1068] sm:$0xff] }
 0x45a   : > { %7606 = vmatpush1.bf16.msra.mxu1 %v11705_v9  ;;  %v13998_v31 = vadd.f32 %v7311_v22, %v7271_v21  ;;  %v7273_v32 = vadd.f32 %v7272_v24, %v13993_v36  ;;  %7637 = vmatprep.mubr.bf16.mxu1 %v13962_v58  ;;  %v11689_v36 = vcombine.low %v3098_v60, %v3102_v19  ;;  %v2938_v9 = vld [vmem:[#allocation9 + $0x1048] sm:$0xff] }
 0x45b   : > { %v7313_v16 = vpop.f32.mrf.mxu1  ;;  %7607 = vmatprep.subr.bf16.mxu1 %v11698_v12  ;;  %v7274_v10 = vpop.f32.mrf.mxu0  ;;  %v3066_v12 = vld [vmem:[#allocation9 + $0x1448] sm:$0xff]  ;;  %v11530_v60 = vcombine.high %v2938_v9, %v2942_v11 }
 0x45c   : > { %v14003_v42 = vadd.f32 %v7313_v16, %v7273_v32  ;;  %7567 = vmatpush1.bf16.msra.mxu0 %v11569_v25  ;;  %v11658_v19 = vcombine.high %v3066_v12, %v3070_v14  ;;  %v2930_v21 = vld [vmem:[#allocation9 + $0x1008] sm:$0xff] }
 0x45d   : > { %v7315_v44 = vpop.f32.mrf.mxu1  ;;  %v7275_v46 = vpop.f32.mrf.mxu0  ;;  %7568 = vmatprep.subr.bf16.mxu0 %v11562_v30  ;;  %v2934_v22 = vld [vmem:[#allocation9 + $0x1028] sm:$0xff]  ;;  %v11657_v30 = vcombine.low %v3066_v12, %v3070_v14 }
 0x45e   : > { %7608 = vmatpush1.bf16.msra.mxu1 %v11697_v26  ;;  %v3058_v25 = vld [vmem:[#allocation9 + $0x1408] sm:$0xff]  ;;  %v11529_v26 = vcombine.low %v2938_v9, %v2942_v11  ;;  %v11522_v32 = vcombine.high %v2930_v21, %v2934_v22  ;;  %v11521_v40 = vcombine.low %v2930_v21, %v2934_v22 }
 0x45f   : > { %v7316_v28 = vpop.f32.mrf.mxu1  ;;  %7609 = vmatprep.subr.bf16.mxu1 %v11690_v34  ;;  %v3062_v24 = vld [vmem:[#allocation9 + $0x1428] sm:$0xff] }
 0x460   : > { %7569 = vmatpush1.bf16.msra.mxu0 %v11561_v45  ;;  %v11650_v16 = vcombine.high %v3058_v25, %v3062_v24  ;;  %v3050_v34 = vld [vmem:[#allocation9 + $0x13c8] sm:$0xff]  ;;  %v11649_v18 = vcombine.low %v3058_v25, %v3062_v24 }
 0x461   : > { %7570 = vmatprep.subr.bf16.mxu0 %v11554_v47  ;;  %v3182_v10 = vld [vmem:[#allocation9 + $0x17e8] sm:$0xff]  ;;  %v11642_v44 = vcombine.high %v3050_v34, %v3054_v35 }
 0x462   : > { %7610 = vmatpush1.bf16.msra.mxu1 %v11689_v36  ;;  %v11770_v45 = vcombine.high %v3178_v37, %v3182_v10  ;;  %v3042_v46 = vld [vmem:[#allocation9 + $0x1388] sm:$0xff]  ;;  %v11769_v52 = vcombine.low %v3178_v37, %v3182_v10 }
 0x463   : > { %7611 = vmatprep.subr.bf16.mxu1 %v11682_v51  ;;  %v3046_v36 = vld [vmem:[#allocation9 + $0x13a8] sm:$0xff]  ;;  %v11641_v51 = vcombine.low %v3050_v34, %v3054_v35 }
 0x464   : > { %7571 = vmatpush1.bf16.msra.mxu0 %v11553_v57  ;;  %v3170_v47 = vld [vmem:[#allocation9 + $0x1788] sm:$0xff]  ;;  %v11634_v53 = vcombine.high %v3042_v46, %v3046_v36 }
 0x465   : > { %7572 = vmatprep.subr.bf16.mxu0 %v11546_v61  ;;  %v3174_v28 = vld [vmem:[#allocation9 + $0x17a8] sm:$0xff] }
 0x466   : > { %7612 = vmatpush1.bf16.msra.mxu1 %v11681_v59  ;;  %v11762_v55 = vcombine.high %v3170_v47, %v3174_v28  ;;  %v3038_v57 = vld [vmem:[#allocation9 + $0x1368] sm:$0xff]  ;;  %v11761_v41 = vcombine.low %v3170_v47, %v3174_v28 }
 0x467   : > { %7613 = vmatprep.subr.bf16.mxu1 %v11674_v62  ;;  %v3162_v59 = vld [vmem:[#allocation9 + $0x1748] sm:$0xff]  ;;  %v11633_v62 = vcombine.low %v3042_v46, %v3046_v36  ;;  %v11626_v1 = vcombine.high %v3034_v56, %v3038_v57 }
 0x468   : > { %7573 = vmatpush1.bf16.msra.mxu0 %v11545_v5  ;;  %v3166_v61 = vld [vmem:[#allocation9 + $0x1768] sm:$0xff] }
 0x469   : > { %7574 = vmatprep.subr.bf16.mxu0 %v11538_v7  ;;  %v11754_v3 = vcombine.high %v3162_v59, %v3166_v61  ;;  %v3026_v4 = vld [vmem:[#allocation9 + $0x1308] sm:$0xff]  ;;  %v11753_v9 = vcombine.low %v3162_v59, %v3166_v61  ;;  %v2475_v61 = vld [vmem:[#allocation9 + $0x1d0] sm:$0xff] }
 0x46a   : > { %7614 = vmatpush1.bf16.msra.mxu1 %v11673_v6  ;;  %v3030_v5 = vld [vmem:[#allocation9 + $0x1328] sm:$0xff] }
 0x46b   : > { %7615 = vmatprep.subr.bf16.mxu1 %v11666_v8  ;;  %v3154_v6 = vld [vmem:[#allocation9 + $0x1708] sm:$0xff]  ;;  %v11625_v8 = vcombine.low %v3034_v56, %v3038_v57  ;;  %v11618_v11 = vcombine.high %v3026_v4, %v3030_v5 }
 0x46c   : > { %7575 = vmatpush1.bf16.msra.mxu0 %v11537_v15  ;;  %v3158_v7 = vld [vmem:[#allocation9 + $0x1728] sm:$0xff] }
 0x46d   : > { %7576 = vmatprep.subr.bf16.mxu0 %v11530_v60  ;;  %v11746_v12 = vcombine.high %v3154_v6, %v3158_v7  ;;  %v3018_v14 = vld [vmem:[#allocation9 + $0x12c8] sm:$0xff]  ;;  %v11745_v21 = vcombine.low %v3154_v6, %v3158_v7  ;;  %v2467_v7 = vld [vmem:[#allocation9 + $0x190] sm:$0xff] }
 0x46e   : > { %7616 = vmatpush1.bf16.msra.mxu1 %v11665_v17  ;;  %v3022_v15 = vld [vmem:[#allocation9 + $0x12e8] sm:$0xff] }
 0x46f   : > { %7617 = vmatprep.subr.bf16.mxu1 %v11658_v19  ;;  %v3146_v17 = vld [vmem:[#allocation9 + $0x16c8] sm:$0xff]  ;;  %v11617_v19 = vcombine.low %v3026_v4, %v3030_v5  ;;  %v11610_v22 = vcombine.high %v3018_v14, %v3022_v15 }
 0x470   : > { %7577 = vmatpush1.bf16.msra.mxu0 %v11529_v26  ;;  %v3150_v60 = vld [vmem:[#allocation9 + $0x16e8] sm:$0xff] }
 0x471   : > { %7578 = vmatprep.subr.bf16.mxu0 %v11522_v32  ;;  %v11738_v25 = vcombine.high %v3146_v17, %v3150_v60  ;;  %v3010_v24 = vld [vmem:[#allocation9 + $0x1288] sm:$0xff]  ;;  %v11737_v34 = vcombine.low %v3146_v17, %v3150_v60  ;;  %v2459_v60 = vld [vmem:[#allocation9 + $0x150] sm:$0xff] }
 0x472   : > { %7618 = vmatpush1.bf16.msra.mxu1 %v11657_v30  ;;  %v3014_v26 = vld [vmem:[#allocation9 + $0x12a8] sm:$0xff] }
 0x473   : > { %7619 = vmatprep.subr.bf16.mxu1 %v11650_v16  ;;  %v3138_v30 = vld [vmem:[#allocation9 + $0x1688] sm:$0xff]  ;;  %v11609_v16 = vcombine.low %v3018_v14, %v3022_v15  ;;  %v11602_v35 = vcombine.high %v3010_v24, %v3014_v26 }
 0x474   : > { %7579 = vmatpush1.bf16.msra.mxu0 %v11521_v40  ;;  %v3142_v32 = vld [vmem:[#allocation9 + $0x16a8] sm:$0xff] }
 0x475   : > { %7580 = vmatprep.subr.bf16.mxu0 %v11642_v44  ;;  %v11730_v37 = vcombine.high %v3138_v30, %v3142_v32  ;;  %v3002_v10 = vld [vmem:[#allocation9 + $0x1248] sm:$0xff]  ;;  %v11729_v46 = vcombine.low %v3138_v30, %v3142_v32 }
 0x476   : > { %7620 = vmatpush1.bf16.msra.mxu1 %v11649_v18  ;;  %v3006_v40 = vld [vmem:[#allocation9 + $0x1268] sm:$0xff] }
 0x477   : > { %7621 = vmatprep.subr.bf16.mxu1 %v11770_v45  ;;  %v3130_v18 = vld [vmem:[#allocation9 + $0x1648] sm:$0xff]  ;;  %v11601_v45 = vcombine.low %v3010_v24, %v3014_v26  ;;  %v11594_v36 = vcombine.high %v3002_v10, %v3006_v40 }
 0x478   : > { %7581 = vmatpush2.bf16.msra.mxu0 %v11641_v51  ;;  %v3134_v44 = vld [vmem:[#allocation9 + $0x1668] sm:$0xff] }
 0x479   : > { %7582 = vmatprep.subr.bf16.mxu0 %v11634_v53  ;;  %v11722_v47 = vcombine.high %v3130_v18, %v3134_v44  ;;  %v2994_v28 = vld [vmem:[#allocation9 + $0x1208] sm:$0xff]  ;;  %v11721_v56 = vcombine.low %v3130_v18, %v3134_v44  ;;  %v2451_v18 = vld [vmem:[#allocation9 + $0x110] sm:$0xff] }
 0x47a   : > { %7622 = vmatpush2.bf16.msra.mxu1 %v11769_v52  ;;  %v2998_v51 = vld [vmem:[#allocation9 + $0x1228] sm:$0xff]  ;;  %v2455_v44 = vld [vmem:[#allocation9 + $0x130] sm:$0xff] }
 0x47b   : > { %7623 = vmatprep.subr.bf16.mxu1 %v11762_v55  ;;  %v3122_v52 = vld [vmem:[#allocation9 + $0x1608] sm:$0xff]  ;;  %v11593_v55 = vcombine.low %v3002_v10, %v3006_v40  ;;  %v11586_v57 = vcombine.high %v2994_v28, %v2998_v51 }
 0x47c   : > { %7583 = vmatpush2.bf16.msra.mxu0 %v11633_v62  ;;  %v3126_v53 = vld [vmem:[#allocation9 + $0x1628] sm:$0xff]  ;;  %v2479_v62 = vld [vmem:[#allocation9 + $0x1f0] sm:$0xff] }
 0x47d   : > { %7584 = vmatprep.subr.bf16.mxu0 %v11626_v1  ;;  %v11714_v59 = vcombine.high %v3122_v52, %v3126_v53  ;;  %v2607_v1 = vld [vmem:[#allocation9 + $0x5f0] sm:$0xff]  ;;  %v11713_v4 = vcombine.low %v3122_v52, %v3126_v53  ;;  %v11068_v5 = vcombine.high %v2475_v61, %v2479_v62  ;;  %v11044_v52 = vcombine.high %v2451_v18, %v2455_v44 }
 0x47e   : > { %7624 = vmatpush2.bf16.msra.mxu1 %v11761_v41  ;;  %v2603_v41 = vld [vmem:[#allocation9 + $0x5d0] sm:$0xff] }
 0x47f   : > { %7625 = vmatprep.subr.bf16.mxu1 %v11754_v3  ;;  %v11585_v3 = vcombine.low %v2994_v28, %v2998_v51  ;;  %v11196_v6 = vcombine.high %v2603_v41, %v2607_v1  ;;  %v11195_v14 = vcombine.low %v2603_v41, %v2607_v1 }
 0x480   : > { %7585 = vmatpush2.bf16.msra.mxu0 %v11625_v8  ;;  %v2471_v8 = vld [vmem:[#allocation9 + $0x1b0] sm:$0xff] }
 0x481   : > { %7586 = vmatprep.subr.bf16.mxu0 %v11618_v11  ;;  %v2599_v11 = vld [vmem:[#allocation9 + $0x5b0] sm:$0xff]  ;;  %v11060_v15 = vcombine.high %v2467_v7, %v2471_v8  ;;  %v11059_v30 = vcombine.low %v2467_v7, %v2471_v8 }
 0x482   : > { %7626 = vmatpush2.bf16.msra.mxu1 %v11753_v9  ;;  %v2595_v9 = vld [vmem:[#allocation9 + $0x590] sm:$0xff] }
 0x483   : > { %7627 = vmatprep.subr.bf16.mxu1 %v11746_v12  ;;  %v11067_v12 = vcombine.low %v2475_v61, %v2479_v62  ;;  %v11188_v17 = vcombine.high %v2595_v9, %v2599_v11  ;;  %v2575_v61 = vld [vmem:[#allocation9 + $0x4f0] sm:$0xff]  ;;  %v11043_v62 = vcombine.low %v2451_v18, %v2455_v44 }
 0x484   : > { %7587 = vmatpush2.bf16.msra.mxu0 %v11617_v19  ;;  %v2463_v19 = vld [vmem:[#allocation9 + $0x170] sm:$0xff] }
 0x485   : > { %7588 = vmatprep.subr.bf16.mxu0 %v11610_v22  ;;  %v2587_v22 = vld [vmem:[#allocation9 + $0x550] sm:$0xff]  ;;  %v11051_v28 = vcombine.low %v2459_v60, %v2463_v19 }
 0x486   : > { %7628 = vmatpush2.bf16.msra.mxu1 %v11745_v21  ;;  %v2567_v7 = vld [vmem:[#allocation9 + $0x4b0] sm:$0xff] }
 0x487   : > { %7629 = vmatprep.subr.bf16.mxu1 %v11738_v25  ;;  %v2591_v25 = vld [vmem:[#allocation9 + $0x570] sm:$0xff] }
 0x488   : > { %7589 = vmatpush2.bf16.msra.mxu0 %v11609_v16  ;;  %v11187_v16 = vcombine.low %v2595_v9, %v2599_v11  ;;  %v11180_v40 = vcombine.high %v2587_v22, %v2591_v25  ;;  %v2543_v18 = vld [vmem:[#allocation9 + $0x3f0] sm:$0xff] }
 0x489   : > { %7590 = vmatprep.subr.bf16.mxu0 %v11602_v35  ;;  %v2667_v44 = vld [vmem:[#allocation9 + $0x7d0] sm:$0xff] }
 0x48a   : > { %7630 = vmatpush2.bf16.msra.mxu1 %v11737_v34  ;;  %v11052_v34 = vcombine.high %v2459_v60, %v2463_v19  ;;  %v2559_v60 = vld [vmem:[#allocation9 + $0x470] sm:$0xff] }
 0x48b   : > { %7631 = vmatprep.subr.bf16.mxu1 %v11730_v37 }
 0x48c   : > { %7591 = vmatpush2.bf16.msra.mxu0 %v11601_v45  ;;  %v2579_v45 = vld [vmem:[#allocation9 + $0x510] sm:$0xff] }
 0x48d   : > { %7592 = vmatprep.subr.bf16.mxu0 %v11594_v36 }
 0x48e   : > { %7632 = vmatpush2.bf16.msra.mxu1 %v11729_v46  ;;  %v2583_v46 = vld [vmem:[#allocation9 + $0x530] sm:$0xff] }
 0x48f   : > { %7633 = vmatprep.subr.bf16.mxu1 %v11722_v47  ;;  %v11171_v41 = vcombine.low %v2579_v45, %v2583_v46 }
 0x490   : > { %7593 = vmatpush2.bf16.msra.mxu0 %v11593_v55  ;;  %v11172_v55 = vcombine.high %v2579_v45, %v2583_v46 }
 0x491   : > { %7594 = vmatprep.subr.bf16.mxu0 %v11586_v57  ;;  %v2447_v57 = vld [vmem:[#allocation9 + $0xf0] sm:$0xff] }
 0x492   : > { %7634 = vmatpush2.bf16.msra.mxu1 %v11721_v56  ;;  %v2443_v56 = vld [vmem:[#allocation9 + $0xd0] sm:$0xff] }
 0x493   : > { %7635 = vmatprep.subr.bf16.mxu1 %v11714_v59  ;;  %v2571_v59 = vld [vmem:[#allocation9 + $0x4d0] sm:$0xff]  ;;  %v11036_v1 = vcombine.high %v2443_v56, %v2447_v57  ;;  %v11035_v8 = vcombine.low %v2443_v56, %v2447_v57 }
 0x494   : > { %7595 = vmatpush2.bf16.msra.mxu0 %v11585_v3  ;;  %v11164_v3 = vcombine.high %v2571_v59, %v2575_v61  ;;  %v11163_v9 = vcombine.low %v2571_v59, %v2575_v61  ;;  %v2523_v61 = vld [vmem:[#allocation9 + $0x350] sm:$0xff] }
 0x495   : > { %7646 = vmatprep.subr.bf16.mxu0 %v11068_v5  ;;  %v2439_v5 = vld [vmem:[#allocation9 + $0xb0] sm:$0xff] }
 0x496   : > { %7636 = vmatpush2.bf16.msra.mxu1 %v11713_v4  ;;  %v2435_v4 = vld [vmem:[#allocation9 + $0x90] sm:$0xff] }
 0x497   : > { %7687 = vmatprep.subr.bf16.mxu1 %v11196_v6  ;;  %v7352_v21 = vpop.f32.mrf.mxu0  ;;  %7597 = vmatmul.mubr.bf16.vlgmr.msra.gmra.mxu0 %v13969_v13  ;;  %v2563_v6 = vld [vmem:[#allocation9 + $0x490] sm:$0xff]  ;;  %v11028_v11 = vcombine.high %v2435_v4, %v2439_v5  ;;  %v11027_v19 = vcombine.low %v2435_v4, %v2439_v5 }
 0x498   : > { %v7353_v24 = vadd.f32 %v7352_v21, %v13998_v31  ;;  %7647 = vmatpush1.bf16.msra.mxu0 %v11067_v12  ;;  %7678 = vmatprep.mubr.bf16.mxu0 %v13866_v29  ;;  %v11156_v12 = vcombine.high %v2563_v6, %v2567_v7  ;;  %v11155_v21 = vcombine.low %v2563_v6, %v2567_v7  ;;  %v2515_v7 = vld [vmem:[#allocation9 + $0x310] sm:$0xff] }
 0x499   : > { %v7393_v26 = vpop.f32.mrf.mxu1  ;;  %7638 = vmatmul.mubr.bf16.vlgmr.msra.gmra.mxu1 %v13973_v23  ;;  %v7354_v32 = vpop.f32.mrf.mxu0  ;;  %7648 = vmatprep.subr.bf16.mxu0 %v11060_v15  ;;  %v2431_v15 = vld [vmem:[#allocation9 + $0x70] sm:$0xff] }
 0x49a   : > { %7688 = vmatpush1.bf16.msra.mxu1 %v11195_v14  ;;  %v14008_v35 = vadd.f32 %v7393_v26, %v7353_v24  ;;  %v7355_v37 = vadd.f32 %v7354_v32, %v14003_v42  ;;  %7719 = vmatprep.mubr.bf16.mxu1 %v13871_v33  ;;  %v11179_v42 = vcombine.low %v2587_v22, %v2591_v25  ;;  %v2427_v14 = vld [vmem:[#allocation9 + $0x50] sm:$0xff] }
 0x49b   : > { %v7395_v10 = vpop.f32.mrf.mxu1  ;;  %7689 = vmatprep.subr.bf16.mxu1 %v11188_v17  ;;  %v7356_v31 = vpop.f32.mrf.mxu0  ;;  %v2555_v17 = vld [vmem:[#allocation9 + $0x450] sm:$0xff]  ;;  %v11020_v22 = vcombine.high %v2427_v14, %v2431_v15 }
 0x49c   : > { %v14013_v36 = vadd.f32 %v7395_v10, %v7355_v37  ;;  %7649 = vmatpush1.bf16.msra.mxu0 %v11059_v30  ;;  %v11148_v25 = vcombine.high %v2555_v17, %v2559_v60  ;;  %v2419_v24 = vld [vmem:[#allocation9 + $0x10] sm:$0xff] }
 0x49d   : > { %v7397_v47 = vpop.f32.mrf.mxu1  ;;  %v7357_v51 = vpop.f32.mrf.mxu0  ;;  %7650 = vmatprep.subr.bf16.mxu0 %v11052_v34  ;;  %v2423_v26 = vld [vmem:[#allocation9 + $0x30] sm:$0xff]  ;;  %v11147_v34 = vcombine.low %v2555_v17, %v2559_v60 }
 0x49e   : > { %7690 = vmatpush1.bf16.msra.mxu1 %v11187_v16  ;;  %v2547_v30 = vld [vmem:[#allocation9 + $0x410] sm:$0xff]  ;;  %v11019_v16 = vcombine.low %v2427_v14, %v2431_v15  ;;  %v11012_v37 = vcombine.high %v2419_v24, %v2423_v26  ;;  %v11011_v45 = vcombine.low %v2419_v24, %v2423_v26 }
 0x49f   : > { %v7398_v53 = vpop.f32.mrf.mxu1  ;;  %7691 = vmatprep.subr.bf16.mxu1 %v11180_v40  ;;  %v2551_v32 = vld [vmem:[#allocation9 + $0x430] sm:$0xff] }
 0x4a0   : > { %7651 = vmatpush1.bf16.msra.mxu0 %v11051_v28  ;;  %v11140_v10 = vcombine.high %v2547_v30, %v2551_v32  ;;  %v2539_v40 = vld [vmem:[#allocation9 + $0x3d0] sm:$0xff]  ;;  %v11139_v46 = vcombine.low %v2547_v30, %v2551_v32 }
 0x4a1   : > { %7652 = vmatprep.subr.bf16.mxu0 %v11044_v52  ;;  %v2671_v31 = vld [vmem:[#allocation9 + $0x7f0] sm:$0xff]  ;;  %v11132_v47 = vcombine.high %v2539_v40, %v2543_v18 }
 0x4a2   : > { %7692 = vmatpush1.bf16.msra.mxu1 %v11179_v42  ;;  %v11260_v28 = vcombine.high %v2667_v44, %v2671_v31  ;;  %v2531_v51 = vld [vmem:[#allocation9 + $0x390] sm:$0xff]  ;;  %v11259_v56 = vcombine.low %v2667_v44, %v2671_v31 }
 0x4a3   : > { %7693 = vmatprep.subr.bf16.mxu1 %v11172_v55  ;;  %v2535_v42 = vld [vmem:[#allocation9 + $0x3b0] sm:$0xff]  ;;  %v11131_v55 = vcombine.low %v2539_v40, %v2543_v18 }
 0x4a4   : > { %7653 = vmatpush1.bf16.msra.mxu0 %v11043_v62  ;;  %v2659_v52 = vld [vmem:[#allocation9 + $0x790] sm:$0xff]  ;;  %v11124_v57 = vcombine.high %v2531_v51, %v2535_v42 }
 0x4a5   : > { %7654 = vmatprep.subr.bf16.mxu0 %v11036_v1  ;;  %v2663_v53 = vld [vmem:[#allocation9 + $0x7b0] sm:$0xff] }
 0x4a6   : > { %7694 = vmatpush1.bf16.msra.mxu1 %v11171_v41  ;;  %v11252_v59 = vcombine.high %v2659_v52, %v2663_v53  ;;  %v2527_v62 = vld [vmem:[#allocation9 + $0x370] sm:$0xff]  ;;  %v11251_v4 = vcombine.low %v2659_v52, %v2663_v53 }
 0x4a7   : > { %7695 = vmatprep.subr.bf16.mxu1 %v11164_v3  ;;  %v2651_v41 = vld [vmem:[#allocation9 + $0x750] sm:$0xff]  ;;  %v11123_v3 = vcombine.low %v2531_v51, %v2535_v42  ;;  %v11116_v5 = vcombine.high %v2523_v61, %v2527_v62 }
 0x4a8   : > { %7655 = vmatpush1.bf16.msra.mxu0 %v11035_v8  ;;  %v2655_v1 = vld [vmem:[#allocation9 + $0x770] sm:$0xff] }
 0x4a9   : > { %7656 = vmatprep.subr.bf16.mxu0 %v11028_v11  ;;  %v11244_v6 = vcombine.high %v2651_v41, %v2655_v1  ;;  %v2519_v8 = vld [vmem:[#allocation9 + $0x330] sm:$0xff]  ;;  %v11243_v14 = vcombine.low %v2651_v41, %v2655_v1 }
 0x4aa   : > { %7696 = vmatpush1.bf16.msra.mxu1 %v11163_v9  ;;  %v2643_v9 = vld [vmem:[#allocation9 + $0x710] sm:$0xff]  ;;  %v11108_v15 = vcombine.high %v2515_v7, %v2519_v8 }
 0x4ab   : > { %7697 = vmatprep.subr.bf16.mxu1 %v11156_v12  ;;  %v2647_v11 = vld [vmem:[#allocation9 + $0x730] sm:$0xff]  ;;  %v11115_v12 = vcombine.low %v2523_v61, %v2527_v62 }
 0x4ac   : > { %7657 = vmatpush1.bf16.msra.mxu0 %v11027_v19  ;;  %v11236_v17 = vcombine.high %v2643_v9, %v2647_v11  ;;  %v2507_v60 = vld [vmem:[#allocation9 + $0x2d0] sm:$0xff]  ;;  %v11235_v24 = vcombine.low %v2643_v9, %v2647_v11  ;;  %v3201_v11 = vsub.s32 3, %v13852_v0 }
 0x4ad   : > { %7658 = vmatprep.subr.bf16.mxu0 %v11020_v22  ;;  %v2511_v19 = vld [vmem:[#allocation9 + $0x2f0] sm:$0xff] }
 0x4ae   : > { %7698 = vmatpush1.bf16.msra.mxu1 %v11155_v21  ;;  %v2635_v21 = vld [vmem:[#allocation9 + $0x6d0] sm:$0xff]  ;;  %v11100_v26 = vcombine.high %v2507_v60, %v2511_v19 }
 0x4af   : > { %7699 = vmatprep.subr.bf16.mxu1 %v11148_v25  ;;  %v2639_v22 = vld [vmem:[#allocation9 + $0x6f0] sm:$0xff]  ;;  %v11107_v25 = vcombine.low %v2515_v7, %v2519_v8 }
 0x4b0   : > { %7659 = vmatpush1.bf16.msra.mxu0 %v11019_v16  ;;  %v11228_v30 = vcombine.high %v2635_v21, %v2639_v22  ;;  %v2499_v32 = vld [vmem:[#allocation9 + $0x290] sm:$0xff]  ;;  %v11227_v40 = vcombine.low %v2635_v21, %v2639_v22 }
 0x4b1   : > { %7660 = vmatprep.subr.bf16.mxu0 %v11012_v37  ;;  %v2503_v16 = vld [vmem:[#allocation9 + $0x2b0] sm:$0xff] }
 0x4b2   : > { %7700 = vmatpush1.bf16.msra.mxu1 %v11147_v34  ;;  %v2627_v34 = vld [vmem:[#allocation9 + $0x690] sm:$0xff]  ;;  %v11092_v18 = vcombine.high %v2499_v32, %v2503_v16 }
 0x4b3   : > { %7701 = vmatprep.subr.bf16.mxu1 %v11140_v10  ;;  %v2631_v37 = vld [vmem:[#allocation9 + $0x6b0] sm:$0xff]  ;;  %v11099_v10 = vcombine.low %v2507_v60, %v2511_v19  ;;  %v13011_v60 = vld [vmem:[#allocation10] sm:$0xff] }
 0x4b4   : > { %7661 = vmatpush1.bf16.msra.mxu0 %v11011_v45  ;;  %v11220_v44 = vcombine.high %v2627_v34, %v2631_v37  ;;  %v2491_v31 = vld [vmem:[#allocation9 + $0x250] sm:$0xff]  ;;  %v11219_v51 = vcombine.low %v2627_v34, %v2631_v37  ;;  %v3198_v19 = vrot.slane %v13011_v60, %v13914_v63 }
 0x4b5   : > { %7662 = vmatprep.subr.bf16.mxu0 %v11132_v47  ;;  %v2495_v45 = vld [vmem:[#allocation9 + $0x270] sm:$0xff] }
 0x4b6   : > { %7702 = vmatpush1.bf16.msra.mxu1 %v11139_v46  ;;  %v2619_v46 = vld [vmem:[#allocation9 + $0x650] sm:$0xff]  ;;  %v11084_v42 = vcombine.high %v2491_v31, %v2495_v45 }
 0x4b7   : > { %7703 = vmatprep.subr.bf16.mxu1 %v11260_v28  ;;  %v2623_v47 = vld [vmem:[#allocation9 + $0x670] sm:$0xff]  ;;  %v11091_v28 = vcombine.low %v2499_v32, %v2503_v16 }
 0x4b8   : > { %7663 = vmatpush2.bf16.msra.mxu0 %v11131_v55  ;;  %v11212_v52 = vcombine.high %v2619_v46, %v2623_v47  ;;  %v2483_v53 = vld [vmem:[#allocation9 + $0x210] sm:$0xff]  ;;  %v11211_v61 = vcombine.low %v2619_v46, %v2623_v47 }
 0x4b9   : > { %7664 = vmatprep.subr.bf16.mxu0 %v11124_v57  ;;  %v2487_v55 = vld [vmem:[#allocation9 + $0x230] sm:$0xff] }
 0x4ba   : > { %7704 = vmatpush2.bf16.msra.mxu1 %v11259_v56  ;;  %v2611_v56 = vld [vmem:[#allocation9 + $0x610] sm:$0xff]  ;;  %v11076_v62 = vcombine.high %v2483_v53, %v2487_v55 }
 0x4bb   : > { %7705 = vmatprep.subr.bf16.mxu1 %v11252_v59  ;;  %v2615_v57 = vld [vmem:[#allocation9 + $0x630] sm:$0xff]  ;;  %v11083_v59 = vcombine.low %v2491_v31, %v2495_v45 }
 0x4bc   : > { %7665 = vmatpush2.bf16.msra.mxu0 %v11123_v3  ;;  %v11204_v41 = vcombine.high %v2611_v56, %v2615_v57  ;;  %v2731_v1 = vld [vmem:[#allocation9 + $0x9d0] sm:$0xff]  ;;  %v11203_v7 = vcombine.low %v2611_v56, %v2615_v57 }
 0x4bd   : > { %7666 = vmatprep.subr.bf16.mxu0 %v11116_v5  ;;  %v2735_v3 = vld [vmem:[#allocation9 + $0x9f0] sm:$0xff] }
 0x4be   : > { %7706 = vmatpush2.bf16.msra.mxu1 %v11251_v4  ;;  %v2859_v4 = vld [vmem:[#allocation9 + $0xdd0] sm:$0xff]  ;;  %v11324_v8 = vcombine.high %v2731_v1, %v2735_v3  ;;  %v11323_v21 = vcombine.low %v2731_v1, %v2735_v3 }
 0x4bf   : > { %7707 = vmatprep.subr.bf16.mxu1 %v11244_v6  ;;  %v2863_v5 = vld [vmem:[#allocation9 + $0xdf0] sm:$0xff]  ;;  %v11075_v6 = vcombine.low %v2483_v53, %v2487_v55 }
 0x4c0   : > { %7667 = vmatpush2.bf16.msra.mxu0 %v11115_v12  ;;  %v11452_v9 = vcombine.high %v2859_v4, %v2863_v5  ;;  %v2723_v12 = vld [vmem:[#allocation9 + $0x990] sm:$0xff]  ;;  %v11451_v22 = vcombine.low %v2859_v4, %v2863_v5 }
 0x4c1   : > { %7668 = vmatprep.subr.bf16.mxu0 %v11108_v15  ;;  %v2851_v15 = vld [vmem:[#allocation9 + $0xd90] sm:$0xff] }
 0x4c2   : > { %7708 = vmatpush2.bf16.msra.mxu1 %v11243_v14  ;;  %v2727_v14 = vld [vmem:[#allocation9 + $0x9b0] sm:$0xff] }
 0x4c3   : > { %7709 = vmatprep.subr.bf16.mxu1 %v11236_v17  ;;  %v2855_v17 = vld [vmem:[#allocation9 + $0xdb0] sm:$0xff] }
 0x4c4   : > { %7669 = vmatpush2.bf16.msra.mxu0 %v11107_v25  ;;  %v11316_v25 = vcombine.high %v2723_v12, %v2727_v14  ;;  %v2719_v32 = vld [vmem:[#allocation9 + $0x970] sm:$0xff]  ;;  %v11443_v31 = vcombine.low %v2851_v15, %v2855_v17 }
 0x4c5   : > { %7670 = vmatprep.subr.bf16.mxu0 %v11100_v26  ;;  %v11444_v26 = vcombine.high %v2851_v15, %v2855_v17  ;;  %v2843_v34 = vld [vmem:[#allocation9 + $0xd50] sm:$0xff] }
 0x4c6   : > { %7710 = vmatpush2.bf16.msra.mxu1 %v11235_v24  ;;  %v3202_v24 = vrot.slane %v13011_v60, %v3201_v11  ;;  %v2847_v37 = vld [vmem:[#allocation9 + $0xd70] sm:$0xff] }
 0x4c7   : > { %7711 = vmatprep.subr.bf16.mxu1 %v11228_v30  ;;  %v2715_v30 = vld [vmem:[#allocation9 + $0x950] sm:$0xff] }
 0x4c8   : > { %7671 = vmatpush2.bf16.msra.mxu0 %v11099_v10  ;;  %v11308_v45 = vcombine.high %v2715_v30, %v2719_v32  ;;  %v2835_v55 = vld [vmem:[#allocation9 + $0xd10] sm:$0xff] }
 0x4c9   : > { %7672 = vmatprep.subr.bf16.mxu0 %v11092_v18  ;;  %v11315_v18 = vcombine.low %v2723_v12, %v2727_v14  ;;  %v2839_v56 = vld [vmem:[#allocation9 + $0xd30] sm:$0xff] }
 0x4ca   : > { %7712 = vmatpush2.bf16.msra.mxu1 %v11227_v40  ;;  %v11428_v4 = vcombine.high %v2835_v55, %v2839_v56  ;;  %v2699_v5 = vld [vmem:[#allocation9 + $0x8d0] sm:$0xff]  ;;  %v11427_v12 = vcombine.low %v2835_v55, %v2839_v56 }
 0x4cb   : > { %7713 = vmatprep.subr.bf16.mxu1 %v11220_v44  ;;  %v2691_v17 = vld [vmem:[#allocation9 + $0x890] sm:$0xff] }
 0x4cc   : > { %7673 = vmatpush2.bf16.msra.mxu0 %v11091_v28  ;;  %v2695_v60 = vld [vmem:[#allocation9 + $0x8b0] sm:$0xff] }
 0x4cd   : > { %7674 = vmatprep.subr.bf16.mxu0 %v11084_v42  ;;  %v2707_v42 = vld [vmem:[#allocation9 + $0x910] sm:$0xff] }
 0x4ce   : > { %7714 = vmatpush2.bf16.msra.mxu1 %v11219_v51  ;;  %v11436_v51 = vcombine.high %v2843_v34, %v2847_v37  ;;  %v2799_v55 = vld [vmem:[#allocation9 + $0xbf0] sm:$0xff] }
 0x4cf   : > { %7715 = vmatprep.subr.bf16.mxu1 %v11212_v52  ;;  %v2711_v52 = vld [vmem:[#allocation9 + $0x930] sm:$0xff] }
 0x4d0   : > { %7675 = vmatpush2.bf16.msra.mxu0 %v11083_v59  ;;  %v11300_v1 = vcombine.high %v2707_v42, %v2711_v52  ;;  %v2923_v56 = vld [vmem:[#allocation9 + $0xfd0] sm:$0xff] }
 0x4d1   : > { %7676 = vmatprep.subr.bf16.mxu0 %v11076_v62 }
 0x4d2   : > { %7716 = vmatpush2.bf16.msra.mxu1 %v11211_v61  ;;  %v11307_v61 = vcombine.low %v2715_v30, %v2719_v32  ;;  %v2683_v30 = vld [vmem:[#allocation9 + $0x850] sm:$0xff] }
 0x4d3   : > { %7717 = vmatprep.subr.bf16.mxu1 %v11204_v41  ;;  %v11435_v41 = vcombine.low %v2843_v34, %v2847_v37  ;;  %v2687_v32 = vld [vmem:[#allocation9 + $0x870] sm:$0xff]  ;;  %v11283_v37 = vcombine.low %v2691_v17, %v2695_v60 }
 0x4d4   : > { %7677 = vmatpush2.bf16.msra.mxu0 %v11075_v6  ;;  %v2703_v6 = vld [vmem:[#allocation9 + $0x8f0] sm:$0xff] }
 0x4d5   : > { %7728 = vmatprep.subr.bf16.mxu0 %v11324_v8  ;;  %v2831_v8 = vld [vmem:[#allocation9 + $0xcf0] sm:$0xff]  ;;  %v11292_v14 = vcombine.high %v2699_v5, %v2703_v6 }
 0x4d6   : > { %7718 = vmatpush2.bf16.msra.mxu1 %v11203_v7  ;;  %v2827_v7 = vld [vmem:[#allocation9 + $0xcd0] sm:$0xff] }
 0x4d7   : > { %7769 = vmatprep.subr.bf16.mxu1 %v11452_v9  ;;  %v7434_v16 = vpop.f32.mrf.mxu0  ;;  %7679 = vmatmul.mubr.bf16.vlgmr.msra.gmra.mxu0 %v13883_v43  ;;  %v11299_v9 = vcombine.low %v2707_v42, %v2711_v52  ;;  %v11420_v15 = vcombine.high %v2827_v7, %v2831_v8  ;;  %v2815_v34 = vld [vmem:[#allocation9 + $0xc70] sm:$0xff] }
 0x4d8   : > { %v7435_v10 = vadd.f32 %v7434_v16, %v3198_v19  ;;  %7729 = vmatpush1.bf16.msra.mxu0 %v11323_v21  ;;  %7760 = vmatprep.mubr.bf16.mxu0 %v13887_v50  ;;  %v2819_v19 = vld [vmem:[#allocation9 + $0xc90] sm:$0xff] }
 0x4d9   : > { %v7475_v40 = vpop.f32.mrf.mxu1  ;;  %7720 = vmatmul.mubr.bf16.vlgmr.msra.gmra.mxu1 %v13893_v20  ;;  %v7436_v44 = vpop.f32.mrf.mxu0  ;;  %7730 = vmatprep.subr.bf16.mxu0 %v11316_v25  ;;  %v2823_v21 = vld [vmem:[#allocation9 + $0xcb0] sm:$0xff]  ;;  %v11419_v25 = vcombine.low %v2827_v7, %v2831_v8 }
 0x4da   : > { %7770 = vmatpush1.bf16.msra.mxu1 %v11451_v22  ;;  %v14021_v46 = vadd.f32 %v7475_v40, %v7435_v10  ;;  %v7437_v47 = vadd.f32 %v7436_v44, %v3202_v24  ;;  %7801 = vmatprep.mubr.bf16.mxu1 %v13902_v2  ;;  %v11291_v22 = vcombine.low %v2699_v5, %v2703_v6  ;;  %v2811_v16 = vld [vmem:[#allocation9 + $0xc50] sm:$0xff] }
 0x4db   : > { %v7477_v28 = vpop.f32.mrf.mxu1  ;;  %7771 = vmatprep.subr.bf16.mxu1 %v11444_v26  ;;  %v7438_v53 = vpop.f32.mrf.mxu0  ;;  %v11284_v24 = vcombine.high %v2691_v17, %v2695_v60  ;;  %v11412_v26 = vcombine.high %v2819_v19, %v2823_v21  ;;  %v11411_v10 = vcombine.low %v2819_v19, %v2823_v21  ;;  %v11276_v40 = vcombine.high %v2683_v30, %v2687_v32  ;;  %v2675_v44 = vld [vmem:[#allocation9 + $0x810] sm:$0xff] }
 0x4dc   : > { %v14025_v57 = vadd.f32 %v7477_v28, %v7437_v47  ;;  %7731 = vmatpush1.bf16.msra.mxu0 %v11315_v18  ;;  %v11404_v18 = vcombine.high %v2811_v16, %v2815_v34  ;;  %v2807_v47 = vld [vmem:[#allocation9 + $0xc30] sm:$0xff]  ;;  %v11275_v28 = vcombine.low %v2683_v30, %v2687_v32 }
 0x4dd   : > { %v7479_v59 = vpop.f32.mrf.mxu1  ;;  %v7439_v62 = vpop.f32.mrf.mxu0  ;;  %7732 = vmatprep.subr.bf16.mxu0 %v11308_v45  ;;  %v2803_v45 = vld [vmem:[#allocation9 + $0xc10] sm:$0xff] }
 0x4de   : > { %7772 = vmatpush1.bf16.msra.mxu1 %v11443_v31  ;;  %v2679_v31 = vld [vmem:[#allocation9 + $0x830] sm:$0xff]  ;;  %v11396_v52 = vcombine.high %v2803_v45, %v2807_v47  ;;  %v11395_v62 = vcombine.low %v2803_v45, %v2807_v47 }
 0x4df   : > { %v7480_v3 = vpop.f32.mrf.mxu1  ;;  %7773 = vmatprep.subr.bf16.mxu1 %v11436_v51  ;;  %v11403_v51 = vcombine.low %v2811_v16, %v2815_v34  ;;  %v11268_v42 = vcombine.high %v2675_v44, %v2679_v31  ;;  %v2795_v53 = vld [vmem:[#allocation9 + $0xbd0] sm:$0xff] }
 0x4e0   : > { %7733 = vmatpush1.bf16.msra.mxu0 %v11307_v61  ;;  %v2927_v59 = vld [vmem:[#allocation9 + $0xff0] sm:$0xff]  ;;  %v11267_v61 = vcombine.low %v2675_v44, %v2679_v31  ;;  %v11387_v7 = vcombine.low %v2795_v53, %v2799_v55 }
 0x4e1   : > { %7734 = vmatprep.subr.bf16.mxu0 %v11300_v1  ;;  %v11516_v1 = vcombine.high %v2923_v56, %v2927_v59  ;;  %v2787_v3 = vld [vmem:[#allocation9 + $0xb90] sm:$0xff]  ;;  %v11515_v8 = vcombine.low %v2923_v56, %v2927_v59 }
 0x4e2   : > { %7774 = vmatpush1.bf16.msra.mxu1 %v11435_v41  ;;  %v11388_v41 = vcombine.high %v2795_v53, %v2799_v55  ;;  %v2915_v5 = vld [vmem:[#allocation9 + $0xf90] sm:$0xff] }
 0x4e3   : > { %7775 = vmatprep.subr.bf16.mxu1 %v11428_v4  ;;  %v2791_v4 = vld [vmem:[#allocation9 + $0xbb0] sm:$0xff] }
 0x4e4   : > { %7735 = vmatpush1.bf16.msra.mxu0 %v11299_v9  ;;  %v2919_v6 = vld [vmem:[#allocation9 + $0xfb0] sm:$0xff]  ;;  %v11380_v9 = vcombine.high %v2787_v3, %v2791_v4  ;;  %v11379_v19 = vcombine.low %v2787_v3, %v2791_v4 }
 0x4e5   : > { %7736 = vmatprep.subr.bf16.mxu0 %v11292_v14  ;;  %v2779_v14 = vld [vmem:[#allocation9 + $0xb50] sm:$0xff]  ;;  %v11507_v21 = vcombine.low %v2915_v5, %v2919_v6 }
 0x4e6   : > { %7776 = vmatpush1.bf16.msra.mxu1 %v11427_v12  ;;  %v11508_v12 = vcombine.high %v2915_v5, %v2919_v6  ;;  %v2907_v17 = vld [vmem:[#allocation9 + $0xf50] sm:$0xff] }
 0x4e7   : > { %7777 = vmatprep.subr.bf16.mxu1 %v11420_v15  ;;  %v2783_v15 = vld [vmem:[#allocation9 + $0xb70] sm:$0xff] }
 0x4e8   : > { %7737 = vmatpush1.bf16.msra.mxu0 %v11291_v22  ;;  %v2911_v60 = vld [vmem:[#allocation9 + $0xf70] sm:$0xff]  ;;  %v11372_v22 = vcombine.high %v2779_v14, %v2783_v15  ;;  %v11371_v16 = vcombine.low %v2779_v14, %v2783_v15 }
 0x4e9   : > { %7738 = vmatprep.subr.bf16.mxu0 %v11284_v24  ;;  %v2771_v24 = vld [vmem:[#allocation9 + $0xb10] sm:$0xff]  ;;  %v11499_v34 = vcombine.low %v2907_v17, %v2911_v60 }
 0x4ea   : > { %7778 = vmatpush1.bf16.msra.mxu1 %v11419_v25  ;;  %v11500_v25 = vcombine.high %v2907_v17, %v2911_v60  ;;  %v2899_v30 = vld [vmem:[#allocation9 + $0xf10] sm:$0xff] }
 0x4eb   : > { %7779 = vmatprep.subr.bf16.mxu1 %v11412_v26  ;;  %v2775_v26 = vld [vmem:[#allocation9 + $0xb30] sm:$0xff] }
 0x4ec   : > { %7739 = vmatpush1.bf16.msra.mxu0 %v11283_v37  ;;  %v2903_v32 = vld [vmem:[#allocation9 + $0xf30] sm:$0xff]  ;;  %v11364_v37 = vcombine.high %v2771_v24, %v2775_v26  ;;  %v11363_v45 = vcombine.low %v2771_v24, %v2775_v26 }
 0x4ed   : > { %7740 = vmatprep.subr.bf16.mxu0 %v11276_v40  ;;  %v2763_v40 = vld [vmem:[#allocation9 + $0xad0] sm:$0xff]  ;;  %v11491_v47 = vcombine.low %v2899_v30, %v2903_v32 }
 0x4ee   : > { %7780 = vmatpush1.bf16.msra.mxu1 %v11411_v10  ;;  %v11492_v10 = vcombine.high %v2899_v30, %v2903_v32  ;;  %v2891_v44 = vld [vmem:[#allocation9 + $0xed0] sm:$0xff] }
 0x4ef   : > { %7781 = vmatprep.subr.bf16.mxu1 %v11404_v18  ;;  %v2767_v18 = vld [vmem:[#allocation9 + $0xaf0] sm:$0xff] }
 0x4f0   : > { %7741 = vmatpush1.bf16.msra.mxu0 %v11275_v28  ;;  %v2895_v31 = vld [vmem:[#allocation9 + $0xef0] sm:$0xff]  ;;  %v11356_v28 = vcombine.high %v2763_v40, %v2767_v18  ;;  %v11355_v56 = vcombine.low %v2763_v40, %v2767_v18 }
 0x4f1   : > { %7742 = vmatprep.subr.bf16.mxu0 %v11268_v42  ;;  %v2755_v42 = vld [vmem:[#allocation9 + $0xa90] sm:$0xff]  ;;  %v11483_v59 = vcombine.low %v2891_v44, %v2895_v31 }
 0x4f2   : > { %7782 = vmatpush1.bf16.msra.mxu1 %v11403_v51  ;;  %v11484_v51 = vcombine.high %v2891_v44, %v2895_v31  ;;  %v2883_v53 = vld [vmem:[#allocation9 + $0xe90] sm:$0xff] }
 0x4f3   : > { %7783 = vmatprep.subr.bf16.mxu1 %v11396_v52  ;;  %v2759_v52 = vld [vmem:[#allocation9 + $0xab0] sm:$0xff] }
 0x4f4   : > { %7743 = vmatpush1.bf16.msra.mxu0 %v11267_v61  ;;  %v2887_v55 = vld [vmem:[#allocation9 + $0xeb0] sm:$0xff]  ;;  %v11348_v61 = vcombine.high %v2755_v42, %v2759_v52  ;;  %v11347_v5 = vcombine.low %v2755_v42, %v2759_v52 }
 0x4f5   : > { %7744 = vmatprep.subr.bf16.mxu0 %v11388_v41  ;;  %v2747_v41 = vld [vmem:[#allocation9 + $0xa50] sm:$0xff]  ;;  %v11475_v6 = vcombine.low %v2883_v53, %v2887_v55 }
 0x4f6   : > { %7784 = vmatpush1.bf16.msra.mxu1 %v11395_v62  ;;  %v11476_v62 = vcombine.high %v2883_v53, %v2887_v55  ;;  %v2875_v3 = vld [vmem:[#allocation9 + $0xe50] sm:$0xff] }
 0x4f7   : > { %7785 = vmatprep.subr.bf16.mxu1 %v11516_v1  ;;  %v2751_v1 = vld [vmem:[#allocation9 + $0xa70] sm:$0xff] }
 0x4f8   : > { %7745 = vmatpush2.bf16.msra.mxu0 %v11387_v7  ;;  %v2879_v4 = vld [vmem:[#allocation9 + $0xe70] sm:$0xff]  ;;  %v11340_v7 = vcombine.high %v2747_v41, %v2751_v1  ;;  %v11339_v17 = vcombine.low %v2747_v41, %v2751_v1 }
 0x4f9   : > { %7746 = vmatprep.subr.bf16.mxu0 %v11380_v9  ;;  %v2739_v9 = vld [vmem:[#allocation9 + $0xa10] sm:$0xff]  ;;  %v11467_v60 = vcombine.low %v2875_v3, %v2879_v4 }
 0x4fa   : > { %7786 = vmatpush2.bf16.msra.mxu1 %v11515_v8  ;;  %v11468_v8 = vcombine.high %v2875_v3, %v2879_v4  ;;  %v2867_v14 = vld [vmem:[#allocation9 + $0xe10] sm:$0xff] }
 0x4fb   : > { %7787 = vmatprep.subr.bf16.mxu1 %v11508_v12  ;;  %v2743_v12 = vld [vmem:[#allocation9 + $0xa30] sm:$0xff] }
 0x4fc   : > { %7747 = vmatpush2.bf16.msra.mxu0 %v11379_v19  ;;  %v2871_v15 = vld [vmem:[#allocation9 + $0xe30] sm:$0xff]  ;;  %v11332_v19 = vcombine.high %v2739_v9, %v2743_v12  ;;  %v11331_v30 = vcombine.low %v2739_v9, %v2743_v12 }
 0x4fd   : > { %7748 = vmatprep.subr.bf16.mxu0 %v11372_v22  ;;  %v2987_v22 = vld [vmem:[#allocation9 + $0x11d0] sm:$0xff]  ;;  %v11459_v32 = vcombine.low %v2867_v14, %v2871_v15 }
 0x4fe   : > { %7788 = vmatpush2.bf16.msra.mxu1 %v11507_v21  ;;  %v11460_v21 = vcombine.high %v2867_v14, %v2871_v15  ;;  %v3115_v24 = vld [vmem:[#allocation9 + $0x15d0] sm:$0xff] }
 0x4ff   : > { %7789 = vmatprep.subr.bf16.mxu1 %v11500_v25  ;;  %v2991_v25 = vld [vmem:[#allocation9 + $0x11f0] sm:$0xff] }
 0x500   : > { %7749 = vmatpush2.bf16.msra.mxu0 %v11371_v16  ;;  %v3119_v26 = vld [vmem:[#allocation9 + $0x15f0] sm:$0xff]  ;;  %v11580_v16 = vcombine.high %v2987_v22, %v2991_v25  ;;  %v11579_v44 = vcombine.low %v2987_v22, %v2991_v25 }
 0x501   : > { %7750 = vmatprep.subr.bf16.mxu0 %v11364_v37  ;;  %v2979_v37 = vld [vmem:[#allocation9 + $0x1190] sm:$0xff]  ;;  %v11707_v31 = vcombine.low %v3115_v24, %v3119_v26 }
 0x502   : > { %7790 = vmatpush2.bf16.msra.mxu1 %v11499_v34  ;;  %v11708_v34 = vcombine.high %v3115_v24, %v3119_v26  ;;  %v3107_v40 = vld [vmem:[#allocation9 + $0x1590] sm:$0xff] }
 0x503   : > { %7791 = vmatprep.subr.bf16.mxu1 %v11492_v10  ;;  %v2983_v10 = vld [vmem:[#allocation9 + $0x11b0] sm:$0xff] }
 0x504   : > { %7751 = vmatpush2.bf16.msra.mxu0 %v11363_v45  ;;  %v3111_v18 = vld [vmem:[#allocation9 + $0x15b0] sm:$0xff]  ;;  %v11572_v45 = vcombine.high %v2979_v37, %v2983_v10 }
 0x505   : > { %7752 = vmatprep.subr.bf16.mxu0 %v11356_v28  ;;  %v2971_v28 = vld [vmem:[#allocation9 + $0x1150] sm:$0xff] }
 0x506   : > { %7792 = vmatpush2.bf16.msra.mxu1 %v11491_v47  ;;  %v11700_v47 = vcombine.high %v3107_v40, %v3111_v18  ;;  %v3099_v52 = vld [vmem:[#allocation9 + $0x1550] sm:$0xff] }
 0x507   : > { %7793 = vmatprep.subr.bf16.mxu1 %v11484_v51  ;;  %v2975_v51 = vld [vmem:[#allocation9 + $0x1170] sm:$0xff] }
 0x508   : > { %7753 = vmatpush2.bf16.msra.mxu0 %v11355_v56  ;;  %v3103_v53 = vld [vmem:[#allocation9 + $0x1570] sm:$0xff]  ;;  %v11564_v41 = vcombine.high %v2971_v28, %v2975_v51  ;;  %v11563_v15 = vcombine.low %v2971_v28, %v2975_v51 }
 0x509   : > { %7754 = vmatprep.subr.bf16.mxu0 %v11348_v61  ;;  %v3095_v9 = vld [vmem:[#allocation9 + $0x1530] sm:$0xff] }
 0x50a   : > { %7794 = vmatpush2.bf16.msra.mxu1 %v11483_v59  ;;  %v11571_v59 = vcombine.low %v2979_v37, %v2983_v10  ;;  %v2955_v22 = vld [vmem:[#allocation9 + $0x10d0] sm:$0xff] }
 0x50b   : > { %7795 = vmatprep.subr.bf16.mxu1 %v11476_v62  ;;  %v11699_v62 = vcombine.low %v3107_v40, %v3111_v18  ;;  %v2959_v25 = vld [vmem:[#allocation9 + $0x10f0] sm:$0xff] }
 0x50c   : > { %7755 = vmatpush2.bf16.msra.mxu0 %v11347_v5  ;;  %v11692_v5 = vcombine.high %v3099_v52, %v3103_v53  ;;  %v3083_v24 = vld [vmem:[#allocation9 + $0x14d0] sm:$0xff] }
 0x50d   : > { %7756 = vmatprep.subr.bf16.mxu0 %v11340_v7  ;;  %v2967_v7 = vld [vmem:[#allocation9 + $0x1130] sm:$0xff] }
 0x50e   : > { %7796 = vmatpush2.bf16.msra.mxu1 %v11475_v6  ;;  %v2963_v6 = vld [vmem:[#allocation9 + $0x1110] sm:$0xff] }
 0x50f   : > { %7797 = vmatprep.subr.bf16.mxu1 %v11468_v8  ;;  %v3091_v8 = vld [vmem:[#allocation9 + $0x1510] sm:$0xff] }
 0x510   : > { %7757 = vmatpush2.bf16.msra.mxu0 %v11339_v17  ;;  %v3087_v26 = vld [vmem:[#allocation9 + $0x14f0] sm:$0xff] }
 0x511   : > { %7758 = vmatprep.subr.bf16.mxu0 %v11332_v19  ;;  %v2947_v37 = vld [vmem:[#allocation9 + $0x1090] sm:$0xff] }
 0x512   : > { %7798 = vmatpush2.bf16.msra.mxu1 %v11467_v60  ;;  %v11556_v60 = vcombine.high %v2963_v6, %v2967_v7  ;;  %v2951_v10 = vld [vmem:[#allocation9 + $0x10b0] sm:$0xff] }
 0x513   : > { %7799 = vmatprep.subr.bf16.mxu1 %v11460_v21  ;;  %v11684_v21 = vcombine.high %v3091_v8, %v3095_v9  ;;  %v3075_v40 = vld [vmem:[#allocation9 + $0x1490] sm:$0xff] }
 0x514   : > { %7759 = vmatpush2.bf16.msra.mxu0 %v11331_v30  ;;  %v11555_v30 = vcombine.low %v2963_v6, %v2967_v7  ;;  %v3079_v18 = vld [vmem:[#allocation9 + $0x14b0] sm:$0xff] }
 0x515   : > { %7810 = vmatprep.subr.bf16.mxu0 %v11580_v16  ;;  %v11548_v16 = vcombine.high %v2955_v22, %v2959_v25  ;;  %v2939_v28 = vld [vmem:[#allocation9 + $0x1050] sm:$0xff] }
 0x516   : > { %7800 = vmatpush2.bf16.msra.mxu1 %v11459_v32  ;;  %v11683_v32 = vcombine.low %v3091_v8, %v3095_v9  ;;  %v2943_v51 = vld [vmem:[#allocation9 + $0x1070] sm:$0xff] }
 0x517   : > { %7851 = vmatprep.subr.bf16.mxu1 %v11708_v34  ;;  %v7516_v42 = vpop.f32.mrf.mxu0  ;;  %7761 = vmatmul.mubr.bf16.vlgmr.msra.gmra.mxu0 %v13950_v39  ;;  %v11676_v34 = vcombine.high %v3083_v24, %v3087_v26  ;;  %v3055_v8 = vld [vmem:[#allocation9 + $0x13f0] sm:$0xff] }
 0x518   : > { %v7517_v55 = vadd.f32 %v7516_v42, %v14021_v46  ;;  %7811 = vmatpush1.bf16.msra.mxu0 %v11579_v44  ;;  %7842 = vmatprep.mubr.bf16.mxu0 %v13953_v48  ;;  %v11547_v44 = vcombine.low %v2955_v22, %v2959_v25  ;;  %v3067_v42 = vld [vmem:[#allocation9 + $0x1450] sm:$0xff] }
 0x519   : > { %v7557_v56 = vpop.f32.mrf.mxu1  ;;  %7802 = vmatmul.mubr.bf16.vlgmr.msra.gmra.mxu1 %v13957_v49  ;;  %v7518_v61 = vpop.f32.mrf.mxu0  ;;  %7812 = vmatprep.subr.bf16.mxu0 %v11572_v45  ;;  %v11540_v45 = vcombine.high %v2947_v37, %v2951_v10  ;;  %v3179_v9 = vld [vmem:[#allocation9 + $0x17d0] sm:$0xff] }
 0x51a   : > { %7852 = vmatpush1.bf16.msra.mxu1 %v11707_v31  ;;  %v14030_v1 = vadd.f32 %v7557_v56, %v7517_v55  ;;  %v7519_v3 = vadd.f32 %v7518_v61, %v14025_v57  ;;  %7883 = vmatprep.mubr.bf16.mxu1 %v13962_v58  ;;  %v11691_v57 = vcombine.low %v3099_v52, %v3103_v53  ;;  %v3071_v52 = vld [vmem:[#allocation9 + $0x1470] sm:$0xff] }
 0x51b   : > { %v7559_v4 = vpop.f32.mrf.mxu1  ;;  %7853 = vmatprep.subr.bf16.mxu1 %v11700_v47  ;;  %v7520_v46 = vpop.f32.mrf.mxu0  ;;  %v11675_v31 = vcombine.low %v3083_v24, %v3087_v26  ;;  %v11668_v47 = vcombine.high %v3075_v40, %v3079_v18  ;;  %v11539_v53 = vcombine.low %v2947_v37, %v2951_v10  ;;  %v11667_v55 = vcombine.low %v3075_v40, %v3079_v18  ;;  %v2931_v61 = vld [vmem:[#allocation9 + $0x1010] sm:$0xff] }
 0x51c   : > { %v14035_v12 = vadd.f32 %v7559_v4, %v7519_v3  ;;  %7813 = vmatpush1.bf16.msra.mxu0 %v11571_v59  ;;  %v11532_v56 = vcombine.high %v2939_v28, %v2943_v51  ;;  %v11660_v59 = vcombine.high %v3067_v42, %v3071_v52  ;;  %v3063_v3 = vld [vmem:[#allocation9 + $0x1430] sm:$0xff]  ;;  %v11531_v4 = vcombine.low %v2939_v28, %v2943_v51 }
 0x51d   : > { %v7561_v14 = vpop.f32.mrf.mxu1  ;;  %v7521_v17 = vpop.f32.mrf.mxu0  ;;  %7814 = vmatprep.subr.bf16.mxu0 %v11564_v41  ;;  %v3059_v41 = vld [vmem:[#allocation9 + $0x1410] sm:$0xff] }
 0x51e   : > { %7854 = vmatpush1.bf16.msra.mxu1 %v11699_v62  ;;  %v2935_v62 = vld [vmem:[#allocation9 + $0x1030] sm:$0xff]  ;;  %v11652_v7 = vcombine.high %v3059_v41, %v3063_v3  ;;  %v11651_v17 = vcombine.low %v3059_v41, %v3063_v3 }
 0x51f   : > { %v7562_v19 = vpop.f32.mrf.mxu1  ;;  %7855 = vmatprep.subr.bf16.mxu1 %v11692_v5  ;;  %v11659_v5 = vcombine.low %v3067_v42, %v3071_v52  ;;  %v11524_v6 = vcombine.high %v2931_v61, %v2935_v62  ;;  %v3051_v46 = vld [vmem:[#allocation9 + $0x13d0] sm:$0xff] }
 0x520   : > { %7815 = vmatpush1.bf16.msra.mxu0 %v11563_v15  ;;  %v3183_v14 = vld [vmem:[#allocation9 + $0x17f0] sm:$0xff]  ;;  %v11523_v15 = vcombine.low %v2931_v61, %v2935_v62  ;;  %v11643_v24 = vcombine.low %v3051_v46, %v3055_v8 }
 0x521   : > { %7816 = vmatprep.subr.bf16.mxu0 %v11556_v60  ;;  %v11772_v60 = vcombine.high %v3179_v9, %v3183_v14  ;;  %v3043_v19 = vld [vmem:[#allocation9 + $0x1390] sm:$0xff]  ;;  %v11771_v26 = vcombine.low %v3179_v9, %v3183_v14 }
 0x522   : > { %7856 = vmatpush1.bf16.msra.mxu1 %v11691_v57  ;;  %v11644_v57 = vcombine.high %v3051_v46, %v3055_v8  ;;  %v3171_v22 = vld [vmem:[#allocation9 + $0x1790] sm:$0xff] }
 0x523   : > { %7857 = vmatprep.subr.bf16.mxu1 %v11684_v21  ;;  %v3047_v21 = vld [vmem:[#allocation9 + $0x13b0] sm:$0xff] }
 0x524   : > { %7817 = vmatpush1.bf16.msra.mxu0 %v11555_v30  ;;  %v3175_v25 = vld [vmem:[#allocation9 + $0x17b0] sm:$0xff]  ;;  %v11636_v30 = vcombine.high %v3043_v19, %v3047_v21  ;;  %v11635_v40 = vcombine.low %v3043_v19, %v3047_v21 }
 0x525   : > { %7818 = vmatprep.subr.bf16.mxu0 %v11548_v16  ;;  %v3035_v16 = vld [vmem:[#allocation9 + $0x1350] sm:$0xff]  ;;  %v11763_v18 = vcombine.low %v3171_v22, %v3175_v25 }
 0x526   : > { %7858 = vmatpush1.bf16.msra.mxu1 %v11683_v32  ;;  %v11764_v32 = vcombine.high %v3171_v22, %v3175_v25  ;;  %v3163_v37 = vld [vmem:[#allocation9 + $0x1750] sm:$0xff] }
 0x527   : > { %7859 = vmatprep.subr.bf16.mxu1 %v11676_v34  ;;  %v3039_v34 = vld [vmem:[#allocation9 + $0x1370] sm:$0xff] }
 0x528   : > { %7819 = vmatpush1.bf16.msra.mxu0 %v11547_v44  ;;  %v3167_v10 = vld [vmem:[#allocation9 + $0x1770] sm:$0xff]  ;;  %v11628_v44 = vcombine.high %v3035_v16, %v3039_v34  ;;  %v11627_v42 = vcombine.low %v3035_v16, %v3039_v34 }
 0x529   : > { %7820 = vmatprep.subr.bf16.mxu0 %v11540_v45  ;;  %v3027_v45 = vld [vmem:[#allocation9 + $0x1310] sm:$0xff]  ;;  %v11755_v52 = vcombine.low %v3163_v37, %v3167_v10 }
 0x52a   : > { %7860 = vmatpush1.bf16.msra.mxu1 %v11675_v31  ;;  %v11756_v31 = vcombine.high %v3163_v37, %v3167_v10  ;;  %v3155_v28 = vld [vmem:[#allocation9 + $0x1710] sm:$0xff] }
 0x52b   : > { %7861 = vmatprep.subr.bf16.mxu1 %v11668_v47  ;;  %v3031_v47 = vld [vmem:[#allocation9 + $0x1330] sm:$0xff] }
 0x52c   : > { %7821 = vmatpush1.bf16.msra.mxu0 %v11539_v53  ;;  %v3159_v51 = vld [vmem:[#allocation9 + $0x1730] sm:$0xff]  ;;  %v11620_v53 = vcombine.high %v3027_v45, %v3031_v47  ;;  %v11619_v41 = vcombine.low %v3027_v45, %v3031_v47  ;;  %v2604_v45 = vld [vmem:[#allocation9 + $0x5d8] sm:$0xff] }
 0x52d   : > { %7822 = vmatprep.subr.bf16.mxu0 %v11532_v56  ;;  %v3019_v56 = vld [vmem:[#allocation9 + $0x12d0] sm:$0xff]  ;;  %v11747_v3 = vcombine.low %v3155_v28, %v3159_v51  ;;  %v2608_v47 = vld [vmem:[#allocation9 + $0x5f8] sm:$0xff] }
 0x52e   : > { %7862 = vmatpush1.bf16.msra.mxu1 %v11667_v55  ;;  %v11748_v55 = vcombine.high %v3155_v28, %v3159_v51  ;;  %v3147_v61 = vld [vmem:[#allocation9 + $0x16d0] sm:$0xff] }
 0x52f   : > { %7863 = vmatprep.subr.bf16.mxu1 %v11660_v59  ;;  %v3023_v59 = vld [vmem:[#allocation9 + $0x12f0] sm:$0xff] }
 0x530   : > { %7823 = vmatpush1.bf16.msra.mxu0 %v11531_v4  ;;  %v3151_v62 = vld [vmem:[#allocation9 + $0x16f0] sm:$0xff]  ;;  %v11612_v4 = vcombine.high %v3019_v56, %v3023_v59  ;;  %v11611_v9 = vcombine.low %v3019_v56, %v3023_v59  ;;  %v2596_v56 = vld [vmem:[#allocation9 + $0x598] sm:$0xff] }
 0x531   : > { %7824 = vmatprep.subr.bf16.mxu0 %v11524_v6  ;;  %v3011_v6 = vld [vmem:[#allocation9 + $0x1290] sm:$0xff]  ;;  %v11739_v14 = vcombine.low %v3147_v61, %v3151_v62  ;;  %v2600_v59 = vld [vmem:[#allocation9 + $0x5b8] sm:$0xff] }
 0x532   : > { %7864 = vmatpush1.bf16.msra.mxu1 %v11659_v5  ;;  %v11740_v5 = vcombine.high %v3147_v61, %v3151_v62  ;;  %v3139_v46 = vld [vmem:[#allocation9 + $0x1690] sm:$0xff]  ;;  %v11197_v62 = vcombine.low %v2604_v45, %v2608_v47 }
 0x533   : > { %7865 = vmatprep.subr.bf16.mxu1 %v11652_v7  ;;  %v3015_v7 = vld [vmem:[#allocation9 + $0x12b0] sm:$0xff] }
 0x534   : > { %7825 = vmatpush1.bf16.msra.mxu0 %v11523_v15  ;;  %v3143_v8 = vld [vmem:[#allocation9 + $0x16b0] sm:$0xff]  ;;  %v11604_v15 = vcombine.high %v3011_v6, %v3015_v7  ;;  %v11603_v22 = vcombine.low %v3011_v6, %v3015_v7  ;;  %v2588_v7 = vld [vmem:[#allocation9 + $0x558] sm:$0xff] }
 0x535   : > { %7826 = vmatprep.subr.bf16.mxu0 %v11644_v57  ;;  %v3003_v57 = vld [vmem:[#allocation9 + $0x1250] sm:$0xff]  ;;  %v11731_v25 = vcombine.low %v3139_v46, %v3143_v8 }
 0x536   : > { %7866 = vmatpush1.bf16.msra.mxu1 %v11651_v17  ;;  %v11732_v17 = vcombine.high %v3139_v46, %v3143_v8  ;;  %v3131_v19 = vld [vmem:[#allocation9 + $0x1650] sm:$0xff]  ;;  %v2592_v46 = vld [vmem:[#allocation9 + $0x578] sm:$0xff] }
 0x537   : > { %7867 = vmatprep.subr.bf16.mxu1 %v11772_v60  ;;  %v3007_v60 = vld [vmem:[#allocation9 + $0x1270] sm:$0xff] }
 0x538   : > { %7827 = vmatpush2.bf16.msra.mxu0 %v11643_v24  ;;  %v3135_v21 = vld [vmem:[#allocation9 + $0x1670] sm:$0xff]  ;;  %v11596_v24 = vcombine.high %v3003_v57, %v3007_v60  ;;  %v11595_v37 = vcombine.low %v3003_v57, %v3007_v60 }
 0x539   : > { %7828 = vmatprep.subr.bf16.mxu0 %v11636_v30  ;;  %v2995_v30 = vld [vmem:[#allocation9 + $0x1210] sm:$0xff]  ;;  %v11723_v10 = vcombine.low %v3131_v19, %v3135_v21 }
 0x53a   : > { %7868 = vmatpush2.bf16.msra.mxu1 %v11771_v26  ;;  %v11724_v26 = vcombine.high %v3131_v19, %v3135_v21  ;;  %v3123_v16 = vld [vmem:[#allocation9 + $0x1610] sm:$0xff] }
 0x53b   : > { %7869 = vmatprep.subr.bf16.mxu1 %v11764_v32  ;;  %v2999_v32 = vld [vmem:[#allocation9 + $0x1230] sm:$0xff] }
 0x53c   : > { %7829 = vmatpush2.bf16.msra.mxu0 %v11635_v40  ;;  %v3127_v34 = vld [vmem:[#allocation9 + $0x1630] sm:$0xff]  ;;  %v11588_v40 = vcombine.high %v2995_v30, %v2999_v32  ;;  %v11587_v28 = vcombine.low %v2995_v30, %v2999_v32  ;;  %v2584_v30 = vld [vmem:[#allocation9 + $0x538] sm:$0xff] }
 0x53d   : > { %7830 = vmatprep.subr.bf16.mxu0 %v11628_v44  ;;  %v2476_v44 = vld [vmem:[#allocation9 + $0x1d8] sm:$0xff]  ;;  %v11715_v51 = vcombine.low %v3123_v16, %v3127_v34 }
 0x53e   : > { %7870 = vmatpush2.bf16.msra.mxu1 %v11763_v18  ;;  %v11716_v18 = vcombine.high %v3123_v16, %v3127_v34 }
 0x53f   : > { %7871 = vmatprep.subr.bf16.mxu1 %v11756_v31  ;;  %v2480_v31 = vld [vmem:[#allocation9 + $0x1f8] sm:$0xff] }
 0x540   : > { %7831 = vmatpush2.bf16.msra.mxu0 %v11627_v42  ;;  %v11070_v42 = vcombine.high %v2476_v44, %v2480_v31  ;;  %v11069_v61 = vcombine.low %v2476_v44, %v2480_v31  ;;  %v2444_v44 = vld [vmem:[#allocation9 + $0xd8] sm:$0xff] }
 0x541   : > { %7832 = vmatprep.subr.bf16.mxu0 %v11620_v53  ;;  %v2468_v53 = vld [vmem:[#allocation9 + $0x198] sm:$0xff] }
 0x542   : > { %7872 = vmatpush2.bf16.msra.mxu1 %v11755_v52  ;;  %v11198_v52 = vcombine.high %v2604_v45, %v2608_v47  ;;  %v2572_v31 = vld [vmem:[#allocation9 + $0x4d8] sm:$0xff] }
 0x543   : > { %7873 = vmatprep.subr.bf16.mxu1 %v11748_v55  ;;  %v2472_v55 = vld [vmem:[#allocation9 + $0x1b8] sm:$0xff] }
 0x544   : > { %7833 = vmatpush2.bf16.msra.mxu0 %v11619_v41  ;;  %v11062_v41 = vcombine.high %v2468_v53, %v2472_v55  ;;  %v2576_v45 = vld [vmem:[#allocation9 + $0x4f8] sm:$0xff] }
 0x545   : > { %7834 = vmatprep.subr.bf16.mxu0 %v11612_v4  ;;  %v2460_v4 = vld [vmem:[#allocation9 + $0x158] sm:$0xff] }
 0x546   : > { %7874 = vmatpush2.bf16.msra.mxu1 %v11747_v3  ;;  %v11190_v3 = vcombine.high %v2596_v56, %v2600_v59 }
 0x547   : > { %7875 = vmatprep.subr.bf16.mxu1 %v11740_v5  ;;  %v2464_v5 = vld [vmem:[#allocation9 + $0x178] sm:$0xff] }
 0x548   : > { %7835 = vmatpush2.bf16.msra.mxu0 %v11611_v9  ;;  %v11054_v57 = vcombine.high %v2460_v4, %v2464_v5  ;;  %v11053_v34 = vcombine.low %v2460_v4, %v2464_v5  ;;  %v2556_v4 = vld [vmem:[#allocation9 + $0x458] sm:$0xff] }
 0x549   : > { %7836 = vmatprep.subr.bf16.mxu0 %v11604_v15  ;;  %v2560_v5 = vld [vmem:[#allocation9 + $0x478] sm:$0xff] }
 0x54a   : > { %7876 = vmatpush2.bf16.msra.mxu1 %v11739_v14  ;;  %v11061_v14 = vcombine.low %v2468_v53, %v2472_v55  ;;  %v2564_v53 = vld [vmem:[#allocation9 + $0x498] sm:$0xff] }
 0x54b   : > { %7877 = vmatprep.subr.bf16.mxu1 %v11732_v17  ;;  %v11189_v17 = vcombine.low %v2596_v56, %v2600_v59  ;;  %v2568_v55 = vld [vmem:[#allocation9 + $0x4b8] sm:$0xff]  ;;  %v11165_v59 = vcombine.low %v2572_v31, %v2576_v45 }
 0x54c   : > { %7837 = vmatpush2.bf16.msra.mxu0 %v11603_v22  ;;  %v11182_v22 = vcombine.high %v2588_v7, %v2592_v46 }
 0x54d   : > { %7838 = vmatprep.subr.bf16.mxu0 %v11596_v24  ;;  %v2456_v24 = vld [vmem:[#allocation9 + $0x138] sm:$0xff] }
 0x54e   : > { %7878 = vmatpush2.bf16.msra.mxu1 %v11731_v25  ;;  %v2452_v25 = vld [vmem:[#allocation9 + $0x118] sm:$0xff] }
 0x54f   : > { %7879 = vmatprep.subr.bf16.mxu1 %v11724_v26  ;;  %v2580_v26 = vld [vmem:[#allocation9 + $0x518] sm:$0xff]  ;;  %v11045_v47 = vcombine.low %v2452_v25, %v2456_v24 }
 0x550   : > { %7839 = vmatpush2.bf16.msra.mxu0 %v11595_v37 }
 0x551   : > { %7840 = vmatprep.subr.bf16.mxu0 %v11588_v40 }
 0x552   : > { %7880 = vmatpush2.bf16.msra.mxu1 %v11723_v10  ;;  %v11046_v10 = vcombine.high %v2452_v25, %v2456_v24  ;;  %v2540_v25 = vld [vmem:[#allocation9 + $0x3d8] sm:$0xff] }
 0x553   : > { %7881 = vmatprep.subr.bf16.mxu1 %v11716_v18  ;;  %v11174_v18 = vcombine.high %v2580_v26, %v2584_v30  ;;  %v2544_v24 = vld [vmem:[#allocation9 + $0x3f8] sm:$0xff] }
 0x554   : > { %7841 = vmatpush2.bf16.msra.mxu0 %v11587_v28 }
 0x555   : > { %7892 = vmatprep.subr.bf16.mxu0 %v11070_v42  ;;  %v2436_v42 = vld [vmem:[#allocation9 + $0x98] sm:$0xff] }
 0x556   : > { %7882 = vmatpush2.bf16.msra.mxu1 %v11715_v51  ;;  %v11166_v51 = vcombine.high %v2572_v31, %v2576_v45 }
 0x557   : > { %7933 = vmatprep.subr.bf16.mxu1 %v11198_v52  ;;  %v7598_v6 = vpop.f32.mrf.mxu0  ;;  %7843 = vmatmul.mubr.bf16.vlgmr.msra.gmra.mxu0 %v13969_v13  ;;  %v2440_v52 = vld [vmem:[#allocation9 + $0xb8] sm:$0xff] }
 0x558   : > { %v7599_v8 = vadd.f32 %v7598_v6, %v14030_v1  ;;  %7893 = vmatpush1.bf16.msra.mxu0 %v11069_v61  ;;  %7924 = vmatprep.mubr.bf16.mxu0 %v13866_v29  ;;  %v2448_v29 = vld [vmem:[#allocation9 + $0xf8] sm:$0xff]  ;;  %v11030_v61 = vcombine.high %v2436_v42, %v2440_v52  ;;  %v11029_v6 = vcombine.low %v2436_v42, %v2440_v52 }
 0x559   : > { %v7639_v9 = vpop.f32.mrf.mxu1  ;;  %7884 = vmatmul.mubr.bf16.vlgmr.msra.gmra.mxu1 %v13973_v23  ;;  %v7600_v15 = vpop.f32.mrf.mxu0  ;;  %7894 = vmatprep.subr.bf16.mxu0 %v11062_v41  ;;  %v11038_v28 = vcombine.high %v2444_v44, %v2448_v29  ;;  %v11037_v56 = vcombine.low %v2444_v44, %v2448_v29  ;;  %v2428_v41 = vld [vmem:[#allocation9 + $0x58] sm:$0xff]  ;;  %v11133_v44 = vcombine.low %v2540_v25, %v2544_v24 }
 0x55a   : > { %7934 = vmatpush1.bf16.msra.mxu1 %v11197_v62  ;;  %v14040_v60 = vadd.f32 %v7639_v9, %v7599_v8  ;;  %v7601_v19 = vadd.f32 %v7600_v15, %v14035_v12  ;;  %7965 = vmatprep.mubr.bf16.mxu1 %v13871_v33  ;;  %v11181_v12 = vcombine.low %v2588_v7, %v2592_v46  ;;  %v2420_v9 = vld [vmem:[#allocation9 + $0x18] sm:$0xff] }
 0x55b   : > { %v7641_v21 = vpop.f32.mrf.mxu1  ;;  %7935 = vmatprep.subr.bf16.mxu1 %v11190_v3  ;;  %v7602_v1 = vpop.f32.mrf.mxu0  ;;  %v11173_v33 = vcombine.low %v2580_v26, %v2584_v30  ;;  %v11158_v62 = vcombine.high %v2564_v53, %v2568_v55  ;;  %v2432_v3 = vld [vmem:[#allocation9 + $0x78] sm:$0xff]  ;;  %v11157_v7 = vcombine.low %v2564_v53, %v2568_v55  ;;  %v11150_v8 = vcombine.high %v2556_v4, %v2560_v5 }
 0x55c   : > { %v14045_v32 = vadd.f32 %v7641_v21, %v7601_v19  ;;  %7895 = vmatpush1.bf16.msra.mxu0 %v11061_v14  ;;  %v11022_v46 = vcombine.high %v2428_v41, %v2432_v3  ;;  %v2424_v14 = vld [vmem:[#allocation9 + $0x38] sm:$0xff]  ;;  %v11149_v19 = vcombine.low %v2556_v4, %v2560_v5 }
 0x55d   : > { %v7643_v16 = vpop.f32.mrf.mxu1  ;;  %v7603_v37 = vpop.f32.mrf.mxu0  ;;  %7896 = vmatprep.subr.bf16.mxu0 %v11054_v57  ;;  %v2548_v15 = vld [vmem:[#allocation9 + $0x418] sm:$0xff]  ;;  %v11021_v57 = vcombine.low %v2428_v41, %v2432_v3  ;;  %v11014_v21 = vcombine.high %v2420_v9, %v2424_v14  ;;  %v11013_v30 = vcombine.low %v2420_v9, %v2424_v14 }
 0x55e   : > { %7936 = vmatpush1.bf16.msra.mxu1 %v11189_v17  ;;  %v2552_v17 = vld [vmem:[#allocation9 + $0x438] sm:$0xff] }
 0x55f   : > { %v7644_v40 = vpop.f32.mrf.mxu1  ;;  %7937 = vmatprep.subr.bf16.mxu1 %v11182_v22  ;;  %v11142_v22 = vcombine.high %v2548_v15, %v2552_v17  ;;  %v2668_v1 = vld [vmem:[#allocation9 + $0x7d8] sm:$0xff]  ;;  %v11141_v16 = vcombine.low %v2548_v15, %v2552_v17 }
 0x560   : > { %7897 = vmatpush1.bf16.msra.mxu0 %v11053_v34  ;;  %v2672_v26 = vld [vmem:[#allocation9 + $0x7f8] sm:$0xff]  ;;  %v11134_v34 = vcombine.high %v2540_v25, %v2544_v24 }
 0x561   : > { %7898 = vmatprep.subr.bf16.mxu0 %v11046_v10  ;;  %v11262_v37 = vcombine.high %v2668_v1, %v2672_v26  ;;  %v2536_v10 = vld [vmem:[#allocation9 + $0x3b8] sm:$0xff]  ;;  %v11261_v29 = vcombine.low %v2668_v1, %v2672_v26 }
 0x562   : > { %7938 = vmatpush1.bf16.msra.mxu1 %v11181_v12  ;;  %v2532_v12 = vld [vmem:[#allocation9 + $0x398] sm:$0xff] }
 0x563   : > { %7939 = vmatprep.subr.bf16.mxu1 %v11174_v18  ;;  %v2660_v40 = vld [vmem:[#allocation9 + $0x798] sm:$0xff]  ;;  %v11126_v31 = vcombine.high %v2532_v12, %v2536_v10  ;;  %v11125_v42 = vcombine.low %v2532_v12, %v2536_v10 }
 0x564   : > { %7899 = vmatpush1.bf16.msra.mxu0 %v11045_v47  ;;  %v2664_v18 = vld [vmem:[#allocation9 + $0x7b8] sm:$0xff] }
 0x565   : > { %7900 = vmatprep.subr.bf16.mxu0 %v11038_v28  ;;  %v11254_v45 = vcombine.high %v2660_v40, %v2664_v18  ;;  %v2524_v47 = vld [vmem:[#allocation9 + $0x358] sm:$0xff]  ;;  %v11253_v52 = vcombine.low %v2660_v40, %v2664_v18 }
 0x566   : > { %7940 = vmatpush1.bf16.msra.mxu1 %v11173_v33  ;;  %v2528_v33 = vld [vmem:[#allocation9 + $0x378] sm:$0xff] }
 0x567   : > { %7941 = vmatprep.subr.bf16.mxu1 %v11166_v51  ;;  %v2652_v28 = vld [vmem:[#allocation9 + $0x758] sm:$0xff]  ;;  %v11118_v53 = vcombine.high %v2524_v47, %v2528_v33  ;;  %v11117_v41 = vcombine.low %v2524_v47, %v2528_v33 }
 0x568   : > { %7901 = vmatpush1.bf16.msra.mxu0 %v11037_v56  ;;  %v2656_v51 = vld [vmem:[#allocation9 + $0x778] sm:$0xff] }
 0x569   : > { %7902 = vmatprep.subr.bf16.mxu0 %v11030_v61  ;;  %v11246_v55 = vcombine.high %v2652_v28, %v2656_v51  ;;  %v2516_v56 = vld [vmem:[#allocation9 + $0x318] sm:$0xff]  ;;  %v11245_v3 = vcombine.low %v2652_v28, %v2656_v51 }
 0x56a   : > { %7942 = vmatpush1.bf16.msra.mxu1 %v11165_v59  ;;  %v2520_v59 = vld [vmem:[#allocation9 + $0x338] sm:$0xff] }
 0x56b   : > { %7943 = vmatprep.subr.bf16.mxu1 %v11158_v62  ;;  %v2644_v61 = vld [vmem:[#allocation9 + $0x718] sm:$0xff]  ;;  %v11110_v4 = vcombine.high %v2516_v56, %v2520_v59  ;;  %v11109_v9 = vcombine.low %v2516_v56, %v2520_v59  ;;  %v3205_v59 = vsub.s32 4, %v13852_v0 }
 0x56c   : > { %7903 = vmatpush1.bf16.msra.mxu0 %v11029_v6  ;;  %v2648_v62 = vld [vmem:[#allocation9 + $0x738] sm:$0xff] }
 0x56d   : > { %7904 = vmatprep.subr.bf16.mxu0 %v11022_v46  ;;  %v11238_v5 = vcombine.high %v2644_v61, %v2648_v62  ;;  %v2508_v6 = vld [vmem:[#allocation9 + $0x2d8] sm:$0xff]  ;;  %v11237_v14 = vcombine.low %v2644_v61, %v2648_v62 }
 0x56e   : > { %7944 = vmatpush1.bf16.msra.mxu1 %v11157_v7  ;;  %v2512_v7 = vld [vmem:[#allocation9 + $0x2f8] sm:$0xff] }
 0x56f   : > { %7945 = vmatprep.subr.bf16.mxu1 %v11150_v8  ;;  %v2636_v46 = vld [vmem:[#allocation9 + $0x6d8] sm:$0xff]  ;;  %v11102_v15 = vcombine.high %v2508_v6, %v2512_v7  ;;  %v11101_v25 = vcombine.low %v2508_v6, %v2512_v7 }
 0x570   : > { %7905 = vmatpush1.bf16.msra.mxu0 %v11021_v57  ;;  %v2640_v8 = vld [vmem:[#allocation9 + $0x6f8] sm:$0xff] }
 0x571   : > { %7906 = vmatprep.subr.bf16.mxu0 %v11014_v21  ;;  %v11230_v17 = vcombine.high %v2636_v46, %v2640_v8  ;;  %v2500_v57 = vld [vmem:[#allocation9 + $0x298] sm:$0xff]  ;;  %v11229_v24 = vcombine.low %v2636_v46, %v2640_v8  ;;  %v13012_v46 = vld [vmem:[#allocation10] sm:$0xff] }
 0x572   : > { %7946 = vmatpush1.bf16.msra.mxu1 %v11149_v19  ;;  %v2504_v19 = vld [vmem:[#allocation9 + $0x2b8] sm:$0xff]  ;;  %v3206_v8 = vrot.slane %v13012_v46, %v3205_v59 }
 0x573   : > { %7947 = vmatprep.subr.bf16.mxu1 %v11142_v22  ;;  %v2628_v21 = vld [vmem:[#allocation9 + $0x698] sm:$0xff]  ;;  %v11094_v1 = vcombine.high %v2500_v57, %v2504_v19  ;;  %v11093_v12 = vcombine.low %v2500_v57, %v2504_v19 }
 0x574   : > { %7907 = vmatpush1.bf16.msra.mxu0 %v11013_v30  ;;  %v2632_v22 = vld [vmem:[#allocation9 + $0x6b8] sm:$0xff] }
 0x575   : > { %7908 = vmatprep.subr.bf16.mxu0 %v11134_v34  ;;  %v11222_v26 = vcombine.high %v2628_v21, %v2632_v22  ;;  %v2492_v30 = vld [vmem:[#allocation9 + $0x258] sm:$0xff]  ;;  %v11221_v10 = vcombine.low %v2628_v21, %v2632_v22 }
 0x576   : > { %7948 = vmatpush1.bf16.msra.mxu1 %v11141_v16  ;;  %v2496_v16 = vld [vmem:[#allocation9 + $0x278] sm:$0xff] }
 0x577   : > { %7949 = vmatprep.subr.bf16.mxu1 %v11262_v37  ;;  %v2620_v34 = vld [vmem:[#allocation9 + $0x658] sm:$0xff]  ;;  %v11086_v40 = vcombine.high %v2492_v30, %v2496_v16  ;;  %v11085_v47 = vcombine.low %v2492_v30, %v2496_v16 }
 0x578   : > { %7909 = vmatpush2.bf16.msra.mxu0 %v11133_v44  ;;  %v2624_v37 = vld [vmem:[#allocation9 + $0x678] sm:$0xff] }
 0x579   : > { %7910 = vmatprep.subr.bf16.mxu0 %v11126_v31  ;;  %v11214_v18 = vcombine.high %v2620_v34, %v2624_v37  ;;  %v2484_v44 = vld [vmem:[#allocation9 + $0x218] sm:$0xff]  ;;  %v11213_v33 = vcombine.low %v2620_v34, %v2624_v37 }
 0x57a   : > { %7950 = vmatpush2.bf16.msra.mxu1 %v11261_v29  ;;  %v2488_v29 = vld [vmem:[#allocation9 + $0x238] sm:$0xff] }
 0x57b   : > { %7951 = vmatprep.subr.bf16.mxu1 %v11254_v45  ;;  %v2612_v31 = vld [vmem:[#allocation9 + $0x618] sm:$0xff]  ;;  %v11078_v28 = vcombine.high %v2484_v44, %v2488_v29  ;;  %v11077_v56 = vcombine.low %v2484_v44, %v2488_v29 }
 0x57c   : > { %7911 = vmatpush2.bf16.msra.mxu0 %v11125_v42  ;;  %v2616_v45 = vld [vmem:[#allocation9 + $0x638] sm:$0xff] }
 0x57d   : > { %7912 = vmatprep.subr.bf16.mxu0 %v11118_v53  ;;  %v11206_v51 = vcombine.high %v2612_v31, %v2616_v45  ;;  %v2732_v42 = vld [vmem:[#allocation9 + $0x9d8] sm:$0xff]  ;;  %v11205_v61 = vcombine.low %v2612_v31, %v2616_v45 }
 0x57e   : > { %7952 = vmatpush2.bf16.msra.mxu1 %v11253_v52  ;;  %v2736_v52 = vld [vmem:[#allocation9 + $0x9f8] sm:$0xff] }
 0x57f   : > { %7953 = vmatprep.subr.bf16.mxu1 %v11246_v55  ;;  %v2860_v53 = vld [vmem:[#allocation9 + $0xdd8] sm:$0xff]  ;;  %v11326_v62 = vcombine.high %v2732_v42, %v2736_v52 }
 0x580   : > { %7913 = vmatpush2.bf16.msra.mxu0 %v11117_v41  ;;  %v2864_v55 = vld [vmem:[#allocation9 + $0xdf8] sm:$0xff] }
 0x581   : > { %7914 = vmatprep.subr.bf16.mxu0 %v11110_v4  ;;  %v11454_v41 = vcombine.high %v2860_v53, %v2864_v55  ;;  %v2724_v4 = vld [vmem:[#allocation9 + $0x998] sm:$0xff] }
 0x582   : > { %7954 = vmatpush2.bf16.msra.mxu1 %v11245_v3  ;;  %v3209_v3 = vsub.s32 5, %v13852_v0  ;;  %v2852_v6 = vld [vmem:[#allocation9 + $0xd98] sm:$0xff] }
 0x583   : > { %7955 = vmatprep.subr.bf16.mxu1 %v11238_v5  ;;  %v2728_v5 = vld [vmem:[#allocation9 + $0x9b8] sm:$0xff] }
 0x584   : > { %7915 = vmatpush2.bf16.msra.mxu0 %v11109_v9  ;;  %v2856_v7 = vld [vmem:[#allocation9 + $0xdb8] sm:$0xff]  ;;  %v11325_v9 = vcombine.low %v2732_v42, %v2736_v52  ;;  %v11317_v30 = vcombine.low %v2724_v4, %v2728_v5 }
 0x585   : > { %7916 = vmatprep.subr.bf16.mxu0 %v11102_v15  ;;  %v11318_v15 = vcombine.high %v2724_v4, %v2728_v5  ;;  %v11446_v57 = vcombine.high %v2852_v6, %v2856_v7  ;;  %v2716_v19 = vld [vmem:[#allocation9 + $0x958] sm:$0xff]  ;;  %v11445_v34 = vcombine.low %v2852_v6, %v2856_v7 }
 0x586   : > { %7956 = vmatpush2.bf16.msra.mxu1 %v11237_v14  ;;  %v11453_v14 = vcombine.low %v2860_v53, %v2864_v55  ;;  %v2720_v21 = vld [vmem:[#allocation9 + $0x978] sm:$0xff] }
 0x587   : > { %7957 = vmatprep.subr.bf16.mxu1 %v11230_v17  ;;  %v3210_v17 = vrot.slane %v13012_v46, %v3209_v3  ;;  %v11310_v37 = vcombine.high %v2716_v19, %v2720_v21  ;;  %v2712_v44 = vld [vmem:[#allocation9 + $0x938] sm:$0xff] }
 0x588   : > { %7917 = vmatpush2.bf16.msra.mxu0 %v11101_v25  ;;  %v2844_v25 = vld [vmem:[#allocation9 + $0xd58] sm:$0xff] }
 0x589   : > { %7918 = vmatprep.subr.bf16.mxu0 %v11094_v1  ;;  %v2836_v31 = vld [vmem:[#allocation9 + $0xd18] sm:$0xff] }
 0x58a   : > { %7958 = vmatpush2.bf16.msra.mxu1 %v11229_v24  ;;  %v2848_v24 = vld [vmem:[#allocation9 + $0xd78] sm:$0xff] }
 0x58b   : > { %7959 = vmatprep.subr.bf16.mxu1 %v11222_v26  ;;  %v2700_v55 = vld [vmem:[#allocation9 + $0x8d8] sm:$0xff] }
 0x58c   : > { %7919 = vmatpush2.bf16.msra.mxu0 %v11093_v12  ;;  %v2832_v59 = vld [vmem:[#allocation9 + $0xcf8] sm:$0xff] }
 0x58d   : > { %7920 = vmatprep.subr.bf16.mxu0 %v11086_v40  ;;  %v2692_v3 = vld [vmem:[#allocation9 + $0x898] sm:$0xff] }
 0x58e   : > { %7960 = vmatpush2.bf16.msra.mxu1 %v11221_v10  ;;  %v2696_v4 = vld [vmem:[#allocation9 + $0x8b8] sm:$0xff] }
 0x58f   : > { %7961 = vmatprep.subr.bf16.mxu1 %v11214_v18  ;;  %v11438_v18 = vcombine.high %v2844_v25, %v2848_v24  ;;  %v2820_v5 = vld [vmem:[#allocation9 + $0xc98] sm:$0xff] }
 0x590   : > { %7921 = vmatpush2.bf16.msra.mxu0 %v11085_v47  ;;  %v2824_v6 = vld [vmem:[#allocation9 + $0xcb8] sm:$0xff] }
 0x591   : > { %7922 = vmatprep.subr.bf16.mxu0 %v11078_v28 }
 0x592   : > { %7962 = vmatpush2.bf16.msra.mxu1 %v11213_v33  ;;  %v11309_v33 = vcombine.low %v2716_v19, %v2720_v21  ;;  %v11285_v19 = vcombine.low %v2692_v3, %v2696_v4  ;;  %v11413_v21 = vcombine.low %v2820_v5, %v2824_v6 }
 0x593   : > { %7963 = vmatprep.subr.bf16.mxu1 %v11206_v51  ;;  %v11437_v51 = vcombine.low %v2844_v25, %v2848_v24  ;;  %v2676_v24 = vld [vmem:[#allocation9 + $0x818] sm:$0xff] }
 0x594   : > { %7923 = vmatpush2.bf16.msra.mxu0 %v11077_v56  ;;  %v2828_v56 = vld [vmem:[#allocation9 + $0xcd8] sm:$0xff] }
 0x595   : > { %7974 = vmatprep.subr.bf16.mxu0 %v11326_v62  ;;  %v11421_v46 = vcombine.low %v2828_v56, %v2832_v59 }
 0x596   : > { %7964 = vmatpush2.bf16.msra.mxu1 %v11205_v61 }
 0x597   : > { %8015 = vmatprep.subr.bf16.mxu1 %v11454_v41  ;;  %v7680_v22 = vpop.f32.mrf.mxu0  ;;  %7925 = vmatmul.mubr.bf16.vlgmr.msra.gmra.mxu0 %v13883_v43  ;;  %v2708_v43 = vld [vmem:[#allocation9 + $0x918] sm:$0xff]  ;;  %v11422_v41 = vcombine.high %v2828_v56, %v2832_v59 }
 0x598   : > { %v7681_v1 = vadd.f32 %v7680_v22, %v3206_v8  ;;  %7975 = vmatpush1.bf16.msra.mxu0 %v11325_v9  ;;  %8006 = vmatprep.mubr.bf16.mxu0 %v13887_v50  ;;  %v11302_v42 = vcombine.high %v2708_v43, %v2712_v44  ;;  %v2704_v50 = vld [vmem:[#allocation9 + $0x8f8] sm:$0xff]  ;;  %v11301_v61 = vcombine.low %v2708_v43, %v2712_v44 }
 0x599   : > { %v7721_v26 = vpop.f32.mrf.mxu1  ;;  %7966 = vmatmul.mubr.bf16.vlgmr.msra.gmra.mxu1 %v13893_v20  ;;  %v7682_v16 = vpop.f32.mrf.mxu0  ;;  %7976 = vmatprep.subr.bf16.mxu0 %v11318_v15  ;;  %v2840_v20 = vld [vmem:[#allocation9 + $0xd38] sm:$0xff]  ;;  %v11294_v62 = vcombine.high %v2700_v55, %v2704_v50  ;;  %v11293_v7 = vcombine.low %v2700_v55, %v2704_v50  ;;  %v11286_v8 = vcombine.high %v2692_v3, %v2696_v4 }
 0x59a   : > { %8016 = vmatpush1.bf16.msra.mxu1 %v11453_v14  ;;  %v14051_v12 = vadd.f32 %v7721_v26, %v7681_v1  ;;  %v7683_v10 = vadd.f32 %v7682_v16, %v3210_v17  ;;  %8047 = vmatprep.mubr.bf16.mxu1 %v13902_v2  ;;  %v11430_v53 = vcombine.high %v2836_v31, %v2840_v20  ;;  %v2684_v14 = vld [vmem:[#allocation9 + $0x858] sm:$0xff] }
 0x59b   : > { %v7723_v40 = vpop.f32.mrf.mxu1  ;;  %8017 = vmatprep.subr.bf16.mxu1 %v11446_v57  ;;  %v7684_v29 = vpop.f32.mrf.mxu0  ;;  %v11429_v2 = vcombine.low %v2836_v31, %v2840_v20  ;;  %v11414_v9 = vcombine.high %v2820_v5, %v2824_v6  ;;  %v2688_v15 = vld [vmem:[#allocation9 + $0x878] sm:$0xff] }
 0x59c   : > { %v14055_v45 = vadd.f32 %v7723_v40, %v7683_v10  ;;  %7977 = vmatpush1.bf16.msra.mxu0 %v11317_v30  ;;  %v2812_v17 = vld [vmem:[#allocation9 + $0xc58] sm:$0xff]  ;;  %v11278_v22 = vcombine.high %v2684_v14, %v2688_v15  ;;  %v11277_v16 = vcombine.low %v2684_v14, %v2688_v15 }
 0x59d   : > { %v7725_v47 = vpop.f32.mrf.mxu1  ;;  %v7685_v28 = vpop.f32.mrf.mxu0  ;;  %7978 = vmatprep.subr.bf16.mxu0 %v11310_v37  ;;  %v2816_v57 = vld [vmem:[#allocation9 + $0xc78] sm:$0xff] }
 0x59e   : > { %8018 = vmatpush1.bf16.msra.mxu1 %v11445_v34  ;;  %v11406_v25 = vcombine.high %v2812_v17, %v2816_v57  ;;  %v2680_v1 = vld [vmem:[#allocation9 + $0x838] sm:$0xff]  ;;  %v11405_v34 = vcombine.low %v2812_v17, %v2816_v57 }
 0x59f   : > { %v7726_v52 = vpop.f32.mrf.mxu1  ;;  %8019 = vmatprep.subr.bf16.mxu1 %v11438_v18  ;;  %v2804_v26 = vld [vmem:[#allocation9 + $0xc18] sm:$0xff]  ;;  %v11270_v37 = vcombine.high %v2676_v24, %v2680_v1  ;;  %v11269_v29 = vcombine.low %v2676_v24, %v2680_v1 }
 0x5a0   : > { %7979 = vmatpush1.bf16.msra.mxu0 %v11309_v33  ;;  %v2808_v30 = vld [vmem:[#allocation9 + $0xc38] sm:$0xff] }
 0x5a1   : > { %7980 = vmatprep.subr.bf16.mxu0 %v11302_v42  ;;  %v11398_v10 = vcombine.high %v2804_v26, %v2808_v30  ;;  %v2796_v40 = vld [vmem:[#allocation9 + $0xbd8] sm:$0xff]  ;;  %v11397_v31 = vcombine.low %v2804_v26, %v2808_v30 }
 0x5a2   : > { %8020 = vmatpush1.bf16.msra.mxu1 %v11437_v51  ;;  %v2800_v18 = vld [vmem:[#allocation9 + $0xbf8] sm:$0xff] }
 0x5a3   : > { %8021 = vmatprep.subr.bf16.mxu1 %v11430_v53  ;;  %v2924_v43 = vld [vmem:[#allocation9 + $0xfd8] sm:$0xff]  ;;  %v11390_v20 = vcombine.high %v2796_v40, %v2800_v18  ;;  %v11389_v52 = vcombine.low %v2796_v40, %v2800_v18 }
 0x5a4   : > { %7981 = vmatpush1.bf16.msra.mxu0 %v11301_v61  ;;  %v2928_v44 = vld [vmem:[#allocation9 + $0xff8] sm:$0xff] }
 0x5a5   : > { %7982 = vmatprep.subr.bf16.mxu0 %v11294_v62  ;;  %v11518_v47 = vcombine.high %v2924_v43, %v2928_v44  ;;  %v2788_v33 = vld [vmem:[#allocation9 + $0xb98] sm:$0xff]  ;;  %v11517_v53 = vcombine.low %v2924_v43, %v2928_v44 }
 0x5a6   : > { %8022 = vmatpush1.bf16.msra.mxu1 %v11429_v2  ;;  %v2792_v28 = vld [vmem:[#allocation9 + $0xbb8] sm:$0xff] }
 0x5a7   : > { %8023 = vmatprep.subr.bf16.mxu1 %v11422_v41  ;;  %v2916_v51 = vld [vmem:[#allocation9 + $0xf98] sm:$0xff]  ;;  %v11382_v55 = vcombine.high %v2788_v33, %v2792_v28  ;;  %v11381_v62 = vcombine.low %v2788_v33, %v2792_v28 }
 0x5a8   : > { %7983 = vmatpush1.bf16.msra.mxu0 %v11293_v7  ;;  %v2920_v42 = vld [vmem:[#allocation9 + $0xfb8] sm:$0xff] }
 0x5a9   : > { %7984 = vmatprep.subr.bf16.mxu0 %v11286_v8  ;;  %v11510_v50 = vcombine.high %v2916_v51, %v2920_v42  ;;  %v2780_v56 = vld [vmem:[#allocation9 + $0xb58] sm:$0xff]  ;;  %v11509_v41 = vcombine.low %v2916_v51, %v2920_v42 }
 0x5aa   : > { %8024 = vmatpush1.bf16.msra.mxu1 %v11421_v46  ;;  %v2784_v59 = vld [vmem:[#allocation9 + $0xb78] sm:$0xff] }
 0x5ab   : > { %8025 = vmatprep.subr.bf16.mxu1 %v11414_v9  ;;  %v2908_v61 = vld [vmem:[#allocation9 + $0xf58] sm:$0xff]  ;;  %v11374_v3 = vcombine.high %v2780_v56, %v2784_v59  ;;  %v11373_v8 = vcombine.low %v2780_v56, %v2784_v59 }
 0x5ac   : > { %7985 = vmatpush1.bf16.msra.mxu0 %v11285_v19  ;;  %v2912_v2 = vld [vmem:[#allocation9 + $0xf78] sm:$0xff] }
 0x5ad   : > { %7986 = vmatprep.subr.bf16.mxu0 %v11278_v22  ;;  %v11502_v4 = vcombine.high %v2908_v61, %v2912_v2  ;;  %v2772_v5 = vld [vmem:[#allocation9 + $0xb18] sm:$0xff]  ;;  %v11501_v9 = vcombine.low %v2908_v61, %v2912_v2 }
 0x5ae   : > { %8026 = vmatpush1.bf16.msra.mxu1 %v11413_v21  ;;  %v2776_v6 = vld [vmem:[#allocation9 + $0xb38] sm:$0xff] }
 0x5af   : > { %8027 = vmatprep.subr.bf16.mxu1 %v11406_v25  ;;  %v2900_v7 = vld [vmem:[#allocation9 + $0xf18] sm:$0xff]  ;;  %v11366_v14 = vcombine.high %v2772_v5, %v2776_v6  ;;  %v11365_v22 = vcombine.low %v2772_v5, %v2776_v6 }
 0x5b0   : > { %7987 = vmatpush1.bf16.msra.mxu0 %v11277_v16  ;;  %v2904_v46 = vld [vmem:[#allocation9 + $0xf38] sm:$0xff] }
 0x5b1   : > { %7988 = vmatprep.subr.bf16.mxu0 %v11270_v37  ;;  %v11494_v15 = vcombine.high %v2900_v7, %v2904_v46  ;;  %v2764_v17 = vld [vmem:[#allocation9 + $0xad8] sm:$0xff]  ;;  %v11493_v25 = vcombine.low %v2900_v7, %v2904_v46 }
 0x5b2   : > { %8028 = vmatpush1.bf16.msra.mxu1 %v11405_v34  ;;  %v2768_v57 = vld [vmem:[#allocation9 + $0xaf8] sm:$0xff] }
 0x5b3   : > { %8029 = vmatprep.subr.bf16.mxu1 %v11398_v10  ;;  %v2892_v19 = vld [vmem:[#allocation9 + $0xed8] sm:$0xff]  ;;  %v11358_v24 = vcombine.high %v2764_v17, %v2768_v57  ;;  %v11357_v37 = vcombine.low %v2764_v17, %v2768_v57 }
 0x5b4   : > { %7989 = vmatpush1.bf16.msra.mxu0 %v11269_v29  ;;  %v2896_v21 = vld [vmem:[#allocation9 + $0xef8] sm:$0xff] }
 0x5b5   : > { %7990 = vmatprep.subr.bf16.mxu0 %v11390_v20  ;;  %v11486_v1 = vcombine.high %v2892_v19, %v2896_v21  ;;  %v2756_v26 = vld [vmem:[#allocation9 + $0xa98] sm:$0xff]  ;;  %v11485_v10 = vcombine.low %v2892_v19, %v2896_v21 }
 0x5b6   : > { %8030 = vmatpush1.bf16.msra.mxu1 %v11397_v31  ;;  %v2760_v30 = vld [vmem:[#allocation9 + $0xab8] sm:$0xff] }
 0x5b7   : > { %8031 = vmatprep.subr.bf16.mxu1 %v11518_v47  ;;  %v2884_v16 = vld [vmem:[#allocation9 + $0xe98] sm:$0xff]  ;;  %v11350_v40 = vcombine.high %v2756_v26, %v2760_v30  ;;  %v11349_v20 = vcombine.low %v2756_v26, %v2760_v30 }
 0x5b8   : > { %7991 = vmatpush2.bf16.msra.mxu0 %v11389_v52  ;;  %v2888_v34 = vld [vmem:[#allocation9 + $0xeb8] sm:$0xff] }
 0x5b9   : > { %7992 = vmatprep.subr.bf16.mxu0 %v11382_v55  ;;  %v11478_v18 = vcombine.high %v2884_v16, %v2888_v34  ;;  %v2748_v43 = vld [vmem:[#allocation9 + $0xa58] sm:$0xff]  ;;  %v11477_v47 = vcombine.low %v2884_v16, %v2888_v34 }
 0x5ba   : > { %8032 = vmatpush2.bf16.msra.mxu1 %v11517_v53  ;;  %v2752_v44 = vld [vmem:[#allocation9 + $0xa78] sm:$0xff] }
 0x5bb   : > { %8033 = vmatprep.subr.bf16.mxu1 %v11510_v50  ;;  %v2876_v29 = vld [vmem:[#allocation9 + $0xe58] sm:$0xff]  ;;  %v11342_v33 = vcombine.high %v2748_v43, %v2752_v44  ;;  %v11341_v55 = vcombine.low %v2748_v43, %v2752_v44 }
 0x5bc   : > { %7993 = vmatpush2.bf16.msra.mxu0 %v11381_v62  ;;  %v2880_v31 = vld [vmem:[#allocation9 + $0xe78] sm:$0xff] }
 0x5bd   : > { %7994 = vmatprep.subr.bf16.mxu0 %v11374_v3  ;;  %v11470_v28 = vcombine.high %v2876_v29, %v2880_v31  ;;  %v2740_v51 = vld [vmem:[#allocation9 + $0xa18] sm:$0xff]  ;;  %v11469_v50 = vcombine.low %v2876_v29, %v2880_v31 }
 0x5be   : > { %8034 = vmatpush2.bf16.msra.mxu1 %v11509_v41  ;;  %v2744_v42 = vld [vmem:[#allocation9 + $0xa38] sm:$0xff] }
 0x5bf   : > { %8035 = vmatprep.subr.bf16.mxu1 %v11502_v4  ;;  %v2868_v52 = vld [vmem:[#allocation9 + $0xe18] sm:$0xff]  ;;  %v11334_v56 = vcombine.high %v2740_v51, %v2744_v42  ;;  %v11333_v3 = vcombine.low %v2740_v51, %v2744_v42 }
 0x5c0   : > { %7995 = vmatpush2.bf16.msra.mxu0 %v11373_v8  ;;  %v2872_v53 = vld [vmem:[#allocation9 + $0xe38] sm:$0xff] }
 0x5c1   : > { %7996 = vmatprep.subr.bf16.mxu0 %v11366_v14  ;;  %v11462_v59 = vcombine.high %v2868_v52, %v2872_v53  ;;  %v2988_v61 = vld [vmem:[#allocation9 + $0x11d8] sm:$0xff]  ;;  %v11461_v4 = vcombine.low %v2868_v52, %v2872_v53 }
 0x5c2   : > { %8036 = vmatpush2.bf16.msra.mxu1 %v11501_v9  ;;  %v2992_v2 = vld [vmem:[#allocation9 + $0x11f8] sm:$0xff] }
 0x5c3   : > { %8037 = vmatprep.subr.bf16.mxu1 %v11494_v15  ;;  %v3116_v62 = vld [vmem:[#allocation9 + $0x15d8] sm:$0xff]  ;;  %v11582_v5 = vcombine.high %v2988_v61, %v2992_v2  ;;  %v11581_v14 = vcombine.low %v2988_v61, %v2992_v2 }
 0x5c4   : > { %7997 = vmatpush2.bf16.msra.mxu0 %v11365_v22  ;;  %v3120_v41 = vld [vmem:[#allocation9 + $0x15f8] sm:$0xff] }
 0x5c5   : > { %7998 = vmatprep.subr.bf16.mxu0 %v11358_v24  ;;  %v11710_v6 = vcombine.high %v3116_v62, %v3120_v41  ;;  %v2980_v7 = vld [vmem:[#allocation9 + $0x1198] sm:$0xff]  ;;  %v11709_v15 = vcombine.low %v3116_v62, %v3120_v41 }
 0x5c6   : > { %8038 = vmatpush2.bf16.msra.mxu1 %v11493_v25  ;;  %v2984_v46 = vld [vmem:[#allocation9 + $0x11b8] sm:$0xff] }
 0x5c7   : > { %8039 = vmatprep.subr.bf16.mxu1 %v11486_v1  ;;  %v3108_v8 = vld [vmem:[#allocation9 + $0x1598] sm:$0xff]  ;;  %v11574_v17 = vcombine.high %v2980_v7, %v2984_v46  ;;  %v11573_v30 = vcombine.low %v2980_v7, %v2984_v46 }
 0x5c8   : > { %7999 = vmatpush2.bf16.msra.mxu0 %v11357_v37  ;;  %v3112_v9 = vld [vmem:[#allocation9 + $0x15b8] sm:$0xff] }
 0x5c9   : > { %8000 = vmatprep.subr.bf16.mxu0 %v11350_v40  ;;  %v11702_v57 = vcombine.high %v3108_v8, %v3112_v9  ;;  %v2972_v19 = vld [vmem:[#allocation9 + $0x1158] sm:$0xff]  ;;  %v11701_v34 = vcombine.low %v3108_v8, %v3112_v9 }
 0x5ca   : > { %8040 = vmatpush2.bf16.msra.mxu1 %v11485_v10  ;;  %v2976_v21 = vld [vmem:[#allocation9 + $0x1178] sm:$0xff] }
 0x5cb   : > { %8041 = vmatprep.subr.bf16.mxu1 %v11478_v18  ;;  %v3100_v25 = vld [vmem:[#allocation9 + $0x1558] sm:$0xff]  ;;  %v11566_v37 = vcombine.high %v2972_v19, %v2976_v21 }
 0x5cc   : > { %8001 = vmatpush2.bf16.msra.mxu0 %v11349_v20  ;;  %v3104_v24 = vld [vmem:[#allocation9 + $0x1578] sm:$0xff] }
 0x5cd   : > { %8002 = vmatprep.subr.bf16.mxu0 %v11342_v33  ;;  %v2964_v43 = vld [vmem:[#allocation9 + $0x1118] sm:$0xff] }
 0x5ce   : > { %8042 = vmatpush2.bf16.msra.mxu1 %v11477_v47  ;;  %v2968_v44 = vld [vmem:[#allocation9 + $0x1138] sm:$0xff]  ;;  %v11565_v47 = vcombine.low %v2972_v19, %v2976_v21 }
 0x5cf   : > { %8043 = vmatprep.subr.bf16.mxu1 %v11470_v28  ;;  %v3096_v29 = vld [vmem:[#allocation9 + $0x1538] sm:$0xff]  ;;  %v11558_v28 = vcombine.high %v2964_v43, %v2968_v44 }
 0x5d0   : > { %8003 = vmatpush2.bf16.msra.mxu0 %v11341_v55  ;;  %v2956_v52 = vld [vmem:[#allocation9 + $0x10d8] sm:$0xff] }
 0x5d1   : > { %8004 = vmatprep.subr.bf16.mxu0 %v11334_v56  ;;  %v3084_v53 = vld [vmem:[#allocation9 + $0x14d8] sm:$0xff] }
 0x5d2   : > { %8044 = vmatpush2.bf16.msra.mxu1 %v11469_v50  ;;  %v3088_v55 = vld [vmem:[#allocation9 + $0x14f8] sm:$0xff]  ;;  %v11557_v50 = vcombine.low %v2964_v43, %v2968_v44 }
 0x5d3   : > { %8045 = vmatprep.subr.bf16.mxu1 %v11462_v59  ;;  %v11678_v59 = vcombine.high %v3084_v53, %v3088_v55  ;;  %v2948_v61 = vld [vmem:[#allocation9 + $0x1098] sm:$0xff] }
 0x5d4   : > { %8005 = vmatpush2.bf16.msra.mxu0 %v11333_v3  ;;  %v2952_v2 = vld [vmem:[#allocation9 + $0x10b8] sm:$0xff] }
 0x5d5   : > { %8056 = vmatprep.subr.bf16.mxu0 %v11582_v5  ;;  %v3076_v62 = vld [vmem:[#allocation9 + $0x1498] sm:$0xff]  ;;  %v11542_v5 = vcombine.high %v2948_v61, %v2952_v2 }
 0x5d6   : > { %8046 = vmatpush2.bf16.msra.mxu1 %v11461_v4  ;;  %v3080_v41 = vld [vmem:[#allocation9 + $0x14b8] sm:$0xff]  ;;  %v11677_v4 = vcombine.low %v3084_v53, %v3088_v55 }
 0x5d7   : > { %8097 = vmatprep.subr.bf16.mxu1 %v11710_v6  ;;  %v7762_v22 = vpop.f32.mrf.mxu0  ;;  %8007 = vmatmul.mubr.bf16.vlgmr.msra.gmra.mxu0 %v13950_v39  ;;  %v11694_v39 = vcombine.high %v3100_v25, %v3104_v24  ;;  %v11670_v6 = vcombine.high %v3076_v62, %v3080_v41  ;;  %v2940_v7 = vld [vmem:[#allocation9 + $0x1058] sm:$0xff] }
 0x5d8   : > { %v7763_v1 = vadd.f32 %v7762_v22, %v14051_v12  ;;  %8057 = vmatpush1.bf16.msra.mxu0 %v11581_v14  ;;  %8088 = vmatprep.mubr.bf16.mxu0 %v13953_v48  ;;  %v2960_v48 = vld [vmem:[#allocation9 + $0x10f8] sm:$0xff]  ;;  %v11541_v14 = vcombine.low %v2948_v61, %v2952_v2 }
 0x5d9   : > { %v7803_v26 = vpop.f32.mrf.mxu1  ;;  %8048 = vmatmul.mubr.bf16.vlgmr.msra.gmra.mxu1 %v13957_v49  ;;  %v7764_v16 = vpop.f32.mrf.mxu0  ;;  %8058 = vmatprep.subr.bf16.mxu0 %v11574_v17  ;;  %v3092_v49 = vld [vmem:[#allocation9 + $0x1518] sm:$0xff]  ;;  %v11550_v56 = vcombine.high %v2956_v52, %v2960_v48  ;;  %v11549_v3 = vcombine.low %v2956_v52, %v2960_v48 }
 0x5da   : > { %8098 = vmatpush1.bf16.msra.mxu1 %v11709_v15  ;;  %v14060_v10 = vadd.f32 %v7803_v26, %v7763_v1  ;;  %v7765_v40 = vadd.f32 %v7764_v16, %v14055_v45  ;;  %8129 = vmatprep.mubr.bf16.mxu1 %v13962_v58  ;;  %v11693_v45 = vcombine.low %v3100_v25, %v3104_v24  ;;  %v2944_v46 = vld [vmem:[#allocation9 + $0x1078] sm:$0xff] }
 0x5db   : > { %v7805_v18 = vpop.f32.mrf.mxu1  ;;  %8099 = vmatprep.subr.bf16.mxu1 %v11702_v57  ;;  %v7766_v12 = vpop.f32.mrf.mxu0  ;;  %v11686_v42 = vcombine.high %v3092_v49, %v3096_v29  ;;  %v11685_v58 = vcombine.low %v3092_v49, %v3096_v29  ;;  %v3068_v8 = vld [vmem:[#allocation9 + $0x1458] sm:$0xff]  ;;  %v11669_v15 = vcombine.low %v3076_v62, %v3080_v41  ;;  %v11534_v17 = vcombine.high %v2940_v7, %v2944_v46 }
 0x5dc   : > { %v14065_v31 = vadd.f32 %v7805_v18, %v7765_v40  ;;  %8059 = vmatpush1.bf16.msra.mxu0 %v11573_v30  ;;  %v3072_v9 = vld [vmem:[#allocation9 + $0x1478] sm:$0xff]  ;;  %v11533_v24 = vcombine.low %v2940_v7, %v2944_v46 }
 0x5dd   : > { %v7807_v20 = vpop.f32.mrf.mxu1  ;;  %v7767_v33 = vpop.f32.mrf.mxu0  ;;  %8060 = vmatprep.subr.bf16.mxu0 %v11566_v37  ;;  %v11662_v57 = vcombine.high %v3068_v8, %v3072_v9  ;;  %v2932_v19 = vld [vmem:[#allocation9 + $0x1018] sm:$0xff]  ;;  %v11661_v1 = vcombine.low %v3068_v8, %v3072_v9 }
 0x5de   : > { %8100 = vmatpush1.bf16.msra.mxu1 %v11701_v34  ;;  %v2936_v21 = vld [vmem:[#allocation9 + $0x1038] sm:$0xff] }
 0x5df   : > { %v7808_v51 = vpop.f32.mrf.mxu1  ;;  %8101 = vmatprep.subr.bf16.mxu1 %v11694_v39  ;;  %v3060_v22 = vld [vmem:[#allocation9 + $0x1418] sm:$0xff]  ;;  %v11526_v26 = vcombine.high %v2932_v19, %v2936_v21  ;;  %v11525_v18 = vcombine.low %v2932_v19, %v2936_v21 }
 0x5e0   : > { %8061 = vmatpush1.bf16.msra.mxu0 %v11565_v47  ;;  %v3064_v25 = vld [vmem:[#allocation9 + $0x1438] sm:$0xff] }
 0x5e1   : > { %8062 = vmatprep.subr.bf16.mxu0 %v11558_v28  ;;  %v11654_v30 = vcombine.high %v3060_v22, %v3064_v25  ;;  %v3052_v16 = vld [vmem:[#allocation9 + $0x13d8] sm:$0xff]  ;;  %v11653_v39 = vcombine.low %v3060_v22, %v3064_v25 }
 0x5e2   : > { %8102 = vmatpush1.bf16.msra.mxu1 %v11693_v45  ;;  %v3056_v34 = vld [vmem:[#allocation9 + $0x13f8] sm:$0xff] }
 0x5e3   : > { %8103 = vmatprep.subr.bf16.mxu1 %v11686_v42  ;;  %v3180_v37 = vld [vmem:[#allocation9 + $0x17d8] sm:$0xff]  ;;  %v11646_v43 = vcombine.high %v3052_v16, %v3056_v34  ;;  %v11645_v47 = vcombine.low %v3052_v16, %v3056_v34 }
 0x5e4   : > { %8063 = vmatpush1.bf16.msra.mxu0 %v11557_v50  ;;  %v3184_v40 = vld [vmem:[#allocation9 + $0x17f8] sm:$0xff] }
 0x5e5   : > { %8064 = vmatprep.subr.bf16.mxu0 %v11550_v56  ;;  %v11774_v44 = vcombine.high %v3180_v37, %v3184_v40  ;;  %v3044_v12 = vld [vmem:[#allocation9 + $0x1398] sm:$0xff]  ;;  %v11773_v33 = vcombine.low %v3180_v37, %v3184_v40 }
 0x5e6   : > { %8104 = vmatpush1.bf16.msra.mxu1 %v11685_v58  ;;  %v3048_v49 = vld [vmem:[#allocation9 + $0x13b8] sm:$0xff] }
 0x5e7   : > { %8105 = vmatprep.subr.bf16.mxu1 %v11678_v59  ;;  %v3172_v29 = vld [vmem:[#allocation9 + $0x1798] sm:$0xff]  ;;  %v11638_v45 = vcombine.high %v3044_v12, %v3048_v49  ;;  %v11637_v53 = vcombine.low %v3044_v12, %v3048_v49 }
 0x5e8   : > { %8065 = vmatpush1.bf16.msra.mxu0 %v11549_v3  ;;  %v3176_v20 = vld [vmem:[#allocation9 + $0x17b8] sm:$0xff] }
 0x5e9   : > { %8066 = vmatprep.subr.bf16.mxu0 %v11542_v5  ;;  %v11766_v28 = vcombine.high %v3172_v29, %v3176_v20  ;;  %v3036_v51 = vld [vmem:[#allocation9 + $0x1358] sm:$0xff]  ;;  %v11765_v55 = vcombine.low %v3172_v29, %v3176_v20 }
 0x5ea   : > { %8106 = vmatpush1.bf16.msra.mxu1 %v11677_v4  ;;  %v3040_v42 = vld [vmem:[#allocation9 + $0x1378] sm:$0xff] }
 0x5eb   : > { %8107 = vmatprep.subr.bf16.mxu1 %v11670_v6  ;;  %v3164_v52 = vld [vmem:[#allocation9 + $0x1758] sm:$0xff]  ;;  %v11630_v50 = vcombine.high %v3036_v51, %v3040_v42  ;;  %v11629_v62 = vcombine.low %v3036_v51, %v3040_v42 }
 0x5ec   : > { %8067 = vmatpush1.bf16.msra.mxu0 %v11541_v14  ;;  %v3168_v48 = vld [vmem:[#allocation9 + $0x1778] sm:$0xff] }
 0x5ed   : > { %8068 = vmatprep.subr.bf16.mxu0 %v11534_v17  ;;  %v11758_v58 = vcombine.high %v3164_v52, %v3168_v48  ;;  %v3028_v56 = vld [vmem:[#allocation9 + $0x1318] sm:$0xff]  ;;  %v11757_v41 = vcombine.low %v3164_v52, %v3168_v48  ;;  %v8139_v52 = vmax.f32 %v14013_v36, 0.0  ;;  %v8141_v48 = vmax.f32 %v14045_v32, 0.0 }
 0x5ee   : > { %8108 = vmatpush1.bf16.msra.mxu1 %v11669_v15  ;;  %v3032_v59 = vld [vmem:[#allocation9 + $0x1338] sm:$0xff] }
 0x5ef   : > { %8109 = vmatprep.subr.bf16.mxu1 %v11662_v57  ;;  %v3156_v61 = vld [vmem:[#allocation9 + $0x1718] sm:$0xff]  ;;  %v11622_v3 = vcombine.high %v3028_v56, %v3032_v59  ;;  %v11621_v8 = vcombine.low %v3028_v56, %v3032_v59 }
 0x5f0   : > { %8069 = vmatpush1.bf16.msra.mxu0 %v11533_v24  ;;  %v3160_v2 = vld [vmem:[#allocation9 + $0x1738] sm:$0xff] }
 0x5f1   : > { %8070 = vmatprep.subr.bf16.mxu0 %v11526_v26  ;;  %v11750_v4 = vcombine.high %v3156_v61, %v3160_v2  ;;  %v3020_v5 = vld [vmem:[#allocation9 + $0x12d8] sm:$0xff]  ;;  %v11749_v9 = vcombine.low %v3156_v61, %v3160_v2  ;;  %v14072_v61 = vpack.c.bf16 %v8141_v48, %v8141_v48 }
 0x5f2   : > { %8110 = vmatpush1.bf16.msra.mxu1 %v11661_v1  ;;  %v3024_v6 = vld [vmem:[#allocation9 + $0x12f8] sm:$0xff] }
 0x5f3   : > { %8111 = vmatprep.subr.bf16.mxu1 %v11654_v30  ;;  %v3148_v7 = vld [vmem:[#allocation9 + $0x16d8] sm:$0xff]  ;;  %v11614_v14 = vcombine.high %v3020_v5, %v3024_v6  ;;  %v11613_v22 = vcombine.low %v3020_v5, %v3024_v6 }
 0x5f4   : > { %8071 = vmatpush1.bf16.msra.mxu0 %v11525_v18  ;;  %v3152_v46 = vld [vmem:[#allocation9 + $0x16f8] sm:$0xff] }
 0x5f5   : > { %8072 = vmatprep.subr.bf16.mxu0 %v11646_v43  ;;  %v11742_v15 = vcombine.high %v3148_v7, %v3152_v46  ;;  %v3012_v17 = vld [vmem:[#allocation9 + $0x1298] sm:$0xff]  ;;  %v11741_v25 = vcombine.low %v3148_v7, %v3152_v46 }
 0x5f6   : > { %8112 = vmatpush1.bf16.msra.mxu1 %v11653_v39  ;;  %v3016_v57 = vld [vmem:[#allocation9 + $0x12b8] sm:$0xff] }
 0x5f7   : > { %8113 = vmatprep.subr.bf16.mxu1 %v11774_v44  ;;  %v3140_v19 = vld [vmem:[#allocation9 + $0x1698] sm:$0xff]  ;;  %v11606_v24 = vcombine.high %v3012_v17, %v3016_v57  ;;  %v11605_v37 = vcombine.low %v3012_v17, %v3016_v57 }
 0x5f8   : > { %8073 = vmatpush2.bf16.msra.mxu0 %v11645_v47  ;;  %v3144_v21 = vld [vmem:[#allocation9 + $0x16b8] sm:$0xff] }
 0x5f9   : > { %8074 = vmatprep.subr.bf16.mxu0 %v11638_v45  ;;  %v11734_v1 = vcombine.high %v3140_v19, %v3144_v21  ;;  %v3004_v26 = vld [vmem:[#allocation9 + $0x1258] sm:$0xff]  ;;  %v11733_v40 = vcombine.low %v3140_v19, %v3144_v21 }
 0x5fa   : > { %8114 = vmatpush2.bf16.msra.mxu1 %v11773_v33  ;;  %v3008_v30 = vld [vmem:[#allocation9 + $0x1278] sm:$0xff] }
 0x5fb   : > { %8115 = vmatprep.subr.bf16.mxu1 %v11766_v28  ;;  %v3132_v16 = vld [vmem:[#allocation9 + $0x1658] sm:$0xff]  ;;  %v11598_v18 = vcombine.high %v3004_v26, %v3008_v30  ;;  %v11597_v29 = vcombine.low %v3004_v26, %v3008_v30 }
 0x5fc   : > { %8075 = vmatpush2.bf16.msra.mxu0 %v11637_v53  ;;  %v3136_v34 = vld [vmem:[#allocation9 + $0x1678] sm:$0xff] }
 0x5fd   : > { %8076 = vmatprep.subr.bf16.mxu0 %v11630_v50  ;;  %v11726_v39 = vcombine.high %v3132_v16, %v3136_v34  ;;  %v2996_v43 = vld [vmem:[#allocation9 + $0x1218] sm:$0xff]  ;;  %v11725_v20 = vcombine.low %v3132_v16, %v3136_v34 }
 0x5fe   : > { %8116 = vmatpush2.bf16.msra.mxu1 %v11765_v55  ;;  %v3000_v44 = vld [vmem:[#allocation9 + $0x1238] sm:$0xff] }
 0x5ff   : > { %8117 = vmatprep.subr.bf16.mxu1 %v11758_v58  ;;  %v3124_v12 = vld [vmem:[#allocation9 + $0x1618] sm:$0xff]  ;;  %v11590_v47 = vcombine.high %v2996_v43, %v3000_v44  ;;  %v11589_v45 = vcombine.low %v2996_v43, %v3000_v44  ;;  %v14069_v58 = vpack.c.bf16 %v8139_v52, %v8139_v52 }
 0x600   : > { %8077 = vmatpush2.bf16.msra.mxu0 %v11629_v62  ;;  %v3128_v49 = vld [vmem:[#allocation9 + $0x1638] sm:$0xff] }
 0x601   : > { %8078 = vmatprep.subr.bf16.mxu0 %v11622_v3  ;;  %v11718_v33 = vcombine.high %v3124_v12, %v3128_v49  ;;  %v11717_v28 = vcombine.low %v3124_v12, %v3128_v49  ;;  %v12517_v51 = vld [vmem:[#allocation12 + $0xe4] ss:$16 sps:$4 sm:$0xff]   ;;  %v12515_v53 = vld [vmem:[#allocation12 + $0xe0] ss:$16 sps:$4 sm:$0xff]  }
 0x602   : > { %8118 = vmatpush2.bf16.msra.mxu1 %v11757_v41  ;;  %v12520_v42 = vld [vmem:[#allocation12 + $0x2e4] ss:$16 sps:$4 sm:$0xff]   ;;  %v12518_v55 = vld [vmem:[#allocation12 + $0x2e0] ss:$16 sps:$4 sm:$0xff]  }
 0x603   : > { %8119 = vmatprep.subr.bf16.mxu1 %v11750_v4  ;;  %v12523_v50 = vld [vmem:[#allocation12 + $0xc4] ss:$16 sps:$4 sm:$0xff]   ;;  %v12521_v32 = vld [vmem:[#allocation12 + $0xc0] ss:$16 sps:$4 sm:$0xff]  }
 0x604   : > { %8079 = vmatpush2.bf16.msra.mxu0 %v11621_v8  ;;  %v12526_v59 = vld [vmem:[#allocation12 + $0x2c4] ss:$16 sps:$4 sm:$0xff]   ;;  %v12524_v41 = vld [vmem:[#allocation12 + $0x2c0] ss:$16 sps:$4 sm:$0xff]  }
 0x605   : > { %8080 = vmatprep.subr.bf16.mxu0 %v11614_v14  ;;  %v12529_v3 = vld [vmem:[#allocation12 + $0xa4] ss:$16 sps:$4 sm:$0xff]   ;;  %v12527_v6 = vld [vmem:[#allocation12 + $0xa0] ss:$16 sps:$4 sm:$0xff]  }
 0x606   : > { %8120 = vmatpush2.bf16.msra.mxu1 %v11749_v9  ;;  %v12530_v46 = vld [vmem:[#allocation12 + $0x2a0] ss:$16 sps:$4 sm:$0xff]   ;;  %v12535_v8 = vld [vmem:[#allocation12 + $0x84] ss:$16 sps:$4 sm:$0xff]  }
 0x607   : > { %8121 = vmatprep.subr.bf16.mxu1 %v11742_v15  ;;  %v12538_v14 = vld [vmem:[#allocation12 + $0x284] ss:$16 sps:$4 sm:$0xff]   ;;  %v12533_v15 = vld [vmem:[#allocation12 + $0x80] ss:$16 sps:$4 sm:$0xff]  }
 0x608   : > { %8081 = vmatpush2.bf16.msra.mxu0 %v11613_v22  ;;  %v12536_v17 = vld [vmem:[#allocation12 + $0x280] ss:$16 sps:$4 sm:$0xff]   ;;  %v12541_v57 = vld [vmem:[#allocation12 + $0x64] ss:$16 sps:$4 sm:$0xff]  }
 0x609   : > { %8082 = vmatprep.subr.bf16.mxu0 %v11606_v24  ;;  %v12544_v19 = vld [vmem:[#allocation12 + $0x264] ss:$16 sps:$4 sm:$0xff]   ;;  %v12539_v21 = vld [vmem:[#allocation12 + $0x60] ss:$16 sps:$4 sm:$0xff]  }
 0x60a   : > { %8122 = vmatpush2.bf16.msra.mxu1 %v11741_v25  ;;  %v12542_v22 = vld [vmem:[#allocation12 + $0x260] ss:$16 sps:$4 sm:$0xff]   ;;  %v12547_v25 = vld [vmem:[#allocation12 + $0x44] ss:$16 sps:$4 sm:$0xff]  }
 0x60b   : > { %8123 = vmatprep.subr.bf16.mxu1 %v11734_v1  ;;  %v12550_v24 = vld [vmem:[#allocation12 + $0x244] ss:$16 sps:$4 sm:$0xff]   ;;  %v12545_v1 = vld [vmem:[#allocation12 + $0x40] ss:$16 sps:$4 sm:$0xff]  }
 0x60c   : > { %8083 = vmatpush2.bf16.msra.mxu0 %v11605_v37  ;;  %v12548_v26 = vld [vmem:[#allocation12 + $0x240] ss:$16 sps:$4 sm:$0xff]   ;;  %v12553_v30 = vld [vmem:[#allocation12 + $0x24] ss:$16 sps:$4 sm:$0xff]  }
 0x60d   : > { %8084 = vmatprep.subr.bf16.mxu0 %v11598_v18  ;;  %v12556_v16 = vld [vmem:[#allocation12 + $0x224] ss:$16 sps:$4 sm:$0xff]   ;;  %v12551_v34 = vld [vmem:[#allocation12 + $0x20] ss:$16 sps:$4 sm:$0xff]  }
 0x60e   : > { %8124 = vmatpush2.bf16.msra.mxu1 %v11733_v40  ;;  %v12554_v37 = vld [vmem:[#allocation12 + $0x220] ss:$16 sps:$4 sm:$0xff]   ;;  %v12559_v40 = vld [vmem:[#allocation12 + $0x4] ss:$16 sps:$4 sm:$0xff]  }
 0x60f   : > { %8125 = vmatprep.subr.bf16.mxu1 %v11726_v39  ;;  %v12562_v18 = vld [vmem:[#allocation12 + $0x204] ss:$16 sps:$4 sm:$0xff]   ;;  %v12557_v39 = vld [vmem:[#allocation12] ss:$16 sps:$4 sm:$0xff]  }
 0x610   : > { %8085 = vmatpush2.bf16.msra.mxu0 %v11597_v29  ;;  %v12560_v43 = vld [vmem:[#allocation12 + $0x200] ss:$16 sps:$4 sm:$0xff]   ;;  %v12565_v44 = vld [vmem:[#allocation12 + $0x1e4] ss:$16 sps:$4 sm:$0xff]  }
 0x611   : > { %8086 = vmatprep.subr.bf16.mxu0 %v11590_v47  ;;  %v12568_v12 = vld [vmem:[#allocation12 + $0x3e4] ss:$16 sps:$4 sm:$0xff]   ;;  %v12563_v49 = vld [vmem:[#allocation12 + $0x1e0] ss:$16 sps:$4 sm:$0xff]  }
 0x612   : > { %8126 = vmatpush2.bf16.msra.mxu1 %v11725_v20  ;;  %v12566_v29 = vld [vmem:[#allocation12 + $0x3e0] ss:$16 sps:$4 sm:$0xff]   ;;  %v12571_v20 = vld [vmem:[#allocation12 + $0x1c4] ss:$16 sps:$4 sm:$0xff]  }
 0x613   : > { %8127 = vmatprep.subr.bf16.mxu1 %v11718_v33  ;;  %v12574_v47 = vld [vmem:[#allocation12 + $0x3c4] ss:$16 sps:$4 sm:$0xff]   ;;  %v12569_v33 = vld [vmem:[#allocation12 + $0x1c0] ss:$16 sps:$4 sm:$0xff]  }
 0x614   : > { %8087 = vmatpush2.bf16.msra.mxu0 %v11589_v45  ;;  %v12572_v45 = vld [vmem:[#allocation12 + $0x3c0] ss:$16 sps:$4 sm:$0xff]   ;;  %v12583_v48 = vld [vmem:[#allocation12 + $0x184] ss:$16 sps:$4 sm:$0xff]  }
 0x615   : > { %9712 = vmatprep.subr.bf16.mxu0 %v12517_v51  ;;  %v12580_v51 = vld [vmem:[#allocation12 + $0x3a4] ss:$16 sps:$4 sm:$0xff]   ;;  %v12578_v52 = vld [vmem:[#allocation12 + $0x3a0] ss:$16 sps:$4 sm:$0xff]  }
 0x616   : > { %8128 = vmatpush2.bf16.msra.mxu1 %v11717_v28  ;;  %v12577_v28 = vld [vmem:[#allocation12 + $0x1a4] ss:$16 sps:$4 sm:$0xff]  }
 0x617   : > { %9753 = vmatprep.subr.bf16.mxu1 %v12520_v42  ;;  %v7844_v56 = vpop.f32.mrf.mxu0  ;;  %8089 = vmatmul.mubr.bf16.vlgmr.msra.gmra.mxu0 %v13969_v13  ;;  %v12575_v42 = vld [vmem:[#allocation12 + $0x1a0] ss:$16 sps:$4 sm:$0xff]  }
 0x618   : > { %v7845_v2 = vadd.f32 %v7844_v56, %v14060_v10  ;;  %9713 = vmatpush1.bf16.msra.mxu0 %v12515_v53  ;;  %9744 = vmatprep.mubr.bf16.mxu0 %v14069_v58  ;;  %v12532_v10 = vld [vmem:[#allocation12 + $0x2a4] ss:$16 sps:$4 sm:$0xff]  }
 0x619   : > { %v7885_v36 = vpop.f32.mrf.mxu1  ;;  %8130 = vmatmul.mubr.bf16.vlgmr.msra.gmra.mxu1 %v13973_v23  ;;  %v14077_v62 = vpop.f32.mrf.mxu0  ;;  %9714 = vmatprep.subr.bf16.mxu0 %v12523_v50  ;;  %v12586_v53 = vld [vmem:[#allocation12 + $0x384] ss:$16 sps:$4 sm:$0xff]   ;;  %v12584_v50 = vld [vmem:[#allocation12 + $0x380] ss:$16 sps:$4 sm:$0xff]  }
 0x61a   : > { %9754 = vmatpush1.bf16.msra.mxu1 %v12518_v55  ;;  %v14079_v4 = vadd.f32 %v7885_v36, %v7845_v2  ;;  %9785 = vmatprep.mubr.bf16.mxu1 %v14072_v61  ;;  %v12581_v55 = vld [vmem:[#allocation12 + $0x180] ss:$16 sps:$4 sm:$0xff]   ;;  %v12589_v56 = vld [vmem:[#allocation12 + $0x164] ss:$16 sps:$4 sm:$0xff]  }
 0x61b   : > { %v14082_v13 = vpop.f32.mrf.mxu1  ;;  %v7848_v5 = vpop.f32.mrf.mxu0  ;;  %9755 = vmatprep.subr.bf16.mxu1 %v12526_v59  ;;  %v12592_v59 = vld [vmem:[#allocation12 + $0x364] ss:$16 sps:$4 sm:$0xff]   ;;  %v12587_v2 = vld [vmem:[#allocation12 + $0x160] ss:$16 sps:$4 sm:$0xff]  }
 0x61c   : > { %9715 = vmatpush1.bf16.msra.mxu0 %v12521_v32  ;;  %v12590_v36 = vld [vmem:[#allocation12 + $0x360] ss:$16 sps:$4 sm:$0xff]   ;;  %v12595_v32 = vld [vmem:[#allocation12 + $0x144] ss:$16 sps:$4 sm:$0xff]  }
 0x61d   : > { %v7889_v23 = vpop.f32.mrf.mxu1  ;;  %v7849_v7 = vpop.f32.mrf.mxu0  ;;  %9716 = vmatprep.subr.bf16.mxu0 %v12529_v3  ;;  %v12593_v3 = vld [vmem:[#allocation12 + $0x140] ss:$16 sps:$4 sm:$0xff]   ;;  %v12601_v5 = vld [vmem:[#allocation12 + $0x124] ss:$16 sps:$4 sm:$0xff]  }
 0x61e   : > { %9756 = vmatpush1.bf16.msra.mxu1 %v12524_v41  ;;  %v12598_v41 = vld [vmem:[#allocation12 + $0x344] ss:$16 sps:$4 sm:$0xff]   ;;  %v12599_v7 = vld [vmem:[#allocation12 + $0x120] ss:$16 sps:$4 sm:$0xff]  }
 0x61f   : > { %v7890_v9 = vpop.f32.mrf.mxu1  ;;  %9757 = vmatprep.subr.bf16.mxu1 %v12532_v10  ;;  %v12596_v10 = vld [vmem:[#allocation12 + $0x340] ss:$16 sps:$4 sm:$0xff]   ;;  %v12604_v23 = vld [vmem:[#allocation12 + $0x324] ss:$16 sps:$4 sm:$0xff]  }
 0x620   : > { %9717 = vmatpush1.bf16.msra.mxu0 %v12527_v6  ;;  %v7847_v6 = vadd.f32 %v14077_v62, %v14065_v31  ;;  %v12610_v9 = vld [vmem:[#allocation12 + $0x304] ss:$16 sps:$4 sm:$0xff]   ;;  %v8140_v31 = vmax.f32 %v14040_v60, 0.0  ;;  %v3217_v62 = vsub.s32 7, %v13852_v0  ;;  %v12668_v60 = vld [vmem:[#allocation12 + $0x6e0] ss:$16 sps:$4 sm:$0xff]  }
 0x621   : > { %9718 = vmatprep.subr.bf16.mxu0 %v12535_v8  ;;  %v12607_v8 = vld [vmem:[#allocation12 + $0x104] ss:$16 sps:$4 sm:$0xff]  }
 0x622   : > { %9758 = vmatpush1.bf16.msra.mxu1 %v12530_v46  ;;  %v12602_v46 = vld [vmem:[#allocation12 + $0x320] ss:$16 sps:$4 sm:$0xff]   ;;  %v12996_v0 = vld [vmem:[%s14257_s9 + $0x38] sm:$0xff]  }
 0x623   : > { %9759 = vmatprep.subr.bf16.mxu1 %v12538_v14  ;;  %v7888_v14 = vadd.f32 %v14082_v13, %v7847_v6  ;;  %v12629_v6 = vld [vmem:[#allocation12 + $0x420] ss:$16 sps:$4 sm:$0xff]  }
 0x624   : > { %9719 = vmatpush1.bf16.msra.mxu0 %v12533_v15  ;;  %v12605_v15 = vld [vmem:[#allocation12 + $0x100] ss:$16 sps:$4 sm:$0xff]  }
 0x625   : > { %9720 = vmatprep.subr.bf16.mxu0 %v12541_v57  ;;  %v12608_v57 = vld [vmem:[#allocation12 + $0x300] ss:$16 sps:$4 sm:$0xff]  }
 0x626   : > { %9760 = vmatpush1.bf16.msra.mxu1 %v12536_v17  ;;  %v8138_v17 = vmax.f32 %v14008_v35, 0.0  ;;  %v12616_v35 = vld [vmem:[#allocation12 + $0x4c4] ss:$16 sps:$4 sm:$0xff]  }
 0x627   : > { %9761 = vmatprep.subr.bf16.mxu1 %v12544_v19  ;;  %v12613_v19 = vld [vmem:[#allocation12 + $0x4e4] ss:$16 sps:$4 sm:$0xff]  }
 0x628   : > { %9721 = vmatpush1.bf16.msra.mxu0 %v12539_v21  ;;  %v12670_v21 = vld [vmem:[#allocation12 + $0x6e4] ss:$16 sps:$4 sm:$0xff]  }
 0x629   : > { %9722 = vmatprep.subr.bf16.mxu0 %v12547_v25  ;;  %v13013_v25 = vld [vmem:[#allocation10] sm:$0xff] }
 0x62a   : > { %9762 = vmatpush1.bf16.msra.mxu1 %v12542_v22  ;;  %v8143_v22 = vmax.f32 %v7888_v14, 0.0  ;;  %v3214_v13 = vrot.slane %v13013_v25, %v2303_v27  ;;  %v12614_v27 = vld [vmem:[#allocation12 + $0x4c0] ss:$16 sps:$4 sm:$0xff]   ;;  %v12637_v14 = vld [vmem:[#allocation12 + $0x5e4] ss:$16 sps:$4 sm:$0xff]  }
 0x62b   : > { %9763 = vmatprep.subr.bf16.mxu1 %v12550_v24  ;;  %v12611_v24 = vld [vmem:[#allocation12 + $0x4e0] ss:$16 sps:$4 sm:$0xff]  }
 0x62c   : > { %9723 = vmatpush1.bf16.msra.mxu0 %v12545_v1  ;;  %v14092_v1 = vpack.c.bf16 %v8138_v17, %v8138_v17  ;;  %v12718_v17 = vld [vmem:[#allocation12 + $0x7e4] ss:$16 sps:$4 sm:$0xff]  }
 0x62d   : > { %9724 = vmatprep.subr.bf16.mxu0 %v12553_v30  ;;  %v3218_v30 = vrot.slane %v13013_v25, %v3217_v62  ;;  %v12724_v62 = vld [vmem:[#allocation12 + $0x7c4] ss:$16 sps:$4 sm:$0xff]   ;;  %v12722_v25 = vld [vmem:[#allocation12 + $0x7c0] ss:$16 sps:$4 sm:$0xff]  }
 0x62e   : > { %9764 = vmatpush1.bf16.msra.mxu1 %v12548_v26  ;;  %v14094_v26 = vpack.c.bf16 %v8140_v31, %v8140_v31  ;;  %v12716_v31 = vld [vmem:[#allocation12 + $0x7e0] ss:$16 sps:$4 sm:$0xff]  }
 0x62f   : > { %9765 = vmatprep.subr.bf16.mxu1 %v12556_v16  ;;  %v14096_v16 = vpack.c.bf16 %v8143_v22, %v8143_v22  ;;  %v12643_v22 = vld [vmem:[#allocation12 + $0x5a4] ss:$16 sps:$4 sm:$0xff]  }
 0x630   : > { %9725 = vmatpush1.bf16.msra.mxu0 %v12551_v34 }
 0x631   : > { %9726 = vmatprep.subr.bf16.mxu0 %v12559_v40 }
 0x632   : > { %9766 = vmatpush1.bf16.msra.mxu1 %v12554_v37  ;;  %v12676_v37 = vld [vmem:[#allocation12 + $0x6c4] ss:$16 sps:$4 sm:$0xff]  }
 0x633   : > { %9767 = vmatprep.subr.bf16.mxu1 %v12562_v18 }
 0x634   : > { %9727 = vmatpush1.bf16.msra.mxu0 %v12557_v39 }
 0x635   : > { %9728 = vmatprep.subr.bf16.mxu0 %v12565_v44 }
 0x636   : > { %9768 = vmatpush1.bf16.msra.mxu1 %v12560_v43  ;;  %v12619_v43 = vld [vmem:[#allocation12 + $0x4a4] ss:$16 sps:$4 sm:$0xff]  }
 0x637   : > { %9769 = vmatprep.subr.bf16.mxu1 %v12568_v12 }
 0x638   : > { %9729 = vmatpush2.bf16.msra.mxu0 %v12563_v49 }
 0x639   : > { %9730 = vmatprep.subr.bf16.mxu0 %v12571_v20 }
 0x63a   : > { %9770 = vmatpush2.bf16.msra.mxu1 %v12566_v29  ;;  %v12674_v29 = vld [vmem:[#allocation12 + $0x6c0] ss:$16 sps:$4 sm:$0xff]  }
 0x63b   : > { %9771 = vmatprep.subr.bf16.mxu1 %v12574_v47  ;;  %v12682_v47 = vld [vmem:[#allocation12 + $0x6a4] ss:$16 sps:$4 sm:$0xff]  }
 0x63c   : > { %9731 = vmatpush2.bf16.msra.mxu0 %v12569_v33 }
 0x63d   : > { %9732 = vmatprep.subr.bf16.mxu0 %v12577_v28  ;;  %v12617_v28 = vld [vmem:[#allocation12 + $0x4a0] ss:$16 sps:$4 sm:$0xff]  }
 0x63e   : > { %9772 = vmatpush2.bf16.msra.mxu1 %v12572_v45 }
 0x63f   : > { %9773 = vmatprep.subr.bf16.mxu1 %v12580_v51 }
 0x640   : > { %9733 = vmatpush2.bf16.msra.mxu0 %v12575_v42  ;;  %v12622_v42 = vld [vmem:[#allocation12 + $0x484] ss:$16 sps:$4 sm:$0xff]  }
 0x641   : > { %9734 = vmatprep.subr.bf16.mxu0 %v12583_v48  ;;  %v12680_v48 = vld [vmem:[#allocation12 + $0x6a0] ss:$16 sps:$4 sm:$0xff]  }
 0x642   : > { %9774 = vmatpush2.bf16.msra.mxu1 %v12578_v52 }
 0x643   : > { %9775 = vmatprep.subr.bf16.mxu1 %v12586_v53  ;;  %v12688_v53 = vld [vmem:[#allocation12 + $0x684] ss:$16 sps:$4 sm:$0xff]  }
 0x644   : > { %9735 = vmatpush2.bf16.msra.mxu0 %v12581_v55  ;;  %v12620_v55 = vld [vmem:[#allocation12 + $0x480] ss:$16 sps:$4 sm:$0xff]  }
 0x645   : > { %9736 = vmatprep.subr.bf16.mxu0 %v12589_v56  ;;  %v12686_v56 = vld [vmem:[#allocation12 + $0x680] ss:$16 sps:$4 sm:$0xff]  }
 0x646   : > { %9776 = vmatpush2.bf16.msra.mxu1 %v12584_v50  ;;  %v12625_v50 = vld [vmem:[#allocation12 + $0x464] ss:$16 sps:$4 sm:$0xff]  }
 0x647   : > { %9777 = vmatprep.subr.bf16.mxu1 %v12592_v59  ;;  %v12694_v59 = vld [vmem:[#allocation12 + $0x664] ss:$16 sps:$4 sm:$0xff]  }
 0x648   : > { %9737 = vmatpush2.bf16.msra.mxu0 %v12587_v2  ;;  %v12623_v2 = vld [vmem:[#allocation12 + $0x460] ss:$16 sps:$4 sm:$0xff]  }
 0x649   : > { %9738 = vmatprep.subr.bf16.mxu0 %v12595_v32  ;;  %v12692_v32 = vld [vmem:[#allocation12 + $0x660] ss:$16 sps:$4 sm:$0xff]  }
 0x64a   : > { %9778 = vmatpush2.bf16.msra.mxu1 %v12590_v36  ;;  %v12628_v36 = vld [vmem:[#allocation12 + $0x444] ss:$16 sps:$4 sm:$0xff]  }
 0x64b   : > { %9779 = vmatprep.subr.bf16.mxu1 %v12598_v41  ;;  %v12700_v41 = vld [vmem:[#allocation12 + $0x644] ss:$16 sps:$4 sm:$0xff]  }
 0x64c   : > { %9739 = vmatpush2.bf16.msra.mxu0 %v12593_v3  ;;  %v12626_v3 = vld [vmem:[#allocation12 + $0x440] ss:$16 sps:$4 sm:$0xff]  }
 0x64d   : > { %9740 = vmatprep.subr.bf16.mxu0 %v12601_v5  ;;  %v12698_v5 = vld [vmem:[#allocation12 + $0x640] ss:$16 sps:$4 sm:$0xff]  }
 0x64e   : > { %9780 = vmatpush2.bf16.msra.mxu1 %v12596_v10  ;;  %v12631_v10 = vld [vmem:[#allocation12 + $0x424] ss:$16 sps:$4 sm:$0xff]  }
 0x64f   : > { %9781 = vmatprep.subr.bf16.mxu1 %v12604_v23  ;;  %v12706_v23 = vld [vmem:[#allocation12 + $0x624] ss:$16 sps:$4 sm:$0xff]  }
 0x650   : > { %9741 = vmatpush2.bf16.msra.mxu0 %v12599_v7  ;;  %v12634_v7 = vld [vmem:[#allocation12 + $0x404] ss:$16 sps:$4 sm:$0xff]  }
 0x651   : > { %9742 = vmatprep.subr.bf16.mxu0 %v12607_v8  ;;  %v12712_v8 = vld [vmem:[#allocation12 + $0x604] ss:$16 sps:$4 sm:$0xff]  }
 0x652   : > { %9782 = vmatpush2.bf16.msra.mxu1 %v12602_v46  ;;  %v12704_v46 = vld [vmem:[#allocation12 + $0x620] ss:$16 sps:$4 sm:$0xff]  }
 0x653   : > { %9783 = vmatprep.subr.bf16.mxu1 %v12610_v9  ;;  %v12632_v9 = vld [vmem:[#allocation12 + $0x400] ss:$16 sps:$4 sm:$0xff]  }
 0x654   : > { %9743 = vmatpush2.bf16.msra.mxu0 %v12605_v15  ;;  %v12710_v15 = vld [vmem:[#allocation12 + $0x600] ss:$16 sps:$4 sm:$0xff]  }
 0x655   : > { %9794 = vmatprep.subr.bf16.mxu0 %v12613_v19  ;;  %v12640_v19 = vld [vmem:[#allocation12 + $0x5c4] ss:$16 sps:$4 sm:$0xff]  }
 0x656   : > { %9784 = vmatpush2.bf16.msra.mxu1 %v12608_v57  ;;  %v12635_v57 = vld [vmem:[#allocation12 + $0x5e0] ss:$16 sps:$4 sm:$0xff]  }
 0x657   : > { %9835 = vmatprep.subr.bf16.mxu1 %v12670_v21  ;;  %v7926_v34 = vpop.f32.mrf.mxu0  ;;  %9745 = vmatmul.mubr.bf16.vlgmr.msra.gmra.mxu0 %v14092_v1  ;;  %v12638_v21 = vld [vmem:[#allocation12 + $0x5c0] ss:$16 sps:$4 sm:$0xff]  }
 0x658   : > { %v7927_v40 = vadd.f32 %v7926_v34, %v3214_v13  ;;  %9795 = vmatpush1.bf16.msra.mxu0 %v12611_v24  ;;  %9826 = vmatprep.mubr.bf16.mxu0 %v14096_v16  ;;  %v12730_v13 = vld [vmem:[#allocation12 + $0x7a4] ss:$16 sps:$4 sm:$0xff]   ;;  %v12641_v24 = vld [vmem:[#allocation12 + $0x5a0] ss:$16 sps:$4 sm:$0xff]  }
 0x659   : > { %v7967_v18 = vpop.f32.mrf.mxu1  ;;  %9786 = vmatmul.mubr.bf16.vlgmr.msra.gmra.mxu1 %v14094_v26  ;;  %v7928_v39 = vpop.f32.mrf.mxu0  ;;  %9796 = vmatprep.subr.bf16.mxu0 %v12616_v35  ;;  %v12646_v35 = vld [vmem:[#allocation12 + $0x584] ss:$16 sps:$4 sm:$0xff]   ;;  %v12644_v34 = vld [vmem:[#allocation12 + $0x580] ss:$16 sps:$4 sm:$0xff]  }
 0x65a   : > { %v14101_v44 = vadd.f32 %v7967_v18, %v7927_v40  ;;  %v7929_v12 = vadd.f32 %v7928_v39, %v3218_v30  ;;  %9836 = vmatpush1.bf16.msra.mxu1 %v12668_v60  ;;  %v12728_v30 = vld [vmem:[#allocation12 + $0x7a0] ss:$16 sps:$4 sm:$0xff]   ;;  %v12736_v60 = vld [vmem:[#allocation12 + $0x784] ss:$16 sps:$4 sm:$0xff]  }
 0x65b   : > { %v7969_v49 = vpop.f32.mrf.mxu1  ;;  %v7930_v20 = vpop.f32.mrf.mxu0  ;;  %9837 = vmatprep.subr.bf16.mxu1 %v12676_v37  ;;  %v12649_v37 = vld [vmem:[#allocation12 + $0x564] ss:$16 sps:$4 sm:$0xff]   ;;  %v12734_v40 = vld [vmem:[#allocation12 + $0x780] ss:$16 sps:$4 sm:$0xff]  }
 0x65c   : > { %v14103_v33 = vadd.f32 %v7969_v49, %v7929_v12  ;;  %9797 = vmatpush1.bf16.msra.mxu0 %v12614_v27  ;;  %v12742_v18 = vld [vmem:[#allocation12 + $0x764] ss:$16 sps:$4 sm:$0xff]   ;;  %v12647_v27 = vld [vmem:[#allocation12 + $0x560] ss:$16 sps:$4 sm:$0xff]  }
 0x65d   : > { %v7971_v45 = vpop.f32.mrf.mxu1  ;;  %v7931_v51 = vpop.f32.mrf.mxu0  ;;  %9798 = vmatprep.subr.bf16.mxu0 %v12619_v43  ;;  %v12652_v39 = vld [vmem:[#allocation12 + $0x544] ss:$16 sps:$4 sm:$0xff]   ;;  %v12740_v43 = vld [vmem:[#allocation12 + $0x760] ss:$16 sps:$4 sm:$0xff]  }
 0x65e   : > { %9838 = vmatpush1.bf16.msra.mxu1 %v12674_v29  ;;  %v12748_v12 = vld [vmem:[#allocation12 + $0x744] ss:$16 sps:$4 sm:$0xff]   ;;  %v12650_v49 = vld [vmem:[#allocation12 + $0x540] ss:$16 sps:$4 sm:$0xff]  }
 0x65f   : > { %v7972_v52 = vpop.f32.mrf.mxu1  ;;  %9839 = vmatprep.subr.bf16.mxu1 %v12682_v47  ;;  %v12655_v29 = vld [vmem:[#allocation12 + $0x524] ss:$16 sps:$4 sm:$0xff]   ;;  %v12746_v20 = vld [vmem:[#allocation12 + $0x740] ss:$16 sps:$4 sm:$0xff]  }
 0x660   : > { %9799 = vmatpush1.bf16.msra.mxu0 %v12617_v28  ;;  %v12754_v47 = vld [vmem:[#allocation12 + $0x724] ss:$16 sps:$4 sm:$0xff]   ;;  %v12653_v45 = vld [vmem:[#allocation12 + $0x520] ss:$16 sps:$4 sm:$0xff]  }
 0x661   : > { %9800 = vmatprep.subr.bf16.mxu0 %v12622_v42  ;;  %v12658_v28 = vld [vmem:[#allocation12 + $0x504] ss:$16 sps:$4 sm:$0xff]   ;;  %v12752_v51 = vld [vmem:[#allocation12 + $0x720] ss:$16 sps:$4 sm:$0xff]  }
 0x662   : > { %9840 = vmatpush1.bf16.msra.mxu1 %v12680_v48  ;;  %v12760_v42 = vld [vmem:[#allocation12 + $0x704] ss:$16 sps:$4 sm:$0xff]   ;;  %v12656_v52 = vld [vmem:[#allocation12 + $0x500] ss:$16 sps:$4 sm:$0xff]   ;;  %v8142_v48 = vmax.f32 %v14079_v4, 0.0 }
 0x663   : > { %9841 = vmatprep.subr.bf16.mxu1 %v12688_v53  ;;  %v12661_v53 = vld [vmem:[#allocation12 + $0xec] ss:$16 sps:$4 sm:$0xff]  }
 0x664   : > { %9801 = vmatpush1.bf16.msra.mxu0 %v12620_v55  ;;  %v12758_v55 = vld [vmem:[#allocation12 + $0x700] ss:$16 sps:$4 sm:$0xff]  }
 0x665   : > { %9802 = vmatprep.subr.bf16.mxu0 %v12625_v50  ;;  %v12766_v50 = vld [vmem:[#allocation12 + $0x2ec] ss:$16 sps:$4 sm:$0xff]  }
 0x666   : > { %9842 = vmatpush1.bf16.msra.mxu1 %v12686_v56  ;;  %v12659_v56 = vld [vmem:[#allocation12 + $0xe8] ss:$16 sps:$4 sm:$0xff]  }
 0x667   : > { %9843 = vmatprep.subr.bf16.mxu1 %v12694_v59  ;;  %v14106_v59 = vpack.c.bf16 %v8142_v48, %v8142_v48  ;;  %v12755_v48 = vld [vmem:[#allocation12 + $0x4c8] ss:$16 sps:$4 sm:$0xff]  }
 0x668   : > { %9803 = vmatpush1.bf16.msra.mxu0 %v12623_v2  ;;  %v12664_v2 = vld [vmem:[#allocation12 + $0xcc] ss:$16 sps:$4 sm:$0xff]  }
 0x669   : > { %9804 = vmatprep.subr.bf16.mxu0 %v12628_v36 }
 0x66a   : > { %9844 = vmatpush1.bf16.msra.mxu1 %v12692_v32 }
 0x66b   : > { %9845 = vmatprep.subr.bf16.mxu1 %v12700_v41  ;;  %v12662_v41 = vld [vmem:[#allocation12 + $0xc8] ss:$16 sps:$4 sm:$0xff]  }
 0x66c   : > { %9805 = vmatpush1.bf16.msra.mxu0 %v12626_v3 }
 0x66d   : > { %9806 = vmatprep.subr.bf16.mxu0 %v12631_v10  ;;  %v12667_v10 = vld [vmem:[#allocation12 + $0xac] ss:$16 sps:$4 sm:$0xff]  }
 0x66e   : > { %9846 = vmatpush1.bf16.msra.mxu1 %v12698_v5 }
 0x66f   : > { %9847 = vmatprep.subr.bf16.mxu1 %v12706_v23 }
 0x670   : > { %9807 = vmatpush1.bf16.msra.mxu0 %v12629_v6 }
 0x671   : > { %9808 = vmatprep.subr.bf16.mxu0 %v12634_v7 }
 0x672   : > { %9848 = vmatpush1.bf16.msra.mxu1 %v12704_v46  ;;  %v12665_v46 = vld [vmem:[#allocation12 + $0xa8] ss:$16 sps:$4 sm:$0xff]  }
 0x673   : > { %9849 = vmatprep.subr.bf16.mxu1 %v12712_v8 }
 0x674   : > { %9809 = vmatpush1.bf16.msra.mxu0 %v12632_v9 }
 0x675   : > { %9810 = vmatprep.subr.bf16.mxu0 %v12637_v14  ;;  %v12671_v14 = vld [vmem:[#allocation12 + $0x88] ss:$16 sps:$4 sm:$0xff]  }
 0x676   : > { %9850 = vmatpush1.bf16.msra.mxu1 %v12710_v15  ;;  %v12677_v15 = vld [vmem:[#allocation12 + $0x68] ss:$16 sps:$4 sm:$0xff]  }
 0x677   : > { %9851 = vmatprep.subr.bf16.mxu1 %v12718_v17  ;;  %v12685_v17 = vld [vmem:[#allocation12 + $0x4c] ss:$16 sps:$4 sm:$0xff]  }
 0x678   : > { %9811 = vmatpush2.bf16.msra.mxu0 %v12635_v57  ;;  %v12683_v57 = vld [vmem:[#allocation12 + $0x48] ss:$16 sps:$4 sm:$0xff]  }
 0x679   : > { %9812 = vmatprep.subr.bf16.mxu0 %v12640_v19  ;;  %v12691_v19 = vld [vmem:[#allocation12 + $0x2c] ss:$16 sps:$4 sm:$0xff]  }
 0x67a   : > { %9852 = vmatpush2.bf16.msra.mxu1 %v12716_v31  ;;  %v12689_v31 = vld [vmem:[#allocation12 + $0x28] ss:$16 sps:$4 sm:$0xff]  }
 0x67b   : > { %9853 = vmatprep.subr.bf16.mxu1 %v12724_v62  ;;  %v12697_v62 = vld [vmem:[#allocation12 + $0xc] ss:$16 sps:$4 sm:$0xff]  }
 0x67c   : > { %9813 = vmatpush2.bf16.msra.mxu0 %v12638_v21  ;;  %v12695_v21 = vld [vmem:[#allocation12 + $0x8] ss:$16 sps:$4 sm:$0xff]  }
 0x67d   : > { %9814 = vmatprep.subr.bf16.mxu0 %v12643_v22  ;;  %v12703_v22 = vld [vmem:[#allocation12 + $0x1ec] ss:$16 sps:$4 sm:$0xff]  }
 0x67e   : > { %9854 = vmatpush2.bf16.msra.mxu1 %v12722_v25  ;;  %v12701_v25 = vld [vmem:[#allocation12 + $0x1e8] ss:$16 sps:$4 sm:$0xff]  }
 0x67f   : > { %9855 = vmatprep.subr.bf16.mxu1 %v12730_v13  ;;  %v12709_v13 = vld [vmem:[#allocation12 + $0x1cc] ss:$16 sps:$4 sm:$0xff]  }
 0x680   : > { %9815 = vmatpush2.bf16.msra.mxu0 %v12641_v24  ;;  %v12707_v24 = vld [vmem:[#allocation12 + $0x1c8] ss:$16 sps:$4 sm:$0xff]  }
 0x681   : > { %9816 = vmatprep.subr.bf16.mxu0 %v12646_v35  ;;  %v12715_v35 = vld [vmem:[#allocation12 + $0x1ac] ss:$16 sps:$4 sm:$0xff]  }
 0x682   : > { %9856 = vmatpush2.bf16.msra.mxu1 %v12728_v30  ;;  %v12713_v30 = vld [vmem:[#allocation12 + $0x1a8] ss:$16 sps:$4 sm:$0xff]  }
 0x683   : > { %9857 = vmatprep.subr.bf16.mxu1 %v12736_v60  ;;  %v12721_v60 = vld [vmem:[#allocation12 + $0x18c] ss:$16 sps:$4 sm:$0xff]  }
 0x684   : > { %9817 = vmatpush2.bf16.msra.mxu0 %v12644_v34  ;;  %v12719_v34 = vld [vmem:[#allocation12 + $0x188] ss:$16 sps:$4 sm:$0xff]  }
 0x685   : > { %9818 = vmatprep.subr.bf16.mxu0 %v12649_v37  ;;  %v12727_v37 = vld [vmem:[#allocation12 + $0x16c] ss:$16 sps:$4 sm:$0xff]  }
 0x686   : > { %9858 = vmatpush2.bf16.msra.mxu1 %v12734_v40  ;;  %v12725_v40 = vld [vmem:[#allocation12 + $0x168] ss:$16 sps:$4 sm:$0xff]  }
 0x687   : > { %9859 = vmatprep.subr.bf16.mxu1 %v12742_v18  ;;  %v12733_v18 = vld [vmem:[#allocation12 + $0x14c] ss:$16 sps:$4 sm:$0xff]  }
 0x688   : > { %9819 = vmatpush2.bf16.msra.mxu0 %v12647_v27  ;;  %v12731_v27 = vld [vmem:[#allocation12 + $0x148] ss:$16 sps:$4 sm:$0xff]  }
 0x689   : > { %9820 = vmatprep.subr.bf16.mxu0 %v12652_v39  ;;  %v12739_v39 = vld [vmem:[#allocation12 + $0x12c] ss:$16 sps:$4 sm:$0xff]  }
 0x68a   : > { %9860 = vmatpush2.bf16.msra.mxu1 %v12740_v43  ;;  %v12737_v43 = vld [vmem:[#allocation12 + $0x128] ss:$16 sps:$4 sm:$0xff]  }
 0x68b   : > { %9861 = vmatprep.subr.bf16.mxu1 %v12748_v12  ;;  %v12745_v12 = vld [vmem:[#allocation12 + $0x10c] ss:$16 sps:$4 sm:$0xff]  }
 0x68c   : > { %9821 = vmatpush2.bf16.msra.mxu0 %v12650_v49  ;;  %v12743_v49 = vld [vmem:[#allocation12 + $0x108] ss:$16 sps:$4 sm:$0xff]  }
 0x68d   : > { %9822 = vmatprep.subr.bf16.mxu0 %v12655_v29  ;;  %v12751_v29 = vld [vmem:[#allocation12 + $0x4ec] ss:$16 sps:$4 sm:$0xff]  }
 0x68e   : > { %9862 = vmatpush2.bf16.msra.mxu1 %v12746_v20 }
 0x68f   : > { %9863 = vmatprep.subr.bf16.mxu1 %v12754_v47  ;;  %v12749_v47 = vld [vmem:[#allocation12 + $0x4e8] ss:$16 sps:$4 sm:$0xff]  }
 0x690   : > { %9823 = vmatpush2.bf16.msra.mxu0 %v12653_v45  ;;  %v12757_v45 = vld [vmem:[#allocation12 + $0x4cc] ss:$16 sps:$4 sm:$0xff]  }
 0x691   : > { %9824 = vmatprep.subr.bf16.mxu0 %v12658_v28 }
 0x692   : > { %9864 = vmatpush2.bf16.msra.mxu1 %v12752_v51 }
 0x693   : > { %9865 = vmatprep.subr.bf16.mxu1 %v12760_v42 }
 0x694   : > { %9825 = vmatpush2.bf16.msra.mxu0 %v12656_v52 }
 0x695   : > { %9876 = vmatprep.subr.bf16.mxu0 %v12661_v53 }
 0x696   : > { %9866 = vmatpush2.bf16.msra.mxu1 %v12758_v55  ;;  %v12763_v55 = vld [vmem:[#allocation12 + $0x4ac] ss:$16 sps:$4 sm:$0xff]  }
 0x697   : > { %v8008_v36 = vpop.f32.mrf.mxu0  ;;  %9827 = vmatmul.mubr.bf16.vlgmr.msra.gmra.mxu0 %v14106_v59  ;;  %9917 = vmatprep.subr.bf16.mxu1 %v12766_v50 }
 0x698   : > { %v8009_v32 = vadd.f32 %v8008_v36, %v14101_v44  ;;  %9877 = vmatpush1.bf16.msra.mxu0 %v12659_v56  ;;  %9908 = vmatprep.mubr.bf16.mxu0 %v14069_v58  ;;  %v12673_v44 = vld [vmem:[#allocation12 + $0x8c] ss:$16 sps:$4 sm:$0xff]  }
 0x699   : > { %v8049_v4 = vpop.f32.mrf.mxu1  ;;  %v14111_v3 = vpop.f32.mrf.mxu0  ;;  %9878 = vmatprep.subr.bf16.mxu0 %v12664_v2  ;;  %v12679_v58 = vld [vmem:[#allocation12 + $0x6c] ss:$16 sps:$4 sm:$0xff]  }
 0x69a   : > { %v14113_v5 = vadd.f32 %v8049_v4, %v8009_v32  ;;  %v8011_v20 = vadd.f32 %v14111_v3, %v14103_v33  ;;  %v12769_v3 = vld [vmem:[#allocation12 + $0x48c] ss:$16 sps:$4 sm:$0xff]  }
 0x69b   : > { %v14115_v23 = vpop.f32.mrf.mxu1  ;;  %v8012_v6 = vpop.f32.mrf.mxu0 }
 0x69c   : > { %9879 = vmatpush1.bf16.msra.mxu0 %v12662_v41  ;;  %v8052_v51 = vadd.f32 %v14115_v23, %v8011_v20  ;;  %v12815_v20 = vld [vmem:[#allocation12 + $0x588] ss:$16 sps:$4 sm:$0xff]  }
 0x69d   : > { %v8053_v7 = vpop.f32.mrf.mxu1  ;;  %v8013_v8 = vpop.f32.mrf.mxu0  ;;  %9880 = vmatprep.subr.bf16.mxu0 %v12667_v10 }
 0x69e   : > { %v12767_v7 = vld [vmem:[#allocation12 + $0x488] ss:$16 sps:$4 sm:$0xff]   ;;  %v12775_v8 = vld [vmem:[#allocation12 + $0x46c] ss:$16 sps:$4 sm:$0xff]  }
 0x69f   : > { %v8054_v9 = vpop.f32.mrf.mxu1 }
 0x6a0   : > { %9881 = vmatpush1.bf16.msra.mxu0 %v12665_v46  ;;  %v12772_v46 = vld [vmem:[#allocation12 + $0x2cc] ss:$16 sps:$4 sm:$0xff]   ;;  %v12773_v9 = vld [vmem:[#allocation12 + $0x468] ss:$16 sps:$4 sm:$0xff]  }
 0x6a1   : > { %9882 = vmatprep.subr.bf16.mxu0 %v12673_v44  ;;  %v12770_v44 = vld [vmem:[#allocation12 + $0x2c8] ss:$16 sps:$4 sm:$0xff]  }
 0x6a4   : > { %9883 = vmatpush1.bf16.msra.mxu0 %v12671_v14  ;;  %v12778_v14 = vld [vmem:[#allocation12 + $0x2ac] ss:$16 sps:$4 sm:$0xff]  }
 0x6a5   : > { %9884 = vmatprep.subr.bf16.mxu0 %v12679_v58  ;;  %v12781_v58 = vld [vmem:[#allocation12 + $0x44c] ss:$16 sps:$4 sm:$0xff]  }
 0x6a8   : > { %9885 = vmatpush1.bf16.msra.mxu0 %v12677_v15  ;;  %v12776_v15 = vld [vmem:[#allocation12 + $0x2a8] ss:$16 sps:$4 sm:$0xff]  }
 0x6a9   : > { %9886 = vmatprep.subr.bf16.mxu0 %v12685_v17  ;;  %v12779_v17 = vld [vmem:[#allocation12 + $0x448] ss:$16 sps:$4 sm:$0xff]  }
 0x6ac   : > { %9887 = vmatpush1.bf16.msra.mxu0 %v12683_v57  ;;  %v12784_v57 = vld [vmem:[#allocation12 + $0x28c] ss:$16 sps:$4 sm:$0xff]  }
 0x6ad   : > { %9888 = vmatprep.subr.bf16.mxu0 %v12691_v19  ;;  %v12787_v19 = vld [vmem:[#allocation12 + $0x42c] ss:$16 sps:$4 sm:$0xff]  }
 0x6b0   : > { %9889 = vmatpush1.bf16.msra.mxu0 %v12689_v31  ;;  %v12782_v31 = vld [vmem:[#allocation12 + $0x288] ss:$16 sps:$4 sm:$0xff]  }
 0x6b1   : > { %9890 = vmatprep.subr.bf16.mxu0 %v12697_v62  ;;  %v12790_v62 = vld [vmem:[#allocation12 + $0x26c] ss:$16 sps:$4 sm:$0xff]  }
 0x6b4   : > { %9891 = vmatpush1.bf16.msra.mxu0 %v12695_v21  ;;  %v12793_v21 = vld [vmem:[#allocation12 + $0x40c] ss:$16 sps:$4 sm:$0xff]  }
 0x6b5   : > { %9892 = vmatprep.subr.bf16.mxu0 %v12703_v22  ;;  %v12788_v22 = vld [vmem:[#allocation12 + $0x268] ss:$16 sps:$4 sm:$0xff]  }
 0x6b8   : > { %9893 = vmatpush2.bf16.msra.mxu0 %v12701_v25  ;;  %v12791_v25 = vld [vmem:[#allocation12 + $0x408] ss:$16 sps:$4 sm:$0xff]  }
 0x6b9   : > { %9894 = vmatprep.subr.bf16.mxu0 %v12709_v13  ;;  %v12796_v13 = vld [vmem:[#allocation12 + $0x24c] ss:$16 sps:$4 sm:$0xff]  }
 0x6bc   : > { %9895 = vmatpush2.bf16.msra.mxu0 %v12707_v24  ;;  %v12799_v24 = vld [vmem:[#allocation12 + $0x5ec] ss:$16 sps:$4 sm:$0xff]  }
 0x6bd   : > { %9896 = vmatprep.subr.bf16.mxu0 %v12715_v35  ;;  %v12794_v35 = vld [vmem:[#allocation12 + $0x248] ss:$16 sps:$4 sm:$0xff]  }
 0x6c0   : > { %9897 = vmatpush2.bf16.msra.mxu0 %v12713_v30  ;;  %v12797_v30 = vld [vmem:[#allocation12 + $0x5e8] ss:$16 sps:$4 sm:$0xff]  }
 0x6c1   : > { %9898 = vmatprep.subr.bf16.mxu0 %v12721_v60  ;;  %v12802_v60 = vld [vmem:[#allocation12 + $0x22c] ss:$16 sps:$4 sm:$0xff]  }
 0x6c4   : > { %9899 = vmatpush2.bf16.msra.mxu0 %v12719_v34  ;;  %v12805_v34 = vld [vmem:[#allocation12 + $0x5cc] ss:$16 sps:$4 sm:$0xff]  }
 0x6c5   : > { %9900 = vmatprep.subr.bf16.mxu0 %v12727_v37  ;;  %v12800_v37 = vld [vmem:[#allocation12 + $0x228] ss:$16 sps:$4 sm:$0xff]  }
 0x6c8   : > { %9901 = vmatpush2.bf16.msra.mxu0 %v12725_v40  ;;  %v12803_v40 = vld [vmem:[#allocation12 + $0x5c8] ss:$16 sps:$4 sm:$0xff]  }
 0x6c9   : > { %9902 = vmatprep.subr.bf16.mxu0 %v12733_v18  ;;  %v12808_v18 = vld [vmem:[#allocation12 + $0x20c] ss:$16 sps:$4 sm:$0xff]  }
 0x6cc   : > { %9903 = vmatpush2.bf16.msra.mxu0 %v12731_v27  ;;  %v12811_v27 = vld [vmem:[#allocation12 + $0x5ac] ss:$16 sps:$4 sm:$0xff]  }
 0x6cd   : > { %9904 = vmatprep.subr.bf16.mxu0 %v12739_v39  ;;  %v12806_v39 = vld [vmem:[#allocation12 + $0x208] ss:$16 sps:$4 sm:$0xff]  }
 0x6d0   : > { %9905 = vmatpush2.bf16.msra.mxu0 %v12737_v43  ;;  %v12809_v43 = vld [vmem:[#allocation12 + $0x5a8] ss:$16 sps:$4 sm:$0xff]  }
 0x6d1   : > { %9906 = vmatprep.subr.bf16.mxu0 %v12745_v12  ;;  %v12814_v12 = vld [vmem:[#allocation12 + $0x3ec] ss:$16 sps:$4 sm:$0xff]  }
 0x6d4   : > { %9907 = vmatpush2.bf16.msra.mxu0 %v12743_v49  ;;  %v12817_v49 = vld [vmem:[#allocation12 + $0x58c] ss:$16 sps:$4 sm:$0xff]  }
 0x6d5   : > { %9958 = vmatprep.subr.bf16.mxu0 %v12751_v29  ;;  %v12812_v29 = vld [vmem:[#allocation12 + $0x3e8] ss:$16 sps:$4 sm:$0xff]  }
 0x6d7   : > { %v8090_v28 = vpop.f32.mrf.mxu0  ;;  %9909 = vmatmul.mubr.bf16.vlgmr.msra.gmra.mxu0 %v14092_v1  ;;  %v12761_v1 = vld [vmem:[#allocation12 + $0x4a8] ss:$16 sps:$4 sm:$0xff]  }
 0x6d8   : > { %v8091_v42 = vadd.f32 %v8090_v28, %v14113_v5  ;;  %9959 = vmatpush1.bf16.msra.mxu0 %v12749_v47  ;;  %9990 = vmatprep.mubr.bf16.mxu0 %v14096_v16  ;;  %v12764_v16 = vld [vmem:[#allocation12 + $0x2e8] ss:$16 sps:$4 sm:$0xff]   ;;  %v12820_v47 = vld [vmem:[#allocation12 + $0x3cc] ss:$16 sps:$4 sm:$0xff]  }
 0x6d9   : > { %v8131_v52 = vpop.f32.mrf.mxu1  ;;  %v8092_v53 = vpop.f32.mrf.mxu0  ;;  %9960 = vmatprep.subr.bf16.mxu0 %v12757_v45  ;;  %v12823_v45 = vld [vmem:[#allocation12 + $0x56c] ss:$16 sps:$4 sm:$0xff]   ;;  %v12818_v28 = vld [vmem:[#allocation12 + $0x3c8] ss:$16 sps:$4 sm:$0xff]  }
 0x6da   : > { %v8132_v33 = vadd.f32 %v8131_v52, %v8091_v42  ;;  %v8093_v50 = vadd.f32 %v8092_v53, %v8052_v51  ;;  %v12821_v51 = vld [vmem:[#allocation12 + $0x568] ss:$16 sps:$4 sm:$0xff]   ;;  %v12826_v42 = vld [vmem:[#allocation12 + $0x3ac] ss:$16 sps:$4 sm:$0xff]  }
 0x6db   : > { %v8133_v56 = vpop.f32.mrf.mxu1  ;;  %v8094_v2 = vpop.f32.mrf.mxu0  ;;  %v12829_v52 = vld [vmem:[#allocation12 + $0x54c] ss:$16 sps:$4 sm:$0xff]   ;;  %v12827_v53 = vld [vmem:[#allocation12 + $0x548] ss:$16 sps:$4 sm:$0xff]  }
 0x6dc   : > { %v8134_v36 = vadd.f32 %v8133_v56, %v8093_v50  ;;  %9961 = vmatpush1.bf16.msra.mxu0 %v12755_v48  ;;  %v8144_v4 = vmax.f32 %v8132_v33, 0.0  ;;  %v12824_v48 = vld [vmem:[#allocation12 + $0x3a8] ss:$16 sps:$4 sm:$0xff]   ;;  %v12835_v33 = vld [vmem:[#allocation12 + $0x52c] ss:$16 sps:$4 sm:$0xff]  }
 0x6dd   : > { %v8135_v32 = vpop.f32.mrf.mxu1  ;;  %v8095_v41 = vpop.f32.mrf.mxu0  ;;  %9962 = vmatprep.subr.bf16.mxu0 %v12763_v55  ;;  %v12832_v55 = vld [vmem:[#allocation12 + $0x38c] ss:$16 sps:$4 sm:$0xff]   ;;  %v12830_v50 = vld [vmem:[#allocation12 + $0x388] ss:$16 sps:$4 sm:$0xff]  }
 0x6de   : > { %v8145_v10 = vmax.f32 %v8134_v36, 0.0  ;;  %v14125_v6 = vpack.c.bf16 %v8144_v4, %v8144_v4  ;;  %v12833_v56 = vld [vmem:[#allocation12 + $0x528] ss:$16 sps:$4 sm:$0xff]   ;;  %v12838_v2 = vld [vmem:[#allocation12 + $0x36c] ss:$16 sps:$4 sm:$0xff]  }
 0x6df   : > { %v8136_v5 = vpop.f32.mrf.mxu1  ;;  %v12841_v36 = vld [vmem:[#allocation12 + $0x50c] ss:$16 sps:$4 sm:$0xff]   ;;  %v12836_v32 = vld [vmem:[#allocation12 + $0x368] ss:$16 sps:$4 sm:$0xff]   ;;  %v14130_v41 = vld [vmem:[#allocation13] sm:$0xf] }
 0x6e0   : > { %v14123_v23 = vpack.c.bf16 %v8145_v10, %v8145_v10  ;;  %9963 = vmatpush1.bf16.msra.mxu0 %v12761_v1  ;;  %v12839_v1 = vld [vmem:[#allocation12 + $0x508] ss:$16 sps:$4 sm:$0xff]   ;;  %v12844_v4 = vld [vmem:[#allocation12 + $0x34c] ss:$16 sps:$4 sm:$0xff]   ;;  %v8415_v5 = vrot.slane %v14130_v41, %v13980_v54 }
 0x6e1   : > { %9964 = vmatprep.subr.bf16.mxu0 %v12769_v3  ;;  %v12901_v3 = vld [vmem:[#allocation15 + $0x74] ss:$8 sps:$4 sm:$0xff]  }
 0x6e2   : > { %9867 = vmatprep.mubr.bf16.mxu1 %v14123_v23  ;;  %v12842_v10 = vld [vmem:[#allocation12 + $0x348] ss:$16 sps:$4 sm:$0xff]  }
 0x6e3   : > { %9868 = vmatmul.mubr.bf16.vlgmr.msra.gmra.mxu1 %v14125_v6 }
 0x6e4   : > { %9918 = vmatpush1.bf16.msra.mxu1 %v12764_v16  ;;  %9949 = vmatprep.mubr.bf16.mxu1 %v14072_v61  ;;  %v12785_v61 = vld [vmem:[#allocation12 + $0x428] ss:$16 sps:$4 sm:$0xff]   ;;  %v12847_v16 = vld [vmem:[#allocation12 + $0x32c] ss:$16 sps:$4 sm:$0xff]  }
 0x6e5   : > { %9965 = vmatpush1.bf16.msra.mxu0 %v12767_v7  ;;  %9919 = vmatprep.subr.bf16.mxu1 %v12772_v46  ;;  %v12899_v7 = vld [vmem:[#allocation15 + $0x70] ss:$8 sps:$4 sm:$0xff]   ;;  %v8419_v46 = vrot.slane %v14130_v41, %v13983_v38 }
 0x6e6   : > { %9966 = vmatprep.subr.bf16.mxu0 %v12775_v8  ;;  %v12904_v8 = vld [vmem:[#allocation15 + $0x64] ss:$8 sps:$4 sm:$0xff]  }
 0x6e8   : > { %9920 = vmatpush1.bf16.msra.mxu1 %v12770_v44 }
 0x6e9   : > { %9967 = vmatpush1.bf16.msra.mxu0 %v12773_v9  ;;  %9921 = vmatprep.subr.bf16.mxu1 %v12778_v14 }
 0x6ea   : > { %9968 = vmatprep.subr.bf16.mxu0 %v12781_v58  ;;  %v12845_v58 = vld [vmem:[#allocation12 + $0x328] ss:$16 sps:$4 sm:$0xff]  }
 0x6ec   : > { %9922 = vmatpush1.bf16.msra.mxu1 %v12776_v15 }
 0x6ed   : > { %9969 = vmatpush1.bf16.msra.mxu0 %v12779_v17  ;;  %9923 = vmatprep.subr.bf16.mxu1 %v12784_v57  ;;  %v12850_v17 = vld [vmem:[#allocation12 + $0x30c] ss:$16 sps:$4 sm:$0xff]  }
 0x6ee   : > { %9970 = vmatprep.subr.bf16.mxu0 %v12787_v19  ;;  %v12902_v57 = vld [vmem:[#allocation15 + $0x60] ss:$8 sps:$4 sm:$0xff]  }
 0x6f0   : > { %9924 = vmatpush1.bf16.msra.mxu1 %v12782_v31 }
 0x6f1   : > { %9971 = vmatpush1.bf16.msra.mxu0 %v12785_v61  ;;  %9925 = vmatprep.subr.bf16.mxu1 %v12790_v62  ;;  %v12907_v62 = vld [vmem:[#allocation15 + $0x54] ss:$8 sps:$4 sm:$0xff]  }
 0x6f2   : > { %9972 = vmatprep.subr.bf16.mxu0 %v12793_v21 }
 0x6f4   : > { %9926 = vmatpush1.bf16.msra.mxu1 %v12788_v22 }
 0x6f5   : > { %9973 = vmatpush1.bf16.msra.mxu0 %v12791_v25  ;;  %9927 = vmatprep.subr.bf16.mxu1 %v12796_v13  ;;  %v12848_v13 = vld [vmem:[#allocation12 + $0x308] ss:$16 sps:$4 sm:$0xff]  }
 0x6f6   : > { %9974 = vmatprep.subr.bf16.mxu0 %v12799_v24 }
 0x6f8   : > { %9928 = vmatpush1.bf16.msra.mxu1 %v12794_v35  ;;  %v12905_v35 = vld [vmem:[#allocation15 + $0x50] ss:$8 sps:$4 sm:$0xff]  }
 0x6f9   : > { %9975 = vmatpush2.bf16.msra.mxu0 %v12797_v30  ;;  %9929 = vmatprep.subr.bf16.mxu1 %v12802_v60  ;;  %v12910_v60 = vld [vmem:[#allocation15 + $0x44] ss:$8 sps:$4 sm:$0xff]  }
 0x6fa   : > { %9976 = vmatprep.subr.bf16.mxu0 %v12805_v34  ;;  %v12851_v34 = vld [vmem:[#allocation12 + $0x6e8] ss:$16 sps:$4 sm:$0xff]  }
 0x6fc   : > { %9930 = vmatpush1.bf16.msra.mxu1 %v12800_v37  ;;  %v12856_v37 = vld [vmem:[#allocation12 + $0x6cc] ss:$16 sps:$4 sm:$0xff]  }
 0x6fd   : > { %9977 = vmatpush2.bf16.msra.mxu0 %v12803_v40  ;;  %9931 = vmatprep.subr.bf16.mxu1 %v12808_v18  ;;  %v12908_v40 = vld [vmem:[#allocation15 + $0x40] ss:$8 sps:$4 sm:$0xff]   ;;  %v12913_v18 = vld [vmem:[#allocation15 + $0x34] ss:$8 sps:$4 sm:$0xff]  }
 0x6fe   : > { %9978 = vmatprep.subr.bf16.mxu0 %v12811_v27  ;;  %v12854_v27 = vld [vmem:[#allocation12 + $0x6c8] ss:$16 sps:$4 sm:$0xff]  }
 0x700   : > { %9932 = vmatpush1.bf16.msra.mxu1 %v12806_v39  ;;  %v12859_v39 = vld [vmem:[#allocation12 + $0x6ac] ss:$16 sps:$4 sm:$0xff]  }
 0x701   : > { %9979 = vmatpush2.bf16.msra.mxu0 %v12809_v43  ;;  %9933 = vmatprep.subr.bf16.mxu1 %v12814_v12  ;;  %v12911_v43 = vld [vmem:[#allocation15 + $0x30] ss:$8 sps:$4 sm:$0xff]   ;;  %v12916_v12 = vld [vmem:[#allocation15 + $0x24] ss:$8 sps:$4 sm:$0xff]  }
 0x702   : > { %9980 = vmatprep.subr.bf16.mxu0 %v12817_v49  ;;  %v12857_v49 = vld [vmem:[#allocation12 + $0x6a8] ss:$16 sps:$4 sm:$0xff]  }
 0x704   : > { %9934 = vmatpush2.bf16.msra.mxu1 %v12812_v29  ;;  %v12862_v29 = vld [vmem:[#allocation12 + $0x68c] ss:$16 sps:$4 sm:$0xff]  }
 0x705   : > { %9981 = vmatpush2.bf16.msra.mxu0 %v12815_v20  ;;  %9935 = vmatprep.subr.bf16.mxu1 %v12820_v47  ;;  %v12914_v20 = vld [vmem:[#allocation15 + $0x20] ss:$8 sps:$4 sm:$0xff]   ;;  %v12919_v47 = vld [vmem:[#allocation15 + $0x14] ss:$8 sps:$4 sm:$0xff]  }
 0x706   : > { %9982 = vmatprep.subr.bf16.mxu0 %v12823_v45  ;;  %v12865_v45 = vld [vmem:[#allocation12 + $0x66c] ss:$16 sps:$4 sm:$0xff]  }
 0x708   : > { %9936 = vmatpush2.bf16.msra.mxu1 %v12818_v28  ;;  %v12922_v28 = vld [vmem:[#allocation15 + $0x4] ss:$8 sps:$4 sm:$0xff]  }
 0x709   : > { %9983 = vmatpush2.bf16.msra.mxu0 %v12821_v51  ;;  %9937 = vmatprep.subr.bf16.mxu1 %v12826_v42  ;;  %v12863_v51 = vld [vmem:[#allocation12 + $0x668] ss:$16 sps:$4 sm:$0xff]   ;;  %v12868_v42 = vld [vmem:[#allocation12 + $0x64c] ss:$16 sps:$4 sm:$0xff]  }
 0x70a   : > { %9984 = vmatprep.subr.bf16.mxu0 %v12829_v52  ;;  %v12920_v52 = vld [vmem:[#allocation15] ss:$8 sps:$4 sm:$0xff]  }
 0x70c   : > { %9938 = vmatpush2.bf16.msra.mxu1 %v12824_v48  ;;  %v12925_v48 = vld [vmem:[#allocation15 + $0xf4] ss:$8 sps:$4 sm:$0xff]  }
 0x70d   : > { %9985 = vmatpush2.bf16.msra.mxu0 %v12827_v53  ;;  %9939 = vmatprep.subr.bf16.mxu1 %v12832_v55  ;;  %v12866_v53 = vld [vmem:[#allocation12 + $0x648] ss:$16 sps:$4 sm:$0xff]   ;;  %v12871_v55 = vld [vmem:[#allocation12 + $0x62c] ss:$16 sps:$4 sm:$0xff]  }
 0x70e   : > { %9986 = vmatprep.subr.bf16.mxu0 %v12835_v33  ;;  %v12923_v33 = vld [vmem:[#allocation15 + $0xf0] ss:$8 sps:$4 sm:$0xff]  }
 0x710   : > { %9940 = vmatpush2.bf16.msra.mxu1 %v12830_v50  ;;  %v12928_v50 = vld [vmem:[#allocation15 + $0xe4] ss:$8 sps:$4 sm:$0xff]  }
 0x711   : > { %9987 = vmatpush2.bf16.msra.mxu0 %v12833_v56  ;;  %9941 = vmatprep.subr.bf16.mxu1 %v12838_v2  ;;  %v12869_v56 = vld [vmem:[#allocation12 + $0x628] ss:$16 sps:$4 sm:$0xff]   ;;  %v12874_v2 = vld [vmem:[#allocation12 + $0x60c] ss:$16 sps:$4 sm:$0xff]  }
 0x712   : > { %9988 = vmatprep.subr.bf16.mxu0 %v12841_v36  ;;  %v12926_v36 = vld [vmem:[#allocation15 + $0xe0] ss:$8 sps:$4 sm:$0xff]  }
 0x714   : > { %9942 = vmatpush2.bf16.msra.mxu1 %v12836_v32  ;;  %v12931_v32 = vld [vmem:[#allocation15 + $0xd4] ss:$8 sps:$4 sm:$0xff]  }
 0x715   : > { %9989 = vmatpush2.bf16.msra.mxu0 %v12839_v1  ;;  %9943 = vmatprep.subr.bf16.mxu1 %v12844_v4  ;;  %v12872_v1 = vld [vmem:[#allocation12 + $0x608] ss:$16 sps:$4 sm:$0xff]   ;;  %v12877_v4 = vld [vmem:[#allocation12 + $0x7ec] ss:$16 sps:$4 sm:$0xff]  }
 0x716   : > { %10444 = vmatprep.subr.bf16.mxu0 %v12901_v3  ;;  %v12929_v3 = vld [vmem:[#allocation15 + $0xd0] ss:$8 sps:$4 sm:$0xff]  }
 0x717   : > { %v9746_v44 = vpop.f32.mrf.mxu0 }
 0x718   : > { %v9747_v9 = vadd.f32 %v9746_v44, %v8415_v5  ;;  %9944 = vmatpush2.bf16.msra.mxu1 %v12842_v10  ;;  %9991 = vmatmul.mubr.bf16.vlgmr.msra.gmra.mxu0 %v14106_v59  ;;  %v12853_v59 = vld [vmem:[#allocation12 + $0x6ec] ss:$16 sps:$4 sm:$0xff]   ;;  %v12934_v10 = vld [vmem:[#allocation15 + $0xc4] ss:$8 sps:$4 sm:$0xff]  }
 0x719   : > { %v9787_v14 = vpop.f32.mrf.mxu1  ;;  %v9748_v15 = vpop.f32.mrf.mxu0  ;;  %9945 = vmatprep.subr.bf16.mxu1 %v12847_v16  ;;  %10445 = vmatpush1.bf16.msra.mxu0 %v12899_v7  ;;  %v12875_v5 = vld [vmem:[#allocation12 + $0x7e8] ss:$16 sps:$4 sm:$0xff]   ;;  %v12880_v16 = vld [vmem:[#allocation12 + $0x7cc] ss:$16 sps:$4 sm:$0xff]  }
 0x71a   : > { %v14137_v19 = vadd.f32 %v9787_v14, %v9747_v9  ;;  %v9749_v31 = vadd.f32 %v9748_v15, %v8419_v46  ;;  %10446 = vmatprep.subr.bf16.mxu0 %v12904_v8  ;;  %v12932_v7 = vld [vmem:[#allocation15 + $0xc0] ss:$8 sps:$4 sm:$0xff]   ;;  %v12937_v46 = vld [vmem:[#allocation15 + $0xb4] ss:$8 sps:$4 sm:$0xff]   ;;  %v12935_v9 = vld [vmem:[#allocation15 + $0xb0] ss:$8 sps:$4 sm:$0xff]  }
 0x71b   : > { %v9789_v61 = vpop.f32.mrf.mxu1  ;;  %v9750_v21 = vpop.f32.mrf.mxu0  ;;  %v12878_v8 = vld [vmem:[#allocation12 + $0x7c8] ss:$16 sps:$4 sm:$0xff]   ;;  %v12883_v44 = vld [vmem:[#allocation12 + $0x7ac] ss:$16 sps:$4 sm:$0xff]  }
 0x71c   : > { %v14139_v22 = vadd.f32 %v9789_v61, %v9749_v31  ;;  %9946 = vmatpush2.bf16.msra.mxu1 %v12845_v58  ;;  %v12940_v14 = vld [vmem:[#allocation15 + $0xa4] ss:$8 sps:$4 sm:$0xff]   ;;  %v12886_v15 = vld [vmem:[#allocation12 + $0x78c] ss:$16 sps:$4 sm:$0xff]  }
 0x71d   : > { %v9791_v25 = vpop.f32.mrf.mxu1  ;;  %v9751_v24 = vpop.f32.mrf.mxu0  ;;  %9947 = vmatprep.subr.bf16.mxu1 %v12850_v17  ;;  %10447 = vmatpush1.bf16.msra.mxu0 %v12902_v57  ;;  %v12881_v58 = vld [vmem:[#allocation12 + $0x7a8] ss:$16 sps:$4 sm:$0xff]   ;;  %v12938_v17 = vld [vmem:[#allocation15 + $0xa0] ss:$8 sps:$4 sm:$0xff]  }
 0x71e   : > { %10448 = vmatprep.subr.bf16.mxu0 %v12907_v62  ;;  %v12943_v57 = vld [vmem:[#allocation15 + $0x94] ss:$8 sps:$4 sm:$0xff]   ;;  %v12889_v61 = vld [vmem:[#allocation12 + $0x76c] ss:$16 sps:$4 sm:$0xff]   ;;  %v12946_v21 = vld [vmem:[#allocation15 + $0x84] ss:$8 sps:$4 sm:$0xff]  }
 0x71f   : > { %v9792_v30 = vpop.f32.mrf.mxu1  ;;  %v12884_v31 = vld [vmem:[#allocation12 + $0x788] ss:$16 sps:$4 sm:$0xff]   ;;  %v12941_v62 = vld [vmem:[#allocation15 + $0x90] ss:$8 sps:$4 sm:$0xff]   ;;  %v12944_v24 = vld [vmem:[#allocation15 + $0x80] ss:$8 sps:$4 sm:$0xff]  }
 0x720   : > { %9948 = vmatpush2.bf16.msra.mxu1 %v12848_v13  ;;  %v12887_v25 = vld [vmem:[#allocation12 + $0x768] ss:$16 sps:$4 sm:$0xff]   ;;  %v12892_v13 = vld [vmem:[#allocation12 + $0x74c] ss:$16 sps:$4 sm:$0xff]  }
 0x721   : > { %9999 = vmatprep.subr.bf16.mxu1 %v12853_v59  ;;  %10449 = vmatpush1.bf16.msra.mxu0 %v12905_v35  ;;  %v12890_v59 = vld [vmem:[#allocation12 + $0x748] ss:$16 sps:$4 sm:$0xff]   ;;  %v12895_v35 = vld [vmem:[#allocation12 + $0x72c] ss:$16 sps:$4 sm:$0xff]  }
 0x722   : > { %10450 = vmatprep.subr.bf16.mxu0 %v12910_v60 }
 0x723   : > { %9950 = vmatmul.mubr.bf16.vlgmr.msra.gmra.mxu1 %v14094_v26  ;;  %v12860_v26 = vld [vmem:[#allocation12 + $0x688] ss:$16 sps:$4 sm:$0xff]  }
 0x724   : > { %10000 = vmatpush1.bf16.msra.mxu1 %v12851_v34  ;;  %10031 = vmatprep.mubr.bf16.mxu1 %v14123_v23  ;;  %v12917_v23 = vld [vmem:[#allocation15 + $0x10] ss:$8 sps:$4 sm:$0xff]   ;;  %v12893_v34 = vld [vmem:[#allocation12 + $0x728] ss:$16 sps:$4 sm:$0xff]  }
 0x725   : > { %10001 = vmatprep.subr.bf16.mxu1 %v12856_v37  ;;  %10451 = vmatpush1.bf16.msra.mxu0 %v12908_v40  ;;  %v12898_v40 = vld [vmem:[#allocation12 + $0x70c] ss:$16 sps:$4 sm:$0xff]  }
 0x726   : > { %10452 = vmatprep.subr.bf16.mxu0 %v12913_v18 }
 0x728   : > { %10002 = vmatpush1.bf16.msra.mxu1 %v12854_v27 }
 0x729   : > { %10003 = vmatprep.subr.bf16.mxu1 %v12859_v39  ;;  %10453 = vmatpush1.bf16.msra.mxu0 %v12911_v43  ;;  %v12896_v39 = vld [vmem:[#allocation12 + $0x708] ss:$16 sps:$4 sm:$0xff]  }
 0x72a   : > { %10454 = vmatprep.subr.bf16.mxu0 %v12916_v12  ;;  %v12947_v12 = vld [vmem:[#allocation15 + $0x170] ss:$8 sps:$4 sm:$0xff]  }
 0x72c   : > { %10004 = vmatpush1.bf16.msra.mxu1 %v12857_v49  ;;  %v12949_v49 = vld [vmem:[#allocation15 + $0x174] ss:$8 sps:$4 sm:$0xff]  }
 0x72d   : > { %10005 = vmatprep.subr.bf16.mxu1 %v12862_v29  ;;  %10455 = vmatpush1.bf16.msra.mxu0 %v12914_v20  ;;  %v12950_v29 = vld [vmem:[#allocation15 + $0x160] ss:$8 sps:$4 sm:$0xff]   ;;  %v12955_v20 = vld [vmem:[#allocation15 + $0x154] ss:$8 sps:$4 sm:$0xff]  }
 0x72e   : > { %10456 = vmatprep.subr.bf16.mxu0 %v12919_v47  ;;  %v12953_v47 = vld [vmem:[#allocation15 + $0x150] ss:$8 sps:$4 sm:$0xff]  }
 0x730   : > { %10006 = vmatpush1.bf16.msra.mxu1 %v12860_v26  ;;  %v12956_v26 = vld [vmem:[#allocation15 + $0x140] ss:$8 sps:$4 sm:$0xff]  }
 0x731   : > { %10007 = vmatprep.subr.bf16.mxu1 %v12865_v45  ;;  %10457 = vmatpush1.bf16.msra.mxu0 %v12917_v23  ;;  %v12961_v45 = vld [vmem:[#allocation15 + $0x134] ss:$8 sps:$4 sm:$0xff]   ;;  %v12959_v23 = vld [vmem:[#allocation15 + $0x130] ss:$8 sps:$4 sm:$0xff]  }
 0x732   : > { %10458 = vmatprep.subr.bf16.mxu0 %v12922_v28  ;;  %v12962_v28 = vld [vmem:[#allocation15 + $0x120] ss:$8 sps:$4 sm:$0xff]  }
 0x734   : > { %10008 = vmatpush1.bf16.msra.mxu1 %v12863_v51  ;;  %v12967_v51 = vld [vmem:[#allocation15 + $0x114] ss:$8 sps:$4 sm:$0xff]  }
 0x735   : > { %10009 = vmatprep.subr.bf16.mxu1 %v12868_v42  ;;  %10459 = vmatpush1.bf16.msra.mxu0 %v12920_v52  ;;  %v12965_v42 = vld [vmem:[#allocation15 + $0x110] ss:$8 sps:$4 sm:$0xff]   ;;  %v12970_v52 = vld [vmem:[#allocation15 + $0x104] ss:$8 sps:$4 sm:$0xff]  }
 0x736   : > { %10460 = vmatprep.subr.bf16.mxu0 %v12925_v48  ;;  %v12968_v48 = vld [vmem:[#allocation15 + $0x100] ss:$8 sps:$4 sm:$0xff]  }
 0x738   : > { %10010 = vmatpush1.bf16.msra.mxu1 %v12866_v53  ;;  %v12973_v53 = vld [vmem:[#allocation15 + $0x1f4] ss:$8 sps:$4 sm:$0xff]  }
 0x739   : > { %10011 = vmatprep.subr.bf16.mxu1 %v12871_v55  ;;  %10461 = vmatpush2.bf16.msra.mxu0 %v12923_v33  ;;  %v12971_v55 = vld [vmem:[#allocation15 + $0x1f0] ss:$8 sps:$4 sm:$0xff]   ;;  %v12976_v33 = vld [vmem:[#allocation15 + $0x1e4] ss:$8 sps:$4 sm:$0xff]  }
 0x73a   : > { %10462 = vmatprep.subr.bf16.mxu0 %v12928_v50  ;;  %v12974_v50 = vld [vmem:[#allocation15 + $0x1e0] ss:$8 sps:$4 sm:$0xff]  }
 0x73c   : > { %10012 = vmatpush1.bf16.msra.mxu1 %v12869_v56  ;;  %v12979_v56 = vld [vmem:[#allocation15 + $0x1d4] ss:$8 sps:$4 sm:$0xff]  }
 0x73d   : > { %10013 = vmatprep.subr.bf16.mxu1 %v12874_v2  ;;  %10463 = vmatpush2.bf16.msra.mxu0 %v12926_v36  ;;  %v12977_v2 = vld [vmem:[#allocation15 + $0x1d0] ss:$8 sps:$4 sm:$0xff]   ;;  %v12982_v36 = vld [vmem:[#allocation15 + $0x1c4] ss:$8 sps:$4 sm:$0xff]  }
 0x73e   : > { %10464 = vmatprep.subr.bf16.mxu0 %v12931_v32  ;;  %v12980_v32 = vld [vmem:[#allocation15 + $0x1c0] ss:$8 sps:$4 sm:$0xff]  }
 0x740   : > { %10014 = vmatpush1.bf16.msra.mxu1 %v12872_v1  ;;  %v12985_v1 = vld [vmem:[#allocation15 + $0x1b4] ss:$8 sps:$4 sm:$0xff]  }
 0x741   : > { %10015 = vmatprep.subr.bf16.mxu1 %v12877_v4  ;;  %10465 = vmatpush2.bf16.msra.mxu0 %v12929_v3  ;;  %v12983_v3 = vld [vmem:[#allocation15 + $0x1b0] ss:$8 sps:$4 sm:$0xff]  }
 0x742   : > { %10466 = vmatprep.subr.bf16.mxu0 %v12934_v10 }
 0x744   : > { %10016 = vmatpush2.bf16.msra.mxu1 %v12875_v5  ;;  %v12988_v5 = vld [vmem:[#allocation15 + $0x1a4] ss:$8 sps:$4 sm:$0xff]  }
 0x745   : > { %10017 = vmatprep.subr.bf16.mxu1 %v12880_v16  ;;  %10467 = vmatpush2.bf16.msra.mxu0 %v12932_v7  ;;  %v12986_v7 = vld [vmem:[#allocation15 + $0x1a0] ss:$8 sps:$4 sm:$0xff]  }
 0x746   : > { %10468 = vmatprep.subr.bf16.mxu0 %v12937_v46 }
 0x748   : > { %10018 = vmatpush2.bf16.msra.mxu1 %v12878_v8 }
 0x749   : > { %10019 = vmatprep.subr.bf16.mxu1 %v12883_v44  ;;  %10469 = vmatpush2.bf16.msra.mxu0 %v12935_v9  ;;  %v12991_v9 = vld [vmem:[#allocation15 + $0x194] ss:$8 sps:$4 sm:$0xff]  }
 0x74a   : > { %10470 = vmatprep.subr.bf16.mxu0 %v12940_v14 }
 0x74c   : > { %10020 = vmatpush2.bf16.msra.mxu1 %v12881_v58  ;;  %v12989_v58 = vld [vmem:[#allocation15 + $0x190] ss:$8 sps:$4 sm:$0xff]  }
 0x74d   : > { %10021 = vmatprep.subr.bf16.mxu1 %v12886_v15  ;;  %10471 = vmatpush2.bf16.msra.mxu0 %v12938_v17 }
 0x74e   : > { %10472 = vmatprep.subr.bf16.mxu0 %v12943_v57 }
 0x750   : > { %10022 = vmatpush2.bf16.msra.mxu1 %v12884_v31 }
 0x751   : > { %10023 = vmatprep.subr.bf16.mxu1 %v12889_v61  ;;  %10473 = vmatpush2.bf16.msra.mxu0 %v12941_v62  ;;  %v12994_v61 = vld [vmem:[#allocation15 + $0x184] ss:$8 sps:$4 sm:$0xff]  }
 0x752   : > { %10474 = vmatprep.subr.bf16.mxu0 %v12946_v21  ;;  %v12992_v21 = vld [vmem:[#allocation15 + $0x180] ss:$8 sps:$4 sm:$0xff]  }
 0x754   : > { %10024 = vmatpush2.bf16.msra.mxu1 %v12887_v25 }
 0x755   : > { %10025 = vmatprep.subr.bf16.mxu1 %v12892_v13  ;;  %10475 = vmatpush2.bf16.msra.mxu0 %v12944_v24 }
 0x757   : > { %v9828_v30 = vpop.f32.mrf.mxu0 }
 0x758   : > { %v14144_v60 = vadd.f32 %v9828_v30, %v14137_v19  ;;  %10026 = vmatpush2.bf16.msra.mxu1 %v12890_v59  ;;  %v12952_v19 = vld [vmem:[#allocation15 + $0x164] ss:$8 sps:$4 sm:$0xff]   ;;  %v8423_v30 = vrot.slane %v14130_v41, %v13914_v63 }
 0x759   : > { %v9830_v37 = vpop.f32.mrf.mxu0  ;;  %10027 = vmatprep.subr.bf16.mxu1 %v12895_v35  ;;  %v12997_v63 = vld [vmem:[%s14257_s9 + $0x70] sm:$0xff]  }
 0x75a   : > { %v14147_v18 = vadd.f32 %v9830_v37, %v14139_v22  ;;  %v12958_v22 = vld [vmem:[#allocation15 + $0x144] ss:$8 sps:$4 sm:$0xff]  }
 0x75b   : > { %v9832_v27 = vpop.f32.mrf.mxu0 }
 0x75c   : > { %10028 = vmatpush2.bf16.msra.mxu1 %v12893_v34  ;;  %v8427_v34 = vrot.slane %v14130_v41, %v3201_v11  ;;  %v12998_v11 = vld [vmem:[%s14257_s9 + $0x30] sm:$0xff]   ;;  %v12999_v41 = vld [vmem:[%s14257_s9 + $0x68] sm:$0xff]  }
 0x75d   : > { %v9833_v43 = vpop.f32.mrf.mxu0  ;;  %10029 = vmatprep.subr.bf16.mxu1 %v12898_v40 }
 0x760   : > { %10030 = vmatpush2.bf16.msra.mxu1 %v12896_v39 }
 0x761   : > { %10485 = vmatprep.subr.bf16.mxu1 %v12949_v49 }
 0x763   : > { %10032 = vmatmul.mubr.bf16.vlgmr.msra.gmra.mxu1 %v14125_v6  ;;  %v12964_v6 = vld [vmem:[#allocation15 + $0x124] ss:$8 sps:$4 sm:$0xff]  }
 0x764   : > { %10486 = vmatpush1.bf16.msra.mxu1 %v12947_v12 }
 0x765   : > { %10487 = vmatprep.subr.bf16.mxu1 %v12952_v19 }
 0x768   : > { %10488 = vmatpush1.bf16.msra.mxu1 %v12950_v29 }
 0x769   : > { %10489 = vmatprep.subr.bf16.mxu1 %v12955_v20  ;;  %v12995_v20 = vld [vmem:[%s14257_s9 + $0x78] sm:$0xff]  }
 0x76a   : > { %12117 = vmatprep.subr.bf16.mxu0 %v12995_v20 }
 0x76c   : > { %10490 = vmatpush1.bf16.msra.mxu1 %v12953_v47  ;;  %v13000_v47 = vld [vmem:[%s14257_s9 + $0x28] sm:$0xff]  }
 0x76d   : > { %10491 = vmatprep.subr.bf16.mxu1 %v12958_v22  ;;  %v13001_v22 = vld [vmem:[%s14257_s9 + $0x60] sm:$0xff]  }
 0x770   : > { %10492 = vmatpush1.bf16.msra.mxu1 %v12956_v26  ;;  %v13002_v26 = vld [vmem:[%s14257_s9 + $0x20] sm:$0xff]  }
 0x771   : > { %10493 = vmatprep.subr.bf16.mxu1 %v12961_v45  ;;  %v13003_v45 = vld [vmem:[%s14257_s9 + $0x58] sm:$0xff]  }
 0x774   : > { %10494 = vmatpush1.bf16.msra.mxu1 %v12959_v23  ;;  %v13004_v23 = vld [vmem:[%s14257_s9 + $0x18] sm:$0xff]  }
 0x775   : > { %10495 = vmatprep.subr.bf16.mxu1 %v12964_v6  ;;  %v13005_v6 = vld [vmem:[%s14257_s9 + $0x50] sm:$0xff]  }
 0x778   : > { %10496 = vmatpush1.bf16.msra.mxu1 %v12962_v28  ;;  %v13006_v28 = vld [vmem:[%s14257_s9 + $0x10] sm:$0xff]  }
 0x779   : > { %10497 = vmatprep.subr.bf16.mxu1 %v12967_v51 }
 0x77c   : > { %10498 = vmatpush1.bf16.msra.mxu1 %v12965_v42 }
 0x77d   : > { %10499 = vmatprep.subr.bf16.mxu1 %v12970_v52 }
 0x780   : > { %10500 = vmatpush1.bf16.msra.mxu1 %v12968_v48 }
 0x781   : > { %10501 = vmatprep.subr.bf16.mxu1 %v12973_v53 }
 0x784   : > { %10502 = vmatpush2.bf16.msra.mxu1 %v12971_v55 }
 0x785   : > { %10503 = vmatprep.subr.bf16.mxu1 %v12976_v33 }
 0x788   : > { %10504 = vmatpush2.bf16.msra.mxu1 %v12974_v50 }
 0x789   : > { %10505 = vmatprep.subr.bf16.mxu1 %v12979_v56 }
 0x78c   : > { %10506 = vmatpush2.bf16.msra.mxu1 %v12977_v2 }
 0x78d   : > { %10507 = vmatprep.subr.bf16.mxu1 %v12982_v36 }
 0x790   : > { %10508 = vmatpush2.bf16.msra.mxu1 %v12980_v32  ;;  %v13007_v32 = vld [vmem:[%s14257_s9 + $0x48] sm:$0xff]  }
 0x791   : > { %10509 = vmatprep.subr.bf16.mxu1 %v12985_v1 }
 0x794   : > { %10510 = vmatpush2.bf16.msra.mxu1 %v12983_v3 }
 0x795   : > { %10511 = vmatprep.subr.bf16.mxu1 %v12988_v5 }
 0x797   : > { %v9910_v4 = vpop.f32.mrf.mxu0 }
 0x798   : > { %10512 = vmatpush2.bf16.msra.mxu1 %v12986_v7  ;;  %v9911_v37 = vadd.f32 %v9910_v4, %v8423_v30  ;;  %v13008_v4 = vld [vmem:[%s14257_s9 + $0x8] sm:$0xff]  }
 0x799   : > { %v9912_v10 = vpop.f32.mrf.mxu0  ;;  %10513 = vmatprep.subr.bf16.mxu1 %v12991_v9  ;;  %v10112_v7 = vld [vmem:[#allocation16] sm:$0x3] }
 0x79b   : > { %v9914_v16 = vpop.f32.mrf.mxu0 }
 0x79c   : > { %10514 = vmatpush2.bf16.msra.mxu1 %v12989_v58  ;;  %v13010_v16 = vld [vmem:[%s14257_s9] sm:$0xff]  }
 0x79d   : > { %v9915_v46 = vpop.f32.mrf.mxu0  ;;  %10515 = vmatprep.subr.bf16.mxu1 %v12994_v61 }
 0x79e   : > { %v10117_v46 = vrot.slane %v10112_v7, %v13980_v54 }
 0x7a0   : > { %10516 = vmatpush2.bf16.msra.mxu1 %v12992_v21 }
 0x7a3   : > { %v9869_v8 = vpop.f32.mrf.mxu1 }
 0x7a4   : > { %v9870_v44 = vadd.f32 %v9869_v8, %v14144_v60  ;;  %v10121_v8 = vrot.slane %v10112_v7, %v13983_v38 }
 0x7a5   : > { %v9871_v14 = vpop.f32.mrf.mxu1 }
 0x7a6   : > { %v9872_v15 = vadd.f32 %v9871_v14, %v14147_v18  ;;  %v10040_v17 = vmax.f32 %v9870_v44, 0.0  ;;  %v9913_v18 = vadd.f32 %v9912_v10, %v8427_v34  ;;  %v13009_v10 = vld [vmem:[%s14257_s9 + $0x40] sm:$0xff]  }
 0x7a7   : > { %v9873_v57 = vpop.f32.mrf.mxu1 }
 0x7a8   : > { %v10041_v31 = vmax.f32 %v9872_v15, 0.0  ;;  %v10044_v13 = vpack.c.bf16 %v10040_v17, %v10040_v17 }
 0x7a9   : > { %v9874_v62 = vpop.f32.mrf.mxu1 }
 0x7aa   : > { %v10045_v25 = vpack.c.bf16 %v10041_v31, %v10041_v31 }
 0x7ac   : > { %10476 = vmatprep.mubr.bf16.mxu0 %v10045_v25 }
 0x7ad   : > { %10477 = vmatmul.mubr.bf16.vlgmr.msra.gmra.mxu0 %v10044_v13 }
 0x7ae   : > { %12118 = vmatpush3.bf16.msra.mxu0 %v12996_v0 }
 0x7af   : > { %12119 = vmatprep.subr.bf16.mxu0 %v12997_v63 }
 0x7b2   : > { %12120 = vmatpush3.bf16.msra.mxu0 %v12998_v11 }
 0x7b3   : > { %12121 = vmatprep.subr.bf16.mxu0 %v12999_v41 }
 0x7b6   : > { %12122 = vmatpush3.bf16.msra.mxu0 %v13000_v47 }
 0x7b7   : > { %12123 = vmatprep.subr.bf16.mxu0 %v13001_v22 }
 0x7ba   : > { %12124 = vmatpush3.bf16.msra.mxu0 %v13002_v26 }
 0x7bb   : > { %12125 = vmatprep.subr.bf16.mxu0 %v13003_v45 }
 0x7be   : > { %12126 = vmatpush3.bf16.msra.mxu0 %v13004_v23 }
 0x7bf   : > { %12127 = vmatprep.subr.bf16.mxu0 %v13005_v6 }
 0x7c2   : > { %12128 = vmatpush3.bf16.msra.mxu0 %v13006_v28 }
 0x7c3   : > { %12129 = vmatprep.subr.bf16.mxu0 %v13007_v32 }
 0x7c6   : > { %12130 = vmatpush3.bf16.msra.mxu0 %v13008_v4 }
 0x7c7   : > { %12131 = vmatprep.subr.bf16.mxu0 %v13009_v10 }
 0x7ca   : > { %12132 = vmatpush3.bf16.msra.mxu0 %v13010_v16 }
 0x7d8   : > { %v9992_v24 = vpop.f32.mrf.mxu0 }
 0x7da   : > { %v9994_v59 = vpop.f32.mrf.mxu0 }
 0x7dc   : > { %v9996_v35 = vpop.f32.mrf.mxu0 }
 0x7de   : > { %v9997_v60 = vpop.f32.mrf.mxu0 }
 0x7e3   : > { %v9951_v40 = vpop.f32.mrf.mxu1 }
 0x7e4   : > { %v9952_v27 = vadd.f32 %v9951_v40, %v9911_v37 }
 0x7e5   : > { %v9953_v39 = vpop.f32.mrf.mxu1 }
 0x7e6   : > { %v9954_v43 = vadd.f32 %v9953_v39, %v9913_v18  ;;  %v9993_v12 = vadd.f32 %v9992_v24, %v9952_v27  ;;  %v12095_v24 = vld [vmem:[#allocation18] ss:$0 sm:$0xff] }
 0x7e7   : > { %v9955_v49 = vpop.f32.mrf.mxu1 }
 0x7e8   : > { %v9995_v19 = vadd.f32 %v9994_v59, %v9954_v43 }
 0x7e9   : > { %v9956_v29 = vpop.f32.mrf.mxu1 }
 0x823   : > { %v10033_v51 = vpop.f32.mrf.mxu1 }
 0x824   : > { %v10034_v42 = vadd.f32 %v10033_v51, %v9993_v12 }
 0x825   : > { %v10035_v52 = vpop.f32.mrf.mxu1 }
 0x826   : > { %v10036_v48 = vadd.f32 %v10035_v52, %v9995_v19  ;;  %v10042_v53 = vmax.f32 %v10034_v42, 0.0 }
 0x827   : > { %v10037_v55 = vpop.f32.mrf.mxu1 }
 0x828   : > { %v10043_v33 = vmax.f32 %v10036_v48, 0.0  ;;  %v10046_v2 = vpack.c.bf16 %v10042_v53, %v10042_v53 }
 0x829   : > { %v10038_v50 = vpop.f32.mrf.mxu1 }
 0x82a   : > { %v10047_v56 = vpack.c.bf16 %v10043_v33, %v10043_v33 }
 0x82c   : > { %10517 = vmatprep.mubr.bf16.mxu1 %v10047_v56 }
 0x82d   : > { %10518 = vmatmul.mubr.bf16.vlgmr.msra.gmra.mxu1 %v10046_v2 }
 0x86d   : > { %v10478_v36 = vpop.f32.mrf.mxu0 }
 0x86e   : > { %v10479_v44 = vadd.f32 %v10478_v36, %v10117_v46 }
 0x86f   : > { %v10480_v1 = vpop.f32.mrf.mxu0 }
 0x870   : > { %v10481_v14 = vadd.f32 %v10480_v1, %v10121_v8 }
 0x871   : > { %v10482_v3 = vpop.f32.mrf.mxu0 }
 0x873   : > { %v10483_v5 = vpop.f32.mrf.mxu0 }
 0x8ed   : > { %v10519_v9 = vpop.f32.mrf.mxu1 }
 0x8ee   : > { %v10520_v58 = vadd.f32 %v10519_v9, %v10479_v44 }
 0x8ef   : > { %v10521_v15 = vpop.f32.mrf.mxu1 }
 0x8f0   : > { %v10522_v17 = vadd.f32 %v10521_v15, %v10481_v14  ;;  %v10526_v57 = vmax.f32 %v10520_v58, 0.0 }
 0x8f1   : > { %v10523_v31 = vpop.f32.mrf.mxu1 }
 0x8f2   : > { %v10527_v61 = vmax.f32 %v10522_v17, 0.0  ;;  %v10528_v25 = vpack.c.bf16 %v10526_v57, %v10526_v57 }
 0x8f3   : > { %v10524_v62 = vpop.f32.mrf.mxu1 }
 0x8f4   : > { %v10529_v21 = vpack.c.bf16 %v10527_v61, %v10527_v61 }
 0x8f6   : > { %10697 = vmatprep.mubr.bf16.mxu0 %v10529_v21 }
 0x8f7   : > { %10698 = vmatmul.mubr.bf16.vlgmr.msra.gmra.mxu0 %v10528_v25 }
 0x9b7   : > { %v12133_v13 = vpop.f32.mrf.mxu0 }
 0x9b9   : > { %v12134_v59 = vpop.f32.mrf.mxu0 }
 0x9ba   : > { %v12135_v54 = vadd.f32 %v12134_v59, %v12133_v13 }
 0x9bb   : > { %v12136_v38 = vpop.f32.mrf.mxu0 }
 0x9bc   : > { %v10700_v35 = vadd.f32 %v12135_v54, %v12095_v24 }
 0x9bd   : > { %v12137_v30 = vpop.f32.mrf.mxu0 }
 0x9be   : > { %10706 = vst.msk [vmem:[#allocation19] sm:$0x3] %vm10705_vm12, %v10700_v35 }
 0x9bf PF: > { %s14300_s4 = sadd.s32 4294967295, %s13360_s24   ;;  %s13390_s25 = smov [#allocation19]  }
 0x9c0   : > { %p14209_p12 = scmp.eq.s32.totalorder %s14300_s4, 23  ;;  %s10714_s8 = sshll.u32 %s13390_s25, 4  ;;  %s10715_s8 = int_to_ptr.vmem [resolvable:$true] %s10714_s8 }
 0x9c1   : > { %s13250_s26 = scalar_lea.vmem %s10715_s8, 32  ;;  %p13257_p1 = scmp.lt.s32.totalorder %s10715_s8, %s10715_s8 }
 0x9c2   : > { %p13251_p3 = scmp.ne.s32.totalorder %s10715_s8, %s13250_s26  ;;  %p13258_p0 = scmp.lt.s32.totalorder %s13250_s26, %s13250_s26 }
 0x9c4   : > { %p13252_p13 = pnand %p13251_p3, %p14209_p12  ;;  %p13259_p2 = por %p13258_p0, %p13257_p1 }
 0x9c6   : > { %p13253_p6 = pneg %p13252_p13 }
 0x9c8   : > { %p13260_p5 = pnand %p13259_p2, %p13253_p6 }
 0x9ca   : > { %13263 = shalt.err (!%p13260_p5)
}
 0x9cb   : > { %s14302_s14 = sld [smem:[#allocation35_spill]] }
 0x9d1   : > { %12209 = dma.vmem_to_hbm [thread:$0]  (%p14209_p12), %s10715_s8, 32, %s14302_s14, [#allocation6]  }
 0x9d2   : > { %13327 = dma.done.wait (%p14209_p12), [#allocation6], 32  }
 0x9d3   : > { %13329 = vsyncadd (%p14209_p12), [#allocation6], 4294967264 }
 0x9d4 PF: > { %s29_s24 = sadd.s32 1, %s13360_s24   ;;  %s14303_s3 = sld [smem:[#allocation26_spill]] }
 0x9d5   : > { %p26_p4 = scmp.ge.s32.totalorder %s29_s24, 26   ;;  %s14304_s17 = smov %s13336_s18 }
 0x9d6   : > { %s14305_s18 = smov %s13340_s19  ;;  %s14306_s19 = smov %s13618_s5 }
 0x9d7   : > { %s14307_s20 = smov %s13352_s22  ;;  %s14308_s21 = smov %s13356_s23 }
 0x9d8   : > { %s14309_s22 = smov %s14312_s16  ;;  %28 = sbr.rel (!%p26_p4) target bundleno = 20 (0x14), region = 162 }
 0x9da   : > { %s14310_s23 = smov %s14303_s3 }
 0x9dd   :  { %10727 = vsyncpa [#allocation5], 1 }
 0x9de   :  { %10729 = vsyncpa [#allocation5 + $0x1], 1 }
 0x9df   :  { %10730 = vsyncpa [#allocation8], 1 }
 0x9e0   :  { %10731 = vsyncpa [#allocation11], 1 }
 0x9e1   :  { %10732 = vsyncpa [#allocation14], 1 }
 0x9e2   :  { %10733 = vsyncpa [#allocation17], 1 }
 0x9e3   :  { %10734 = vsyncpa [#allocation6], 1 }
 0x9e4   :  { %10736 = vsyncpa [#allocation6 + $0x1], 1 }

</bundles_post_ra>
